<compile_context>
chip_gen: v7x
topology: tpu7x:2x2x1
jax: 0.10.0
libtpu: 0.0.40
codegen_flags: <defaults>
</compile_context>

<pallas_src>
import jax
import jax.numpy as jnp
from jax import lax
from jax.experimental import pallas as pl
from jax.experimental.pallas import tpu as pltpu

# ----- sizes (small stand-ins for the module's fixed 1024x1024 render) -------
H = W = 64
P = H * W                     # 4096 pixels
NV = 256                      # trainable mesh vertices (16 x 16 sphere grid)
TILE = min(8192, P // 2)      # pixels per grid step (2048 here; 8192 at 1024x1024)
BETA = 16.0                   # softmax splat sharpness
NATTR = 16                    # padded attribute rows (sublane-tile aligned groups)


# ========== Pallas kernel: soft-rasterize + Blinn-Phong shading ==============
def _render_kernel(pix_ref, vgeom_ref, vattr_ref, o_ref):
    # --- soft rasterization logits via ONE bf16 MXU dot (expanded quadratic) --
    # s[v,p] = 2*beta*(vx*px + vy*py) - beta*(vx^2 + vy^2)
    #        = -beta*|v - p|^2 + beta*|p|^2  (|p|^2 is per-pixel constant and
    #          cancels in the softmax normalization)
    s = jnp.dot(vgeom_ref[...], pix_ref[...],
                preferred_element_type=jnp.float32)          # (NV, T) f32 acc
    m = jnp.max(s, axis=0, keepdims=True)                    # (1, T)
    e = jnp.exp((s - m).astype(jnp.bfloat16))                # (NV, T) bf16 exp

    # --- interpolate attrs + softmax denominator in ONE bf16 MXU dot ---------
    attrs = jnp.dot(vattr_ref[...], e,
                    preferred_element_type=jnp.float32)      # (16, T) f32
    inv = pl.reciprocal(attrs[6:7, :], approx=True)          # (1, T), denom >= 1

    lvec = attrs[0:3, :] * inv          # (light - pos)/sqrt(lpow)     (3, T)
    vvec = attrs[3:6, :]                # view vector, direction only  (3, T)
    nrm = attrs[8:11, :]                # normal, direction only       (3, T)
    alb = attrs[11:14, :] * inv         # albedo                       (3, T)

    # --- Blinn-Phong shading on (3, T) slabs ---------------------------------
    dist2 = jnp.sum(lvec * lvec, axis=0, keepdims=True) + 1e-8   # (1, T)
    rs = lax.rsqrt(dist2)                                         # reused below
    ldir = lvec * rs

    vdir = vvec * lax.rsqrt(jnp.sum(vvec * vvec, axis=0, keepdims=True) + 1e-8)

    hvec = ldir + vdir
    hdir = hvec * lax.rsqrt(jnp.sum(hvec * hvec, axis=0, keepdims=True) + 1e-8)

    ndir = nrm * lax.rsqrt(jnp.sum(nrm * nrm, axis=0, keepdims=True) + 1e-8)

    diff = jnp.maximum(jnp.sum(ndir * ldir, axis=0, keepdims=True), 0.0)  # (1,T)
    sdot = jnp.maximum(jnp.sum(ndir * hdir, axis=0, keepdims=True), 0.0)
    s2 = sdot * sdot
    s4 = s2 * s2
    s8 = s4 * s4
    s16 = s8 * s8
    spec = s16 * s16                                          # shininess = 32
    spec = jnp.where(diff > 0.0, spec, 0.0)                   # gate by n.l > 0

    # rs*rs == light_power / |light - pos|^2  (1/sqrt(lpow) folded into lvec rows)
    o_ref[...] = (alb * diff + spec) * (rs * rs)              # (3, T)


def raster_and_shade(pix3, vgeom, vattr16):
    grid = (P // TILE,)
    cost = pl.CostEstimate(
        flops=int(2 * P * NV * (3 + NATTR) + 60 * P),
        transcendentals=int(NV * P + 5 * P),
        bytes_accessed=int(pix3.size * pix3.dtype.itemsize
                           + 3 * P * 4
                           + vgeom.size * vgeom.dtype.itemsize
                           + vattr16.size * vattr16.dtype.itemsize),
    )
    return pl.pallas_call(
        _render_kernel,
        out_shape=jax.ShapeDtypeStruct((3, P), jnp.float32),
        grid_spec=pltpu.PrefetchScalarGridSpec(
            num_scalar_prefetch=0,
            grid=grid,
            in_specs=[pl.BlockSpec((3, TILE), lambda i: (0, i)),
                      pl.BlockSpec((NV, 3), lambda i: (0, 0)),
                      pl.BlockSpec((NATTR, NV), lambda i: (0, 0))],
            out_specs=pl.BlockSpec((3, TILE), lambda i: (0, i)),
        ),
        compiler_params=pltpu.CompilerParams(
            # pixel-tile axis is independent work -> shards across both v7x TCs
            dimension_semantics=("parallel",)),
        cost_estimate=cost,
    )(pix3, vgeom, vattr16)


# =============================== module port ==================================
class Trainer:
    """JAX/Pallas port of Model/trainer.py:Trainer.

    `trainable_go` is the trainable geometry: dict with 'verts' (NV,3),
    'normals' (NV,3), 'albedo' (NV,3).
    """

    def __init__(self, trainable_go):
        self.trainable_go = trainable_go

    def forward(self, mvp, campos, light_pos, light_power):
        verts = self.trainable_go["verts"]
        normals = self.trainable_go["normals"]
        albedo = self.trainable_go["albedo"]

        # ---- vertex stage in plain JAX (tiny matmul, not worth a kernel) ----
        verts_h = jnp.concatenate(
            [verts, jnp.ones((NV, 1), jnp.float32)], axis=1)
        clip = verts_h @ mvp.T                                    # (NV, 4)
        w = clip[:, 3:4]
        w_safe = jnp.where(jnp.abs(w) < 1e-6,
                           jnp.where(w >= 0.0, 1e-6, -1e-6), w)   # sign-preserving
        ndc = jnp.clip(clip[:, 0:2] / w_safe, -8.0, 8.0)          # (NV, 2)

        # expanded-quadratic geometry rows: [2*beta*x, 2*beta*y, -beta*|v|^2]
        beta = jnp.float32(BETA)
        vgeom = jnp.concatenate(
            [2.0 * beta * ndc,
             -beta * jnp.sum(ndc * ndc, axis=1, keepdims=True)],
            axis=1).astype(jnp.bfloat16)                          # (NV, 3) bf16

        # ---- pixel-space homogeneous NDC grid (glue) ----
        ys = (jnp.arange(H, dtype=jnp.float32) + 0.5) / H * 2.0 - 1.0
        xs = (jnp.arange(W, dtype=jnp.float32) + 0.5) / W * 2.0 - 1.0
        gy, gx = jnp.meshgrid(ys, xs, indexing="ij")
        pix3 = jnp.stack([gx.reshape(-1), gy.reshape(-1),
                          jnp.ones((P,), jnp.float32)],
                         axis=0).astype(jnp.bfloat16)             # (3, P) bf16

        # ---- 16-row attribute matrix, scene constants folded in -------------
        # interpolation is linear, so softmax-avg(light - v) == light - pos and
        # softmax-avg(cam - v) == cam - pos; 1/sqrt(light_power) folded into the
        # lvec rows makes in-kernel attenuation exactly rs*rs.
        inv_sqrt_lpow = lax.rsqrt(jnp.float32(light_power))
        lrows = (light_pos[None, :].astype(jnp.float32) - verts) * inv_sqrt_lpow
        vrows = campos[None, :].astype(jnp.float32) - verts
        ones = jnp.ones((NV, 1), jnp.float32)
        pad1 = jnp.zeros((NV, 1), jnp.float32)
        pad2 = jnp.zeros((NV, 2), jnp.float32)
        vattr16 = jnp.concatenate(
            [lrows, vrows, ones, pad1,        # rows 0..7  (first sublane tile)
             normals, albedo, pad2],          # rows 8..15 (second sublane tile)
            axis=1).T.astype(jnp.bfloat16)                        # (16, NV)

        img = raster_and_shade(pix3, vgeom, vattr16)              # (3, P)
        return img.reshape(3, H, W).transpose(1, 2, 0)            # (H, W, 3)

    __call__ = forward


# =============================== glue helpers =================================
def _look_at(eye, center, up):
    f = center - eye
    f = f / jnp.linalg.norm(f)
    s = jnp.cross(f, up)
    s = s / jnp.linalg.norm(s)
    u = jnp.cross(s, f)
    m = jnp.stack([
        jnp.concatenate([s, jnp.array([-jnp.dot(s, eye)])]),
        jnp.concatenate([u, jnp.array([-jnp.dot(u, eye)])]),
        jnp.concatenate([-f, jnp.array([jnp.dot(f, eye)])]),
        jnp.array([0.0, 0.0, 0.0, 1.0]),
    ])
    return m.astype(jnp.float32)


def _perspective(fovy, aspect, near, far):
    t = 1.0 / jnp.tan(fovy / 2.0)
    return jnp.array(
        [[t / aspect, 0.0, 0.0, 0.0],
         [0.0, t, 0.0, 0.0],
         [0.0, 0.0, (far + near) / (near - far), 2.0 * far * near / (near - far)],
         [0.0, 0.0, -1.0, 0.0]], dtype=jnp.float32)


if __name__ == "__main__":
    key = jax.random.PRNGKey(0)
    k1, k2, k3 = jax.random.split(key, 3)

    # ---- trainable geometry (deterministic init): perturbed unit sphere ----
    n = 16
    theta = jnp.linspace(0.15, jnp.pi - 0.15, n)
    phi = jnp.linspace(0.0, 2.0 * jnp.pi, n, endpoint=False)
    tt, pp = jnp.meshgrid(theta, phi, indexing="ij")
    sphere = jnp.stack([jnp.sin(tt) * jnp.cos(pp),
                        jnp.sin(tt) * jnp.sin(pp),
                        jnp.cos(tt)], axis=-1).reshape(NV, 3).astype(jnp.float32)
    verts = sphere + 0.02 * jax.random.normal(k1, (NV, 3), jnp.float32)
    normals = verts / jnp.linalg.norm(verts, axis=1, keepdims=True)
    albedo = 0.5 + 0.5 * jax.random.uniform(k2, (NV, 3), dtype=jnp.float32)
    trainable_go = {"verts": verts, "normals": normals, "albedo": albedo}

    # ---- forward() arguments (mvp, campos, light_pos, light_power) ----
    campos = jnp.array([0.0, 0.0, 3.0], jnp.float32)
    light_pos = (jnp.array([2.0, 2.0, 3.0], jnp.float32)
                 + 0.1 * jax.random.normal(k3, (3,), jnp.float32))
    light_power = 8.0
    mvp = _perspective(jnp.float32(jnp.pi / 4.0), 1.0, 0.1, 10.0) @ _look_at(
        campos, jnp.zeros(3, jnp.float32), jnp.array([0.0, 1.0, 0.0], jnp.float32))

    trainer = Trainer(trainable_go)
    image = trainer(mvp, campos, light_pos, light_power)
    image = jax.block_until_ready(image)

    assert image.shape == (H, W, 3), image.shape
    assert bool(jnp.all(jnp.isfinite(image)))
    print("KERNEL_OK")
</pallas_src>

<mosaic_0001>
module attributes {stable_mosaic.version = 11 : i64} {
  func.func @_render_kernel(%arg0: i32, %arg1: memref<3x2048xbf16, #tpu.memory_space<vmem>>, %arg2: memref<256x3xbf16, #tpu.memory_space<vmem>>, %arg3: memref<16x256xbf16, #tpu.memory_space<vmem>>, %arg4: memref<3x2048xf32, #tpu.memory_space<vmem>>) attributes {dimension_semantics = [#tpu.dimension_semantics<parallel>], iteration_bounds = array<i64: 2>, scalar_prefetch = 0 : i64, scratch_operands = 0 : i64, tpu.core_type = #tpu.core_type<tc>, window_params = [{transform_indices = @transform_0, window_bounds = array<i64: 3, 2048>}, {pipeline_mode = #tpu.pipeline_mode<synchronous>, transform_indices = @transform_1, window_bounds = array<i64: 256, 3>}, {pipeline_mode = #tpu.pipeline_mode<synchronous>, transform_indices = @transform_2, window_bounds = array<i64: 16, 256>}, {transform_indices = @transform_3, window_bounds = array<i64: 3, 2048>}]} {
    %c0 = arith.constant 0 : index
    %c0_0 = arith.constant 0 : index
    %0 = vector.load %arg2[%c0, %c0_0] : memref<256x3xbf16, #tpu.memory_space<vmem>>, vector<256x3xbf16>
    %c0_1 = arith.constant 0 : index
    %c0_2 = arith.constant 0 : index
    %1 = vector.load %arg1[%c0_1, %c0_2] : memref<3x2048xbf16, #tpu.memory_space<vmem>>, vector<3x2048xbf16>
    %cst = arith.constant dense<0.000000e+00> : vector<256x2048xf32>
    %2 = tpu.matmul %0, %1, %cst {dimension_numbers = #tpu.dot_dimension_numbers<[1], [0], [0], [1], [0, 0, 1, 1], [], []>} : vector<256x3xbf16>, vector<3x2048xbf16>, vector<256x2048xf32> -> vector<256x2048xf32>
    %cst_3 = arith.constant dense<0xFF800000> : vector<2048xf32>
    %3 = vector.multi_reduction <maximumf>, %2, %cst_3 [0] : vector<256x2048xf32> to vector<2048xf32>
    %4 = vector.shape_cast %3 : vector<2048xf32> to vector<1x2048xf32>
    %5 = vector.broadcast %4 : vector<1x2048xf32> to vector<256x2048xf32>
    %6 = arith.subf %2, %5 : vector<256x2048xf32>
    %7 = arith.truncf %6 : vector<256x2048xf32> to vector<256x2048xbf16>
    %8 = math.exp %7 : vector<256x2048xbf16>
    %c0_4 = arith.constant 0 : index
    %c0_5 = arith.constant 0 : index
    %9 = vector.load %arg3[%c0_4, %c0_5] : memref<16x256xbf16, #tpu.memory_space<vmem>>, vector<16x256xbf16>
    %cst_6 = arith.constant dense<0.000000e+00> : vector<16x2048xf32>
    %10 = tpu.matmul %9, %8, %cst_6 {dimension_numbers = #tpu.dot_dimension_numbers<[1], [0], [0], [1], [0, 0, 1, 1], [], []>} : vector<16x256xbf16>, vector<256x2048xbf16>, vector<16x2048xf32> -> vector<16x2048xf32>
    %11 = vector.extract_strided_slice %10 {offsets = [6, 0], sizes = [1, 2048], strides = [1, 1]} : vector<16x2048xf32> to vector<1x2048xf32>
    %12 = tpu.reciprocal %11 {approx = true} : vector<1x2048xf32> -> vector<1x2048xf32>
    %13 = vector.extract_strided_slice %10 {offsets = [0, 0], sizes = [3, 2048], strides = [1, 1]} : vector<16x2048xf32> to vector<3x2048xf32>
    %14 = vector.broadcast %12 : vector<1x2048xf32> to vector<3x2048xf32>
    %15 = arith.mulf %13, %14 : vector<3x2048xf32>
    %16 = vector.extract_strided_slice %10 {offsets = [3, 0], sizes = [3, 2048], strides = [1, 1]} : vector<16x2048xf32> to vector<3x2048xf32>
    %17 = vector.extract_strided_slice %10 {offsets = [8, 0], sizes = [3, 2048], strides = [1, 1]} : vector<16x2048xf32> to vector<3x2048xf32>
    %18 = vector.extract_strided_slice %10 {offsets = [11, 0], sizes = [3, 2048], strides = [1, 1]} : vector<16x2048xf32> to vector<3x2048xf32>
    %19 = vector.broadcast %12 : vector<1x2048xf32> to vector<3x2048xf32>
    %20 = arith.mulf %18, %19 : vector<3x2048xf32>
    %21 = arith.mulf %15, %15 : vector<3x2048xf32>
    %cst_7 = arith.constant dense<0.000000e+00> : vector<2048xf32>
    %22 = vector.multi_reduction <add>, %21, %cst_7 [0] : vector<3x2048xf32> to vector<2048xf32>
    %23 = vector.shape_cast %22 : vector<2048xf32> to vector<1x2048xf32>
    %cst_8 = arith.constant 9.99999993E-9 : f32
    %24 = vector.broadcast %cst_8 : f32 to vector<1x2048xf32>
    %25 = arith.addf %23, %24 : vector<1x2048xf32>
    %26 = math.rsqrt %25 : vector<1x2048xf32>
    %27 = vector.broadcast %26 : vector<1x2048xf32> to vector<3x2048xf32>
    %28 = arith.mulf %15, %27 : vector<3x2048xf32>
    %29 = arith.mulf %16, %16 : vector<3x2048xf32>
    %cst_9 = arith.constant dense<0.000000e+00> : vector<2048xf32>
    %30 = vector.multi_reduction <add>, %29, %cst_9 [0] : vector<3x2048xf32> to vector<2048xf32>
    %31 = vector.shape_cast %30 : vector<2048xf32> to vector<1x2048xf32>
    %cst_10 = arith.constant 9.99999993E-9 : f32
    %32 = vector.broadcast %cst_10 : f32 to vector<1x2048xf32>
    %33 = arith.addf %31, %32 : vector<1x2048xf32>
    %34 = math.rsqrt %33 : vector<1x2048xf32>
    %35 = vector.broadcast %34 : vector<1x2048xf32> to vector<3x2048xf32>
    %36 = arith.mulf %16, %35 : vector<3x2048xf32>
    %37 = arith.addf %28, %36 : vector<3x2048xf32>
    %38 = arith.mulf %37, %37 : vector<3x2048xf32>
    %cst_11 = arith.constant dense<0.000000e+00> : vector<2048xf32>
    %39 = vector.multi_reduction <add>, %38, %cst_11 [0] : vector<3x2048xf32> to vector<2048xf32>
    %40 = vector.shape_cast %39 : vector<2048xf32> to vector<1x2048xf32>
    %cst_12 = arith.constant 9.99999993E-9 : f32
    %41 = vector.broadcast %cst_12 : f32 to vector<1x2048xf32>
    %42 = arith.addf %40, %41 : vector<1x2048xf32>
    %43 = math.rsqrt %42 : vector<1x2048xf32>
    %44 = vector.broadcast %43 : vector<1x2048xf32> to vector<3x2048xf32>
    %45 = arith.mulf %37, %44 : vector<3x2048xf32>
    %46 = arith.mulf %17, %17 : vector<3x2048xf32>
    %cst_13 = arith.constant dense<0.000000e+00> : vector<2048xf32>
    %47 = vector.multi_reduction <add>, %46, %cst_13 [0] : vector<3x2048xf32> to vector<2048xf32>
    %48 = vector.shape_cast %47 : vector<2048xf32> to vector<1x2048xf32>
    %cst_14 = arith.constant 9.99999993E-9 : f32
    %49 = vector.broadcast %cst_14 : f32 to vector<1x2048xf32>
    %50 = arith.addf %48, %49 : vector<1x2048xf32>
    %51 = math.rsqrt %50 : vector<1x2048xf32>
    %52 = vector.broadcast %51 : vector<1x2048xf32> to vector<3x2048xf32>
    %53 = arith.mulf %17, %52 : vector<3x2048xf32>
    %54 = arith.mulf %53, %28 : vector<3x2048xf32>
    %cst_15 = arith.constant dense<0.000000e+00> : vector<2048xf32>
    %55 = vector.multi_reduction <add>, %54, %cst_15 [0] : vector<3x2048xf32> to vector<2048xf32>
    %56 = vector.shape_cast %55 : vector<2048xf32> to vector<1x2048xf32>
    %cst_16 = arith.constant 0.000000e+00 : f32
    %57 = vector.broadcast %cst_16 : f32 to vector<1x2048xf32>
    %58 = arith.maximumf %56, %57 : vector<1x2048xf32>
    %59 = arith.mulf %53, %45 : vector<3x2048xf32>
    %cst_17 = arith.constant dense<0.000000e+00> : vector<2048xf32>
    %60 = vector.multi_reduction <add>, %59, %cst_17 [0] : vector<3x2048xf32> to vector<2048xf32>
    %61 = vector.shape_cast %60 : vector<2048xf32> to vector<1x2048xf32>
    %cst_18 = arith.constant 0.000000e+00 : f32
    %62 = vector.broadcast %cst_18 : f32 to vector<1x2048xf32>
    %63 = arith.maximumf %61, %62 : vector<1x2048xf32>
    %64 = arith.mulf %63, %63 : vector<1x2048xf32>
    %65 = arith.mulf %64, %64 : vector<1x2048xf32>
    %66 = arith.mulf %65, %65 : vector<1x2048xf32>
    %67 = arith.mulf %66, %66 : vector<1x2048xf32>
    %68 = arith.mulf %67, %67 : vector<1x2048xf32>
    %cst_19 = arith.constant 0.000000e+00 : f32
    %69 = vector.broadcast %cst_19 : f32 to vector<1x2048xf32>
    %70 = arith.cmpf ogt, %58, %69 : vector<1x2048xf32>
    %cst_20 = arith.constant 0.000000e+00 : f32
    %71 = vector.broadcast %cst_20 : f32 to vector<1x2048xf32>
    %72 = arith.select %70, %68, %71 : vector<1x2048xi1>, vector<1x2048xf32>
    %73 = vector.broadcast %58 : vector<1x2048xf32> to vector<3x2048xf32>
    %74 = arith.mulf %20, %73 : vector<3x2048xf32>
    %75 = vector.broadcast %72 : vector<1x2048xf32> to vector<3x2048xf32>
    %76 = arith.addf %74, %75 : vector<3x2048xf32>
    %77 = arith.mulf %26, %26 : vector<1x2048xf32>
    %78 = vector.broadcast %77 : vector<1x2048xf32> to vector<3x2048xf32>
    %79 = arith.mulf %76, %78 : vector<3x2048xf32>
    %c0_21 = arith.constant 0 : index
    %c0_22 = arith.constant 0 : index
    %80 = vector.load %arg4[%c0_21, %c0_22] : memref<3x2048xf32, #tpu.memory_space<vmem>>, vector<3x2048xf32>
    tpu.vector_store %arg4[%c0_21, %c0_22], %79 {strides = array<i32>} : memref<3x2048xf32, #tpu.memory_space<vmem>>, vector<3x2048xf32>,
    return
  }
  func.func @transform_0(%arg0: i32) -> (i32, i32) {
    %c0_i32 = arith.constant 0 : i32
    %c0_i32_0 = arith.constant 0 : i32
    return %c0_i32, %arg0 : i32, i32
  }
  func.func @transform_1(%arg0: i32) -> (i32, i32) {
    %c0_i32 = arith.constant 0 : i32
    %c0_i32_0 = arith.constant 0 : i32
    %c0_i32_1 = arith.constant 0 : i32
    return %c0_i32, %c0_i32_0 : i32, i32
  }
  func.func @transform_2(%arg0: i32) -> (i32, i32) {
    %c0_i32 = arith.constant 0 : i32
    %c0_i32_0 = arith.constant 0 : i32
    %c0_i32_1 = arith.constant 0 : i32
    return %c0_i32, %c0_i32_0 : i32, i32
  }
  func.func @transform_3(%arg0: i32) -> (i32, i32) {
    %c0_i32 = arith.constant 0 : i32
    %c0_i32_0 = arith.constant 0 : i32
    return %c0_i32, %arg0 : i32, i32
  }
}

</mosaic_0001>

<bundles_post_ra>
// kernel: tpu_custom_call.1
= control target key start
LH: loop header
LB: loop body
LE: loop exit
PB: predicated region body
PF: predicated region fallthrough
CT: control target
= control target key end

     0   :  { %8 = vsyncpa [#allocation3], 0  ;;  %s12896_s0 = inlined_call_operand.vmem [shape: bf16[3,4096], index: 0, kind: input, shape index: {}]   ;;  %s12897_s1 = inlined_call_operand.vmem [shape: bf16[256,3], index: 1, kind: input, shape index: {}]   ;;  %s12898_s2 = inlined_call_operand.vmem [shape: bf16[16,256], index: 2, kind: input, shape index: {}]   ;;  %s12899_s3 = inlined_call_operand.hbm [shape: f32[3,4096], index: 3, kind: output, shape index: {}]  }
   0x1   :  { %10 = vsyncpa [#allocation3 + $0x1], 0  ;;  %s7054_s12 = smov 0   ;;  %s7056_s13 = smov 0  }
   0x2   :  { %s7058_s14 = smov 0   ;;  %s7060_s15 = smov 0  }
   0x3 LB: > { %s7075_s16 = sadd.s32 4294967295, %s7028_s15   ;;  %s6039_s17 = sadd.s32 4294967294, %s7028_s15   ;;  %s7028_s15 = sphi %s7060_s15, %s14937_s15   ;;  %s7024_s14 = sphi %s7058_s14, %s14936_s14   ;;  %s7020_s13 = sphi %s7056_s13, %s14935_s13   ;;  %s7016_s12 = sphi %s7054_s12, %s14934_s12  }
   0x4   : > { %s7079_s18 = sadd.s32 1, %s7028_s15   ;;  %s91_s19 = sadd.s32 1, %s7024_s14 }
   0x5   : > { %s88_s20 = ssub.s32 %s7028_s15, %s7079_s18  ;;  %p101_p0 = scmp.ne.s32.totalorder %s7024_s14, %s7020_s13 }
   0x6   : > { %p89_p1 = scmp.eq.s32.totalorder %s88_s20, 0  ;;  %p102_p2 = scmp.eq.s32.totalorder %s7075_s16, 1 }
   0x7   : > { %p107_p3 = scmp.ne.s32.totalorder %s7020_s13, %s7016_s12  ;;  %p108_p4 = scmp.eq.s32.totalorder %s6039_s17, 1 }
   0x8   : > { %s7090_s21 = scalar_select %p89_p1, %s7024_s14, %s91_s19  }
   0x9   : > { %p7092_p5 = por %p102_p2, %p101_p0  ;;  %p7096_p6 = por %p108_p4, %p107_p3 }
   0xa   : > { %p6042_p7 = scmp.ge.s32.totalorder %s7028_s15, 1  ;;  %p141_p8 = scmp.lt.s32.totalorder %s7028_s15, 3 }
   0xc   : > { %p142_p9 = pnand %p6042_p7, %p141_p8 }
   0xe   : > { %145 = sbr.rel (%p142_p9) target bundleno = 1333 (0x535), region = 32 }
  0x15   : > { %s6044_s24 = sshll.u32 %s7075_s16, 4  ;;  %v297_v0 = vlaneseq  ;;  %v7030_v1 = vmov 1983009808   ;;  %vm410_vm0 = vcmask 1040384   ;;  %v12903_v4 = vmov 0   ;;  %v7132_v27 = vld [vmem:[%s12897_s1] sm:$0xff]  }
  0x16   : > { %p166_p10 = scmp.lt.s32.totalorder %s6044_s24, 31  ;;  %v295_v2 = vunpack.c.l.s4 %v7030_v1  ;;  %494 = vmatprep.mubr.bf16.mxu0 %v12903_v4  ;;  %687 = vmatprep.mubr.bf16.mxu1 %v12903_v4  ;;  %vm411_vm1 = vcmask 1041408   ;;  %v7032_v6 = vmov 65535   ;;  %vm361_vm2 = vcmask 23552   ;;  %v7150_v34 = vld [vmem:[%s12897_s1 + $0x8] sm:$0xff]   ;;  %v7170_v40 = vld [vmem:[%s12897_s1 + $0x10] sm:$0xff]  }
  0x17   : > { %v7103_v3 = vshrl.u32 %v297_v0, 7  ;;  %v412_v7 = vsel %vm410_vm0, 4294967295, %v7032_v6  ;;  %v7181_v41 = vld [vmem:[%s12897_s1 + $0x18] sm:$0xff]   ;;  %v7192_v42 = vld [vmem:[%s12897_s1 + $0x20] sm:$0xff]   ;;  %v7203_v43 = vld [vmem:[%s12897_s1 + $0x28] sm:$0xff]   ;;  %vm4618_vm3 = vcmask 1042432  }
  0x18   : > { %s14939_s24 = smov (!%p166_p10, %s6044_s24), 31  ;;  %v296_v5 = vunpack.c.0.s8 %v295_v2  ;;  %v7117_v10 = vsel %vm411_vm1, %v412_v7, 0  ;;  %v7214_v44 = vld [vmem:[%s12897_s1 + $0x30] sm:$0xff]   ;;  %v7225_v45 = vld [vmem:[%s12897_s1 + $0x38] sm:$0xff]   ;;  %v7236_v46 = vld [vmem:[%s12897_s1 + $0x40] sm:$0xff]   ;;  %vm5915_vm7 = vcmask 1044484  }
  0x19   : > { %13400 = vst [vmem:[#allocation5_spill] sm:$0xff] %v7103_v3  ;;  %s6045_s25 = sshll.u32 %s14939_s24, 1  ;;  %v7247_v47 = vld [vmem:[%s12897_s1 + $0x48] sm:$0xff]   ;;  %v7258_v48 = vld [vmem:[%s12897_s1 + $0x50] sm:$0xff]   ;;  %v7269_v49 = vld [vmem:[%s12897_s1 + $0x58] sm:$0xff]   ;;  %s162_s19 = sand.u32 1, %s7020_s13  }
  0x1a   : > { %v7109_v8 = vsub.s32 %v296_v5, %v7103_v3  ;;  %s7114_s28 = scalar_lea.vmem %s12896_s0, %s6045_s25  ;;  %v7280_v50 = vld [vmem:[%s12897_s1 + $0x60] sm:$0xff]   ;;  %v7291_v51 = vld [vmem:[%s12897_s1 + $0x68] sm:$0xff]   ;;  %v7302_v52 = vld [vmem:[%s12897_s1 + $0x70] sm:$0xff]   ;;  %s6043_s20 = sshll.u32 %s162_s19, 6 }
  0x1b   : > { %v205_v9 = vld [vmem:[%s7114_s28] sm:$0xff]  ;;  %v206_v11 = vld [vmem:[%s7114_s28 + $0x8] sm:$0xff]  ;;  %v207_v31 = vld [vmem:[%s7114_s28 + $0x10] sm:$0xff]  ;;  %s12261_s24 = scalar_lea.vmem [#allocation2], %s6043_s20  ;;  %s6205_s25 = sshll.u32 %s7075_s16, 10 }
  0x1c   : > { %v300_v12 = vrot.slane %v205_v9, %v7109_v8  ;;  %v293_v13 = vcombine.high %v205_v9, %v205_v9  ;;  %v317_v14 = vrot.slane %v206_v11, %v7109_v8  ;;  %v310_v15 = vcombine.high %v206_v11, %v206_v11  ;;  %v7313_v53 = vld [vmem:[%s12897_s1 + $0x78] sm:$0xff]   ;;  %vm12250_vm9 = vmor %vm410_vm0, %vm5915_vm7  ;;  %s12849_s29 = scalar_lea.hbm %s12899_s3, %s6205_s25  ;;  %s5966_s30 = scalar_lea.sflag [#allocation3], %s162_s19 }
  0x1d   : > { %v7145_v32 = vrot.slane %v207_v31, %v7109_v8  ;;  %v327_v33 = vcombine.high %v207_v31, %v207_v31  ;;  %v208_v56 = vld [vmem:[%s7114_s28 + $0x18] sm:$0xff]  ;;  %s5980_s28 = sshll.u32 %s12261_s24, 4  ;;  %s7033_s4 = smov [#allocation2]   ;;  %s12851_s28 = int_to_ptr.vmem [resolvable:$true] %s5980_s28 }
  0x1e   : > { %v308_v16 = vcombine.high %v300_v12, %v300_v12  ;;  %v307_v17 = vrot.slane %v293_v13, %v7109_v8  ;;  %v325_v18 = vcombine.high %v317_v14, %v317_v14  ;;  %v415_v19 = vand.u32 %v7117_v10, %v300_v12  ;;  %s6966_s16 = scalar_lea.vmem %s12851_s28, 1024  ;;  %s6970_s5 = sshll.u32 %s7033_s4, 4  ;;  %s6971_s5 = int_to_ptr.vmem [resolvable:$false] %s6970_s5 }
  0x1f   : > { %v324_v20 = vrot.slane %v310_v15, %v7109_v8  ;;  %v427_v29 = vand.u32 %v7117_v10, %v317_v14  ;;  %v342_v35 = vcombine.high %v7145_v32, %v7145_v32  ;;  %v7155_v36 = vrot.slane %v327_v33, %v7109_v8  ;;  %p6967_p11 = scmp.ne.s32.totalorder %s12851_s28, %s6966_s16  ;;  %s6972_s6 = scalar_lea.vmem %s6971_s5, 2048 }
  0x20   : > { %v418_v21 = vand.u32 %v7117_v10, %v308_v16  ;;  %v309_v22 = vcombine.high %v307_v17, %v307_v17  ;;  %v430_v23 = vand.u32 %v7117_v10, %v325_v18  ;;  %v421_v24 = vand.u32 %v7117_v10, %v307_v17  ;;  %p6973_p0 = scmp.lt.s32.totalorder %s12851_s28, %s6971_s5  ;;  %p6974_p1 = scmp.lt.s32.totalorder %s6972_s6, %s6966_s16 }
  0x21   : > { %v326_v25 = vcombine.high %v324_v20, %v324_v20  ;;  %v433_v30 = vand.u32 %v7117_v10, %v324_v20  ;;  %v442_v37 = vand.u32 %v7117_v10, %v342_v35  ;;  %v343_v38 = vcombine.high %v7155_v36, %v7155_v36  ;;  %p6968_p12 = pnand %p6967_p11, %p7092_p5 }
  0x22   : > { %462 = vmatprep.subr.bf16.mxu0 %v418_v21  ;;  %v424_v26 = vand.u32 %v7117_v10, %v309_v22  ;;  %v439_v54 = vand.u32 %v7117_v10, %v7145_v32  ;;  %v445_v55 = vand.u32 %v7117_v10, %v7155_v36  ;;  %v7333_v57 = vrot.slane %v208_v56, %v7109_v8  ;;  %p6975_p2 = por %p6974_p1, %p6973_p0 }
  0x23   : > { %463 = vmatpush1.bf16.msra.mxu0 %v415_v19  ;;  %v436_v28 = vand.u32 %v7117_v10, %v326_v25  ;;  %v448_v39 = vand.u32 %v7117_v10, %v343_v38  ;;  %v344_v58 = vcombine.high %v208_v56, %v208_v56  ;;  %p6969_p13 = pneg %p6968_p12 }
  0x24   : > { %655 = vmatprep.subr.bf16.mxu1 %v424_v26  ;;  %848 = vmatprep.subr.bf16.mxu0 %v430_v23  ;;  %v359_v59 = vcombine.high %v7333_v57, %v7333_v57 }
  0x25   : > { %656 = vmatpush1.bf16.msra.mxu1 %v421_v24  ;;  %v7338_v60 = vrot.slane %v344_v58, %v7109_v8  ;;  %p6976_p3 = pnand %p6975_p2, %p6969_p13 }
  0x26   : > { %6062 = vmatmul.mubr.msk.bf16.vlgmr.msra.gmra.mrb[0].mxu0 %vm361_vm2, %v7132_v27  ;;  %1041 = vmatprep.subr.bf16.mxu1 %v436_v28  ;;  %v454_v61 = vand.u32 %v7117_v10, %v359_v59 }
  0x27   : > { %849 = vmatpush1.bf16.msra.mxu0 %v427_v29  ;;  %504 = vmatprep.mubr.bf16.mxu0 %v12903_v4  ;;  %v360_v62 = vcombine.high %v7338_v60, %v7338_v60 }
  0x28   : > { %6078 = vmatmul.mubr.msk.bf16.vlgmr.msra.gmra.mrb[0].mxu1 %vm361_vm2, %v7132_v27  ;;  %1234 = vmatprep.subr.bf16.mxu0 %v442_v37 }
  0x29   : > { %1042 = vmatpush1.bf16.msra.mxu1 %v433_v30  ;;  %697 = vmatprep.mubr.bf16.mxu1 %v12903_v4  ;;  %v460_v63 = vand.u32 %v7117_v10, %v360_v62 }
  0x2a   : > { %1427 = vmatprep.subr.bf16.mxu1 %v448_v39 }
  0x2e   : > { %6063 = vmatmul.mubr.msk.bf16.gmra.mrb[4].mxu0 %vm361_vm2, %v7150_v34 }
  0x2f   : > { %514 = vmatprep.mubr.bf16.mxu0 %v12903_v4 }
  0x30   : > { %6079 = vmatmul.mubr.msk.bf16.gmra.mrb[4].mxu1 %vm361_vm2, %v7150_v34 }
  0x31   : > { %707 = vmatprep.mubr.bf16.mxu1 %v12903_v4 }
  0x36   : > { %6064 = vmatmul.mubr.msk.bf16.gmra.mrb[8].mxu0 %vm361_vm2, %v7170_v40 }
  0x37   : > { %524 = vmatprep.mubr.bf16.mxu0 %v12903_v4 }
  0x38   : > { %6080 = vmatmul.mubr.msk.bf16.gmra.mrb[8].mxu1 %vm361_vm2, %v7170_v40 }
  0x39   : > { %717 = vmatprep.mubr.bf16.mxu1 %v12903_v4 }
  0x3e   : > { %6065 = vmatmul.mubr.msk.bf16.gmra.mrb[12].mxu0 %vm361_vm2, %v7181_v41 }
  0x3f   : > { %534 = vmatprep.mubr.bf16.mxu0 %v12903_v4 }
  0x40   : > { %6081 = vmatmul.mubr.msk.bf16.gmra.mrb[12].mxu1 %vm361_vm2, %v7181_v41 }
  0x41   : > { %727 = vmatprep.mubr.bf16.mxu1 %v12903_v4 }
  0x46   : > { %6066 = vmatmul.mubr.msk.bf16.gmra.mrb[16].mxu0 %vm361_vm2, %v7192_v42 }
  0x47   : > { %544 = vmatprep.mubr.bf16.mxu0 %v12903_v4 }
  0x48   : > { %6082 = vmatmul.mubr.msk.bf16.gmra.mrb[16].mxu1 %vm361_vm2, %v7192_v42 }
  0x49   : > { %737 = vmatprep.mubr.bf16.mxu1 %v12903_v4 }
  0x4e   : > { %6067 = vmatmul.mubr.msk.bf16.gmra.mrb[20].mxu0 %vm361_vm2, %v7203_v43 }
  0x4f   : > { %554 = vmatprep.mubr.bf16.mxu0 %v12903_v4 }
  0x50   : > { %6083 = vmatmul.mubr.msk.bf16.gmra.mrb[20].mxu1 %vm361_vm2, %v7203_v43 }
  0x51   : > { %747 = vmatprep.mubr.bf16.mxu1 %v12903_v4 }
  0x56   : > { %6068 = vmatmul.mubr.msk.bf16.gmra.mrb[24].mxu0 %vm361_vm2, %v7214_v44 }
  0x57   : > { %564 = vmatprep.mubr.bf16.mxu0 %v12903_v4 }
  0x58   : > { %6084 = vmatmul.mubr.msk.bf16.gmra.mrb[24].mxu1 %vm361_vm2, %v7214_v44 }
  0x59   : > { %757 = vmatprep.mubr.bf16.mxu1 %v12903_v4 }
  0x5e   : > { %6069 = vmatmul.mubr.msk.bf16.gmra.mrb[28].mxu0 %vm361_vm2, %v7225_v45 }
  0x5f   : > { %574 = vmatprep.mubr.bf16.mxu0 %v12903_v4 }
  0x60   : > { %6085 = vmatmul.mubr.msk.bf16.gmra.mrb[28].mxu1 %vm361_vm2, %v7225_v45 }
  0x61   : > { %767 = vmatprep.mubr.bf16.mxu1 %v12903_v4 }
  0x66   : > { %6070 = vmatmul.mubr.msk.bf16.gmra.mrb[32].mxu0 %vm361_vm2, %v7236_v46 }
  0x67   : > { %584 = vmatprep.mubr.bf16.mxu0 %v12903_v4 }
  0x68   : > { %6086 = vmatmul.mubr.msk.bf16.gmra.mrb[32].mxu1 %vm361_vm2, %v7236_v46 }
  0x69   : > { %777 = vmatprep.mubr.bf16.mxu1 %v12903_v4 }
  0x6e   : > { %6071 = vmatmul.mubr.msk.bf16.gmra.mrb[36].mxu0 %vm361_vm2, %v7247_v47 }
  0x6f   : > { %594 = vmatprep.mubr.bf16.mxu0 %v12903_v4 }
  0x70   : > { %6087 = vmatmul.mubr.msk.bf16.gmra.mrb[36].mxu1 %vm361_vm2, %v7247_v47 }
  0x71   : > { %787 = vmatprep.mubr.bf16.mxu1 %v12903_v4 }
  0x76   : > { %6072 = vmatmul.mubr.msk.bf16.gmra.mrb[40].mxu0 %vm361_vm2, %v7258_v48 }
  0x77   : > { %604 = vmatprep.mubr.bf16.mxu0 %v12903_v4 }
  0x78   : > { %6088 = vmatmul.mubr.msk.bf16.gmra.mrb[40].mxu1 %vm361_vm2, %v7258_v48 }
  0x79   : > { %797 = vmatprep.mubr.bf16.mxu1 %v12903_v4 }
  0x7e   : > { %6073 = vmatmul.mubr.msk.bf16.gmra.mrb[44].mxu0 %vm361_vm2, %v7269_v49 }
  0x7f   : > { %614 = vmatprep.mubr.bf16.mxu0 %v12903_v4 }
  0x80   : > { %6089 = vmatmul.mubr.msk.bf16.gmra.mrb[44].mxu1 %vm361_vm2, %v7269_v49 }
  0x81   : > { %807 = vmatprep.mubr.bf16.mxu1 %v12903_v4 }
  0x86   : > { %6074 = vmatmul.mubr.msk.bf16.gmra.mrb[48].mxu0 %vm361_vm2, %v7280_v50 }
  0x87   : > { %624 = vmatprep.mubr.bf16.mxu0 %v12903_v4 }
  0x88   : > { %6090 = vmatmul.mubr.msk.bf16.gmra.mrb[48].mxu1 %vm361_vm2, %v7280_v50 }
  0x89   : > { %817 = vmatprep.mubr.bf16.mxu1 %v12903_v4 }
  0x8e   : > { %6075 = vmatmul.mubr.msk.bf16.gmra.mrb[52].mxu0 %vm361_vm2, %v7291_v51 }
  0x8f   : > { %634 = vmatprep.mubr.bf16.mxu0 %v12903_v4 }
  0x90   : > { %6091 = vmatmul.mubr.msk.bf16.gmra.mrb[52].mxu1 %vm361_vm2, %v7291_v51 }
  0x91   : > { %827 = vmatprep.mubr.bf16.mxu1 %v12903_v4 }
  0x96   : > { %6076 = vmatmul.mubr.msk.bf16.gmra.mrb[56].mxu0 %vm361_vm2, %v7302_v52 }
  0x97   : > { %644 = vmatprep.mubr.bf16.mxu0 %v12903_v4 }
  0x98   : > { %6092 = vmatmul.mubr.msk.bf16.gmra.mrb[56].mxu1 %vm361_vm2, %v7302_v52 }
  0x99   : > { %837 = vmatprep.mubr.bf16.mxu1 %v12903_v4 }
  0x9e   : > { %6077 = vmatmul.mubr.msk.bf16.gmra.mrb[60].mxu0 %vm361_vm2, %v7313_v53 }
  0x9f   : > { %880 = vmatprep.mubr.bf16.mxu0 %v12903_v4 }
  0xa0   : > { %6093 = vmatmul.mubr.msk.bf16.gmra.mrb[60].mxu1 %vm361_vm2, %v7313_v53 }
  0xa1   : > { %1073 = vmatprep.mubr.bf16.mxu1 %v12903_v4 }
  0xa6   : > { %6094 = vmatmul.mubr.msk.bf16.vlgmr.msra.gmra.mrb[64].mxu0 %vm361_vm2, %v7132_v27 }
  0xa7   : > { %1235 = vmatpush1.bf16.msra.mxu0 %v439_v54  ;;  %890 = vmatprep.mubr.bf16.mxu0 %v12903_v4 }
  0xa8   : > { %6110 = vmatmul.mubr.msk.bf16.vlgmr.msra.gmra.mrb[64].mxu1 %vm361_vm2, %v7132_v27  ;;  %1620 = vmatprep.subr.bf16.mxu0 %v454_v61 }
  0xa9   : > { %1428 = vmatpush1.bf16.msra.mxu1 %v445_v55  ;;  %1083 = vmatprep.mubr.bf16.mxu1 %v12903_v4 }
  0xaa   : > { %1813 = vmatprep.subr.bf16.mxu1 %v460_v63 }
  0xae   : > { %6095 = vmatmul.mubr.msk.bf16.gmra.mrb[68].mxu0 %vm361_vm2, %v7150_v34 }
  0xaf   : > { %900 = vmatprep.mubr.bf16.mxu0 %v12903_v4 }
  0xb0   : > { %6111 = vmatmul.mubr.msk.bf16.gmra.mrb[68].mxu1 %vm361_vm2, %v7150_v34 }
  0xb1   : > { %1093 = vmatprep.mubr.bf16.mxu1 %v12903_v4 }
  0xb6   : > { %6096 = vmatmul.mubr.msk.bf16.gmra.mrb[72].mxu0 %vm361_vm2, %v7170_v40 }
  0xb7   : > { %910 = vmatprep.mubr.bf16.mxu0 %v12903_v4 }
  0xb8   : > { %6112 = vmatmul.mubr.msk.bf16.gmra.mrb[72].mxu1 %vm361_vm2, %v7170_v40 }
  0xb9   : > { %1103 = vmatprep.mubr.bf16.mxu1 %v12903_v4 }
  0xbe   : > { %6097 = vmatmul.mubr.msk.bf16.gmra.mrb[76].mxu0 %vm361_vm2, %v7181_v41 }
  0xbf   : > { %920 = vmatprep.mubr.bf16.mxu0 %v12903_v4 }
  0xc0   : > { %6113 = vmatmul.mubr.msk.bf16.gmra.mrb[76].mxu1 %vm361_vm2, %v7181_v41 }
  0xc1   : > { %1113 = vmatprep.mubr.bf16.mxu1 %v12903_v4 }
  0xc6   : > { %6098 = vmatmul.mubr.msk.bf16.gmra.mrb[80].mxu0 %vm361_vm2, %v7192_v42 }
  0xc7   : > { %930 = vmatprep.mubr.bf16.mxu0 %v12903_v4 }
  0xc8   : > { %6114 = vmatmul.mubr.msk.bf16.gmra.mrb[80].mxu1 %vm361_vm2, %v7192_v42 }
  0xc9   : > { %1123 = vmatprep.mubr.bf16.mxu1 %v12903_v4 }
  0xce   : > { %6099 = vmatmul.mubr.msk.bf16.gmra.mrb[84].mxu0 %vm361_vm2, %v7203_v43 }
  0xcf   : > { %940 = vmatprep.mubr.bf16.mxu0 %v12903_v4 }
  0xd0   : > { %6115 = vmatmul.mubr.msk.bf16.gmra.mrb[84].mxu1 %vm361_vm2, %v7203_v43 }
  0xd1   : > { %1133 = vmatprep.mubr.bf16.mxu1 %v12903_v4 }
  0xd6   : > { %6100 = vmatmul.mubr.msk.bf16.gmra.mrb[88].mxu0 %vm361_vm2, %v7214_v44 }
  0xd7   : > { %950 = vmatprep.mubr.bf16.mxu0 %v12903_v4 }
  0xd8   : > { %6116 = vmatmul.mubr.msk.bf16.gmra.mrb[88].mxu1 %vm361_vm2, %v7214_v44 }
  0xd9   : > { %1143 = vmatprep.mubr.bf16.mxu1 %v12903_v4 }
  0xde   : > { %6101 = vmatmul.mubr.msk.bf16.gmra.mrb[92].mxu0 %vm361_vm2, %v7225_v45 }
  0xdf   : > { %960 = vmatprep.mubr.bf16.mxu0 %v12903_v4 }
  0xe0   : > { %6117 = vmatmul.mubr.msk.bf16.gmra.mrb[92].mxu1 %vm361_vm2, %v7225_v45 }
  0xe1   : > { %1153 = vmatprep.mubr.bf16.mxu1 %v12903_v4 }
  0xe6   : > { %6102 = vmatmul.mubr.msk.bf16.gmra.mrb[96].mxu0 %vm361_vm2, %v7236_v46 }
  0xe7   : > { %970 = vmatprep.mubr.bf16.mxu0 %v12903_v4 }
  0xe8   : > { %6118 = vmatmul.mubr.msk.bf16.gmra.mrb[96].mxu1 %vm361_vm2, %v7236_v46 }
  0xe9   : > { %1163 = vmatprep.mubr.bf16.mxu1 %v12903_v4 }
  0xee   : > { %6103 = vmatmul.mubr.msk.bf16.gmra.mrb[100].mxu0 %vm361_vm2, %v7247_v47 }
  0xef   : > { %980 = vmatprep.mubr.bf16.mxu0 %v12903_v4 }
  0xf0   : > { %6119 = vmatmul.mubr.msk.bf16.gmra.mrb[100].mxu1 %vm361_vm2, %v7247_v47 }
  0xf1   : > { %1173 = vmatprep.mubr.bf16.mxu1 %v12903_v4 }
  0xf6   : > { %6104 = vmatmul.mubr.msk.bf16.gmra.mrb[104].mxu0 %vm361_vm2, %v7258_v48 }
  0xf7   : > { %990 = vmatprep.mubr.bf16.mxu0 %v12903_v4 }
  0xf8   : > { %6120 = vmatmul.mubr.msk.bf16.gmra.mrb[104].mxu1 %vm361_vm2, %v7258_v48 }
  0xf9   : > { %v7403_v0 = vpop.f32.mrb[0].mxu0  ;;  %1183 = vmatprep.mubr.bf16.mxu1 %v12903_v4 }
  0xfa   : > { %v7406_v1 = vpop.f32.mrb[1].mxu0 }
  0xfb   : > { %v7408_v2 = vpop.f32.mrb[2].mxu0  ;;  %v7410_v5 = vpop.f32.mrb[0].mxu1 }
  0xfc   : > { %13401 = vst [vmem:[#allocation6_spill] sm:$0xff] %v7410_v5  ;;  %v2006_v6 = vmax.f32 %v7403_v0, %v7408_v2  ;;  %v7414_v7 = vpop.f32.mrb[3].mxu0  ;;  %v7416_v8 = vpop.f32.mrb[1].mxu1 }
  0xfd   : > { %13402 = vst [vmem:[#allocation7_spill] sm:$0xff] %v7416_v8  ;;  %v2043_v9 = vmax.f32 %v7406_v1, %v7414_v7  ;;  %v7420_v11 = vpop.f32.mrb[2].mxu1 }
  0xfe   : > { %13403 = vst [vmem:[#allocation8_spill] sm:$0xff] %v7420_v11  ;;  %v2080_v12 = vmax.f32 %v7410_v5, %v7420_v11  ;;  %v7424_v13 = vpop.f32.mrb[3].mxu1  ;;  %6105 = vmatmul.mubr.msk.bf16.gmra.mrb[108].mxu0 %vm361_vm2, %v7269_v49 }
  0xff   : > { %13404 = vst [vmem:[#allocation9_spill] sm:$0xff] %v7424_v13  ;;  %v2117_v14 = vmax.f32 %v7416_v8, %v7424_v13  ;;  %1000 = vmatprep.mubr.bf16.mxu0 %v12903_v4 }
 0x100   : > { %6121 = vmatmul.mubr.msk.bf16.gmra.mrb[108].mxu1 %vm361_vm2, %v7269_v49 }
 0x101   : > { %v7433_v15 = vpop.f32.mrb[4].mxu0  ;;  %1193 = vmatprep.mubr.bf16.mxu1 %v12903_v4 }
 0x102   : > { %v2007_v16 = vmax.f32 %v2006_v6, %v7433_v15  ;;  %v7437_v17 = vpop.f32.mrb[5].mxu0 }
 0x103   : > { %v2044_v18 = vmax.f32 %v2043_v9, %v7437_v17  ;;  %v7440_v19 = vpop.f32.mrb[6].mxu0  ;;  %v7442_v20 = vpop.f32.mrb[4].mxu1 }
 0x104   : > { %13405 = vst [vmem:[#allocation10_spill] sm:$0xff] %v7442_v20  ;;  %v2008_v21 = vmax.f32 %v2007_v16, %v7440_v19  ;;  %v2081_v22 = vmax.f32 %v2080_v12, %v7442_v20  ;;  %v7446_v23 = vpop.f32.mrb[7].mxu0  ;;  %v7448_v24 = vpop.f32.mrb[5].mxu1 }
 0x105   : > { %13406 = vst [vmem:[#allocation11_spill] sm:$0xff] %v7448_v24  ;;  %v2045_v25 = vmax.f32 %v2044_v18, %v7446_v23  ;;  %v2118_v26 = vmax.f32 %v2117_v14, %v7448_v24  ;;  %v7452_v28 = vpop.f32.mrb[6].mxu1 }
 0x106   : > { %13407 = vst [vmem:[#allocation12_spill] sm:$0xff] %v7452_v28  ;;  %v2082_v29 = vmax.f32 %v2081_v22, %v7452_v28  ;;  %v7455_v30 = vpop.f32.mrb[7].mxu1  ;;  %6106 = vmatmul.mubr.msk.bf16.gmra.mrb[112].mxu0 %vm361_vm2, %v7280_v50 }
 0x107   : > { %13408 = vst [vmem:[#allocation13_spill] sm:$0xff] %v7455_v30  ;;  %v2119_v31 = vmax.f32 %v2118_v26, %v7455_v30  ;;  %1010 = vmatprep.mubr.bf16.mxu0 %v12903_v4 }
 0x108   : > { %6122 = vmatmul.mubr.msk.bf16.gmra.mrb[112].mxu1 %vm361_vm2, %v7280_v50 }
 0x109   : > { %v7463_v32 = vpop.f32.mrb[8].mxu0  ;;  %1203 = vmatprep.mubr.bf16.mxu1 %v12903_v4 }
 0x10a   : > { %v2009_v33 = vmax.f32 %v2008_v21, %v7463_v32  ;;  %v7467_v35 = vpop.f32.mrb[9].mxu0 }
 0x10b   : > { %v2046_v36 = vmax.f32 %v2045_v25, %v7467_v35  ;;  %v7470_v37 = vpop.f32.mrb[10].mxu0  ;;  %v7472_v38 = vpop.f32.mrb[8].mxu1 }
 0x10c   : > { %13409 = vst [vmem:[#allocation14_spill] sm:$0xff] %v7472_v38  ;;  %v2010_v39 = vmax.f32 %v2009_v33, %v7470_v37  ;;  %v2083_v54 = vmax.f32 %v2082_v29, %v7472_v38  ;;  %v7476_v55 = vpop.f32.mrb[11].mxu0  ;;  %v7478_v56 = vpop.f32.mrb[9].mxu1 }
 0x10d   : > { %13410 = vst [vmem:[#allocation15_spill] sm:$0xff] %v7478_v56  ;;  %v2047_v58 = vmax.f32 %v2046_v36, %v7476_v55  ;;  %v2120_v59 = vmax.f32 %v2119_v31, %v7478_v56  ;;  %v7482_v61 = vpop.f32.mrb[10].mxu1 }
 0x10e   : > { %13411 = vst [vmem:[#allocation16_spill] sm:$0xff] %v7482_v61  ;;  %v2084_v62 = vmax.f32 %v2083_v54, %v7482_v61  ;;  %v7485_v63 = vpop.f32.mrb[11].mxu1  ;;  %6107 = vmatmul.mubr.msk.bf16.gmra.mrb[116].mxu0 %vm361_vm2, %v7291_v51 }
 0x10f   : > { %13412 = vst [vmem:[#allocation17_spill] sm:$0xff] %v7485_v63  ;;  %v2121_v6 = vmax.f32 %v2120_v59, %v7485_v63  ;;  %1020 = vmatprep.mubr.bf16.mxu0 %v12903_v4 }
 0x110   : > { %6123 = vmatmul.mubr.msk.bf16.gmra.mrb[116].mxu1 %vm361_vm2, %v7291_v51 }
 0x111   : > { %v7493_v9 = vpop.f32.mrb[12].mxu0  ;;  %1213 = vmatprep.mubr.bf16.mxu1 %v12903_v4 }
 0x112   : > { %v7496_v12 = vpop.f32.mrb[13].mxu0  ;;  %v2011_v14 = vmax.f32 %v2010_v39, %v7493_v9 }
 0x113   : > { %v7499_v16 = vpop.f32.mrb[14].mxu0  ;;  %v7501_v18 = vpop.f32.mrb[12].mxu1  ;;  %v2048_v21 = vmax.f32 %v2047_v58, %v7496_v12 }
 0x114   : > { %13413 = vst [vmem:[#allocation18_spill] sm:$0xff] %v7501_v18  ;;  %v7504_v22 = vpop.f32.mrb[15].mxu0  ;;  %v7506_v25 = vpop.f32.mrb[13].mxu1  ;;  %v2012_v26 = vmax.f32 %v2011_v14, %v7499_v16  ;;  %v2085_v29 = vmax.f32 %v2084_v62, %v7501_v18 }
 0x115   : > { %13414 = vst [vmem:[#allocation19_spill] sm:$0xff] %v7504_v22  ;;  %13415 = vst [vmem:[#allocation20_spill] sm:$0xff] %v7506_v25  ;;  %v7510_v31 = vpop.f32.mrb[14].mxu1  ;;  %v2049_v33 = vmax.f32 %v2048_v21, %v7504_v22  ;;  %v2122_v36 = vmax.f32 %v2121_v6, %v7506_v25 }
 0x116   : > { %13416 = vst [vmem:[#allocation21_spill] sm:$0xff] %v7510_v31  ;;  %v7514_v39 = vpop.f32.mrb[15].mxu1  ;;  %6108 = vmatmul.mubr.msk.bf16.gmra.mrb[120].mxu0 %vm361_vm2, %v7302_v52  ;;  %v2086_v54 = vmax.f32 %v2085_v29, %v7510_v31 }
 0x117   : > { %13417 = vst [vmem:[#allocation22_spill] sm:$0xff] %v7514_v39  ;;  %v2123_v58 = vmax.f32 %v2122_v36, %v7514_v39  ;;  %1030 = vmatprep.mubr.bf16.mxu0 %v12903_v4 }
 0x118   : > { %6124 = vmatmul.mubr.msk.bf16.gmra.mrb[120].mxu1 %vm361_vm2, %v7302_v52 }
 0x119   : > { %v7523_v59 = vpop.f32.mrb[16].mxu0  ;;  %1223 = vmatprep.mubr.bf16.mxu1 %v12903_v4 }
 0x11a   : > { %v2013_v62 = vmax.f32 %v2012_v26, %v7523_v59  ;;  %v7527_v6 = vpop.f32.mrb[17].mxu0 }
 0x11b   : > { %13418 = vst [vmem:[#allocation23_spill] sm:$0xff] %v7527_v6  ;;  %v2050_v14 = vmax.f32 %v2049_v33, %v7527_v6  ;;  %v7530_v21 = vpop.f32.mrb[18].mxu0  ;;  %v7532_v29 = vpop.f32.mrb[16].mxu1 }
 0x11c   : > { %13419 = vst [vmem:[#allocation24_spill] sm:$0xff] %v7532_v29  ;;  %v2014_v36 = vmax.f32 %v2013_v62, %v7530_v21  ;;  %v2087_v3 = vmax.f32 %v2086_v54, %v7532_v29  ;;  %v7536_v39 = vpop.f32.mrb[19].mxu0  ;;  %v7538_v52 = vpop.f32.mrb[17].mxu1  ;;  %v13424_v54 = vmov 0  }
 0x11d   : > { %13420 = vst [vmem:[#allocation25_spill] sm:$0xff] %v7536_v39  ;;  %13421 = vst [vmem:[#allocation26_spill] sm:$0xff] %v7538_v52  ;;  %v2051_v4 = vmax.f32 %v2050_v14, %v7536_v39  ;;  %v2124_v26 = vmax.f32 %v2123_v58, %v7538_v52  ;;  %v7542_v25 = vpop.f32.mrb[18].mxu1 }
 0x11e   : > { %13422 = vst [vmem:[#allocation27_spill] sm:$0xff] %v7542_v25  ;;  %v2088_v33 = vmax.f32 %v2087_v3, %v7542_v25  ;;  %v7545_v63 = vpop.f32.mrb[19].mxu1  ;;  %6109 = vmatmul.mubr.msk.bf16.gmra.mrb[124].mxu0 %vm361_vm2, %v7313_v53  ;;  %v457_v25 = vand.u32 %v7117_v10, %v7338_v60 }
 0x11f   : > { %13423 = vst [vmem:[#allocation28_spill] sm:$0xff] %v7545_v63  ;;  %v2125_v62 = vmax.f32 %v2124_v26, %v7545_v63  ;;  %1266 = vmatprep.mubr.bf16.mxu0 %v13424_v54  ;;  %v451_v26 = vand.u32 %v7117_v10, %v7333_v57 }
 0x120   : > { %6125 = vmatmul.mubr.msk.bf16.gmra.mrb[124].mxu1 %vm361_vm2, %v7313_v53 }
 0x121   : > { %v7553_v56 = vpop.f32.mrb[20].mxu0  ;;  %1459 = vmatprep.mubr.bf16.mxu1 %v13424_v54 }
 0x122   : > { %v2015_v58 = vmax.f32 %v2014_v36, %v7553_v56  ;;  %v7557_v14 = vpop.f32.mrb[21].mxu0 }
 0x123   : > { %13425 = vst [vmem:[#allocation29_spill] sm:$0xff] %v7557_v14  ;;  %v2052_v3 = vmax.f32 %v2051_v4, %v7557_v14  ;;  %v7560_v52 = vpop.f32.mrb[22].mxu0  ;;  %v7562_v30 = vpop.f32.mrb[20].mxu1 }
 0x124   : > { %13426 = vst [vmem:[#allocation30_spill] sm:$0xff] %v7562_v30  ;;  %v2016_v63 = vmax.f32 %v2015_v58, %v7560_v52  ;;  %v2089_v53 = vmax.f32 %v2088_v33, %v7562_v30  ;;  %v7568_v24 = vpop.f32.mrb[23].mxu0  ;;  %v7570_v13 = vpop.f32.mrb[21].mxu1 }
 0x125   : > { %13427 = vst [vmem:[#allocation31_spill] sm:$0xff] %v7568_v24  ;;  %13428 = vst [vmem:[#allocation32_spill] sm:$0xff] %v7570_v13  ;;  %v2053_v36 = vmax.f32 %v2052_v3, %v7568_v24  ;;  %v2126_v8 = vmax.f32 %v2125_v62, %v7570_v13  ;;  %v7574_v4 = vpop.f32.mrb[22].mxu1 }
 0x126   : > { %13429 = vst [vmem:[#allocation33_spill] sm:$0xff] %v7574_v4  ;;  %v2090_v29 = vmax.f32 %v2089_v53, %v7574_v4  ;;  %v7579_v57 = vpop.f32.mrb[23].mxu1  ;;  %6126 = vmatmul.mubr.msk.bf16.vlgmr.msra.gmra.mrb[128].mxu0 %vm361_vm2, %v7132_v27 }
 0x127   : > { %13430 = vst [vmem:[#allocation34_spill] sm:$0xff] %v7579_v57  ;;  %v2127_v33 = vmax.f32 %v2126_v8, %v7579_v57  ;;  %1621 = vmatpush1.bf16.msra.mxu0 %v451_v26  ;;  %1276 = vmatprep.mubr.bf16.mxu0 %v13424_v54 }
 0x128   : > { %6142 = vmatmul.mubr.msk.bf16.vlgmr.msra.gmra.mrb[128].mxu1 %vm361_vm2, %v7132_v27 }
 0x129   : > { %v7587_v62 = vpop.f32.mrb[24].mxu0  ;;  %1814 = vmatpush1.bf16.msra.mxu1 %v457_v25  ;;  %1469 = vmatprep.mubr.bf16.mxu1 %v13424_v54 }
 0x12a   : > { %v2017_v10 = vmax.f32 %v2016_v63, %v7587_v62  ;;  %v7591_v60 = vpop.f32.mrb[25].mxu0 }
 0x12b   : > { %13431 = vst [vmem:[#allocation35_spill] sm:$0xff] %v7591_v60  ;;  %v2054_v58 = vmax.f32 %v2053_v36, %v7591_v60  ;;  %v7594_v3 = vpop.f32.mrb[26].mxu0  ;;  %v7596_v8 = vpop.f32.mrb[24].mxu1 }
 0x12c   : > { %13432 = vst [vmem:[#allocation36_spill] sm:$0xff] %v7596_v8  ;;  %v2018_v26 = vmax.f32 %v2017_v10, %v7594_v3  ;;  %v2091_v53 = vmax.f32 %v2090_v29, %v7596_v8  ;;  %v7600_v27 = vpop.f32.mrb[27].mxu0  ;;  %v7602_v57 = vpop.f32.mrb[25].mxu1 }
 0x12d   : > { %13433 = vst [vmem:[#allocation37_spill] sm:$0xff] %v7600_v27  ;;  %13434 = vst [vmem:[#allocation38_spill] sm:$0xff] %v7602_v57  ;;  %v2055_v25 = vmax.f32 %v2054_v58, %v7600_v27  ;;  %v2128_v63 = vmax.f32 %v2127_v33, %v7602_v57  ;;  %v7606_v13 = vpop.f32.mrb[26].mxu1 }
 0x12e   : > { %13435 = vst [vmem:[#allocation39_spill] sm:$0xff] %v7606_v13  ;;  %v2092_v36 = vmax.f32 %v2091_v53, %v7606_v13  ;;  %v7609_v4 = vpop.f32.mrb[27].mxu1  ;;  %6127 = vmatmul.mubr.msk.bf16.gmra.mrb[132].mxu0 %vm361_vm2, %v7150_v34 }
 0x12f   : > { %13436 = vst [vmem:[#allocation40_spill] sm:$0xff] %v7609_v4  ;;  %v2129_v10 = vmax.f32 %v2128_v63, %v7609_v4  ;;  %1286 = vmatprep.mubr.bf16.mxu0 %v13424_v54 }
 0x130   : > { %6143 = vmatmul.mubr.msk.bf16.gmra.mrb[132].mxu1 %vm361_vm2, %v7150_v34 }
 0x131   : > { %v7617_v29 = vpop.f32.mrb[28].mxu0  ;;  %1479 = vmatprep.mubr.bf16.mxu1 %v13424_v54 }
 0x132   : > { %v2019_v33 = vmax.f32 %v2018_v26, %v7617_v29  ;;  %v7621_v58 = vpop.f32.mrb[29].mxu0 }
 0x133   : > { %13437 = vst [vmem:[#allocation41_spill] sm:$0xff] %v7621_v58  ;;  %v2056_v53 = vmax.f32 %v2055_v25, %v7621_v58  ;;  %v7624_v57 = vpop.f32.mrb[30].mxu0  ;;  %v7626_v13 = vpop.f32.mrb[28].mxu1 }
 0x134   : > { %13438 = vst [vmem:[#allocation42_spill] sm:$0xff] %v7626_v13  ;;  %v2020_v63 = vmax.f32 %v2019_v33, %v7624_v57  ;;  %v2093_v4 = vmax.f32 %v2092_v36, %v7626_v13  ;;  %v7630_v8 = vpop.f32.mrb[31].mxu0  ;;  %v7632_v34 = vpop.f32.mrb[29].mxu1 }
 0x135   : > { %13439 = vst [vmem:[#allocation43_spill] sm:$0xff] %v7630_v8  ;;  %13440 = vst [vmem:[#allocation44_spill] sm:$0xff] %v7632_v34  ;;  %v2057_v30 = vmax.f32 %v2056_v53, %v7630_v8  ;;  %v2130_v26 = vmax.f32 %v2129_v10, %v7632_v34  ;;  %v7636_v31 = vpop.f32.mrb[30].mxu1 }
 0x136   : > { %13441 = vst [vmem:[#allocation45_spill] sm:$0xff] %v7636_v31  ;;  %v2094_v25 = vmax.f32 %v2093_v4, %v7636_v31  ;;  %v7639_v18 = vpop.f32.mrb[31].mxu1  ;;  %6128 = vmatmul.mubr.msk.bf16.gmra.mrb[136].mxu0 %vm361_vm2, %v7170_v40 }
 0x137   : > { %13442 = vst [vmem:[#allocation46_spill] sm:$0xff] %v7639_v18  ;;  %v2131_v33 = vmax.f32 %v2130_v26, %v7639_v18  ;;  %1296 = vmatprep.mubr.bf16.mxu0 %v13424_v54 }
 0x138   : > { %6144 = vmatmul.mubr.msk.bf16.gmra.mrb[136].mxu1 %vm361_vm2, %v7170_v40 }
 0x139   : > { %v7647_v36 = vpop.f32.mrb[32].mxu0  ;;  %1489 = vmatprep.mubr.bf16.mxu1 %v13424_v54 }
 0x13a   : > { %v2021_v10 = vmax.f32 %v2020_v63, %v7647_v36  ;;  %v7651_v53 = vpop.f32.mrb[33].mxu0 }
 0x13b   : > { %13443 = vst [vmem:[#allocation47_spill] sm:$0xff] %v7651_v53  ;;  %v2058_v4 = vmax.f32 %v2057_v30, %v7651_v53  ;;  %v7654_v34 = vpop.f32.mrb[34].mxu0  ;;  %v7656_v31 = vpop.f32.mrb[32].mxu1 }
 0x13c   : > { %13444 = vst [vmem:[#allocation48_spill] sm:$0xff] %v7656_v31  ;;  %v2022_v26 = vmax.f32 %v2021_v10, %v7654_v34  ;;  %v2095_v18 = vmax.f32 %v2094_v25, %v7656_v31  ;;  %v7660_v13 = vpop.f32.mrb[35].mxu0  ;;  %v7662_v40 = vpop.f32.mrb[33].mxu1 }
 0x13d   : > { %13445 = vst [vmem:[#allocation49_spill] sm:$0xff] %v7660_v13  ;;  %13446 = vst [vmem:[#allocation50_spill] sm:$0xff] %v7662_v40  ;;  %v2059_v61 = vmax.f32 %v2058_v4, %v7660_v13  ;;  %v2132_v63 = vmax.f32 %v2131_v33, %v7662_v40  ;;  %v7666_v38 = vpop.f32.mrb[34].mxu1 }
 0x13e   : > { %13447 = vst [vmem:[#allocation51_spill] sm:$0xff] %v7666_v38  ;;  %v2096_v30 = vmax.f32 %v2095_v18, %v7666_v38  ;;  %v7669_v28 = vpop.f32.mrb[35].mxu1  ;;  %6129 = vmatmul.mubr.msk.bf16.gmra.mrb[140].mxu0 %vm361_vm2, %v7181_v41 }
 0x13f   : > { %13448 = vst [vmem:[#allocation52_spill] sm:$0xff] %v7669_v28  ;;  %v2133_v10 = vmax.f32 %v2132_v63, %v7669_v28  ;;  %1306 = vmatprep.mubr.bf16.mxu0 %v13424_v54 }
 0x140   : > { %6145 = vmatmul.mubr.msk.bf16.gmra.mrb[140].mxu1 %vm361_vm2, %v7181_v41 }
 0x141   : > { %v7677_v25 = vpop.f32.mrb[36].mxu0  ;;  %1499 = vmatprep.mubr.bf16.mxu1 %v13424_v54 }
 0x142   : > { %v2023_v33 = vmax.f32 %v2022_v26, %v7677_v25  ;;  %v7681_v4 = vpop.f32.mrb[37].mxu0 }
 0x143   : > { %13449 = vst [vmem:[#allocation53_spill] sm:$0xff] %v7681_v4  ;;  %v2060_v18 = vmax.f32 %v2059_v61, %v7681_v4  ;;  %v7684_v40 = vpop.f32.mrb[38].mxu0  ;;  %v7686_v38 = vpop.f32.mrb[36].mxu1 }
 0x144   : > { %13450 = vst [vmem:[#allocation54_spill] sm:$0xff] %v7686_v38  ;;  %v2024_v63 = vmax.f32 %v2023_v33, %v7684_v40  ;;  %v2097_v28 = vmax.f32 %v2096_v30, %v7686_v38  ;;  %v7690_v31 = vpop.f32.mrb[39].mxu0  ;;  %v7692_v41 = vpop.f32.mrb[37].mxu1 }
 0x145   : > { %13451 = vst [vmem:[#allocation55_spill] sm:$0xff] %v7690_v31  ;;  %13452 = vst [vmem:[#allocation56_spill] sm:$0xff] %v7692_v41  ;;  %v2061_v20 = vmax.f32 %v2060_v18, %v7690_v31  ;;  %v2134_v26 = vmax.f32 %v2133_v10, %v7692_v41  ;;  %v7696_v11 = vpop.f32.mrb[38].mxu1 }
 0x146   : > { %13453 = vst [vmem:[#allocation57_spill] sm:$0xff] %v7696_v11  ;;  %v2098_v61 = vmax.f32 %v2097_v28, %v7696_v11  ;;  %v7699_v5 = vpop.f32.mrb[39].mxu1  ;;  %6130 = vmatmul.mubr.msk.bf16.gmra.mrb[144].mxu0 %vm361_vm2, %v7192_v42 }
 0x147   : > { %13454 = vst [vmem:[#allocation58_spill] sm:$0xff] %v7699_v5  ;;  %v2135_v33 = vmax.f32 %v2134_v26, %v7699_v5  ;;  %1316 = vmatprep.mubr.bf16.mxu0 %v13424_v54 }
 0x148   : > { %6146 = vmatmul.mubr.msk.bf16.gmra.mrb[144].mxu1 %vm361_vm2, %v7192_v42 }
 0x149   : > { %v7707_v30 = vpop.f32.mrb[40].mxu0  ;;  %1509 = vmatprep.mubr.bf16.mxu1 %v13424_v54 }
 0x14a   : > { %v2025_v10 = vmax.f32 %v2024_v63, %v7707_v30  ;;  %v7711_v18 = vpop.f32.mrb[41].mxu0 }
 0x14b   : > { %13455 = vst [vmem:[#allocation59_spill] sm:$0xff] %v7711_v18  ;;  %v2062_v28 = vmax.f32 %v2061_v20, %v7711_v18  ;;  %v7714_v41 = vpop.f32.mrb[42].mxu0  ;;  %v7716_v11 = vpop.f32.mrb[40].mxu1 }
 0x14c   : > { %13456 = vst [vmem:[#allocation60_spill] sm:$0xff] %v7716_v11  ;;  %v2026_v26 = vmax.f32 %v2025_v10, %v7714_v41  ;;  %v2099_v5 = vmax.f32 %v2098_v61, %v7716_v11  ;;  %v7720_v38 = vpop.f32.mrb[43].mxu0  ;;  %v7722_v42 = vpop.f32.mrb[41].mxu1 }
 0x14d   : > { %13457 = vst [vmem:[#allocation61_spill] sm:$0xff] %v7720_v38  ;;  %13458 = vst [vmem:[#allocation62_spill] sm:$0xff] %v7722_v42  ;;  %v2063_v31 = vmax.f32 %v2062_v28, %v7720_v38  ;;  %v2136_v63 = vmax.f32 %v2135_v33, %v7722_v42  ;;  %v7726_v4 = vpop.f32.mrb[42].mxu1 }
 0x14e   : > { %13459 = vst [vmem:[#allocation63_spill] sm:$0xff] %v7726_v4  ;;  %v2100_v20 = vmax.f32 %v2099_v5, %v7726_v4  ;;  %v7729_v18 = vpop.f32.mrb[43].mxu1  ;;  %6131 = vmatmul.mubr.msk.bf16.gmra.mrb[148].mxu0 %vm361_vm2, %v7203_v43 }
 0x14f   : > { %13460 = vst [vmem:[#allocation64_spill] sm:$0xff] %v7729_v18  ;;  %v2137_v10 = vmax.f32 %v2136_v63, %v7729_v18  ;;  %1326 = vmatprep.mubr.bf16.mxu0 %v13424_v54 }
 0x150   : > { %6147 = vmatmul.mubr.msk.bf16.gmra.mrb[148].mxu1 %vm361_vm2, %v7203_v43 }
 0x151   : > { %v7737_v61 = vpop.f32.mrb[44].mxu0  ;;  %1519 = vmatprep.mubr.bf16.mxu1 %v13424_v54 }
 0x152   : > { %v2027_v33 = vmax.f32 %v2026_v26, %v7737_v61  ;;  %v7741_v28 = vpop.f32.mrb[45].mxu0 }
 0x153   : > { %13461 = vst [vmem:[#allocation65_spill] sm:$0xff] %v7741_v28  ;;  %v2064_v5 = vmax.f32 %v2063_v31, %v7741_v28  ;;  %v7744_v42 = vpop.f32.mrb[46].mxu0  ;;  %v7746_v4 = vpop.f32.mrb[44].mxu1 }
 0x154   : > { %13462 = vst [vmem:[#allocation66_spill] sm:$0xff] %v7746_v4  ;;  %v2028_v63 = vmax.f32 %v2027_v33, %v7744_v42  ;;  %v2101_v18 = vmax.f32 %v2100_v20, %v7746_v4  ;;  %v7750_v11 = vpop.f32.mrb[47].mxu0  ;;  %v7752_v43 = vpop.f32.mrb[45].mxu1 }
 0x155   : > { %13463 = vst [vmem:[#allocation67_spill] sm:$0xff] %v7750_v11  ;;  %13464 = vst [vmem:[#allocation68_spill] sm:$0xff] %v7752_v43  ;;  %v2065_v38 = vmax.f32 %v2064_v5, %v7750_v11  ;;  %v2138_v26 = vmax.f32 %v2137_v10, %v7752_v43  ;;  %v7756_v13 = vpop.f32.mrb[46].mxu1 }
 0x156   : > { %13465 = vst [vmem:[#allocation69_spill] sm:$0xff] %v7756_v13  ;;  %v2102_v31 = vmax.f32 %v2101_v18, %v7756_v13  ;;  %v7759_v28 = vpop.f32.mrb[47].mxu1  ;;  %6132 = vmatmul.mubr.msk.bf16.gmra.mrb[152].mxu0 %vm361_vm2, %v7214_v44 }
 0x157   : > { %13466 = vst [vmem:[#allocation70_spill] sm:$0xff] %v7759_v28  ;;  %v2139_v33 = vmax.f32 %v2138_v26, %v7759_v28  ;;  %1336 = vmatprep.mubr.bf16.mxu0 %v13424_v54 }
 0x158   : > { %6148 = vmatmul.mubr.msk.bf16.gmra.mrb[152].mxu1 %vm361_vm2, %v7214_v44 }
 0x159   : > { %v7767_v20 = vpop.f32.mrb[48].mxu0  ;;  %1529 = vmatprep.mubr.bf16.mxu1 %v13424_v54 }
 0x15a   : > { %v2029_v10 = vmax.f32 %v2028_v63, %v7767_v20  ;;  %v7771_v5 = vpop.f32.mrb[49].mxu0 }
 0x15b   : > { %13467 = vst [vmem:[#allocation71_spill] sm:$0xff] %v7771_v5  ;;  %v2066_v18 = vmax.f32 %v2065_v38, %v7771_v5  ;;  %v7774_v43 = vpop.f32.mrb[50].mxu0  ;;  %v7776_v13 = vpop.f32.mrb[48].mxu1 }
 0x15c   : > { %13468 = vst [vmem:[#allocation72_spill] sm:$0xff] %v7776_v13  ;;  %v2030_v26 = vmax.f32 %v2029_v10, %v7774_v43  ;;  %v2103_v28 = vmax.f32 %v2102_v31, %v7776_v13  ;;  %v7780_v4 = vpop.f32.mrb[51].mxu0  ;;  %v7782_v44 = vpop.f32.mrb[49].mxu1 }
 0x15d   : > { %13469 = vst [vmem:[#allocation73_spill] sm:$0xff] %v7780_v4  ;;  %13470 = vst [vmem:[#allocation74_spill] sm:$0xff] %v7782_v44  ;;  %v2067_v11 = vmax.f32 %v2066_v18, %v7780_v4  ;;  %v2140_v63 = vmax.f32 %v2139_v33, %v7782_v44  ;;  %v7786_v53 = vpop.f32.mrb[50].mxu1 }
 0x15e   : > { %13471 = vst [vmem:[#allocation75_spill] sm:$0xff] %v7786_v53  ;;  %v2104_v38 = vmax.f32 %v2103_v28, %v7786_v53  ;;  %v7789_v5 = vpop.f32.mrb[51].mxu1  ;;  %6133 = vmatmul.mubr.msk.bf16.gmra.mrb[156].mxu0 %vm361_vm2, %v7225_v45 }
 0x15f   : > { %13472 = vst [vmem:[#allocation76_spill] sm:$0xff] %v7789_v5  ;;  %v2141_v10 = vmax.f32 %v2140_v63, %v7789_v5  ;;  %1346 = vmatprep.mubr.bf16.mxu0 %v13424_v54 }
 0x160   : > { %6149 = vmatmul.mubr.msk.bf16.gmra.mrb[156].mxu1 %vm361_vm2, %v7225_v45 }
 0x161   : > { %v7797_v31 = vpop.f32.mrb[52].mxu0  ;;  %1539 = vmatprep.mubr.bf16.mxu1 %v13424_v54 }
 0x162   : > { %v2031_v33 = vmax.f32 %v2030_v26, %v7797_v31  ;;  %v7801_v18 = vpop.f32.mrb[53].mxu0 }
 0x163   : > { %13473 = vst [vmem:[#allocation77_spill] sm:$0xff] %v7801_v18  ;;  %v2068_v28 = vmax.f32 %v2067_v11, %v7801_v18  ;;  %v7804_v44 = vpop.f32.mrb[54].mxu0  ;;  %v7806_v53 = vpop.f32.mrb[52].mxu1 }
 0x164   : > { %13474 = vst [vmem:[#allocation78_spill] sm:$0xff] %v7806_v53  ;;  %v2032_v63 = vmax.f32 %v2031_v33, %v7804_v44  ;;  %v2105_v5 = vmax.f32 %v2104_v38, %v7806_v53  ;;  %v7810_v13 = vpop.f32.mrb[55].mxu0  ;;  %v7812_v45 = vpop.f32.mrb[53].mxu1 }
 0x165   : > { %13475 = vst [vmem:[#allocation79_spill] sm:$0xff] %v7810_v13  ;;  %13476 = vst [vmem:[#allocation80_spill] sm:$0xff] %v7812_v45  ;;  %v2069_v4 = vmax.f32 %v2068_v28, %v7810_v13  ;;  %v2142_v26 = vmax.f32 %v2141_v10, %v7812_v45  ;;  %v7816_v8 = vpop.f32.mrb[54].mxu1 }
 0x166   : > { %13477 = vst [vmem:[#allocation81_spill] sm:$0xff] %v7816_v8  ;;  %v2106_v11 = vmax.f32 %v2105_v5, %v7816_v8  ;;  %v7819_v18 = vpop.f32.mrb[55].mxu1  ;;  %6134 = vmatmul.mubr.msk.bf16.gmra.mrb[160].mxu0 %vm361_vm2, %v7236_v46 }
 0x167   : > { %13478 = vst [vmem:[#allocation82_spill] sm:$0xff] %v7819_v18  ;;  %v2143_v33 = vmax.f32 %v2142_v26, %v7819_v18  ;;  %1356 = vmatprep.mubr.bf16.mxu0 %v13424_v54 }
 0x168   : > { %6150 = vmatmul.mubr.msk.bf16.gmra.mrb[160].mxu1 %vm361_vm2, %v7236_v46 }
 0x169   : > { %v7827_v38 = vpop.f32.mrb[56].mxu0  ;;  %1549 = vmatprep.mubr.bf16.mxu1 %v13424_v54 }
 0x16a   : > { %v2033_v10 = vmax.f32 %v2032_v63, %v7827_v38  ;;  %v7831_v28 = vpop.f32.mrb[57].mxu0 }
 0x16b   : > { %13479 = vst [vmem:[#allocation83_spill] sm:$0xff] %v7831_v28  ;;  %v2070_v5 = vmax.f32 %v2069_v4, %v7831_v28  ;;  %v7834_v45 = vpop.f32.mrb[58].mxu0  ;;  %v7836_v8 = vpop.f32.mrb[56].mxu1 }
 0x16c   : > { %13480 = vst [vmem:[#allocation84_spill] sm:$0xff] %v7836_v8  ;;  %v2034_v26 = vmax.f32 %v2033_v10, %v7834_v45  ;;  %v2107_v18 = vmax.f32 %v2106_v11, %v7836_v8  ;;  %v7840_v53 = vpop.f32.mrb[59].mxu0  ;;  %v7842_v46 = vpop.f32.mrb[57].mxu1 }
 0x16d   : > { %13481 = vst [vmem:[#allocation85_spill] sm:$0xff] %v7840_v53  ;;  %13482 = vst [vmem:[#allocation86_spill] sm:$0xff] %v7842_v46  ;;  %v2071_v13 = vmax.f32 %v2070_v5, %v7840_v53  ;;  %v2144_v63 = vmax.f32 %v2143_v33, %v7842_v46  ;;  %v7846_v58 = vpop.f32.mrb[58].mxu1 }
 0x16e   : > { %13483 = vst [vmem:[#allocation87_spill] sm:$0xff] %v7846_v58  ;;  %v2108_v4 = vmax.f32 %v2107_v18, %v7846_v58  ;;  %v7849_v28 = vpop.f32.mrb[59].mxu1  ;;  %6135 = vmatmul.mubr.msk.bf16.gmra.mrb[164].mxu0 %vm361_vm2, %v7247_v47 }
 0x16f   : > { %13484 = vst [vmem:[#allocation88_spill] sm:$0xff] %v7849_v28  ;;  %v2145_v10 = vmax.f32 %v2144_v63, %v7849_v28  ;;  %1366 = vmatprep.mubr.bf16.mxu0 %v13424_v54 }
 0x170   : > { %6151 = vmatmul.mubr.msk.bf16.gmra.mrb[164].mxu1 %vm361_vm2, %v7247_v47 }
 0x171   : > { %v646_v11 = vpop.f32.mrb[60].mxu0  ;;  %1559 = vmatprep.mubr.bf16.mxu1 %v13424_v54 }
 0x172   : > { %v2035_v33 = vmax.f32 %v2034_v26, %v646_v11  ;;  %v7858_v5 = vpop.f32.mrb[61].mxu0 }
 0x173   : > { %v2072_v18 = vmax.f32 %v2071_v13, %v7858_v5  ;;  %v650_v46 = vpop.f32.mrb[62].mxu0  ;;  %v7861_v58 = vpop.f32.mrb[60].mxu1 }
 0x174   : > { %13485 = vst [vmem:[#allocation89_spill] sm:$0xff] %v7861_v58  ;;  %v2036_v8 = vmax.f32 %v2035_v33, %v650_v46  ;;  %v2109_v53 = vmax.f32 %v2108_v4, %v7861_v58  ;;  %v7864_v63 = vpop.f32.mrb[63].mxu0  ;;  %v7866_v28 = vpop.f32.mrb[61].mxu1 }
 0x175   : > { %13486 = vst [vmem:[#allocation90_spill] sm:$0xff] %v7866_v28  ;;  %v2073_v47 = vmax.f32 %v2072_v18, %v7864_v63  ;;  %v2146_v27 = vmax.f32 %v2145_v10, %v7866_v28  ;;  %v7870_v60 = vpop.f32.mrb[62].mxu1 }
 0x176   : > { %13487 = vst [vmem:[#allocation91_spill] sm:$0xff] %v7870_v60  ;;  %v2037_v26 = vrot.slane %v2036_v8, 4  ;;  %v2110_v24 = vmax.f32 %v2109_v53, %v7870_v60  ;;  %v7873_v13 = vpop.f32.mrb[63].mxu1  ;;  %6136 = vmatmul.mubr.msk.bf16.gmra.mrb[168].mxu0 %vm361_vm2, %v7258_v48 }
 0x177   : > { %13488 = vst [vmem:[#allocation92_spill] sm:$0xff] %v7873_v13  ;;  %v2074_v33 = vrot.slane %v2073_v47, 4  ;;  %v7878_v4 = vmax.f32 %v2146_v27, %v7873_v13  ;;  %1376 = vmatprep.mubr.bf16.mxu0 %v13424_v54 }
 0x178   : > { %v2038_v58 = vmax.f32 %v2036_v8, %v2037_v26  ;;  %6152 = vmatmul.mubr.msk.bf16.gmra.mrb[168].mxu1 %vm361_vm2, %v7258_v48 }
 0x179   : > { %13489 = vst [vmem:[#allocation93_spill] sm:$0xff] %v7878_v4  ;;  %v2075_v10 = vmax.f32 %v2073_v47, %v2074_v33  ;;  %v7883_v18 = vpop.f32.mrb[64].mxu0  ;;  %1569 = vmatprep.mubr.bf16.mxu1 %v13424_v54 }
 0x17a   : > { %13490 = vst [vmem:[#allocation94_spill] sm:$0xff] %v7883_v18  ;;  %v2039_v53 = vrot.slane %v2038_v58, 2  ;;  %v7886_v28 = vpop.f32.mrb[65].mxu0 }
 0x17b   : > { %13491 = vst [vmem:[#allocation95_spill] sm:$0xff] %v7886_v28  ;;  %v2076_v60 = vrot.slane %v2075_v10, 2  ;;  %v7888_v14 = vpop.f32.mrb[66].mxu0  ;;  %v7890_v39 = vpop.f32.mrb[64].mxu1 }
 0x17c   : > { %13492 = vst [vmem:[#allocation96_spill] sm:$0xff] %v7888_v14  ;;  %13493 = vst [vmem:[#allocation97_spill] sm:$0xff] %v7890_v39  ;;  %v2040_v27 = vmax.f32 %v2038_v58, %v2039_v53  ;;  %v7894_v26 = vpop.f32.mrb[67].mxu0  ;;  %v7896_v48 = vpop.f32.mrb[65].mxu1  ;;  %v2111_v53 = vrot.slane %v2110_v24, 4 }
 0x17d   : > { %13494 = vst [vmem:[#allocation98_spill] sm:$0xff] %v7894_v26  ;;  %13495 = vst [vmem:[#allocation99_spill] sm:$0xff] %v7896_v48  ;;  %v2077_v47 = vmax.f32 %v2075_v10, %v2076_v60  ;;  %v7900_v13 = vpop.f32.mrb[66].mxu1 }
 0x17e   : > { %13496 = vst [vmem:[#allocation100_spill] sm:$0xff] %v7900_v13  ;;  %v2041_v4 = vrot.slane %v2040_v27, 1  ;;  %v7904_v22 = vpop.f32.mrb[67].mxu1  ;;  %6137 = vmatmul.mubr.msk.bf16.gmra.mrb[172].mxu0 %vm361_vm2, %v7269_v49 }
 0x17f   : > { %13497 = vst [vmem:[#allocation101_spill] sm:$0xff] %v7904_v22  ;;  %1386 = vmatprep.mubr.bf16.mxu0 %v13424_v54  ;;  %v2078_v10 = vrot.slane %v2077_v47, 1 }
 0x180   : > { %v7911_v60 = vmax.f32 %v2040_v27, %v2041_v4  ;;  %6153 = vmatmul.mubr.msk.bf16.gmra.mrb[172].mxu1 %vm361_vm2, %v7269_v49 }
 0x181   : > { %v7915_v33 = vpop.f32.mrb[68].mxu0  ;;  %1579 = vmatprep.mubr.bf16.mxu1 %v13424_v54 }
 0x182   : > { %13498 = vst [vmem:[#allocation102_spill] sm:$0xff] %v7915_v33  ;;  %v3078_v6 = vsub.f32 %v646_v11, %v7911_v60  ;;  %v3094_v8 = vsub.f32 %v650_v46, %v7911_v60  ;;  %v2598_v58 = vsub.f32 %v7403_v0, %v7911_v60  ;;  %v2614_v4 = vsub.f32 %v7408_v2, %v7911_v60  ;;  %v7924_v27 = vpop.f32.mrb[69].mxu0 }
 0x183   : > { %13499 = vst [vmem:[#allocation103_spill] sm:$0xff] %v7924_v27  ;;  %v2630_v49 = vsub.f32 %v7433_v15, %v7911_v60  ;;  %v2646_v22 = vsub.f32 %v7440_v19, %v7911_v60  ;;  %v2662_v48 = vsub.f32 %v7463_v32, %v7911_v60  ;;  %v2678_v46 = vsub.f32 %v7470_v37, %v7911_v60  ;;  %v7934_v11 = vpop.f32.mrb[70].mxu0  ;;  %v7936_v0 = vpop.f32.mrb[68].mxu1 }
 0x184   : > { %13500 = vst [vmem:[#allocation104_spill] sm:$0xff] %v7934_v11  ;;  %13501 = vst [vmem:[#allocation105_spill] sm:$0xff] %v7936_v0  ;;  %v7938_v13 = vpack.c.bf16 %v3094_v8, %v3078_v6  ;;  %v2694_v2 = vsub.f32 %v7493_v9, %v7911_v60  ;;  %v2710_v15 = vsub.f32 %v7499_v16, %v7911_v60  ;;  %v7946_v39 = vpop.f32.mrb[71].mxu0  ;;  %v7948_v32 = vpop.f32.mrb[69].mxu1 }
 0x185   : > { %v2726_v19 = vsub.f32 %v7523_v59, %v7911_v60  ;;  %13503 = vst [vmem:[#allocation107_spill] sm:$0xff] %v7946_v39  ;;  %13504 = vst [vmem:[#allocation108_spill] sm:$0xff] %v7948_v32  ;;  %v2742_v37 = vsub.f32 %v7530_v21, %v7911_v60  ;;  %v2758_v6 = vsub.f32 %v7553_v56, %v7911_v60  ;;  %v7958_v16 = vpop.f32.mrb[70].mxu1  ;;  %v13611_v32 = vld [vmem:[#allocation84_spill] sm:$0xff] }
 0x186   : > { %13502 = vst [vmem:[#allocation106_spill] sm:$0xff] %v7938_v13  ;;  %v2774_v8 = vsub.f32 %v7560_v52, %v7911_v60  ;;  %v2790_v9 = vsub.f32 %v7587_v62, %v7911_v60  ;;  %13505 = vst [vmem:[#allocation109_spill] sm:$0xff] %v7958_v16  ;;  %v2806_v59 = vsub.f32 %v7594_v3, %v7911_v60  ;;  %v7968_v56 = vpop.f32.mrb[71].mxu1  ;;  %6138 = vmatmul.mubr.msk.bf16.gmra.mrb[176].mxu0 %vm361_vm2, %v7280_v50 }
 0x187   : > { %v2822_v13 = vsub.f32 %v7617_v29, %v7911_v60  ;;  %v2838_v21 = vsub.f32 %v7624_v57, %v7911_v60  ;;  %v7966_v39 = vmax.f32 %v2110_v24, %v2111_v53  ;;  %13506 = vst [vmem:[#allocation110_spill] sm:$0xff] %v7968_v56  ;;  %v2854_v52 = vsub.f32 %v7647_v36, %v7911_v60 }
 0x188   : > { %v2870_v62 = vsub.f32 %v7654_v34, %v7911_v60  ;;  %v2886_v3 = vsub.f32 %v7677_v25, %v7911_v60  ;;  %v2902_v29 = vsub.f32 %v7684_v40, %v7911_v60  ;;  %1396 = vmatprep.mubr.bf16.mxu0 %v13424_v54  ;;  %v2918_v24 = vsub.f32 %v7707_v30, %v7911_v60 }
 0x189   : > { %v2934_v57 = vsub.f32 %v7714_v41, %v7911_v60  ;;  %v2950_v36 = vsub.f32 %v7737_v61, %v7911_v60  ;;  %v7987_v53 = vmax.f32 %v2077_v47, %v2078_v10  ;;  %6154 = vmatmul.mubr.msk.bf16.gmra.mrb[176].mxu1 %vm361_vm2, %v7280_v50  ;;  %v2966_v34 = vsub.f32 %v7744_v42, %v7911_v60  ;;  %v7999_v30 = vpop.f32.mrb[72].mxu0 }
 0x18a   : > { %v2982_v40 = vsub.f32 %v7767_v20, %v7911_v60  ;;  %v2998_v25 = vsub.f32 %v7774_v43, %v7911_v60  ;;  %v3014_v41 = vsub.f32 %v7797_v31, %v7911_v60  ;;  %13507 = vst [vmem:[#allocation111_spill] sm:$0xff] %v7999_v30  ;;  %1589 = vmatprep.mubr.bf16.mxu1 %v13424_v54  ;;  %v8010_v47 = vpop.f32.mrb[73].mxu0 }
 0x18b   : > { %v3030_v61 = vsub.f32 %v7804_v44, %v7911_v60  ;;  %v3046_v50 = vsub.f32 %v7827_v38, %v7911_v60  ;;  %v3062_v42 = vsub.f32 %v7834_v45, %v7911_v60  ;;  %v8008_v20 = vpack.c.bf16 %v2614_v4, %v2598_v58  ;;  %13508 = vst [vmem:[#allocation112_spill] sm:$0xff] %v8010_v47  ;;  %v8020_v56 = vpop.f32.mrb[74].mxu0  ;;  %v8022_v44 = vpop.f32.mrb[72].mxu1 }
 0x18c   : > { %v8012_v43 = vpack.c.bf16 %v2646_v22, %v2630_v49  ;;  %v8014_v31 = vpack.c.bf16 %v2678_v46, %v2662_v48  ;;  %v8016_v10 = vpack.c.bf16 %v2710_v15, %v2694_v2  ;;  %v8018_v30 = vpack.c.bf16 %v2742_v37, %v2726_v19  ;;  %13509 = vst [vmem:[#allocation113_spill] sm:$0xff] %v8020_v56  ;;  %v8032_v22 = vpop.f32.mrb[75].mxu0  ;;  %v8034_v48 = vpop.f32.mrb[73].mxu1 }
 0x18d   : > { %13510 = vst [vmem:[#allocation114_spill] sm:$0xff] %v8022_v44  ;;  %v8024_v38 = vpack.c.bf16 %v2774_v8, %v2758_v6  ;;  %v8026_v16 = vpack.c.bf16 %v2806_v59, %v2790_v9  ;;  %v8028_v45 = vpack.c.bf16 %v2838_v21, %v2822_v13  ;;  %v8030_v58 = vpack.c.bf16 %v2870_v62, %v2854_v52  ;;  %v8044_v2 = vpop.f32.mrb[74].mxu1 }
 0x18e   : > { %13512 = vst [vmem:[#allocation116_spill] sm:$0xff] %v8032_v22  ;;  %13513 = vst [vmem:[#allocation117_spill] sm:$0xff] %v8034_v48  ;;  %v8036_v60 = vpack.c.bf16 %v2902_v29, %v2886_v3  ;;  %v8038_v4 = vpack.c.bf16 %v2934_v57, %v2918_v24  ;;  %v8040_v49 = vpack.c.bf16 %v2966_v34, %v2950_v36  ;;  %v8054_v6 = vpop.f32.mrb[75].mxu1  ;;  %6139 = vmatmul.mubr.msk.bf16.gmra.mrb[180].mxu0 %vm361_vm2, %v7291_v51  ;;  %v13525_v3 = vld [vmem:[#allocation25_spill] sm:$0xff] }
 0x18f   : > { %13511 = vst [vmem:[#allocation115_spill] sm:$0xff] %v8030_v58  ;;  %v8042_v46 = vpack.c.bf16 %v2998_v25, %v2982_v40  ;;  %13518 = vst [vmem:[#allocation122_spill] sm:$0xff] %v8044_v2  ;;  %v8046_v15 = vpack.c.bf16 %v3030_v61, %v3014_v41  ;;  %v8048_v13 = vpack.c.bf16 %v3062_v42, %v3046_v50  ;;  %1406 = vmatprep.mubr.bf16.mxu0 %v13424_v54  ;;  %v13530_v34 = vld [vmem:[#allocation37_spill] sm:$0xff]  ;;  %v13533_v42 = vld [vmem:[#allocation43_spill] sm:$0xff] }
 0x190   : > { %13514 = vst [vmem:[#allocation118_spill] sm:$0xff] %v8036_v60  ;;  %13515 = vst [vmem:[#allocation119_spill] sm:$0xff] %v8038_v4  ;;  %v3079_v19 = vsub.f32 %v7858_v5, %v7987_v53  ;;  %v3095_v37 = vsub.f32 %v7864_v63, %v7987_v53  ;;  %v2599_v8 = vsub.f32 %v7406_v1, %v7987_v53  ;;  %v2113_v25 = vrot.slane %v7966_v39, 2  ;;  %v13532_v61 = vld [vmem:[#allocation41_spill] sm:$0xff]  ;;  %v13545_v4 = vld [vmem:[#allocation67_spill] sm:$0xff] }
 0x191   : > { %13516 = vst [vmem:[#allocation120_spill] sm:$0xff] %v8040_v49  ;;  %13517 = vst [vmem:[#allocation121_spill] sm:$0xff] %v8042_v46  ;;  %v2615_v9 = vsub.f32 %v7414_v7, %v7987_v53  ;;  %v2631_v59 = vsub.f32 %v7437_v17, %v7987_v53  ;;  %v2647_v5 = vsub.f32 %v7446_v23, %v7987_v53  ;;  %6155 = vmatmul.mubr.msk.bf16.gmra.mrb[180].mxu1 %vm361_vm2, %v7291_v51  ;;  %v13523_v7 = vld [vmem:[#allocation19_spill] sm:$0xff]  ;;  %v8085_v57 = vpop.f32.mrb[76].mxu0  ;;  %v13544_v49 = vld [vmem:[#allocation65_spill] sm:$0xff] }
 0x192   : > { %13519 = vst [vmem:[#allocation123_spill] sm:$0xff] %v8046_v15  ;;  %13520 = vst [vmem:[#allocation124_spill] sm:$0xff] %v8048_v13  ;;  %v8067_v63 = vpack.c.bf16 %v3095_v37, %v3079_v19  ;;  %v2663_v21 = vsub.f32 %v7467_v35, %v7987_v53  ;;  %v2679_v52 = vsub.f32 %v7476_v55, %v7987_v53  ;;  %v13524_v23 = vld [vmem:[#allocation23_spill] sm:$0xff]  ;;  %v13526_v35 = vld [vmem:[#allocation29_spill] sm:$0xff]  ;;  %1599 = vmatprep.mubr.bf16.mxu1 %v13424_v54  ;;  %v8095_v41 = vpop.f32.mrb[77].mxu0 }
 0x193   : > { %13521 = vst [vmem:[#allocation125_spill] sm:$0xff] %v8054_v6  ;;  %v2695_v1 = vsub.f32 %v7496_v12, %v7987_v53  ;;  %v2711_v17 = vsub.f32 %v13523_v7, %v7987_v53  ;;  %v2727_v62 = vsub.f32 %v13524_v23, %v7987_v53  ;;  %v2743_v29 = vsub.f32 %v13525_v3, %v7987_v53  ;;  %v13528_v55 = vld [vmem:[#allocation31_spill] sm:$0xff]  ;;  %v13535_v23 = vld [vmem:[#allocation49_spill] sm:$0xff] }
 0x194   : > { %13522 = vst [vmem:[#allocation126_spill] sm:$0xff] %v8067_v63  ;;  %v2759_v24 = vsub.f32 %v13526_v35, %v7987_v53  ;;  %13527 = vst [vmem:[#allocation19_spill] sm:$0xff] %v8085_v57  ;;  %v2775_v12 = vsub.f32 %v13528_v55, %v7987_v53  ;;  %v13529_v51 = vld [vmem:[#allocation35_spill] sm:$0xff]  ;;  %v2807_v40 = vsub.f32 %v13530_v34, %v7987_v53  ;;  %v8105_v35 = vpop.f32.mrb[78].mxu0  ;;  %v8107_v55 = vpop.f32.mrb[76].mxu1 }
 0x195   : > { %v2791_v36 = vsub.f32 %v13529_v51, %v7987_v53  ;;  %13531 = vst [vmem:[#allocation23_spill] sm:$0xff] %v8095_v41  ;;  %v2823_v50 = vsub.f32 %v13532_v61, %v7987_v53  ;;  %v2839_v19 = vsub.f32 %v13533_v42, %v7987_v53  ;;  %v13534_v37 = vld [vmem:[#allocation47_spill] sm:$0xff]  ;;  %v2871_v3 = vsub.f32 %v13535_v23, %v7987_v53  ;;  %v13538_v51 = vld [vmem:[#allocation53_spill] sm:$0xff]  ;;  %v8115_v42 = vpop.f32.mrb[79].mxu0  ;;  %v8117_v46 = vpop.f32.mrb[77].mxu1 }
 0x196   : > { %v2855_v7 = vsub.f32 %v13534_v37, %v7987_v53  ;;  %13536 = vst [vmem:[#allocation25_spill] sm:$0xff] %v8105_v35  ;;  %13537 = vst [vmem:[#allocation29_spill] sm:$0xff] %v8107_v55  ;;  %v2887_v34 = vsub.f32 %v13538_v51, %v7987_v53  ;;  %v13539_v63 = vld [vmem:[#allocation55_spill] sm:$0xff]  ;;  %v13543_v37 = vld [vmem:[#allocation61_spill] sm:$0xff]  ;;  %v2951_v35 = vsub.f32 %v13544_v49, %v7987_v53 }
 0x197   : > { %v2903_v13 = vsub.f32 %v13539_v63, %v7987_v53  ;;  %v13540_v61 = vld [vmem:[#allocation59_spill] sm:$0xff]  ;;  %13541 = vst [vmem:[#allocation31_spill] sm:$0xff] %v8115_v42  ;;  %13542 = vst [vmem:[#allocation35_spill] sm:$0xff] %v8117_v46  ;;  %v2935_v23 = vsub.f32 %v13543_v37, %v7987_v53  ;;  %v2967_v55 = vsub.f32 %v13545_v4, %v7987_v53  ;;  %v8127_v63 = vpop.f32.mrb[78].mxu1  ;;  %v13549_v42 = vld [vmem:[#allocation77_spill] sm:$0xff] }
 0x198   : > { %v2919_v15 = vsub.f32 %v13540_v61, %v7987_v53  ;;  %v13546_v51 = vld [vmem:[#allocation71_spill] sm:$0xff]  ;;  %13547 = vst [vmem:[#allocation37_spill] sm:$0xff] %v8127_v63  ;;  %v13548_v61 = vld [vmem:[#allocation73_spill] sm:$0xff]  ;;  %v3015_v46 = vsub.f32 %v13549_v42, %v7987_v53  ;;  %v8137_v22 = vpop.f32.mrb[79].mxu1  ;;  %v2114_v63 = vmax.f32 %v7966_v39, %v2113_v25  ;;  %v8147_v42 = vpack.c.bf16 %v2615_v9, %v2599_v8 }
 0x199   : > { %v2983_v41 = vsub.f32 %v13546_v51, %v7987_v53  ;;  %v2999_v57 = vsub.f32 %v13548_v61, %v7987_v53  ;;  %v13550_v6 = vld [vmem:[#allocation79_spill] sm:$0xff]  ;;  %13552 = vst [vmem:[#allocation41_spill] sm:$0xff] %v8137_v22  ;;  %v13553_v51 = vld [vmem:[#allocation85_spill] sm:$0xff]  ;;  %v8155_v22 = vpack.c.bf16 %v2711_v17, %v2695_v1  ;;  %v8157_v48 = vpack.c.bf16 %v2743_v29, %v2727_v62  ;;  %v8165_v8 = vpop.f32.mrb[80].mxu0 }
 0x19a   : > { %v3031_v37 = vsub.f32 %v13550_v6, %v7987_v53  ;;  %v13551_v2 = vld [vmem:[#allocation83_spill] sm:$0xff]  ;;  %v3063_v61 = vsub.f32 %v13553_v51, %v7987_v53  ;;  %v8153_v6 = vpack.c.bf16 %v2679_v52, %v2663_v21  ;;  %v2115_v56 = vrot.slane %v2114_v63, 1  ;;  %13554 = vst [vmem:[#allocation43_spill] sm:$0xff] %v8165_v8  ;;  %v8177_v1 = vpop.f32.mrb[81].mxu0 }
 0x19b   : > { %v3047_v49 = vsub.f32 %v13551_v2, %v7987_v53  ;;  %v6943_v4 = vld [vmem:[%s12897_s1 + $0x70] sm:$0xff]   ;;  %v8150_v2 = vpack.c.bf16 %v2647_v5, %v2631_v59  ;;  %v8159_v53 = vpack.c.bf16 %v2775_v12, %v2759_v24  ;;  %v8161_v39 = vpack.c.bf16 %v2807_v40, %v2791_v36  ;;  %v8167_v9 = vpop.f32.mrb[80].mxu1  ;;  %13560 = vst [vmem:[#allocation61_spill] sm:$0xff] %v8177_v1  ;;  %v13565_v12 = vld [vmem:[#allocation93_spill] sm:$0xff]  ;;  %v8188_v40 = vpop.f32.mrb[82].mxu0 }
 0x19c   : > { %6140 = vmatmul.mubr.msk.bf16.gmra.mrb[184].mxu0 %vm361_vm2, %v6943_v4  ;;  %6156 = vmatmul.mubr.msk.bf16.gmra.mrb[184].mxu1 %vm361_vm2, %v6943_v4  ;;  %v8163_v25 = vpack.c.bf16 %v2839_v19, %v2823_v50  ;;  %13555 = vst [vmem:[#allocation47_spill] sm:$0xff] %v8167_v9  ;;  %v8169_v59 = vpack.c.bf16 %v2871_v3, %v2855_v7  ;;  %v8179_v17 = vpop.f32.mrb[81].mxu1  ;;  %v2148_v36 = vrot.slane %v13565_v12, 4  ;;  %13566 = vst [vmem:[#allocation77_spill] sm:$0xff] %v8188_v40  ;;  %v13571_v7 = vld [vmem:[#allocation91_spill] sm:$0xff] }
 0x19d   : > { %1416 = vmatprep.mubr.bf16.mxu0 %v13424_v54  ;;  %1609 = vmatprep.mubr.bf16.mxu1 %v13424_v54  ;;  %v8171_v5 = vpack.c.bf16 %v2903_v13, %v2887_v34  ;;  %v8173_v21 = vpack.c.bf16 %v2935_v23, %v2919_v15  ;;  %v8175_v52 = vpack.c.bf16 %v2967_v55, %v2951_v35  ;;  %v8190_v13 = vpop.f32.mrb[82].mxu1  ;;  %v6944_v15 = vld [vmem:[%s12897_s1 + $0x78] sm:$0xff]   ;;  %v13572_v35 = vld [vmem:[#allocation6_spill] sm:$0xff] }
 0x19e   : > { %13556 = vst [vmem:[#allocation49_spill] sm:$0xff] %v8169_v59  ;;  %13561 = vst [vmem:[#allocation65_spill] sm:$0xff] %v8179_v17  ;;  %v8181_v62 = vpack.c.bf16 %v2999_v57, %v2983_v41  ;;  %v8183_v29 = vpack.c.bf16 %v3031_v37, %v3015_v46  ;;  %v8185_v24 = vpack.c.bf16 %v3063_v61, %v3047_v49  ;;  %v8198_v57 = vpop.f32.mrb[83].mxu0  ;;  %v8200_v46 = vpop.f32.mrb[83].mxu1  ;;  %v13570_v41 = vld [vmem:[#allocation89_spill] sm:$0xff]  ;;  %v13576_v49 = vld [vmem:[#allocation12_spill] sm:$0xff] }
 0x19f   : > { %13557 = vst [vmem:[#allocation53_spill] sm:$0xff] %v8171_v5  ;;  %13558 = vst [vmem:[#allocation55_spill] sm:$0xff] %v8173_v21  ;;  %v8196_v50 = vmax.f32 %v2114_v63, %v2115_v56  ;;  %v13574_v56 = vld [vmem:[#allocation8_spill] sm:$0xff]  ;;  %v13575_v63 = vld [vmem:[#allocation10_spill] sm:$0xff]  ;;  %v2149_v51 = vmax.f32 %v13565_v12, %v2148_v36 }
 0x1a0   : > { %13559 = vst [vmem:[#allocation59_spill] sm:$0xff] %v8175_v52  ;;  %13562 = vst [vmem:[#allocation67_spill] sm:$0xff] %v8181_v62  ;;  %v13585_v36 = vld [vmem:[#allocation24_spill] sm:$0xff]  ;;  %v13599_v17 = vld [vmem:[#allocation54_spill] sm:$0xff] }
 0x1a1   : > { %13563 = vst [vmem:[#allocation71_spill] sm:$0xff] %v8183_v29  ;;  %13564 = vst [vmem:[#allocation73_spill] sm:$0xff] %v8185_v24  ;;  %v3080_v19 = vsub.f32 %v13570_v41, %v8196_v50  ;;  %v3096_v3 = vsub.f32 %v13571_v7, %v8196_v50  ;;  %v2600_v55 = vsub.f32 %v13572_v35, %v8196_v50  ;;  %v8210_v34 = vpop.f32.mrb[84].mxu0  ;;  %v13579_v41 = vld [vmem:[#allocation14_spill] sm:$0xff]  ;;  %v13580_v35 = vld [vmem:[#allocation16_spill] sm:$0xff] }
 0x1a2   : > { %13567 = vst [vmem:[#allocation79_spill] sm:$0xff] %v8190_v13  ;;  %13568 = vst [vmem:[#allocation83_spill] sm:$0xff] %v8198_v57  ;;  %v2616_v23 = vsub.f32 %v13574_v56, %v8196_v50  ;;  %v2632_v37 = vsub.f32 %v13575_v63, %v8196_v50  ;;  %v2648_v4 = vsub.f32 %v13576_v49, %v8196_v50  ;;  %v8220_v61 = vpop.f32.mrb[85].mxu0  ;;  %v13583_v63 = vld [vmem:[#allocation18_spill] sm:$0xff]  ;;  %v13584_v49 = vld [vmem:[#allocation21_spill] sm:$0xff] }
 0x1a3   : > { %13569 = vst [vmem:[#allocation85_spill] sm:$0xff] %v8200_v46  ;;  %13573 = vst [vmem:[#allocation93_spill] sm:$0xff] %v8210_v34  ;;  %v2664_v7 = vsub.f32 %v13579_v41, %v8196_v50  ;;  %v2680_v24 = vsub.f32 %v13580_v35, %v8196_v50  ;;  %v8228_v29 = vpop.f32.mrb[86].mxu0  ;;  %v8230_v56 = vpop.f32.mrb[84].mxu1  ;;  %v2696_v62 = vsub.f32 %v13583_v63, %v8196_v50  ;;  %v13588_v41 = vld [vmem:[#allocation27_spill] sm:$0xff]  ;;  %v13591_v63 = vld [vmem:[#allocation33_spill] sm:$0xff] }
 0x1a4   : > { %6141 = vmatmul.mubr.msk.bf16.gmra.mrb[188].mxu0 %vm361_vm2, %v6944_v15  ;;  %6157 = vmatmul.mubr.msk.bf16.gmra.mrb[188].mxu1 %vm361_vm2, %v6944_v15  ;;  %13577 = vst [vmem:[#allocation89_spill] sm:$0xff] %v8220_v61  ;;  %v8222_v15 = vpack.c.bf16 %v3096_v3, %v3080_v19  ;;  %13581 = vst [vmem:[#allocation6_spill] sm:$0xff] %v8228_v29  ;;  %v2712_v12 = vsub.f32 %v13584_v49, %v8196_v50  ;;  %v8238_v3 = vpop.f32.mrb[87].mxu0  ;;  %v13589_v29 = vld [vmem:[#allocation30_spill] sm:$0xff]  ;;  %v13592_v49 = vld [vmem:[#allocation36_spill] sm:$0xff] }
 0x1a5   : > { %1652 = vmatprep.mubr.bf16.mxu0 %v13424_v54  ;;  %1845 = vmatprep.mubr.bf16.mxu1 %v13424_v54  ;;  %13582 = vst [vmem:[#allocation8_spill] sm:$0xff] %v8230_v56  ;;  %v2728_v19 = vsub.f32 %v13585_v36, %v8196_v50  ;;  %13586 = vst [vmem:[#allocation10_spill] sm:$0xff] %v8238_v3  ;;  %v2744_v35 = vsub.f32 %v13588_v41, %v8196_v50  ;;  %v13593_v36 = vld [vmem:[#allocation39_spill] sm:$0xff]  ;;  %v2150_v3 = vrot.slane %v2149_v51, 2  ;;  %v6945_v41 = vld [vmem:[%s12897_s1] sm:$0xff]  }
 0x1a6   : > { %13578 = vst [vmem:[#allocation91_spill] sm:$0xff] %v8222_v15  ;;  %v8240_v15 = vpop.f32.mrb[85].mxu1  ;;  %v2760_v61 = vsub.f32 %v13589_v29, %v8196_v50  ;;  %v2776_v34 = vsub.f32 %v13591_v63, %v8196_v50  ;;  %v2792_v46 = vsub.f32 %v13592_v49, %v8196_v50  ;;  %v2808_v13 = vsub.f32 %v13593_v36, %v8196_v50  ;;  %v13595_v29 = vld [vmem:[#allocation42_spill] sm:$0xff]  ;;  %v13596_v63 = vld [vmem:[#allocation45_spill] sm:$0xff]  ;;  %v13597_v49 = vld [vmem:[#allocation48_spill] sm:$0xff] }
 0x1a7   : > { %13587 = vst [vmem:[#allocation12_spill] sm:$0xff] %v8240_v15  ;;  %v8246_v56 = vpop.f32.mrb[86].mxu1  ;;  %v2840_v15 = vsub.f32 %v13596_v63, %v8196_v50  ;;  %v2856_v40 = vsub.f32 %v13597_v49, %v8196_v50  ;;  %v13598_v36 = vld [vmem:[#allocation51_spill] sm:$0xff]  ;;  %v2888_v9 = vsub.f32 %v13599_v17, %v8196_v50  ;;  %v13600_v52 = vld [vmem:[#allocation57_spill] sm:$0xff]  ;;  %v13603_v49 = vld [vmem:[#allocation66_spill] sm:$0xff]  ;;  %v3048_v0 = vsub.f32 %v13611_v32, %v8196_v50 }
 0x1a8   : > { %13590 = vst [vmem:[#allocation14_spill] sm:$0xff] %v8246_v56  ;;  %v8254_v57 = vpop.f32.mrb[87].mxu1  ;;  %v2824_v56 = vsub.f32 %v13595_v29, %v8196_v50  ;;  %v2904_v1 = vsub.f32 %v13600_v52, %v8196_v50  ;;  %v13601_v29 = vld [vmem:[#allocation60_spill] sm:$0xff]  ;;  %v13602_v63 = vld [vmem:[#allocation63_spill] sm:$0xff]  ;;  %v2952_v44 = vsub.f32 %v13603_v49, %v8196_v50  ;;  %v13605_v17 = vld [vmem:[#allocation69_spill] sm:$0xff] }
 0x1a9   : > { %13594 = vst [vmem:[#allocation16_spill] sm:$0xff] %v8254_v57  ;;  %v2872_v57 = vsub.f32 %v13598_v36, %v8196_v50  ;;  %v2920_v8 = vsub.f32 %v13601_v29, %v8196_v50  ;;  %v2936_v21 = vsub.f32 %v13602_v63, %v8196_v50  ;;  %v8280_v5 = vpop.f32.mrb[88].mxu0  ;;  %v2968_v36 = vsub.f32 %v13605_v17, %v8196_v50  ;;  %v13606_v52 = vld [vmem:[#allocation72_spill] sm:$0xff]  ;;  %v13609_v63 = vld [vmem:[#allocation78_spill] sm:$0xff]  ;;  %v13610_v49 = vld [vmem:[#allocation81_spill] sm:$0xff] }
 0x1aa   : > { %13604 = vst [vmem:[#allocation18_spill] sm:$0xff] %v8280_v5  ;;  %v2984_v47 = vsub.f32 %v13606_v52, %v8196_v50  ;;  %v2151_v29 = vmax.f32 %v2149_v51, %v2150_v3  ;;  %v8289_v58 = vpop.f32.mrb[89].mxu0  ;;  %v3016_v11 = vsub.f32 %v13609_v63, %v8196_v50  ;;  %v3032_v5 = vsub.f32 %v13610_v49, %v8196_v50  ;;  %v13614_v52 = vld [vmem:[#allocation87_spill] sm:$0xff]  ;;  %v6946_v32 = vld [vmem:[%s12897_s1 + $0x8] sm:$0xff]  }
 0x1ab   : > { %13608 = vst [vmem:[#allocation21_spill] sm:$0xff] %v8289_v58  ;;  %v8297_v59 = vpop.f32.mrb[90].mxu0  ;;  %v8299_v17 = vpop.f32.mrb[88].mxu1  ;;  %v3064_v26 = vsub.f32 %v13614_v52, %v8196_v50  ;;  %v3367_v3 = vmul.bf16 1069105081, %v8008_v20  ;;  %v8308_v63 = vpack.c.bf16 %v2616_v23, %v2600_v55  ;;  %v8318_v52 = vpack.c.bf16 %v2680_v24, %v2664_v7  ;;  %v13647_v7 = vld [vmem:[#allocation22_spill] sm:$0xff] }
 0x1ac   : > { %6158 = vmatmul.mubr.msk.bf16.vlgmr.msra.gmra.mrb[192].mxu0 %vm361_vm2, %v6945_v41  ;;  %6174 = vmatmul.mubr.msk.bf16.vlgmr.msra.gmra.mrb[192].mxu1 %vm361_vm2, %v6945_v41  ;;  %v13607_v41 = vld [vmem:[#allocation75_spill] sm:$0xff]  ;;  %13612 = vst [vmem:[#allocation24_spill] sm:$0xff] %v8297_v59  ;;  %13613 = vst [vmem:[#allocation27_spill] sm:$0xff] %v8299_v17  ;;  %v8305_v51 = vpop.f32.mrb[89].mxu1  ;;  %v2152_v58 = vrot.slane %v2151_v29, 1  ;;  %v8323_v20 = vpack.c.bf16 %v2712_v12, %v2696_v62  ;;  %v8325_v55 = vpack.c.bf16 %v2744_v35, %v2728_v19 }
 0x1ad   : > { %1662 = vmatprep.mubr.bf16.mxu0 %v13424_v54  ;;  %1855 = vmatprep.mubr.bf16.mxu1 %v13424_v54  ;;  %v3000_v60 = vsub.f32 %v13607_v41, %v8196_v50  ;;  %v8303_v41 = vpop.f32.mrb[91].mxu0  ;;  %13616 = vst [vmem:[#allocation33_spill] sm:$0xff] %v8305_v51  ;;  %v3370_v49 = vmul.bf16 1069105081, %v8147_v42  ;;  %v3418_v59 = vmul.bf16 1069105081, %v8150_v2  ;;  %v8316_v50 = vpack.c.bf16 %v2648_v4, %v2632_v37 }
 0x1ae   : > { %13615 = vst [vmem:[#allocation30_spill] sm:$0xff] %v8303_v41  ;;  %v8320_v41 = vpop.f32.mrb[90].mxu1  ;;  %v8327_v23 = vpack.c.bf16 %v2776_v34, %v2760_v61  ;;  %v8329_v51 = vpack.c.bf16 %v2808_v13, %v2792_v46  ;;  %v8334_v42 = vpack.c.bf16 %v2840_v15, %v2824_v56  ;;  %v8336_v2 = vpack.c.bf16 %v2872_v57, %v2856_v40  ;;  %v13638_v57 = vld [vmem:[#allocation9_spill] sm:$0xff]  ;;  %v13639_v15 = vld [vmem:[#allocation11_spill] sm:$0xff] }
 0x1af   : > { %13617 = vst [vmem:[#allocation36_spill] sm:$0xff] %v8320_v41  ;;  %v8331_v17 = vpop.f32.mrb[91].mxu1  ;;  %v8338_v24 = vpack.c.bf16 %v2904_v1, %v2888_v9  ;;  %v8340_v37 = vpack.c.bf16 %v2936_v21, %v2920_v8  ;;  %v8345_v34 = vpack.c.bf16 %v2968_v36, %v2952_v44  ;;  %v8347_v13 = vpack.c.bf16 %v3000_v60, %v2984_v47  ;;  %v13635_v60 = vld [vmem:[#allocation7_spill] sm:$0xff] }
 0x1b0   : > { %13618 = vst [vmem:[#allocation39_spill] sm:$0xff] %v8327_v23  ;;  %13619 = vst [vmem:[#allocation42_spill] sm:$0xff] %v8329_v51  ;;  %v8349_v46 = vpack.c.bf16 %v3032_v5, %v3016_v11  ;;  %v8351_v4 = vpack.c.bf16 %v3064_v26, %v3048_v0  ;;  %6271 = vpow.bf16 %v3370_v49  ;;  %v8355_v40 = vmax.f32 %v2151_v29, %v2152_v58  ;;  %v13633_v11 = vld [vmem:[#allocation90_spill] sm:$0xff]  ;;  %v13634_v26 = vld [vmem:[#allocation92_spill] sm:$0xff] }
 0x1b1   : > { %13620 = vst [vmem:[#allocation45_spill] sm:$0xff] %v8331_v17  ;;  %13621 = vst [vmem:[#allocation48_spill] sm:$0xff] %v8334_v42  ;;  %v8342_v62 = vpop.f32.mrb[92].mxu0  ;;  %v3415_v21 = vmul.bf16 1069105081, %v8012_v43  ;;  %6273 = vpow.bf16 %v3367_v3  ;;  %v6947_v12 = vld [vmem:[%s12897_s1 + $0x10] sm:$0xff]  }
 0x1b2   : > { %13622 = vst [vmem:[#allocation51_spill] sm:$0xff] %v8336_v2  ;;  %13623 = vst [vmem:[#allocation54_spill] sm:$0xff] %v8338_v24  ;;  %v8353_v61 = vpop.f32.mrb[93].mxu0  ;;  %v3466_v44 = vmul.bf16 1069105081, %v8153_v6  ;;  %6275 = vpow.bf16 %v3418_v59  ;;  %v3081_v47 = vsub.f32 %v13633_v11, %v8355_v40  ;;  %v3097_v0 = vsub.f32 %v13634_v26, %v8355_v40  ;;  %v13640_v59 = vld [vmem:[#allocation13_spill] sm:$0xff] }
 0x1b3   : > { %13624 = vst [vmem:[#allocation57_spill] sm:$0xff] %v8340_v37  ;;  %13625 = vst [vmem:[#allocation60_spill] sm:$0xff] %v8342_v62  ;;  %v8357_v9 = vpop.f32.mrb[94].mxu0  ;;  %v8359_v8 = vpop.f32.mrb[92].mxu1  ;;  %v3463_v19 = vmul.bf16 1069105081, %v8014_v31  ;;  %6277 = vpow.bf16 %v3415_v21 }
 0x1b4   : > { %6159 = vmatmul.mubr.msk.bf16.gmra.mrb[196].mxu0 %vm361_vm2, %v6946_v32  ;;  %6175 = vmatmul.mubr.msk.bf16.gmra.mrb[196].mxu1 %vm361_vm2, %v6946_v32  ;;  %13626 = vst [vmem:[#allocation63_spill] sm:$0xff] %v8345_v34  ;;  %13627 = vst [vmem:[#allocation66_spill] sm:$0xff] %v8347_v13  ;;  %v8369_v5 = vpop.f32.mrb[95].mxu0  ;;  %v8371_v1 = vpop.f32.mrb[93].mxu1  ;;  %v8386_v35 = vpack.c.bf16 %v3097_v0, %v3081_v47  ;;  %v13643_v36 = vld [vmem:[#allocation15_spill] sm:$0xff]  ;;  %v13644_v3 = vld [vmem:[#allocation17_spill] sm:$0xff]  ;;  %6279 = vpow.bf16 %v3466_v44 }
 0x1b5   : > { %1672 = vmatprep.mubr.bf16.mxu0 %v13424_v54  ;;  %1865 = vmatprep.mubr.bf16.mxu1 %v13424_v54  ;;  %13628 = vst [vmem:[#allocation69_spill] sm:$0xff] %v8349_v46  ;;  %13629 = vst [vmem:[#allocation72_spill] sm:$0xff] %v8351_v4  ;;  %v8379_v56 = vpop.f32.mrb[94].mxu1  ;;  %v13646_v11 = vld [vmem:[#allocation20_spill] sm:$0xff]  ;;  %v13648_v31 = vld [vmem:[#allocation26_spill] sm:$0xff]  ;;  %6281 = vpow.bf16 %v3463_v19 }
 0x1b6   : > { %13630 = vst [vmem:[#allocation75_spill] sm:$0xff] %v8353_v61  ;;  %13631 = vst [vmem:[#allocation78_spill] sm:$0xff] %v8357_v9  ;;  %v8392_v49 = vpop.f32.mrb[95].mxu1  ;;  %v3514_v0 = vmul.bf16 1069105081, %v8155_v22  ;;  %v13649_v32 = vld [vmem:[#allocation28_spill] sm:$0xff] }
 0x1b7   : > { %13632 = vst [vmem:[#allocation81_spill] sm:$0xff] %v8359_v8  ;;  %13636 = vst [vmem:[#allocation84_spill] sm:$0xff] %v8369_v5  ;;  %v2745_v29 = vsub.f32 %v13649_v32, %v8355_v40  ;;  %v13650_v43 = vld [vmem:[#allocation32_spill] sm:$0xff]  ;;  %v3511_v6 = vmul.bf16 1069105081, %v8016_v10  ;;  %v13652_v26 = vld [vmem:[#allocation34_spill] sm:$0xff] }
 0x1b8   : > { %13637 = vst [vmem:[#allocation87_spill] sm:$0xff] %v8371_v1  ;;  %13641 = vst [vmem:[#allocation90_spill] sm:$0xff] %v8379_v56  ;;  %v2761_v21 = vsub.f32 %v13650_v43, %v8355_v40  ;;  %v2777_v47 = vsub.f32 %v13652_v26, %v8355_v40  ;;  %v13654_v22 = vld [vmem:[#allocation40_spill] sm:$0xff]  ;;  %v13657_v46 = vld [vmem:[#allocation46_spill] sm:$0xff]  ;;  %6283 = vpow.bf16 %v3514_v0 }
 0x1b9   : > { %13642 = vst [vmem:[#allocation92_spill] sm:$0xff] %v8386_v35  ;;  %13645 = vst [vmem:[#allocation7_spill] sm:$0xff] %v8392_v49  ;;  %v8407_v58 = vpop.f32.mrb[96].mxu0  ;;  %v2809_v44 = vsub.f32 %v13654_v22, %v8355_v40  ;;  %v13656_v43 = vld [vmem:[#allocation44_spill] sm:$0xff]  ;;  %v2841_v13 = vsub.f32 %v13657_v46, %v8355_v40  ;;  %v13658_v10 = vld [vmem:[#allocation50_spill] sm:$0xff]  ;;  %6285 = vpow.bf16 %v3511_v6 }
 0x1ba   : > { %13651 = vst [vmem:[#allocation9_spill] sm:$0xff] %v8407_v58  ;;  %v8417_v35 = vpop.f32.mrb[97].mxu0  ;;  %v2825_v32 = vsub.f32 %v13656_v43, %v8355_v40  ;;  %v2857_v34 = vsub.f32 %v13658_v10, %v8355_v40  ;;  %v13661_v22 = vld [vmem:[#allocation52_spill] sm:$0xff]  ;;  %v13663_v43 = vld [vmem:[#allocation58_spill] sm:$0xff]  ;;  %v3559_v49 = vmul.bf16 1069105081, %v8018_v30 }
 0x1bb   : > { %13655 = vst [vmem:[#allocation11_spill] sm:$0xff] %v8417_v35  ;;  %v8425_v37 = vpop.f32.mrb[98].mxu0  ;;  %v8427_v26 = vpop.f32.mrb[96].mxu1  ;;  %v2873_v24 = vsub.f32 %v13661_v22, %v8355_v40  ;;  %v13662_v19 = vld [vmem:[#allocation56_spill] sm:$0xff]  ;;  %v2905_v42 = vsub.f32 %v13663_v43, %v8355_v40  ;;  %v13666_v10 = vld [vmem:[#allocation62_spill] sm:$0xff] }
 0x1bc   : > { %6160 = vmatmul.mubr.msk.bf16.gmra.mrb[200].mxu0 %vm361_vm2, %v6947_v12  ;;  %6176 = vmatmul.mubr.msk.bf16.gmra.mrb[200].mxu1 %vm361_vm2, %v6947_v12  ;;  %v13653_v12 = vld [vmem:[#allocation38_spill] sm:$0xff]  ;;  %13659 = vst [vmem:[#allocation13_spill] sm:$0xff] %v8425_v37  ;;  %13660 = vst [vmem:[#allocation15_spill] sm:$0xff] %v8427_v26  ;;  %v2889_v2 = vsub.f32 %v13662_v19, %v8355_v40  ;;  %v8436_v51 = vpop.f32.mrb[99].mxu0  ;;  %v8438_v46 = vpop.f32.mrb[97].mxu1  ;;  %v2921_v37 = vsub.f32 %v13666_v10, %v8355_v40  ;;  %v13667_v26 = vld [vmem:[#allocation64_spill] sm:$0xff] }
 0x1bd   : > { %1682 = vmatprep.mubr.bf16.mxu0 %v13424_v54  ;;  %1875 = vmatprep.mubr.bf16.mxu1 %v13424_v54  ;;  %v2793_v4 = vsub.f32 %v13653_v12, %v8355_v40  ;;  %v3562_v12 = vmul.bf16 1069105081, %v8157_v48  ;;  %13664 = vst [vmem:[#allocation17_spill] sm:$0xff] %v8436_v51  ;;  %13665 = vst [vmem:[#allocation20_spill] sm:$0xff] %v8438_v46  ;;  %v2937_v48 = vsub.f32 %v13667_v26, %v8355_v40  ;;  %v13668_v35 = vld [vmem:[#allocation68_spill] sm:$0xff]  ;;  %v8446_v58 = vpop.f32.mrb[98].mxu1  ;;  %v6272_v19 = vpop.eup %6271 }
 0x1be   : > { %v2953_v22 = vsub.f32 %v13668_v35, %v8355_v40  ;;  %13669 = vst [vmem:[#allocation22_spill] sm:$0xff] %v8446_v58  ;;  %v13670_v43 = vld [vmem:[#allocation70_spill] sm:$0xff]  ;;  %v13672_v56 = vld [vmem:[#allocation76_spill] sm:$0xff]  ;;  %v8455_v23 = vpop.f32.mrb[99].mxu1  ;;  %v6274_v26 = vpop.eup %6273  ;;  %v3610_v30 = vmul.bf16 1069105081, %v8159_v53  ;;  %4146 = vmatprep.subr.bf16.mxu0 %v6272_v19 }
 0x1bf   : > { %v2969_v51 = vsub.f32 %v13670_v43, %v8355_v40  ;;  %v13671_v46 = vld [vmem:[#allocation74_spill] sm:$0xff]  ;;  %v3001_v10 = vsub.f32 %v13672_v56, %v8355_v40  ;;  %13673 = vst [vmem:[#allocation26_spill] sm:$0xff] %v8455_v23  ;;  %v6948_v35 = vld [vmem:[%s12897_s1 + $0x18] sm:$0xff]   ;;  %v6276_v23 = vpop.eup %6275  ;;  %4147 = vmatpush1.bf16.msra.mxu0 %v6274_v26  ;;  %6287 = vpow.bf16 %v3562_v12  ;;  %v3607_v53 = vmul.bf16 1069105081, %v8024_v38 }
 0x1c0   : > { %v2985_v0 = vsub.f32 %v13671_v46, %v8355_v40  ;;  %v13674_v58 = vld [vmem:[#allocation80_spill] sm:$0xff]  ;;  %v13675_v5 = vld [vmem:[#allocation82_spill] sm:$0xff]  ;;  %4148 = vmatprep.subr.bf16.mxu0 %v6276_v23  ;;  %6289 = vpow.bf16 %v3559_v49  ;;  %v13680_v23 = vsub.f32 %v13639_v15, %v8355_v40  ;;  %v13681_v12 = vsub.f32 %v13640_v59, %v8355_v40 }
 0x1c1   : > { %v3017_v43 = vsub.f32 %v13674_v58, %v8355_v40  ;;  %v3033_v46 = vsub.f32 %v13675_v5, %v8355_v40  ;;  %v13676_v9 = vld [vmem:[#allocation86_spill] sm:$0xff]  ;;  %v13677_v1 = vld [vmem:[#allocation88_spill] sm:$0xff]  ;;  %v6278_v58 = vpop.eup %6277  ;;  %6291 = vpow.bf16 %v3610_v30  ;;  %v13678_v5 = vsub.f32 %v13635_v60, %v8355_v40  ;;  %v8491_v49 = vpop.f32.mrb[100].mxu0 }
 0x1c2   : > { %v3049_v56 = vsub.f32 %v13676_v9, %v8355_v40  ;;  %v3065_v8 = vsub.f32 %v13677_v1, %v8355_v40  ;;  %v3658_v9 = vmul.bf16 1069105081, %v8161_v39  ;;  %v13679_v1 = vsub.f32 %v13638_v57, %v8355_v40  ;;  %v6280_v19 = vpop.eup %6279 }
 0x1c3   : > { %v8489_v38 = vpack.c.bf16 %v13681_v12, %v13680_v23  ;;  %v8493_v39 = vpop.f32.mrb[100].mxu1  ;;  %v13683_v60 = vsub.f32 %v13643_v36, %v8355_v40  ;;  %v13684_v57 = vsub.f32 %v13644_v3, %v8355_v40  ;;  %v13685_v15 = vsub.f32 %v13646_v11, %v8355_v40  ;;  %4149 = vmatpush1.bf16.msra.mxu0 %v6278_v58  ;;  %v8518_v36 = vpop.f32.mrb[101].mxu0  ;;  %v13701_v58 = vld [vmem:[#allocation97_spill] sm:$0xff] }
 0x1c4   : > { %6161 = vmatmul.mubr.msk.bf16.gmra.mrb[204].mxu0 %vm361_vm2, %v6948_v35  ;;  %6177 = vmatmul.mubr.msk.bf16.gmra.mrb[204].mxu1 %vm361_vm2, %v6948_v35  ;;  %v8481_v6 = vpack.c.bf16 %v13679_v1, %v13678_v5  ;;  %13682 = vst [vmem:[#allocation28_spill] sm:$0xff] %v8493_v39  ;;  %v13686_v59 = vsub.f32 %v13647_v7, %v8355_v40  ;;  %v8520_v3 = vpop.f32.mrb[101].mxu1  ;;  %6293 = vpow.bf16 %v3607_v53 }
 0x1c5   : > { %1692 = vmatprep.mubr.bf16.mxu0 %v13424_v54  ;;  %1885 = vmatprep.mubr.bf16.mxu1 %v13424_v54  ;;  %v8501_v35 = vpack.c.bf16 %v13684_v57, %v13683_v60  ;;  %v13687_v30 = vsub.f32 %v13648_v31, %v8355_v40  ;;  %v8516_v1 = vpack.c.bf16 %v2777_v47, %v2761_v21  ;;  %v8530_v60 = vpop.f32.mrb[102].mxu0  ;;  %v8532_v40 = vpop.f32.mrb[102].mxu1  ;;  %6295 = vpow.bf16 %v3658_v9  ;;  %v13702_v9 = vld [vmem:[#allocation100_spill] sm:$0xff] }
 0x1c6   : > { %v8509_v26 = vpack.c.bf16 %v13686_v59, %v13685_v15  ;;  %13688 = vst [vmem:[#allocation32_spill] sm:$0xff] %v8520_v3  ;;  %v8522_v23 = vpack.c.bf16 %v2809_v44, %v2793_v4  ;;  %v8524_v11 = vpack.c.bf16 %v2841_v13, %v2825_v32  ;;  %v8526_v12 = vpack.c.bf16 %v2873_v24, %v2857_v34  ;;  %v8542_v13 = vpop.f32.mrb[103].mxu0  ;;  %v8544_v24 = vpop.f32.mrb[103].mxu1  ;;  %v13704_v15 = vld [vmem:[#allocation108_spill] sm:$0xff]  ;;  %v13705_v59 = vld [vmem:[#allocation99_spill] sm:$0xff] }
 0x1c7   : > { %v8514_v5 = vpack.c.bf16 %v2745_v29, %v13687_v30  ;;  %v8528_v7 = vpack.c.bf16 %v2905_v42, %v2889_v2  ;;  %4150 = vmatprep.subr.bf16.mxu0 %v6280_v19  ;;  %13689 = vst [vmem:[#allocation34_spill] sm:$0xff] %v8532_v40  ;;  %v6282_v29 = vpop.eup %6281  ;;  %v8534_v31 = vpack.c.bf16 %v2937_v48, %v2921_v37  ;;  %13693 = vst [vmem:[#allocation46_spill] sm:$0xff] %v8544_v24  ;;  %v6949_v42 = vld [vmem:[%s12897_s1 + $0x20] sm:$0xff]  }
 0x1c8   : > { %v8536_v47 = vpack.c.bf16 %v2969_v51, %v2953_v22  ;;  %v8538_v21 = vpack.c.bf16 %v3001_v10, %v2985_v0  ;;  %v8540_v4 = vpack.c.bf16 %v3033_v46, %v3017_v43  ;;  %v8550_v2 = vpack.c.bf16 %v3065_v8, %v3049_v56  ;;  %v6284_v51 = vpop.eup %6283  ;;  %4151 = vmatpush1.bf16.msra.mxu0 %v6282_v29  ;;  %v13696_v22 = vld [vmem:[#allocation98_spill] sm:$0xff]  ;;  %v13699_v56 = vld [vmem:[#allocation49_spill] sm:$0xff] }
 0x1c9   : > { %v3655_v37 = vmul.bf16 1069105081, %v8026_v16  ;;  %v3706_v34 = vmul.bf16 1069105081, %v8163_v25  ;;  %4152 = vmatprep.subr.bf16.mxu0 %v6284_v51  ;;  %v6286_v44 = vpop.eup %6285  ;;  %v3703_v8 = vmul.bf16 1069105081, %v8028_v45  ;;  %v13695_v48 = vmax.f32 %v7883_v18, %v7888_v14 }
 0x1ca   : > { %13690 = vst [vmem:[#allocation38_spill] sm:$0xff] %v8536_v47  ;;  %13691 = vst [vmem:[#allocation40_spill] sm:$0xff] %v8538_v21  ;;  %v6288_v32 = vpop.eup %6287  ;;  %v13697_v0 = vmax.f32 %v7886_v28, %v13696_v22  ;;  %v8566_v25 = vpop.f32.mrb[104].mxu0  ;;  %v3754_v53 = vmul.bf16 1069105081, %v13699_v56  ;;  %v13700_v45 = vld [vmem:[#allocation105_spill] sm:$0xff]  ;;  %v13703_v19 = vmax.f32 %v13701_v58, %v13702_v9 }
 0x1cb   : > { %13692 = vst [vmem:[#allocation44_spill] sm:$0xff] %v8540_v4  ;;  %13694 = vst [vmem:[#allocation50_spill] sm:$0xff] %v8550_v2  ;;  %6297 = vpow.bf16 %v3655_v37  ;;  %v2155_v16 = vmax.f32 %v13695_v48, %v7915_v33  ;;  %v8568_v43 = vpop.f32.mrb[104].mxu1  ;;  %v6290_v46 = vpop.eup %6289  ;;  %v13706_v30 = vld [vmem:[#allocation101_spill] sm:$0xff]  ;;  %v13709_v48 = vld [vmem:[#allocation104_spill] sm:$0xff] }
 0x1cc   : > { %6162 = vmatmul.mubr.msk.bf16.gmra.mrb[208].mxu0 %vm361_vm2, %v6949_v42  ;;  %6178 = vmatmul.mubr.msk.bf16.gmra.mrb[208].mxu1 %vm361_vm2, %v6949_v42  ;;  %v2192_v10 = vmax.f32 %v13697_v0, %v7924_v27  ;;  %13698 = vst [vmem:[#allocation52_spill] sm:$0xff] %v8568_v43  ;;  %6299 = vpow.bf16 %v3706_v34  ;;  %v2229_v57 = vmax.f32 %v13703_v19, %v13700_v45  ;;  %v8579_v51 = vpop.f32.mrb[105].mxu0  ;;  %v8581_v37 = vpop.f32.mrb[105].mxu1  ;;  %v13710_v56 = vld [vmem:[#allocation107_spill] sm:$0xff]  ;;  %v6950_v19 = vld [vmem:[%s12897_s1 + $0x28] sm:$0xff]  }
 0x1cd   : > { %1702 = vmatprep.mubr.bf16.mxu0 %v13424_v54  ;;  %1895 = vmatprep.mubr.bf16.mxu1 %v13424_v54  ;;  %v13707_v29 = vmax.f32 %v13705_v59, %v13706_v30  ;;  %13708 = vst [vmem:[#allocation56_spill] sm:$0xff] %v8581_v37  ;;  %v2156_v0 = vmax.f32 %v2155_v16, %v13709_v48  ;;  %v8585_v27 = vpop.f32.mrb[106].mxu0  ;;  %v8587_v22 = vpop.f32.mrb[106].mxu1  ;;  %v13714_v59 = vld [vmem:[#allocation110_spill] sm:$0xff]  ;;  %6301 = vpow.bf16 %v3703_v8  ;;  %v13718_v48 = vld [vmem:[#allocation112_spill] sm:$0xff]  ;;  %v13732_v2 = vld [vmem:[#allocation35_spill] sm:$0xff] }
 0x1ce   : > { %4153 = vmatpush1.bf16.msra.mxu0 %v6286_v44  ;;  %v6292_v44 = vpop.eup %6291  ;;  %v2193_v34 = vmax.f32 %v2192_v10, %v13710_v56  ;;  %13711 = vst [vmem:[#allocation58_spill] sm:$0xff] %v8587_v22  ;;  %v8596_v9 = vpop.f32.mrb[107].mxu0  ;;  %v13716_v10 = vld [vmem:[#allocation118_spill] sm:$0xff]  ;;  %v13717_v56 = vld [vmem:[#allocation111_spill] sm:$0xff]  ;;  %6303 = vpow.bf16 %v3754_v53  ;;  %v3376_v8 = vmul.bf16 1069105081, %v8481_v6 }
 0x1cf   : > { %v2266_v42 = vmax.f32 %v13707_v29, %v13704_v15  ;;  %4154 = vmatprep.subr.bf16.mxu0 %v6288_v32  ;;  %v13712_v32 = vld [vmem:[#allocation115_spill] sm:$0xff]  ;;  %v13713_v15 = vld [vmem:[#allocation109_spill] sm:$0xff]  ;;  %v8598_v16 = vpop.f32.mrb[107].mxu1  ;;  %v3799_v58 = vmul.bf16 1069105081, %v13716_v10  ;;  %v2157_v28 = vmax.f32 %v2156_v0, %v13717_v56 }
 0x1d0   : > { %v3751_v29 = vmul.bf16 1069105081, %v13712_v32  ;;  %v2230_v30 = vmax.f32 %v2229_v57, %v13713_v15  ;;  %13715 = vst [vmem:[#allocation62_spill] sm:$0xff] %v8598_v16  ;;  %v2194_v33 = vmax.f32 %v2193_v34, %v13718_v48  ;;  %v13719_v32 = vld [vmem:[#allocation53_spill] sm:$0xff]  ;;  %v13723_v34 = vld [vmem:[#allocation116_spill] sm:$0xff]  ;;  %v13727_v6 = vld [vmem:[#allocation19_spill] sm:$0xff] }
 0x1d1   : > { %v2267_v45 = vmax.f32 %v2266_v42, %v13714_v59  ;;  %v3802_v57 = vmul.bf16 1069105081, %v13719_v32  ;;  %v13720_v42 = vld [vmem:[#allocation114_spill] sm:$0xff]  ;;  %v13721_v15 = vld [vmem:[#allocation117_spill] sm:$0xff]  ;;  %v8608_v18 = vpop.f32.mrb[108].mxu0  ;;  %v13742_v47 = vld [vmem:[#allocation59_spill] sm:$0xff] }
 0x1d2   : > { %4155 = vmatpush1.bf16.msra.mxu0 %v6290_v46  ;;  %v2231_v59 = vmax.f32 %v2230_v30, %v13720_v42  ;;  %v13722_v0 = vld [vmem:[#allocation113_spill] sm:$0xff]  ;;  %v2195_v46 = vmax.f32 %v2194_v33, %v13723_v34  ;;  %v8614_v48 = vpop.f32.mrb[109].mxu0  ;;  %6305 = vpow.bf16 %v3751_v29  ;;  %v3373_v53 = vmul.bf16 1069105081, %v8308_v63  ;;  %v13724_v30 = vld [vmem:[#allocation122_spill] sm:$0xff]  ;;  %v13728_v34 = vld [vmem:[#allocation23_spill] sm:$0xff] }
 0x1d3   : > { %v2268_v14 = vmax.f32 %v2267_v45, %v13721_v15  ;;  %4156 = vmatprep.subr.bf16.mxu0 %v6292_v44  ;;  %v2158_v10 = vmax.f32 %v2157_v28, %v13722_v0  ;;  %v13725_v45 = vld [vmem:[#allocation125_spill] sm:$0xff]  ;;  %v8619_v15 = vpop.f32.mrb[110].mxu0  ;;  %v8621_v42 = vpop.f32.mrb[108].mxu1  ;;  %6307 = vpow.bf16 %v3799_v58  ;;  %v3424_v28 = vmul.bf16 1069105081, %v8489_v38  ;;  %v13734_v38 = vld [vmem:[#allocation119_spill] sm:$0xff] }
 0x1d4   : > { %6163 = vmatmul.mubr.msk.bf16.gmra.mrb[212].mxu0 %vm361_vm2, %v6950_v19  ;;  %6179 = vmatmul.mubr.msk.bf16.gmra.mrb[212].mxu1 %vm361_vm2, %v6950_v19  ;;  %v6294_v19 = vpop.eup %6293  ;;  %v2232_v32 = vmax.f32 %v2231_v59, %v13724_v30  ;;  %13726 = vst [vmem:[#allocation64_spill] sm:$0xff] %v8621_v42  ;;  %v2196_v0 = vmax.f32 %v2195_v46, %v13728_v34  ;;  %v8626_v29 = vpop.f32.mrb[111].mxu0  ;;  %v13730_v59 = vld [vmem:[#allocation55_spill] sm:$0xff]  ;;  %6309 = vpow.bf16 %v3802_v57  ;;  %v3847_v21 = vmul.bf16 1069105081, %v13734_v38  ;;  %v13739_v38 = vld [vmem:[#allocation41_spill] sm:$0xff] }
 0x1d5   : > { %1712 = vmatprep.mubr.bf16.mxu0 %v13424_v54  ;;  %1905 = vmatprep.mubr.bf16.mxu1 %v13424_v54  ;;  %v2269_v44 = vmax.f32 %v2268_v14, %v13725_v45  ;;  %v6296_v56 = vpop.eup %6295  ;;  %v2159_v33 = vmax.f32 %v2158_v10, %v13727_v6  ;;  %v8628_v63 = vpop.f32.mrb[109].mxu1  ;;  %v3850_v30 = vmul.bf16 1069105081, %v13730_v59  ;;  %v13731_v14 = vld [vmem:[#allocation29_spill] sm:$0xff]  ;;  %6311 = vpow.bf16 %v3376_v8  ;;  %v6951_v57 = vld [vmem:[%s12897_s1 + $0x30] sm:$0xff]  }
 0x1d6   : > { %4157 = vmatpush1.bf16.msra.mxu0 %v6294_v19  ;;  %13729 = vst [vmem:[#allocation68_spill] sm:$0xff] %v8628_v63  ;;  %v2233_v45 = vmax.f32 %v2232_v32, %v13731_v14  ;;  %v8633_v58 = vpop.f32.mrb[110].mxu1  ;;  %v13735_v10 = vld [vmem:[#allocation25_spill] sm:$0xff]  ;;  %v13736_v19 = vld [vmem:[#allocation31_spill] sm:$0xff]  ;;  %v6298_v32 = vpop.eup %6297  ;;  %6313 = vpow.bf16 %v3373_v53 }
 0x1d7   : > { %v2270_v4 = vmax.f32 %v2269_v44, %v13732_v2  ;;  %4158 = vmatprep.subr.bf16.mxu0 %v6296_v56  ;;  %13733 = vst [vmem:[#allocation70_spill] sm:$0xff] %v8633_v58  ;;  %v2160_v46 = vmax.f32 %v2159_v33, %v13735_v10  ;;  %v2197_v34 = vmax.f32 %v2196_v0, %v13736_v19  ;;  %v8638_v6 = vpop.f32.mrb[111].mxu1  ;;  %v3421_v56 = vmul.bf16 1069105081, %v8316_v50  ;;  %v13738_v44 = vld [vmem:[#allocation37_spill] sm:$0xff]  ;;  %v6300_v33 = vpop.eup %6299  ;;  %v13740_v2 = vld [vmem:[#allocation43_spill] sm:$0xff] }
 0x1d8   : > { %13737 = vst [vmem:[#allocation74_spill] sm:$0xff] %v8638_v6  ;;  %v2234_v59 = vmax.f32 %v2233_v45, %v13738_v44  ;;  %v3472_v0 = vmul.bf16 1069105081, %v8501_v35  ;;  %6315 = vpow.bf16 %v3424_v28  ;;  %v13741_v19 = vld [vmem:[#allocation61_spill] sm:$0xff]  ;;  %v3898_v50 = vmul.bf16 1069105081, %v13742_v47  ;;  %v6302_v47 = vpop.eup %6301 }
 0x1d9   : > { %v2271_v8 = vmax.f32 %v2270_v4, %v13739_v38  ;;  %v2161_v14 = vmax.f32 %v2160_v46, %v13740_v2  ;;  %v2198_v10 = vmax.f32 %v2197_v34, %v13741_v19  ;;  %6317 = vpow.bf16 %v3850_v30  ;;  %v13743_v53 = vld [vmem:[#allocation47_spill] sm:$0xff]  ;;  %v13744_v44 = vld [vmem:[#allocation65_spill] sm:$0xff]  ;;  %v8655_v38 = vpop.f32.mrb[112].mxu0  ;;  %v13745_v35 = vld [vmem:[#allocation120_spill] sm:$0xff] }
 0x1da   : > { %4159 = vmatpush1.bf16.msra.mxu0 %v6298_v32  ;;  %v2235_v45 = vmax.f32 %v2234_v59, %v13743_v53  ;;  %v3895_v28 = vmul.bf16 1069105081, %v13745_v35  ;;  %6319 = vpow.bf16 %v3847_v21  ;;  %v13746_v46 = vld [vmem:[#allocation77_spill] sm:$0xff]  ;;  %v13747_v32 = vld [vmem:[#allocation83_spill] sm:$0xff]  ;;  %v3469_v30 = vmul.bf16 1069105081, %v8318_v52  ;;  %v6304_v35 = vpop.eup %6303 }
 0x1db   : > { %v2272_v4 = vmax.f32 %v2271_v8, %v13744_v44  ;;  %4160 = vmatprep.subr.bf16.mxu0 %v6300_v33  ;;  %v2162_v34 = vmax.f32 %v2161_v14, %v13746_v46  ;;  %v2199_v19 = vmax.f32 %v2198_v10, %v13747_v32  ;;  %6321 = vpow.bf16 %v3421_v56  ;;  %v13749_v59 = vld [vmem:[#allocation79_spill] sm:$0xff]  ;;  %v13750_v33 = vld [vmem:[#allocation85_spill] sm:$0xff]  ;;  %v8668_v2 = vpop.f32.mrb[112].mxu1 }
 0x1dc   : > { %6164 = vmatmul.mubr.msk.bf16.gmra.mrb[216].mxu0 %vm361_vm2, %v6951_v57  ;;  %6180 = vmatmul.mubr.msk.bf16.gmra.mrb[216].mxu1 %vm361_vm2, %v6951_v57  ;;  %v8661_v57 = vpop.f32.mrb[113].mxu0  ;;  %v2236_v8 = vmax.f32 %v2235_v45, %v13749_v59  ;;  %13752 = vst [vmem:[#allocation82_spill] sm:$0xff] %v8668_v2  ;;  %v3520_v21 = vmul.bf16 1069105081, %v8509_v26  ;;  %6323 = vpow.bf16 %v3472_v0  ;;  %v13753_v14 = vld [vmem:[#allocation93_spill] sm:$0xff]  ;;  %v8675_v52 = vpop.f32.mrb[113].mxu1 }
 0x1dd   : > { %1722 = vmatprep.mubr.bf16.mxu0 %v13424_v54  ;;  %1915 = vmatprep.mubr.bf16.mxu1 %v13424_v54  ;;  %13748 = vst [vmem:[#allocation76_spill] sm:$0xff] %v8661_v57  ;;  %v2273_v44 = vmax.f32 %v2272_v4, %v13750_v33  ;;  %v8666_v53 = vpop.f32.mrb[114].mxu0  ;;  %v2163_v10 = vmax.f32 %v2162_v34, %v13753_v14  ;;  %v13754_v32 = vld [vmem:[#allocation89_spill] sm:$0xff]  ;;  %13756 = vst [vmem:[#allocation88_spill] sm:$0xff] %v8675_v52  ;;  %v13757_v56 = vld [vmem:[#allocation67_spill] sm:$0xff]  ;;  %6325 = vpow.bf16 %v3898_v50  ;;  %v8680_v2 = vpop.f32.mrb[114].mxu1 }
 0x1de   : > { %13751 = vst [vmem:[#allocation80_spill] sm:$0xff] %v8666_v53  ;;  %v2200_v46 = vmax.f32 %v2199_v19, %v13754_v32  ;;  %4161 = vmatpush1.bf16.msra.mxu0 %v6302_v47  ;;  %v8673_v57 = vpop.f32.mrb[115].mxu0  ;;  %v3946_v45 = vmul.bf16 1069105081, %v13757_v56  ;;  %v13758_v4 = vld [vmem:[#allocation8_spill] sm:$0xff]  ;;  %13760 = vst [vmem:[#allocation49_spill] sm:$0xff] %v8680_v2  ;;  %v6306_v26 = vpop.eup %6305  ;;  %6327 = vpow.bf16 %v3895_v28 }
 0x1df   : > { %13755 = vst [vmem:[#allocation86_spill] sm:$0xff] %v8673_v57  ;;  %v2237_v33 = vmax.f32 %v2236_v8, %v13758_v4  ;;  %v13759_v59 = vld [vmem:[#allocation12_spill] sm:$0xff]  ;;  %4162 = vmatprep.subr.bf16.mxu0 %v6304_v35  ;;  %v13761_v0 = vld [vmem:[#allocation121_spill] sm:$0xff]  ;;  %v13762_v19 = vld [vmem:[#allocation6_spill] sm:$0xff]  ;;  %v8685_v57 = vpop.f32.mrb[115].mxu1  ;;  %6329 = vpow.bf16 %v3469_v30 }
 0x1e0   : > { %v2274_v53 = vmax.f32 %v2273_v44, %v13759_v59  ;;  %v3943_v34 = vmul.bf16 1069105081, %v13761_v0  ;;  %v2164_v47 = vmax.f32 %v2163_v10, %v13762_v19  ;;  %v13763_v32 = vld [vmem:[#allocation10_spill] sm:$0xff]  ;;  %13764 = vst [vmem:[#allocation115_spill] sm:$0xff] %v8685_v57  ;;  %v6952_v50 = vld [vmem:[%s12897_s1 + $0x38] sm:$0xff]   ;;  %v6308_v44 = vpop.eup %6307  ;;  %6331 = vpow.bf16 %v3520_v21  ;;  %v13772_v21 = vld [vmem:[#allocation123_spill] sm:$0xff] }
 0x1e1   : > { %v2201_v14 = vmax.f32 %v2200_v46, %v13763_v32  ;;  %v3517_v8 = vmul.bf16 1069105081, %v8323_v20  ;;  %v13765_v35 = vld [vmem:[#allocation14_spill] sm:$0xff]  ;;  %v13766_v0 = vld [vmem:[#allocation16_spill] sm:$0xff]  ;;  %v6310_v10 = vpop.eup %6309  ;;  %v3568_v46 = vmul.bf16 1069105081, %v8514_v5  ;;  %6333 = vpow.bf16 %v3946_v45 }
 0x1e2   : > { %v2238_v56 = vmax.f32 %v2237_v33, %v13765_v35  ;;  %v2275_v28 = vmax.f32 %v2274_v53, %v13766_v0  ;;  %v13767_v59 = vld [vmem:[#allocation18_spill] sm:$0xff]  ;;  %v13768_v32 = vld [vmem:[#allocation21_spill] sm:$0xff]  ;;  %4163 = vmatpush1.bf16.msra.mxu0 %v6306_v26  ;;  %v6312_v57 = vpop.eup %6311  ;;  %v13769_v20 = vld [vmem:[#allocation71_spill] sm:$0xff]  ;;  %v8702_v2 = vpop.f32.mrb[116].mxu0  ;;  %6335 = vpow.bf16 %v3943_v34 }
 0x1e3   : > { %v2165_v4 = vmax.f32 %v2164_v47, %v13767_v59  ;;  %v2202_v19 = vmax.f32 %v2201_v14, %v13768_v32  ;;  %v3994_v30 = vmul.bf16 1069105081, %v13769_v20  ;;  %v13770_v33 = vld [vmem:[#allocation27_spill] sm:$0xff]  ;;  %v13771_v53 = vld [vmem:[#allocation33_spill] sm:$0xff]  ;;  %4164 = vmatprep.subr.bf16.mxu0 %v6310_v10  ;;  %v6314_v5 = vpop.eup %6313  ;;  %v3991_v47 = vmul.bf16 1069105081, %v13772_v21  ;;  %4189 = vmatprep.subr.bf16.mxu1 %v6312_v57 }
 0x1e4   : > { %6165 = vmatmul.mubr.msk.bf16.gmra.mrb[220].mxu0 %vm361_vm2, %v6952_v50  ;;  %6181 = vmatmul.mubr.msk.bf16.gmra.mrb[220].mxu1 %vm361_vm2, %v6952_v50  ;;  %v2239_v35 = vmax.f32 %v2238_v56, %v13770_v33  ;;  %v2276_v0 = vmax.f32 %v2275_v28, %v13771_v53  ;;  %v13773_v14 = vld [vmem:[#allocation24_spill] sm:$0xff]  ;;  %v13774_v50 = vld [vmem:[#allocation30_spill] sm:$0xff]  ;;  %v8708_v20 = vpop.f32.mrb[117].mxu0  ;;  %v6316_v45 = vpop.eup %6315  ;;  %v3565_v56 = vmul.bf16 1069105081, %v8325_v55  ;;  %6337 = vpow.bf16 %v3517_v8  ;;  %v13780_v33 = vld [vmem:[#allocation87_spill] sm:$0xff] }
 0x1e5   : > { %1732 = vmatprep.mubr.bf16.mxu0 %v13424_v54  ;;  %1925 = vmatprep.mubr.bf16.mxu1 %v13424_v54  ;;  %v2166_v26 = vmax.f32 %v2165_v4, %v13773_v14  ;;  %v2203_v32 = vmax.f32 %v2202_v19, %v13774_v50  ;;  %v8713_v53 = vpop.f32.mrb[118].mxu0  ;;  %v8715_v21 = vpop.f32.mrb[116].mxu1  ;;  %v3616_v4 = vmul.bf16 1069105081, %v8516_v1  ;;  %6339 = vpow.bf16 %v3568_v46 }
 0x1e6   : > { %4190 = vmatpush1.bf16.msra.mxu1 %v6314_v5  ;;  %v2240_v28 = vmax.f32 %v2239_v35, %v8320_v41  ;;  %v2277_v10 = vmax.f32 %v2276_v0, %v8331_v17  ;;  %13775 = vst [vmem:[#allocation118_spill] sm:$0xff] %v8715_v21  ;;  %v6318_v57 = vpop.eup %6317  ;;  %4165 = vmatpush1.bf16.msra.mxu0 %v6308_v44  ;;  %v8720_v55 = vpop.f32.mrb[119].mxu0  ;;  %v13778_v0 = vld [vmem:[#allocation73_spill] sm:$0xff]  ;;  %6341 = vpow.bf16 %v3994_v30 }
 0x1e7   : > { %4191 = vmatprep.subr.bf16.mxu1 %v6316_v45  ;;  %v2167_v34 = vmax.f32 %v2166_v26, %v8342_v62  ;;  %v2204_v19 = vmax.f32 %v2203_v32, %v8353_v61  ;;  %13776 = vst [vmem:[#allocation53_spill] sm:$0xff] %v8720_v55  ;;  %v8722_v8 = vpop.f32.mrb[117].mxu1  ;;  %v6320_v35 = vpop.eup %6319  ;;  %v4042_v5 = vmul.bf16 1069105081, %v13778_v0  ;;  %v13779_v17 = vld [vmem:[#allocation81_spill] sm:$0xff]  ;;  %4166 = vmatprep.subr.bf16.mxu0 %v6318_v57  ;;  %v13781_v26 = vld [vmem:[#allocation124_spill] sm:$0xff]  ;;  %6343 = vpow.bf16 %v3991_v47 }
 0x1e8   : > { %13777 = vst [vmem:[#allocation55_spill] sm:$0xff] %v8722_v8  ;;  %v2241_v41 = vmax.f32 %v2240_v28, %v13779_v17  ;;  %v2278_v50 = vmax.f32 %v2277_v10, %v13780_v33  ;;  %v8727_v1 = vpop.f32.mrb[118].mxu1  ;;  %v6322_v46 = vpop.eup %6321  ;;  %v4039_v45 = vmul.bf16 1069105081, %v13781_v26  ;;  %v13782_v32 = vld [vmem:[#allocation78_spill] sm:$0xff]  ;;  %v13783_v61 = vld [vmem:[#allocation84_spill] sm:$0xff]  ;;  %6345 = vpow.bf16 %v3565_v56 }
 0x1e9   : > { %v2168_v44 = vmax.f32 %v2167_v34, %v13782_v32  ;;  %v2205_v62 = vmax.f32 %v2204_v19, %v13783_v61  ;;  %v8732_v14 = vpop.f32.mrb[119].mxu1  ;;  %v6953_v30 = vld [vmem:[%s12897_s1 + $0x40] sm:$0xff]   ;;  %v6324_v28 = vpop.eup %6323  ;;  %v13785_v10 = vld [vmem:[#allocation39_spill] sm:$0xff]  ;;  %v13786_v0 = vld [vmem:[#allocation90_spill] sm:$0xff]  ;;  %v3664_v19 = vmul.bf16 1069105081, %v8522_v23  ;;  %6347 = vpow.bf16 %v3616_v4 }
 0x1ea   : > { %13784 = vst [vmem:[#allocation119_spill] sm:$0xff] %v8732_v14  ;;  %v3613_v57 = vmul.bf16 1069105081, %v13785_v10  ;;  %4192 = vmatpush1.bf16.msra.mxu1 %v6322_v46  ;;  %v2242_v26 = vmax.f32 %v2241_v41, %v13786_v0  ;;  %v13787_v47 = vld [vmem:[#allocation7_spill] sm:$0xff]  ;;  %v6326_v34 = vpop.eup %6325  ;;  %v13788_v17 = vld [vmem:[#allocation9_spill] sm:$0xff]  ;;  %4167 = vmatpush1.bf16.msra.mxu0 %v6320_v35  ;;  %v13790_v10 = vld [vmem:[#allocation126_spill] sm:$0xff]  ;;  %6349 = vpow.bf16 %v4042_v5 }
 0x1eb   : > { %v2279_v33 = vmax.f32 %v2278_v50, %v13787_v47  ;;  %4193 = vmatprep.subr.bf16.mxu1 %v6324_v28  ;;  %v2169_v61 = vmax.f32 %v2168_v44, %v13788_v17  ;;  %v13789_v32 = vld [vmem:[#allocation11_spill] sm:$0xff]  ;;  %v6328_v14 = vpop.eup %6327  ;;  %v4090_v56 = vmul.bf16 1069105081, %v13790_v10  ;;  %v13792_v0 = vld [vmem:[#allocation20_spill] sm:$0xff]  ;;  %4168 = vmatprep.subr.bf16.mxu0 %v6326_v34  ;;  %v8749_v47 = vpop.f32.mrb[120].mxu0  ;;  %v13793_v4 = vld [vmem:[#allocation106_spill] sm:$0xff]  ;;  %6351 = vpow.bf16 %v4039_v45 }
 0x1ec   : > { %6166 = vmatmul.mubr.msk.bf16.gmra.mrb[224].mxu0 %vm361_vm2, %v6953_v30  ;;  %v2206_v59 = vmax.f32 %v2205_v62, %v13789_v32  ;;  %v13791_v46 = vld [vmem:[#allocation15_spill] sm:$0xff]  ;;  %6182 = vmatmul.mubr.msk.bf16.gmra.mrb[224].mxu1 %vm361_vm2, %v6953_v30  ;;  %v6330_v23 = vpop.eup %6329  ;;  %v4087_v28 = vmul.bf16 1069105081, %v13793_v4  ;;  %v13794_v44 = vld [vmem:[#allocation13_spill] sm:$0xff]  ;;  %v8754_v17 = vpop.f32.mrb[121].mxu0  ;;  %6353 = vpow.bf16 %v3613_v57  ;;  %v13797_v30 = vld [vmem:[#allocation22_spill] sm:$0xff] }
 0x1ed   : > { %1742 = vmatprep.mubr.bf16.mxu0 %v13424_v54  ;;  %v2243_v41 = vmax.f32 %v2242_v26, %v13791_v46  ;;  %v2280_v50 = vmax.f32 %v2279_v33, %v13792_v0  ;;  %v2170_v62 = vmax.f32 %v2169_v61, %v13794_v44  ;;  %v13795_v35 = vld [vmem:[#allocation17_spill] sm:$0xff]  ;;  %1935 = vmatprep.mubr.bf16.mxu1 %v13424_v54  ;;  %v6332_v5 = vpop.eup %6331  ;;  %v13796_v26 = vld [vmem:[#allocation42_spill] sm:$0xff]  ;;  %v8760_v46 = vpop.f32.mrb[122].mxu0  ;;  %6355 = vpow.bf16 %v3664_v19 }
 0x1ee   : > { %v2207_v32 = vmax.f32 %v2206_v59, %v13795_v35  ;;  %v3661_v33 = vmul.bf16 1069105081, %v13796_v26  ;;  %4194 = vmatpush1.bf16.msra.mxu1 %v6330_v23  ;;  %v13798_v10 = vld [vmem:[#allocation26_spill] sm:$0xff]  ;;  %v8762_v45 = vpop.f32.mrb[120].mxu1  ;;  %v6334_v61 = vpop.eup %6333  ;;  %v3712_v59 = vmul.bf16 1069105081, %v8524_v11  ;;  %4169 = vmatpush1.bf16.msra.mxu0 %v6328_v14  ;;  %6357 = vpow.bf16 %v4090_v56 }
 0x1ef   : > { %v2244_v34 = vmax.f32 %v2243_v41, %v13797_v30  ;;  %v2281_v0 = vmax.f32 %v2280_v50, %v13798_v10  ;;  %4195 = vmatprep.subr.bf16.mxu1 %v6332_v5  ;;  %v2171_v4 = vmax.f32 %v2170_v62, %v8491_v49  ;;  %v8767_v57 = vpop.f32.mrb[123].mxu0  ;;  %v8769_v23 = vpop.f32.mrb[121].mxu1  ;;  %4170 = vmatprep.subr.bf16.mxu0 %v6334_v61  ;;  %6359 = vpow.bf16 %v4087_v28  ;;  %v6954_v62 = vld [vmem:[%s12897_s1 + $0x48] sm:$0xff]   ;;  %v13801_v5 = vld [vmem:[#allocation48_spill] sm:$0xff] }
 0x1f0   : > { %v2208_v35 = vmax.f32 %v2207_v32, %v8518_v36  ;;  %13799 = vst [vmem:[#allocation59_spill] sm:$0xff] %v8769_v23  ;;  %v6336_v41 = vpop.eup %6335  ;;  %v8773_v10 = vpop.f32.mrb[122].mxu1  ;;  %6361 = vpow.bf16 %v3661_v33  ;;  %v3760_v61 = vmul.bf16 1069105081, %v8526_v12 }
 0x1f1   : > { %v2245_v50 = vmax.f32 %v2244_v34, %v8493_v39  ;;  %v2282_v26 = vmax.f32 %v2281_v0, %v8520_v3  ;;  %v6338_v11 = vpop.eup %6337  ;;  %v2172_v19 = vmax.f32 %v2171_v4, %v8530_v60  ;;  %v8777_v14 = vpop.f32.mrb[123].mxu1  ;;  %v3709_v0 = vmul.bf16 1069105081, %v13801_v5 }
 0x1f2   : > { %v2209_v32 = vmax.f32 %v2208_v35, %v8542_v13  ;;  %13800 = vst [vmem:[#allocation120_spill] sm:$0xff] %v8777_v14  ;;  %v6340_v56 = vpop.eup %6339  ;;  %4196 = vmatpush1.bf16.msra.mxu1 %v6338_v11  ;;  %6363 = vpow.bf16 %v3712_v59  ;;  %4171 = vmatpush1.bf16.msra.mxu0 %v6336_v41 }
 0x1f3   : > { %v2246_v34 = vmax.f32 %v2245_v50, %v8532_v40  ;;  %v2283_v28 = vmax.f32 %v2282_v26, %v8544_v24  ;;  %v6342_v35 = vpop.eup %6341  ;;  %4197 = vmatprep.subr.bf16.mxu1 %v6340_v56  ;;  %v2173_v4 = vmax.f32 %v2172_v19, %v8566_v25  ;;  %v8793_v50 = vpop.f32.mrb[124].mxu0  ;;  %v13802_v19 = vld [vmem:[#allocation51_spill] sm:$0xff]  ;;  %6365 = vpow.bf16 %v3709_v0 }
 0x1f4   : > { %6167 = vmatmul.mubr.msk.bf16.gmra.mrb[228].mxu0 %vm361_vm2, %v6954_v62  ;;  %v2210_v3 = vmax.f32 %v2209_v32, %v8579_v51  ;;  %v6344_v39 = vpop.eup %6343  ;;  %4172 = vmatprep.subr.bf16.mxu0 %v6342_v35  ;;  %v8797_v56 = vpop.f32.mrb[125].mxu0  ;;  %v3757_v32 = vmul.bf16 1069105081, %v13802_v19  ;;  %6367 = vpow.bf16 %v3760_v61 }
 0x1f5   : > { %1752 = vmatprep.mubr.bf16.mxu0 %v13424_v54  ;;  %v2247_v33 = vmax.f32 %v2246_v34, %v8568_v43  ;;  %v2284_v11 = vmax.f32 %v2283_v28, %v8581_v37  ;;  %6183 = vmatmul.mubr.msk.bf16.gmra.mrb[228].mxu1 %vm361_vm2, %v6954_v62  ;;  %v6346_v26 = vpop.eup %6345  ;;  %v2174_v12 = vmax.f32 %v2173_v4, %v8585_v27  ;;  %v8803_v34 = vpop.f32.mrb[126].mxu0 }
 0x1f6   : > { %v2211_v59 = vmax.f32 %v2210_v3, %v8596_v9  ;;  %1945 = vmatprep.mubr.bf16.mxu1 %v13424_v54  ;;  %v6348_v41 = vpop.eup %6347  ;;  %4198 = vmatpush1.bf16.msra.mxu1 %v6346_v26  ;;  %v8805_v28 = vpop.f32.mrb[124].mxu1  ;;  %v3808_v3 = vmul.bf16 1069105081, %v8528_v7  ;;  %6369 = vpow.bf16 %v3757_v32 }
 0x1f7   : > { %v2248_v5 = vmax.f32 %v2247_v33, %v8587_v22  ;;  %v2285_v62 = vmax.f32 %v2284_v11, %v8598_v16  ;;  %v6350_v35 = vpop.eup %6349  ;;  %4199 = vmatprep.subr.bf16.mxu1 %v6348_v41  ;;  %v2175_v4 = vmax.f32 %v2174_v12, %v8608_v18  ;;  %4173 = vmatpush1.bf16.msra.mxu0 %v6344_v39  ;;  %v8810_v0 = vpop.f32.mrb[127].mxu0  ;;  %v6955_v39 = vld [vmem:[%s12897_s1 + $0x50] sm:$0xff]  }
 0x1f8   : > { %v2212_v37 = vmax.f32 %v2211_v59, %v8614_v48  ;;  %v8812_v26 = vpop.f32.mrb[125].mxu1  ;;  %v6352_v33 = vpop.eup %6351  ;;  %4174 = vmatprep.subr.bf16.mxu0 %v6350_v35  ;;  %6371 = vpow.bf16 %v3808_v3  ;;  %v13809_v3 = vld [vmem:[#allocation80_spill] sm:$0xff] }
 0x1f9   : > { %v2249_v11 = vmax.f32 %v2248_v5, %v8621_v42  ;;  %v2286_v19 = vmax.f32 %v2285_v62, %v8628_v63  ;;  %v8816_v16 = vpop.f32.mrb[126].mxu1  ;;  %v6354_v7 = vpop.eup %6353  ;;  %v2176_v61 = vmax.f32 %v2175_v4, %v8619_v15  ;;  %v13804_v5 = vld [vmem:[#allocation54_spill] sm:$0xff]  ;;  %v3856_v4 = vmul.bf16 1069105081, %v8534_v31  ;;  %v13805_v42 = vld [vmem:[#allocation76_spill] sm:$0xff] }
 0x1fa   : > { %v2213_v12 = vmax.f32 %v2212_v37, %v8626_v29  ;;  %v8820_v41 = vpop.f32.mrb[127].mxu1  ;;  %v6356_v59 = vpop.eup %6355  ;;  %v3805_v24 = vmul.bf16 1069105081, %v13804_v5  ;;  %4200 = vmatpush1.bf16.msra.mxu1 %v6354_v7  ;;  %v13806_v5 = vld [vmem:[#allocation82_spill] sm:$0xff] }
 0x1fb   : > { %13803 = vst [vmem:[#allocation67_spill] sm:$0xff] %v8820_v41  ;;  %v2250_v62 = vmax.f32 %v2249_v11, %v8633_v58  ;;  %v2287_v35 = vmax.f32 %v2286_v19, %v8638_v6  ;;  %v6358_v37 = vpop.eup %6357  ;;  %4201 = vmatprep.subr.bf16.mxu1 %v6356_v59  ;;  %v2177_v63 = vmax.f32 %v2176_v61, %v8655_v38  ;;  %v8836_v11 = vpop.f32.mrb[128].mxu0  ;;  %v13808_v6 = vld [vmem:[#allocation57_spill] sm:$0xff]  ;;  %v13810_v58 = vld [vmem:[#allocation86_spill] sm:$0xff] }
 0x1fc   : > { %6168 = vmatmul.mubr.msk.bf16.gmra.mrb[232].mxu0 %vm361_vm2, %v6955_v39  ;;  %v2214_v22 = vmax.f32 %v2213_v12, %v13805_v42  ;;  %v6360_v43 = vpop.eup %6359  ;;  %13807 = vst [vmem:[#allocation121_spill] sm:$0xff] %v8836_v11  ;;  %v3853_v31 = vmul.bf16 1069105081, %v13808_v6  ;;  %v8841_v40 = vpop.f32.mrb[129].mxu0  ;;  %6373 = vpow.bf16 %v3805_v24  ;;  %v13812_v12 = vld [vmem:[#allocation38_spill] sm:$0xff] }
 0x1fd   : > { %1762 = vmatprep.mubr.bf16.mxu0 %v13424_v54  ;;  %4175 = vmatpush1.bf16.msra.mxu0 %v6352_v33  ;;  %v2251_v32 = vmax.f32 %v2250_v62, %v13806_v5  ;;  %v2288_v7 = vmax.f32 %v2287_v35, %v8675_v52  ;;  %v6362_v19 = vpop.eup %6361  ;;  %v2178_v59 = vmax.f32 %v2177_v63, %v13809_v3  ;;  %v3904_v62 = vmul.bf16 1069105081, %v13812_v12  ;;  %v13813_v35 = vld [vmem:[#allocation49_spill] sm:$0xff]  ;;  %v8847_v5 = vpop.f32.mrb[130].mxu0 }
 0x1fe   : > { %4176 = vmatprep.subr.bf16.mxu0 %v6358_v37  ;;  %6184 = vmatmul.mubr.msk.bf16.gmra.mrb[232].mxu1 %vm361_vm2, %v6955_v39  ;;  %v2215_v61 = vmax.f32 %v2214_v22, %v13810_v58  ;;  %13811 = vst [vmem:[#allocation71_spill] sm:$0xff] %v8841_v40  ;;  %v6364_v33 = vpop.eup %6363  ;;  %v13814_v37 = vld [vmem:[#allocation115_spill] sm:$0xff]  ;;  %13815 = vst [vmem:[#allocation123_spill] sm:$0xff] %v8847_v5  ;;  %v8849_v6 = vpop.f32.mrb[128].mxu1  ;;  %6375 = vpow.bf16 %v3856_v4  ;;  %v2302_v24 = vmax.f32 %v8836_v11, %v8847_v5 }
 0x1ff   : > { %1955 = vmatprep.mubr.bf16.mxu1 %v13424_v54  ;;  %4202 = vmatpush1.bf16.msra.mxu1 %v6362_v19  ;;  %v2252_v39 = vmax.f32 %v2251_v32, %v13813_v35  ;;  %v2289_v52 = vmax.f32 %v2288_v7, %v13814_v37  ;;  %13816 = vst [vmem:[#allocation73_spill] sm:$0xff] %v8849_v6  ;;  %v8855_v12 = vpop.f32.mrb[131].mxu0  ;;  %v8857_v19 = vpop.f32.mrb[129].mxu1  ;;  %v13819_v32 = vld [vmem:[#allocation63_spill] sm:$0xff]  ;;  %6377 = vpow.bf16 %v3853_v31 }
 0x200   : > { %4203 = vmatprep.subr.bf16.mxu1 %v6364_v33  ;;  %v2179_v22 = vmax.f32 %v2178_v59, %v8702_v2  ;;  %v2216_v63 = vmax.f32 %v2215_v61, %v8708_v20  ;;  %13817 = vst [vmem:[#allocation124_spill] sm:$0xff] %v8855_v12  ;;  %13818 = vst [vmem:[#allocation39_spill] sm:$0xff] %v8857_v19  ;;  %v3901_v7 = vmul.bf16 1069105081, %v13819_v32  ;;  %v8864_v59 = vpop.f32.mrb[130].mxu1  ;;  %v6366_v61 = vpop.eup %6365  ;;  %6379 = vpow.bf16 %v3904_v62 }
 0x201   : > { %4177 = vmatpush1.bf16.msra.mxu0 %v6360_v43  ;;  %v2253_v37 = vmax.f32 %v2252_v39, %v8715_v21  ;;  %v2290_v35 = vmax.f32 %v2289_v52, %v8722_v8  ;;  %v2339_v4 = vmax.f32 %v8841_v40, %v8855_v12  ;;  %13820 = vst [vmem:[#allocation126_spill] sm:$0xff] %v8864_v59  ;;  %v13821_v43 = vld [vmem:[#allocation40_spill] sm:$0xff]  ;;  %v8871_v32 = vpop.f32.mrb[131].mxu1  ;;  %v6368_v39 = vpop.eup %6367  ;;  %v13823_v12 = vld [vmem:[#allocation119_spill] sm:$0xff]  ;;  %v13825_v21 = vld [vmem:[#allocation69_spill] sm:$0xff] }
 0x202   : > { %v3952_v33 = vmul.bf16 1069105081, %v13821_v43  ;;  %v2180_v5 = vmax.f32 %v2179_v22, %v8713_v53  ;;  %v2217_v11 = vmax.f32 %v2216_v63, %v8720_v55  ;;  %v2376_v30 = vmax.f32 %v8849_v6, %v8864_v59  ;;  %13822 = vst [vmem:[#allocation106_spill] sm:$0xff] %v8871_v32  ;;  %v6956_v52 = vld [vmem:[%s12897_s1 + $0x58] sm:$0xff]   ;;  %v13824_v59 = vld [vmem:[#allocation66_spill] sm:$0xff] }
 0x203   : > { %4204 = vmatpush1.bf16.msra.mxu1 %v6366_v61  ;;  %v2254_v43 = vmax.f32 %v2253_v37, %v8727_v1  ;;  %v2291_v22 = vmax.f32 %v2290_v35, %v13823_v12  ;;  %v2413_v63 = vmax.f32 %v8857_v19, %v8871_v32  ;;  %v3949_v6 = vmul.bf16 1069105081, %v13824_v59  ;;  %v13826_v61 = vld [vmem:[#allocation44_spill] sm:$0xff]  ;;  %v8890_v32 = vpop.f32.mrb[132].mxu0  ;;  %v6370_v19 = vpop.eup %6369 }
 0x204   : > { %6169 = vmatmul.mubr.msk.bf16.gmra.mrb[236].mxu0 %vm361_vm2, %v6956_v52  ;;  %4205 = vmatprep.subr.bf16.mxu1 %v6368_v39  ;;  %v2181_v40 = vmax.f32 %v2180_v5, %v8749_v47  ;;  %v2218_v8 = vmax.f32 %v2217_v11, %v8754_v17  ;;  %v3997_v31 = vmul.bf16 1069105081, %v13825_v21  ;;  %v4000_v55 = vmul.bf16 1069105081, %v13826_v61  ;;  %13827 = vst [vmem:[#allocation13_spill] sm:$0xff] %v8890_v32  ;;  %v8895_v59 = vpop.f32.mrb[133].mxu0  ;;  %v6372_v21 = vpop.eup %6371 }
 0x205   : > { %1772 = vmatprep.mubr.bf16.mxu0 %v13424_v54  ;;  %v2255_v37 = vmax.f32 %v2254_v43, %v8762_v45  ;;  %v2292_v35 = vmax.f32 %v2291_v22, %v8769_v23  ;;  %6381 = vpow.bf16 %v3901_v7  ;;  %v2303_v11 = vmax.f32 %v2302_v24, %v8890_v32  ;;  %13828 = vst [vmem:[#allocation42_spill] sm:$0xff] %v8895_v59  ;;  %v8901_v7 = vpop.f32.mrb[134].mxu0  ;;  %v13874_v23 = vld [vmem:[#allocation60_spill] sm:$0xff] }
 0x206   : > { %6185 = vmatmul.mubr.msk.bf16.gmra.mrb[236].mxu1 %vm361_vm2, %v6956_v52  ;;  %v2182_v62 = vmax.f32 %v2181_v40, %v8760_v46  ;;  %v2219_v5 = vmax.f32 %v2218_v8, %v8767_v57  ;;  %6383 = vpow.bf16 %v3952_v33  ;;  %v2340_v43 = vmax.f32 %v2339_v4, %v8895_v59  ;;  %13829 = vst [vmem:[#allocation48_spill] sm:$0xff] %v8901_v7  ;;  %v8903_v40 = vpop.f32.mrb[132].mxu1 }
 0x207   : > { %1965 = vmatprep.mubr.bf16.mxu1 %v13424_v54  ;;  %4206 = vmatpush1.bf16.msra.mxu1 %v6370_v19  ;;  %v2256_v39 = vmax.f32 %v2255_v37, %v8773_v10  ;;  %v2293_v52 = vmax.f32 %v2292_v35, %v8777_v14  ;;  %13830 = vst [vmem:[#allocation51_spill] sm:$0xff] %v8903_v40  ;;  %v8909_v19 = vpop.f32.mrb[135].mxu0  ;;  %v8911_v61 = vpop.f32.mrb[133].mxu1  ;;  %6385 = vpow.bf16 %v3949_v6 }
 0x208   : > { %4207 = vmatprep.subr.bf16.mxu1 %v6372_v21  ;;  %v2183_v8 = vmax.f32 %v2182_v62, %v8793_v50  ;;  %v2220_v24 = vmax.f32 %v2219_v5, %v8797_v56  ;;  %v2304_v22 = vmax.f32 %v2303_v11, %v8901_v7  ;;  %v2377_v33 = vmax.f32 %v2376_v30, %v8903_v40  ;;  %v8917_v59 = vpop.f32.mrb[134].mxu1  ;;  %v6374_v62 = vpop.eup %6373  ;;  %v13834_v5 = vld [vmem:[#allocation50_spill] sm:$0xff] }
 0x209   : > { %13831 = vst [vmem:[#allocation54_spill] sm:$0xff] %v8909_v19  ;;  %13832 = vst [vmem:[#allocation76_spill] sm:$0xff] %v8911_v61  ;;  %v2257_v37 = vmax.f32 %v2256_v39, %v8805_v28  ;;  %v2294_v4 = vmax.f32 %v2293_v52, %v8812_v26  ;;  %v2341_v35 = vmax.f32 %v2340_v43, %v8909_v19  ;;  %v4048_v32 = vmul.bf16 1069105081, %v13834_v5  ;;  %v8923_v7 = vpop.f32.mrb[135].mxu1  ;;  %v6957_v39 = vld [vmem:[%s12897_s1 + $0x60] sm:$0xff]  }
 0x20a   : > { %v2414_v21 = vmax.f32 %v2413_v63, %v8911_v61  ;;  %13833 = vst [vmem:[#allocation57_spill] sm:$0xff] %v8917_v59  ;;  %v2184_v11 = vmax.f32 %v2183_v8, %v8803_v34  ;;  %v2221_v30 = vmax.f32 %v2220_v24, %v8810_v0  ;;  %v2378_v40 = vmax.f32 %v2377_v33, %v8917_v59  ;;  %v6376_v63 = vpop.eup %6375  ;;  %v8938_v5 = vpop.f32.mrb[136].mxu0 }
 0x20b   : > { %13835 = vst [vmem:[#allocation80_spill] sm:$0xff] %v8923_v7  ;;  %4208 = vmatpush1.bf16.msra.mxu1 %v6374_v62  ;;  %v8930_v52 = vmax.f32 %v2257_v37, %v8816_v16  ;;  %v8933_v43 = vmax.f32 %v2294_v4, %v8820_v41  ;;  %6387 = vpow.bf16 %v4000_v55  ;;  %13836 = vst [vmem:[#allocation86_spill] sm:$0xff] %v8938_v5  ;;  %v6378_v6 = vpop.eup %6377  ;;  %v8941_v4 = vpop.f32.mrb[137].mxu0 }
 0x20c   : > { %6170 = vmatmul.mubr.msk.bf16.gmra.mrb[240].mxu0 %vm361_vm2, %v6957_v39  ;;  %v2415_v8 = vmax.f32 %v2414_v21, %v8923_v7  ;;  %4209 = vmatprep.subr.bf16.mxu1 %v6376_v63  ;;  %v2185_v24 = vrot.slane %v2184_v11, 4  ;;  %v2222_v33 = vrot.slane %v2221_v30, 4  ;;  %6389 = vpow.bf16 %v3997_v31  ;;  %13837 = vst [vmem:[#allocation38_spill] sm:$0xff] %v8941_v4  ;;  %v6380_v21 = vpop.eup %6379  ;;  %v13838_v7 = vld [vmem:[#allocation92_spill] sm:$0xff]  ;;  %v8947_v19 = vpop.f32.mrb[138].mxu0 }
 0x20d   : > { %1782 = vmatprep.mubr.bf16.mxu0 %v13424_v54  ;;  %v2305_v61 = vmax.f32 %v2304_v22, %v8938_v5  ;;  %v4096_v55 = vmul.bf16 1069105081, %v13838_v7  ;;  %v13839_v63 = vld [vmem:[#allocation72_spill] sm:$0xff]  ;;  %6391 = vpow.bf16 %v4048_v32  ;;  %13840 = vst [vmem:[#allocation63_spill] sm:$0xff] %v8947_v19  ;;  %v8949_v31 = vpop.f32.mrb[136].mxu1 }
 0x20e   : > { %6186 = vmatmul.mubr.msk.bf16.gmra.mrb[240].mxu1 %vm361_vm2, %v6957_v39  ;;  %v2186_v62 = vmax.f32 %v2184_v11, %v2185_v24  ;;  %v2223_v37 = vmax.f32 %v2221_v30, %v2222_v33  ;;  %v4045_v59 = vmul.bf16 1069105081, %v13839_v63  ;;  %v2342_v39 = vmax.f32 %v2341_v35, %v8941_v4  ;;  %13841 = vst [vmem:[#allocation40_spill] sm:$0xff] %v8949_v31  ;;  %v8955_v33 = vpop.f32.mrb[139].mxu0  ;;  %v8957_v7 = vpop.f32.mrb[137].mxu1  ;;  %v13847_v4 = vld [vmem:[#allocation91_spill] sm:$0xff] }
 0x20f   : > { %1975 = vmatprep.mubr.bf16.mxu1 %v13424_v54  ;;  %4210 = vmatpush1.bf16.msra.mxu1 %v6378_v6  ;;  %v2306_v30 = vmax.f32 %v2305_v61, %v8947_v19  ;;  %v8953_v24 = vmax.f32 %v2378_v40, %v8949_v31  ;;  %13843 = vst [vmem:[#allocation69_spill] sm:$0xff] %v8955_v33  ;;  %13844 = vst [vmem:[#allocation44_spill] sm:$0xff] %v8957_v7  ;;  %v8963_v63 = vpop.f32.mrb[138].mxu1  ;;  %v4093_v5 = vmul.bf16 1069105081, %v13847_v4  ;;  %v6958_v31 = vld [vmem:[%s12897_s1 + $0x68] sm:$0xff]  }
 0x210   : > { %4211 = vmatprep.subr.bf16.mxu1 %v6380_v21  ;;  %v2187_v11 = vrot.slane %v2186_v62, 2  ;;  %v2224_v22 = vrot.slane %v2223_v37, 2  ;;  %v6382_v32 = vpop.eup %6381  ;;  %v2343_v6 = vmax.f32 %v2342_v39, %v8955_v33  ;;  %v8961_v35 = vmax.f32 %v2415_v8, %v8957_v7  ;;  %13846 = vst [vmem:[#allocation92_spill] sm:$0xff] %v8963_v63  ;;  %v8968_v61 = vpop.f32.mrb[139].mxu1  ;;  %v13859_v33 = vld [vmem:[#allocation102_spill] sm:$0xff]  ;;  %v13861_v19 = vld [vmem:[#allocation111_spill] sm:$0xff] }
 0x211   : > { %13842 = vst [vmem:[#allocation66_spill] sm:$0xff] %v8953_v24  ;;  %v6384_v21 = vpop.eup %6383  ;;  %13848 = vst [vmem:[#allocation72_spill] sm:$0xff] %v8968_v61  ;;  %6393 = vpow.bf16 %v4045_v59  ;;  %v2259_v39 = vrot.slane %v8930_v52, 4  ;;  %v13862_v61 = vld [vmem:[#allocation113_spill] sm:$0xff]  ;;  %v13867_v24 = vld [vmem:[#allocation43_spill] sm:$0xff] }
 0x212   : > { %13845 = vst [vmem:[#allocation50_spill] sm:$0xff] %v8961_v35  ;;  %v2188_v14 = vmax.f32 %v2186_v62, %v2187_v11  ;;  %v8974_v8 = vmax.f32 %v2223_v37, %v2224_v22  ;;  %6395 = vpow.bf16 %v4096_v55  ;;  %v8981_v11 = vpop.f32.mrb[140].mxu0  ;;  %v6386_v40 = vpop.eup %6385  ;;  %v13866_v63 = vld [vmem:[#allocation25_spill] sm:$0xff] }
 0x213   : > { %4212 = vmatpush1.bf16.msra.mxu1 %v6382_v32  ;;  %13849 = vst [vmem:[#allocation91_spill] sm:$0xff] %v8981_v11  ;;  %v8986_v59 = vmax.f32 %v2306_v30, %v8981_v11  ;;  %v8988_v37 = vpop.f32.mrb[141].mxu0  ;;  %6397 = vpow.bf16 %v4093_v5  ;;  %v8993_v32 = vmax.f32 %v8930_v52, %v2259_v39  ;;  %v13856_v52 = vld [vmem:[#allocation96_spill] sm:$0xff] }
 0x214   : > { %6171 = vmatmul.mubr.msk.bf16.gmra.mrb[244].mxu0 %vm361_vm2, %v6958_v31  ;;  %4213 = vmatprep.subr.bf16.mxu1 %v6384_v21  ;;  %v2189_v4 = vrot.slane %v2188_v14, 1  ;;  %13851 = vst [vmem:[#allocation128_spill] sm:$0xff] %v8988_v37  ;;  %v2226_v55 = vrot.slane %v8974_v8, 1  ;;  %v9000_v21 = vpop.f32.mrb[140].mxu1  ;;  %v13860_v11 = vld [vmem:[#allocation104_spill] sm:$0xff] }
 0x215   : > { %1792 = vmatprep.mubr.bf16.mxu0 %v13424_v54  ;;  %13850 = vst [vmem:[#allocation127_spill] sm:$0xff] %v8986_v59  ;;  %13854 = vst [vmem:[#allocation131_spill] sm:$0xff] %v9000_v21 }
 0x216   : > { %6187 = vmatmul.mubr.msk.bf16.gmra.mrb[244].mxu1 %vm361_vm2, %v6958_v31  ;;  %v8983_v7 = vmax.f32 %v2188_v14, %v2189_v4  ;;  %v6388_v22 = vpop.eup %6387  ;;  %v8996_v31 = vmax.f32 %v2343_v6, %v8988_v37  ;;  %v8998_v14 = vpop.f32.mrb[142].mxu0  ;;  %v9072_v41 = vmax.f32 %v8974_v8, %v2226_v55 }
 0x217   : > { %1985 = vmatprep.mubr.bf16.mxu1 %v13424_v54  ;;  %4214 = vmatpush1.bf16.msra.mxu1 %v6386_v40  ;;  %13853 = vst [vmem:[#allocation130_spill] sm:$0xff] %v8998_v14  ;;  %v13855_v40 = vld [vmem:[#allocation94_spill] sm:$0xff]  ;;  %v9010_v62 = vpop.f32.mrb[143].mxu0  ;;  %v9012_v6 = vpop.f32.mrb[141].mxu1 }
 0x218   : > { %13852 = vst [vmem:[#allocation129_spill] sm:$0xff] %v8996_v31  ;;  %4215 = vmatprep.subr.bf16.mxu1 %v6388_v22  ;;  %v3082_v30 = vsub.f32 %v8793_v50, %v8983_v7  ;;  %v3098_v5 = vsub.f32 %v8803_v34, %v8983_v7  ;;  %v2602_v4 = vsub.f32 %v13855_v40, %v8983_v7  ;;  %13857 = vst [vmem:[#allocation94_spill] sm:$0xff] %v9010_v62  ;;  %v6390_v37 = vpop.eup %6389  ;;  %v9022_v35 = vpop.f32.mrb[142].mxu1 }
 0x219   : > { %v2618_v39 = vsub.f32 %v13856_v52, %v8983_v7  ;;  %13858 = vst [vmem:[#allocation96_spill] sm:$0xff] %v9012_v6  ;;  %v2634_v22 = vsub.f32 %v13859_v33, %v8983_v7  ;;  %v2650_v50 = vsub.f32 %v13860_v11, %v8983_v7  ;;  %v2666_v34 = vsub.f32 %v13861_v19, %v8983_v7  ;;  %v6392_v52 = vpop.eup %6391  ;;  %v13865_v6 = vld [vmem:[#allocation19_spill] sm:$0xff]  ;;  %v9032_v21 = vpop.f32.mrb[143].mxu1 }
 0x21a   : > { %v2682_v40 = vsub.f32 %v13862_v61, %v8983_v7  ;;  %13863 = vst [vmem:[#allocation102_spill] sm:$0xff] %v9022_v35  ;;  %v9024_v31 = vpack.c.bf16 %v3098_v5, %v3082_v30  ;;  %v2698_v62 = vsub.f32 %v13865_v6, %v8983_v7  ;;  %v2714_v33 = vsub.f32 %v13866_v63, %v8983_v7  ;;  %v6959_v19 = vld [vmem:[%s12897_s1 + $0x70] sm:$0xff]   ;;  %v13869_v61 = vld [vmem:[#allocation77_spill] sm:$0xff]  ;;  %v13871_v63 = vld [vmem:[#allocation6_spill] sm:$0xff] }
 0x21b   : > { %v2730_v11 = vsub.f32 %v13867_v24, %v8983_v7  ;;  %13868 = vst [vmem:[#allocation111_spill] sm:$0xff] %v9032_v21  ;;  %4216 = vmatpush1.bf16.msra.mxu1 %v6390_v37  ;;  %v2746_v30 = vsub.f32 %v13869_v61, %v8983_v7  ;;  %v13870_v5 = vld [vmem:[#allocation93_spill] sm:$0xff]  ;;  %v2778_v35 = vsub.f32 %v13871_v63, %v8983_v7  ;;  %v13872_v24 = vld [vmem:[#allocation18_spill] sm:$0xff]  ;;  %v13873_v21 = vld [vmem:[#allocation24_spill] sm:$0xff]  ;;  %v9087_v55 = vpop.f32.mrb[144].mxu1 }
 0x21c   : > { %13864 = vst [vmem:[#allocation104_spill] sm:$0xff] %v9024_v31  ;;  %6172 = vmatmul.mubr.msk.bf16.gmra.mrb[248].mxu0 %vm361_vm2, %v6959_v19  ;;  %v2762_v6 = vsub.f32 %v13870_v5, %v8983_v7  ;;  %v2794_v59 = vsub.f32 %v13872_v24, %v8983_v7  ;;  %4217 = vmatprep.subr.bf16.mxu1 %v6392_v52  ;;  %v13875_v37 = vld [vmem:[#allocation78_spill] sm:$0xff]  ;;  %v13876_v5 = vld [vmem:[#allocation9_spill] sm:$0xff]  ;;  %13880 = vst [vmem:[#allocation43_spill] sm:$0xff] %v9087_v55 }
 0x21d   : > { %v2810_v14 = vsub.f32 %v13873_v21, %v8983_v7  ;;  %v2826_v12 = vsub.f32 %v13874_v23, %v8983_v7  ;;  %v2842_v31 = vsub.f32 %v13875_v37, %v8983_v7  ;;  %1802 = vmatprep.mubr.bf16.mxu0 %v13424_v54  ;;  %v2858_v63 = vsub.f32 %v13876_v5, %v8983_v7  ;;  %v9063_v23 = vpop.f32.mrb[144].mxu0  ;;  %v6394_v37 = vpop.eup %6393 }
 0x21e   : > { %v2874_v24 = vsub.f32 %v13794_v44, %v8983_v7  ;;  %v2890_v52 = vsub.f32 %v8491_v49, %v8983_v7  ;;  %v2906_v21 = vsub.f32 %v8530_v60, %v8983_v7  ;;  %6188 = vmatmul.mubr.msk.bf16.gmra.mrb[248].mxu1 %vm361_vm2, %v6959_v19  ;;  %13877 = vst [vmem:[#allocation113_spill] sm:$0xff] %v9063_v23  ;;  %v9074_v49 = vpop.f32.mrb[145].mxu0  ;;  %v6396_v60 = vpop.eup %6395 }
 0x21f   : > { %v2922_v61 = vsub.f32 %v8566_v25, %v8983_v7  ;;  %v2938_v5 = vsub.f32 %v8585_v27, %v8983_v7  ;;  %v2954_v44 = vsub.f32 %v8608_v18, %v8983_v7  ;;  %13878 = vst [vmem:[#allocation19_spill] sm:$0xff] %v9074_v49  ;;  %1995 = vmatprep.mubr.bf16.mxu1 %v13424_v54  ;;  %v9085_v8 = vpop.f32.mrb[146].mxu0  ;;  %v9099_v49 = vpop.f32.mrb[145].mxu1 }
 0x220   : > { %4218 = vmatpush1.bf16.msra.mxu1 %v6394_v37  ;;  %v2970_v19 = vsub.f32 %v8619_v15, %v8983_v7  ;;  %v2986_v25 = vsub.f32 %v8655_v38, %v8983_v7  ;;  %v3002_v27 = vsub.f32 %v13809_v3, %v8983_v7  ;;  %v3018_v18 = vsub.f32 %v8702_v2, %v8983_v7  ;;  %v9097_v3 = vpop.f32.mrb[147].mxu0  ;;  %v9104_v2 = vld [vmem:[%s12898_s2 + $0x4] ss:$8 sps:$4 sm:$0xff]  }
 0x221   : > { %13879 = vst [vmem:[#allocation25_spill] sm:$0xff] %v9085_v8  ;;  %4219 = vmatprep.subr.bf16.mxu1 %v6396_v60  ;;  %v3034_v54 = vsub.f32 %v8713_v53, %v8983_v7  ;;  %v3050_v15 = vsub.f32 %v8749_v47, %v8983_v7  ;;  %v3066_v38 = vsub.f32 %v8760_v46, %v8983_v7  ;;  %13881 = vst [vmem:[#allocation77_spill] sm:$0xff] %v9097_v3  ;;  %v9114_v46 = vpop.f32.mrb[146].mxu1  ;;  %v6398_v7 = vpop.eup %6397 }
 0x222   : > { %v9095_v37 = vpack.c.bf16 %v2618_v39, %v2602_v4  ;;  %13882 = vst [vmem:[#allocation93_spill] sm:$0xff] %v9099_v49  ;;  %v9106_v60 = vpack.c.bf16 %v2650_v50, %v2634_v22  ;;  %v9108_v53 = vpack.c.bf16 %v2682_v40, %v2666_v34  ;;  %v9110_v55 = vpack.c.bf16 %v2714_v33, %v2698_v62  ;;  %v9124_v8 = vpop.f32.mrb[147].mxu1  ;;  %v6960_v62 = vld [vmem:[%s12897_s1 + $0x78] sm:$0xff]   ;;  %v13889_v40 = vld [vmem:[#allocation95_spill] sm:$0xff] }
 0x223   : > { %v9112_v47 = vpack.c.bf16 %v2746_v30, %v2730_v11  ;;  %13883 = vst [vmem:[#allocation6_spill] sm:$0xff] %v9114_v46  ;;  %v9116_v4 = vpack.c.bf16 %v2778_v35, %v2762_v6  ;;  %v9118_v39 = vpack.c.bf16 %v2810_v14, %v2794_v59  ;;  %v9120_v49 = vpack.c.bf16 %v2842_v31, %v2826_v12  ;;  %v13890_v11 = vld [vmem:[#allocation98_spill] sm:$0xff]  ;;  %v13891_v6 = vld [vmem:[#allocation103_spill] sm:$0xff] }
 0x224   : > { %v9122_v3 = vpack.c.bf16 %v2874_v24, %v2858_v63  ;;  %13884 = vst [vmem:[#allocation18_spill] sm:$0xff] %v9124_v8  ;;  %6173 = vmatmul.mubr.msk.bf16.gmra.mrb[252].mxu0 %vm361_vm2, %v6960_v62  ;;  %4220 = vmatpush1.bf16.msra.mxu1 %v6398_v7  ;;  %v9130_v22 = vpack.c.bf16 %v2906_v21, %v2890_v52  ;;  %v13892_v63 = vld [vmem:[#allocation107_spill] sm:$0xff]  ;;  %v13911_v8 = vld [vmem:[#allocation84_spill] sm:$0xff] }
 0x225   : > { %v9132_v50 = vpack.c.bf16 %v2938_v5, %v2922_v61  ;;  %v9134_v35 = vpack.c.bf16 %v2970_v19, %v2954_v44  ;;  %v9136_v59 = vpack.c.bf16 %v3002_v27, %v2986_v25  ;;  %v9138_v12 = vpack.c.bf16 %v3034_v54, %v3018_v18  ;;  %4178 = vmatprep.mubr.bf16.mxu0 %v9104_v2  ;;  %v13895_v5 = vld [vmem:[#allocation116_spill] sm:$0xff]  ;;  %v13896_v19 = vld [vmem:[#allocation23_spill] sm:$0xff]  ;;  %v6268_v18 = vld [vmem:[%s12898_s2] ss:$8 sps:$4 sm:$0xff]  }
 0x226   : > { %v9140_v31 = vpack.c.bf16 %v3066_v38, %v3050_v15  ;;  %v3083_v14 = vsub.f32 %v8797_v56, %v9072_v41  ;;  %v3099_v34 = vsub.f32 %v8810_v0, %v9072_v41  ;;  %v2603_v33 = vsub.f32 %v13889_v40, %v9072_v41  ;;  %6189 = vmatmul.mubr.msk.bf16.gmra.mrb[252].mxu1 %vm361_vm2, %v6960_v62  ;;  %v9156_v56 = vpop.f32.mrb[148].mxu0  ;;  %v13894_v0 = vld [vmem:[#allocation112_spill] sm:$0xff]  ;;  %v13898_v54 = vld [vmem:[#allocation31_spill] sm:$0xff]  ;;  %v13899_v38 = vld [vmem:[#allocation61_spill] sm:$0xff] }
 0x227   : > { %13885 = vst [vmem:[#allocation24_spill] sm:$0xff] %v9134_v35  ;;  %13886 = vst [vmem:[#allocation60_spill] sm:$0xff] %v9136_v59  ;;  %v2619_v30 = vsub.f32 %v13890_v11, %v9072_v41  ;;  %v2635_v61 = vsub.f32 %v13891_v6, %v9072_v41  ;;  %v2651_v24 = vsub.f32 %v13892_v63, %v9072_v41  ;;  %v9166_v27 = vpop.f32.mrb[149].mxu0  ;;  %4221 = vmatprep.mubr.bf16.mxu1 %v9104_v2  ;;  %v13900_v62 = vld [vmem:[#allocation83_spill] sm:$0xff]  ;;  %v9182_v6 = vpop.f32.mrb[148].mxu1  ;;  %v13904_v63 = vld [vmem:[#allocation10_spill] sm:$0xff] }
 0x228   : > { %13887 = vst [vmem:[#allocation78_spill] sm:$0xff] %v9138_v12  ;;  %13888 = vst [vmem:[#allocation9_spill] sm:$0xff] %v9140_v31  ;;  %v9158_v52 = vpack.c.bf16 %v3099_v34, %v3083_v14  ;;  %v2667_v21 = vsub.f32 %v13894_v0, %v9072_v41  ;;  %v2683_v44 = vsub.f32 %v13895_v5, %v9072_v41  ;;  %v13901_v34 = vld [vmem:[#allocation89_spill] sm:$0xff]  ;;  %v9180_v11 = vpop.f32.mrb[150].mxu0 }
 0x229   : > { %13893 = vst [vmem:[#allocation95_spill] sm:$0xff] %v9156_v56  ;;  %v2699_v25 = vsub.f32 %v13896_v19, %v9072_v41  ;;  %13897 = vst [vmem:[#allocation98_spill] sm:$0xff] %v9166_v27  ;;  %v2715_v15 = vsub.f32 %v13898_v54, %v9072_v41  ;;  %v2731_v7 = vsub.f32 %v13899_v38, %v9072_v41  ;;  %v13905_v5 = vld [vmem:[#allocation21_spill] sm:$0xff]  ;;  %v13906_v54 = vld [vmem:[#allocation30_spill] sm:$0xff]  ;;  %v13907_v38 = vrot.slane %v8993_v32, 2  ;;  %v9193_v12 = vpop.f32.mrb[151].mxu0 }
 0x22a   : > { %v2747_v14 = vsub.f32 %v13900_v62, %v9072_v41  ;;  %v2763_v40 = vsub.f32 %v13901_v34, %v9072_v41  ;;  %13902 = vst [vmem:[#allocation103_spill] sm:$0xff] %v9180_v11  ;;  %13903 = vst [vmem:[#allocation107_spill] sm:$0xff] %v9182_v6  ;;  %v2779_v0 = vsub.f32 %v13904_v63, %v9072_v41  ;;  %v9195_v34 = vpop.f32.mrb[149].mxu1  ;;  %v13910_v11 = vld [vmem:[#allocation75_spill] sm:$0xff]  ;;  %v13913_v56 = vld [vmem:[#allocation17_spill] sm:$0xff] }
 0x22b   : > { %v2795_v19 = vsub.f32 %v13905_v5, %v9072_v41  ;;  %v2811_v31 = vsub.f32 %v13906_v54, %v9072_v41  ;;  %v2262_v62 = vmax.f32 %v8993_v32, %v13907_v38  ;;  %13908 = vst [vmem:[#allocation112_spill] sm:$0xff] %v9193_v12  ;;  %13909 = vst [vmem:[#allocation116_spill] sm:$0xff] %v9195_v34  ;;  %v13912_v27 = vld [vmem:[#allocation11_spill] sm:$0xff]  ;;  %v9205_v46 = vpop.f32.mrb[150].mxu1 }
 0x22c   : > { %v2827_v6 = vsub.f32 %v13910_v11, %v9072_v41  ;;  %v2843_v63 = vsub.f32 %v13911_v8, %v9072_v41  ;;  %v2859_v5 = vsub.f32 %v13912_v27, %v9072_v41  ;;  %v2875_v54 = vsub.f32 %v13913_v56, %v9072_v41  ;;  %13914 = vst [vmem:[#allocation23_spill] sm:$0xff] %v9205_v46  ;;  %v9213_v34 = vpop.f32.mrb[151].mxu1 }
 0x22d   : > { %v2891_v32 = vsub.f32 %v8518_v36, %v9072_v41  ;;  %v2907_v38 = vsub.f32 %v8542_v13, %v9072_v41  ;;  %v2923_v11 = vsub.f32 %v8579_v51, %v9072_v41  ;;  %13915 = vst [vmem:[#allocation31_spill] sm:$0xff] %v9213_v34  ;;  %4179 = vmatmul.mubr.bf16.vlgmr.msra.gmra.mrb[0].mxu0 %v6268_v18  ;;  %v13916_v34 = vld [vmem:[#allocation53_spill] sm:$0xff]  ;;  %v2263_v46 = vrot.slane %v2262_v62, 1 }
 0x22e   : > { %v2939_v8 = vsub.f32 %v8596_v9, %v9072_v41  ;;  %v2955_v56 = vsub.f32 %v8614_v48, %v9072_v41  ;;  %v2971_v27 = vsub.f32 %v8626_v29, %v9072_v41  ;;  %v2987_v36 = vsub.f32 %v13805_v42, %v9072_v41  ;;  %4264 = vmatprep.mubr.bf16.mxu0 %v9104_v2 }
 0x22f   : > { %v3003_v13 = vsub.f32 %v13810_v58, %v9072_v41  ;;  %v3019_v51 = vsub.f32 %v8708_v20, %v9072_v41  ;;  %v3035_v9 = vsub.f32 %v13916_v34, %v9072_v41  ;;  %v3051_v48 = vsub.f32 %v8754_v17, %v9072_v41  ;;  %4222 = vmatmul.mubr.bf16.vlgmr.msra.gmra.mrb[0].mxu1 %v6268_v18 }
 0x230   : > { %v3067_v29 = vsub.f32 %v8767_v57, %v9072_v41  ;;  %v2296_v42 = vrot.slane %v8933_v43, 4  ;;  %v9235_v12 = vpack.c.bf16 %v2619_v30, %v2603_v33  ;;  %4307 = vmatprep.mubr.bf16.mxu1 %v9104_v2  ;;  %v9238_v58 = vpack.c.bf16 %v2651_v24, %v2635_v61  ;;  %v9255_v30 = vpop.f32.mrb[152].mxu0  ;;  %v9257_v2 = vpop.f32.mrb[152].mxu1 }
 0x231   : > { %v9240_v20 = vpack.c.bf16 %v2683_v44, %v2667_v21  ;;  %v9242_v59 = vpack.c.bf16 %v2715_v15, %v2699_v25  ;;  %v9244_v34 = vmax.f32 %v2262_v62, %v2263_v46  ;;  %v9247_v23 = vpack.c.bf16 %v2747_v14, %v2731_v7  ;;  %13917 = vst [vmem:[#allocation61_spill] sm:$0xff] %v9255_v30  ;;  %v9269_v44 = vpop.f32.mrb[153].mxu1 }
 0x232   : > { %v2297_v17 = vmax.f32 %v8933_v43, %v2296_v42  ;;  %v9249_v57 = vpack.c.bf16 %v2779_v0, %v2763_v40  ;;  %v9251_v41 = vpack.c.bf16 %v2811_v31, %v2795_v19  ;;  %v9253_v33 = vpack.c.bf16 %v2843_v63, %v2827_v6  ;;  %13918 = vst [vmem:[#allocation83_spill] sm:$0xff] %v9257_v2  ;;  %v9267_v43 = vpop.f32.mrb[153].mxu0  ;;  %v9279_v7 = vpop.f32.mrb[154].mxu1  ;;  %v13930_v6 = vld [vmem:[#allocation97_spill] sm:$0xff]  ;;  %v13933_v63 = vld [vmem:[#allocation100_spill] sm:$0xff] }
 0x233   : > { %v9259_v61 = vpack.c.bf16 %v2875_v54, %v2859_v5  ;;  %v9261_v24 = vpack.c.bf16 %v2907_v38, %v2891_v32  ;;  %v9263_v46 = vpack.c.bf16 %v2939_v8, %v2923_v11  ;;  %v9265_v21 = vpack.c.bf16 %v2971_v27, %v2955_v56  ;;  %13923 = vst [vmem:[#allocation75_spill] sm:$0xff] %v9267_v43  ;;  %v9277_v15 = vpop.f32.mrb[154].mxu0  ;;  %v9289_v62 = vpop.f32.mrb[155].mxu1  ;;  %v13934_v54 = vld [vmem:[#allocation105_spill] sm:$0xff]  ;;  %v13939_v27 = vld [vmem:[#allocation122_spill] sm:$0xff] }
 0x234   : > { %13924 = vst [vmem:[#allocation84_spill] sm:$0xff] %v9269_v44  ;;  %v9271_v31 = vpack.c.bf16 %v3003_v13, %v2987_v36  ;;  %v9273_v25 = vpack.c.bf16 %v3035_v9, %v3019_v51  ;;  %v9275_v18 = vpack.c.bf16 %v3067_v29, %v3051_v48  ;;  %13928 = vst [vmem:[#allocation132_spill] sm:$0xff] %v9277_v15  ;;  %v9287_v19 = vpop.f32.mrb[155].mxu0  ;;  %v13935_v38 = vld [vmem:[#allocation109_spill] sm:$0xff]  ;;  %v2298_v13 = vrot.slane %v2297_v17, 2  ;;  %v9307_v9 = vpop.f32.mrb[156].mxu1 }
 0x235   : > { %13919 = vst [vmem:[#allocation89_spill] sm:$0xff] %v9259_v61  ;;  %13920 = vst [vmem:[#allocation10_spill] sm:$0xff] %v9261_v24  ;;  %v3084_v14 = vsub.f32 %v8805_v28, %v9244_v34  ;;  %v3100_v40 = vsub.f32 %v8816_v16, %v9244_v34  ;;  %v2604_v0 = vsub.f32 %v13930_v6, %v9244_v34  ;;  %v9297_v28 = vpop.f32.mrb[156].mxu0  ;;  %v13938_v16 = vld [vmem:[#allocation114_spill] sm:$0xff]  ;;  %v13942_v48 = vld [vmem:[#allocation29_spill] sm:$0xff] }
 0x236   : > { %13921 = vst [vmem:[#allocation21_spill] sm:$0xff] %v9263_v46  ;;  %13922 = vst [vmem:[#allocation30_spill] sm:$0xff] %v9265_v21  ;;  %v2620_v5 = vsub.f32 %v13933_v63, %v9244_v34  ;;  %v2636_v32 = vsub.f32 %v13934_v54, %v9244_v34  ;;  %v2652_v11 = vsub.f32 %v13935_v38, %v9244_v34  ;;  %v9305_v51 = vpop.f32.mrb[157].mxu0  ;;  %v13943_v42 = vld [vmem:[#allocation37_spill] sm:$0xff]  ;;  %v9317_v54 = vpop.f32.mrb[157].mxu1  ;;  %v13947_v38 = vld [vmem:[#allocation79_spill] sm:$0xff] }
 0x237   : > { %13925 = vst [vmem:[#allocation11_spill] sm:$0xff] %v9271_v31  ;;  %13926 = vst [vmem:[#allocation17_spill] sm:$0xff] %v9273_v25  ;;  %v9299_v8 = vpack.c.bf16 %v3100_v40, %v3084_v14  ;;  %v2668_v56 = vsub.f32 %v13938_v16, %v9244_v34  ;;  %v2684_v36 = vsub.f32 %v13939_v27, %v9244_v34  ;;  %v13944_v14 = vld [vmem:[#allocation47_spill] sm:$0xff]  ;;  %v9315_v63 = vpop.f32.mrb[158].mxu0  ;;  %v13948_v27 = vld [vmem:[#allocation8_spill] sm:$0xff] }
 0x238   : > { %13927 = vst [vmem:[#allocation53_spill] sm:$0xff] %v9275_v18  ;;  %13929 = vst [vmem:[#allocation133_spill] sm:$0xff] %v9279_v7  ;;  %v2700_v29 = vsub.f32 %v13942_v48, %v9244_v34  ;;  %v2716_v6 = vsub.f32 %v13943_v42, %v9244_v34  ;;  %v2732_v40 = vsub.f32 %v13944_v14, %v9244_v34  ;;  %v9323_v25 = vpop.f32.mrb[159].mxu0  ;;  %v13951_v48 = vld [vmem:[#allocation14_spill] sm:$0xff]  ;;  %v13967_v43 = vld [vmem:[#allocation49_spill] sm:$0xff] }
 0x239   : > { %13931 = vst [vmem:[#allocation97_spill] sm:$0xff] %v9287_v19  ;;  %13932 = vst [vmem:[#allocation134_spill] sm:$0xff] %v9289_v62  ;;  %v2748_v16 = vsub.f32 %v13947_v38, %v9244_v34  ;;  %v2764_v18 = vsub.f32 %v13948_v27, %v9244_v34  ;;  %v2780_v42 = vsub.f32 %v13951_v48, %v9244_v34  ;;  %v13955_v38 = vld [vmem:[#allocation81_spill] sm:$0xff]  ;;  %v13956_v27 = vld [vmem:[#allocation90_spill] sm:$0xff] }
 0x23a   : > { %13936 = vst [vmem:[#allocation100_spill] sm:$0xff] %v9297_v28  ;;  %13937 = vst [vmem:[#allocation105_spill] sm:$0xff] %v9299_v8  ;;  %v9325_v8 = vpop.f32.mrb[158].mxu1  ;;  %v2828_v31 = vsub.f32 %v13955_v38, %v9244_v34  ;;  %v2299_v28 = vmax.f32 %v2297_v17, %v2298_v13  ;;  %v13958_v48 = vld [vmem:[#allocation22_spill] sm:$0xff]  ;;  %v9384_v61 = vpack.c.bf16 %v2620_v5, %v2604_v0 }
 0x23b   : > { %13940 = vst [vmem:[#allocation109_spill] sm:$0xff] %v9305_v51  ;;  %13941 = vst [vmem:[#allocation114_spill] sm:$0xff] %v9307_v9  ;;  %v13952_v9 = vld [vmem:[#allocation27_spill] sm:$0xff]  ;;  %v2844_v51 = vsub.f32 %v13956_v27, %v9244_v34  ;;  %v2876_v7 = vsub.f32 %v13958_v48, %v9244_v34  ;;  %v13962_v38 = vld [vmem:[#allocation58_spill] sm:$0xff] }
 0x23c   : > { %13945 = vst [vmem:[#allocation122_spill] sm:$0xff] %v9315_v63  ;;  %13946 = vst [vmem:[#allocation29_spill] sm:$0xff] %v9317_v54  ;;  %v2796_v14 = vsub.f32 %v13952_v9, %v9244_v34  ;;  %v13953_v63 = vld [vmem:[#allocation36_spill] sm:$0xff]  ;;  %v9333_v54 = vpop.f32.mrb[159].mxu1  ;;  %v2940_v15 = vsub.f32 %v13962_v38, %v9244_v34  ;;  %v13965_v17 = vld [vmem:[#allocation70_spill] sm:$0xff]  ;;  %v3036_v38 = vsub.f32 %v8727_v1, %v9244_v34 }
 0x23d   : > { %13949 = vst [vmem:[#allocation37_spill] sm:$0xff] %v9323_v25  ;;  %13950 = vst [vmem:[#allocation47_spill] sm:$0xff] %v9325_v8  ;;  %v2812_v62 = vsub.f32 %v13953_v63, %v9244_v34  ;;  %v13957_v25 = vld [vmem:[#allocation15_spill] sm:$0xff]  ;;  %v13959_v9 = vld [vmem:[#allocation28_spill] sm:$0xff]  ;;  %v2972_v13 = vsub.f32 %v13965_v17, %v9244_v34  ;;  %v9371_v17 = vpop.f32.mrb[160].mxu1 }
 0x23e   : > { %13954 = vst [vmem:[#allocation79_spill] sm:$0xff] %v9333_v54  ;;  %v2860_v8 = vsub.f32 %v13957_v25, %v9244_v34  ;;  %v2892_v44 = vsub.f32 %v13959_v9, %v9244_v34  ;;  %v13960_v63 = vld [vmem:[#allocation34_spill] sm:$0xff]  ;;  %v13961_v54 = vld [vmem:[#allocation52_spill] sm:$0xff]  ;;  %v9353_v25 = vpop.f32.mrb[160].mxu0  ;;  %13971 = vst [vmem:[#allocation36_spill] sm:$0xff] %v9371_v17  ;;  %v9378_v35 = vpop.f32.mrb[161].mxu1 }
 0x23f   : > { %v2908_v19 = vsub.f32 %v13960_v63, %v9244_v34  ;;  %v2924_v2 = vsub.f32 %v13961_v54, %v9244_v34  ;;  %v13963_v27 = vld [vmem:[#allocation64_spill] sm:$0xff]  ;;  %13964 = vst [vmem:[#allocation8_spill] sm:$0xff] %v9353_v25  ;;  %v13966_v48 = vld [vmem:[#allocation82_spill] sm:$0xff]  ;;  %v3004_v63 = vsub.f32 %v13967_v43, %v9244_v34  ;;  %v9361_v30 = vpop.f32.mrb[161].mxu0  ;;  %v2300_v25 = vrot.slane %v2299_v28, 1  ;;  %13973 = vst [vmem:[#allocation90_spill] sm:$0xff] %v9378_v35 }
 0x240   : > { %v2956_v21 = vsub.f32 %v13963_v27, %v9244_v34  ;;  %v2988_v9 = vsub.f32 %v13966_v48, %v9244_v34  ;;  %13968 = vst [vmem:[#allocation14_spill] sm:$0xff] %v9361_v30  ;;  %v13969_v54 = vld [vmem:[#allocation118_spill] sm:$0xff]  ;;  %v3052_v27 = vsub.f32 %v8762_v45, %v9244_v34  ;;  %v9369_v24 = vpop.f32.mrb[162].mxu0  ;;  %v3379_v48 = vmul.bf16 1069105081, %v9095_v37 }
 0x241   : > { %v3020_v46 = vsub.f32 %v13969_v54, %v9244_v34  ;;  %13970 = vst [vmem:[#allocation27_spill] sm:$0xff] %v9369_v24  ;;  %v3068_v43 = vsub.f32 %v8773_v10, %v9244_v34  ;;  %v9376_v30 = vpop.f32.mrb[163].mxu0  ;;  %v9380_v54 = vmax.f32 %v2299_v28, %v2300_v25  ;;  %v3427_v1 = vmul.bf16 1069105081, %v9106_v60  ;;  %v9393_v34 = vpop.f32.mrb[162].mxu1 }
 0x242   : > { %13972 = vst [vmem:[#allocation81_spill] sm:$0xff] %v9376_v30  ;;  %6399 = vpow.bf16 %v3379_v48  ;;  %v3382_v45 = vmul.bf16 1069105081, %v9235_v12  ;;  %v3430_v17 = vmul.bf16 1069105081, %v9238_v58  ;;  %v9387_v24 = vpack.c.bf16 %v2652_v11, %v2636_v32  ;;  %13974 = vst [vmem:[#allocation15_spill] sm:$0xff] %v9393_v34 }
 0x243   : > { %v9389_v37 = vpack.c.bf16 %v2684_v36, %v2668_v56  ;;  %v9391_v10 = vpack.c.bf16 %v2716_v6, %v2700_v29  ;;  %v9395_v35 = vpop.f32.mrb[164].mxu0  ;;  %v9397_v28 = vpack.c.bf16 %v2748_v16, %v2732_v40  ;;  %v9399_v60 = vpack.c.bf16 %v2780_v42, %v2764_v18  ;;  %v9405_v0 = vpop.f32.mrb[163].mxu1  ;;  %v13995_v6 = vld [vmem:[#allocation101_spill] sm:$0xff]  ;;  %v13996_v16 = vld [vmem:[#allocation108_spill] sm:$0xff]  ;;  %v14002_v48 = vld [vmem:[#allocation35_spill] sm:$0xff] }
 0x244   : > { %13975 = vst [vmem:[#allocation22_spill] sm:$0xff] %v9395_v35  ;;  %v9401_v25 = vpack.c.bf16 %v2812_v62, %v2796_v14  ;;  %v9403_v12 = vpack.c.bf16 %v2844_v51, %v2828_v31  ;;  %13979 = vst [vmem:[#allocation58_spill] sm:$0xff] %v9405_v0  ;;  %v9407_v58 = vpop.f32.mrb[165].mxu0  ;;  %v9409_v5 = vpack.c.bf16 %v2876_v7, %v2860_v8  ;;  %v9419_v18 = vpop.f32.mrb[164].mxu1  ;;  %6401 = vpow.bf16 %v3382_v45  ;;  %v14003_v45 = vld [vmem:[#allocation41_spill] sm:$0xff]  ;;  %v14006_v40 = vld [vmem:[#allocation12_spill] sm:$0xff] }
 0x245   : > { %13976 = vst [vmem:[#allocation28_spill] sm:$0xff] %v9399_v60  ;;  %13980 = vst [vmem:[#allocation64_spill] sm:$0xff] %v9407_v58  ;;  %v9411_v32 = vpack.c.bf16 %v2908_v19, %v2892_v44  ;;  %v9413_v11 = vpack.c.bf16 %v2940_v15, %v2924_v2  ;;  %v9415_v56 = vpack.c.bf16 %v2972_v13, %v2956_v21  ;;  %v9417_v36 = vpop.f32.mrb[166].mxu0  ;;  %v9429_v7 = vpop.f32.mrb[165].mxu1  ;;  %v3478_v2 = vmul.bf16 1069105081, %v9240_v20 }
 0x246   : > { %13977 = vst [vmem:[#allocation34_spill] sm:$0xff] %v9401_v25  ;;  %13978 = vst [vmem:[#allocation52_spill] sm:$0xff] %v9403_v12  ;;  %v9421_v62 = vpack.c.bf16 %v3004_v63, %v2988_v9  ;;  %v9423_v31 = vpack.c.bf16 %v3036_v38, %v3020_v46  ;;  %v9425_v51 = vpack.c.bf16 %v3068_v43, %v3052_v27  ;;  %v9427_v29 = vpop.f32.mrb[167].mxu0  ;;  %v13992_v44 = vld [vmem:[#allocation67_spill] sm:$0xff]  ;;  %v9438_v46 = vpop.f32.mrb[166].mxu1  ;;  %6403 = vpow.bf16 %v3430_v17  ;;  %v13997_v20 = vld [vmem:[#allocation110_spill] sm:$0xff] }
 0x247   : > { %13981 = vst [vmem:[#allocation70_spill] sm:$0xff] %v9409_v5  ;;  %13982 = vst [vmem:[#allocation82_spill] sm:$0xff] %v9411_v32  ;;  %v3085_v21 = vsub.f32 %v8812_v26, %v9380_v54  ;;  %v3101_v15 = vsub.f32 %v13992_v44, %v9380_v54  ;;  %v13993_v19 = vld [vmem:[#allocation99_spill] sm:$0xff]  ;;  %v9446_v13 = vpop.f32.mrb[167].mxu1  ;;  %v14000_v9 = vld [vmem:[#allocation117_spill] sm:$0xff]  ;;  %v2701_v43 = vsub.f32 %v14002_v48, %v9380_v54  ;;  %6405 = vpow.bf16 %v3427_v1 }
 0x248   : > { %13983 = vst [vmem:[#allocation49_spill] sm:$0xff] %v9413_v11  ;;  %13984 = vst [vmem:[#allocation118_spill] sm:$0xff] %v9415_v56  ;;  %v14001_v38 = vld [vmem:[#allocation125_spill] sm:$0xff]  ;;  %v3475_v17 = vmul.bf16 1069105081, %v9108_v53  ;;  %v2717_v44 = vsub.f32 %v14003_v45, %v9380_v54  ;;  %6407 = vpow.bf16 %v3478_v2  ;;  %v14008_v53 = vld [vmem:[#allocation16_spill] sm:$0xff] }
 0x249   : > { %13985 = vst [vmem:[#allocation135_spill] sm:$0xff] %v9417_v36  ;;  %13986 = vst [vmem:[#allocation136_spill] sm:$0xff] %v9419_v18  ;;  %v9448_v26 = vpack.c.bf16 %v3101_v15, %v3085_v21  ;;  %v2685_v27 = vsub.f32 %v14001_v38, %v9380_v54  ;;  %v14004_v14 = vld [vmem:[#allocation65_spill] sm:$0xff]  ;;  %v3526_v21 = vmul.bf16 1069105081, %v9242_v59  ;;  %v2765_v38 = vsub.f32 %v14006_v40, %v9380_v54  ;;  %v9466_v8 = vpop.f32.mrb[168].mxu0 }
 0x24a   : > { %13987 = vst [vmem:[#allocation137_spill] sm:$0xff] %v9421_v62  ;;  %13988 = vst [vmem:[#allocation138_spill] sm:$0xff] %v9423_v31  ;;  %v14005_v15 = vld [vmem:[#allocation85_spill] sm:$0xff]  ;;  %v2781_v48 = vsub.f32 %v14008_v53, %v9380_v54  ;;  %v9474_v31 = vpop.f32.mrb[169].mxu0  ;;  %v14012_v62 = vld [vmem:[#allocation87_spill] sm:$0xff]  ;;  %6409 = vpow.bf16 %v3475_v17 }
 0x24b   : > { %13989 = vst [vmem:[#allocation139_spill] sm:$0xff] %v9425_v51  ;;  %13990 = vst [vmem:[#allocation140_spill] sm:$0xff] %v9427_v29  ;;  %v2749_v63 = vsub.f32 %v14005_v15, %v9380_v54  ;;  %v14009_v45 = vld [vmem:[#allocation33_spill] sm:$0xff]  ;;  %v3523_v15 = vmul.bf16 1069105081, %v9110_v55  ;;  %v2829_v40 = vsub.f32 %v14012_v62, %v9380_v54  ;;  %v14013_v56 = vld [vmem:[#allocation7_spill] sm:$0xff]  ;;  %6411 = vpow.bf16 %v3526_v21 }
 0x24c   : > { %13991 = vst [vmem:[#allocation141_spill] sm:$0xff] %v9429_v7  ;;  %13994 = vst [vmem:[#allocation67_spill] sm:$0xff] %v9438_v46  ;;  %v2797_v51 = vsub.f32 %v14009_v45, %v9380_v54  ;;  %v14010_v42 = vld [vmem:[#allocation45_spill] sm:$0xff]  ;;  %v2845_v2 = vsub.f32 %v14013_v56, %v9380_v54  ;;  %v14014_v11 = vld [vmem:[#allocation20_spill] sm:$0xff]  ;;  %v9483_v32 = vpop.f32.mrb[170].mxu0  ;;  %v9485_v45 = vpop.f32.mrb[168].mxu1 }
 0x24d   : > { %13998 = vst [vmem:[#allocation99_spill] sm:$0xff] %v9446_v13  ;;  %13999 = vst [vmem:[#allocation101_spill] sm:$0xff] %v9448_v26  ;;  %v2813_v1 = vsub.f32 %v14010_v42, %v9380_v54  ;;  %v6400_v59 = vpop.eup %6399  ;;  %v2861_v53 = vsub.f32 %v14014_v11, %v9380_v54  ;;  %v14017_v42 = vld [vmem:[#allocation26_spill] sm:$0xff]  ;;  %v14018_v12 = vld [vmem:[#allocation32_spill] sm:$0xff]  ;;  %v9493_v25 = vpop.f32.mrb[171].mxu0  ;;  %6413 = vpow.bf16 %v3523_v15  ;;  %v14036_v15 = vsub.f32 %v13995_v6, %v9380_v54 }
 0x24e   : > { %14007 = vst [vmem:[#allocation108_spill] sm:$0xff] %v9466_v8  ;;  %14011 = vst [vmem:[#allocation110_spill] sm:$0xff] %v9474_v31  ;;  %v2877_v5 = vsub.f32 %v14017_v42, %v9380_v54  ;;  %v2893_v55 = vsub.f32 %v14018_v12, %v9380_v54  ;;  %v14019_v13 = vld [vmem:[#allocation46_spill] sm:$0xff]  ;;  %v9495_v56 = vpop.f32.mrb[169].mxu1  ;;  %v3574_v11 = vmul.bf16 1069105081, %v9247_v23 }
 0x24f   : > { %14015 = vst [vmem:[#allocation117_spill] sm:$0xff] %v9483_v32  ;;  %14016 = vst [vmem:[#allocation125_spill] sm:$0xff] %v9485_v45  ;;  %v2909_v62 = vsub.f32 %v14019_v13, %v9380_v54  ;;  %v14022_v32 = vld [vmem:[#allocation56_spill] sm:$0xff]  ;;  %v14023_v17 = vld [vmem:[#allocation62_spill] sm:$0xff]  ;;  %v9504_v46 = vpop.f32.mrb[170].mxu1 }
 0x250   : > { %14020 = vst [vmem:[#allocation35_spill] sm:$0xff] %v9493_v25  ;;  %14021 = vst [vmem:[#allocation41_spill] sm:$0xff] %v9495_v56  ;;  %v2925_v31 = vsub.f32 %v14022_v32, %v9380_v54  ;;  %v2941_v45 = vsub.f32 %v14023_v17, %v9380_v54  ;;  %v14024_v42 = vld [vmem:[#allocation68_spill] sm:$0xff]  ;;  %v14026_v12 = vld [vmem:[#allocation74_spill] sm:$0xff]  ;;  %v9512_v60 = vpop.f32.mrb[171].mxu1  ;;  %v6402_v32 = vpop.eup %6401  ;;  %6415 = vpow.bf16 %v3574_v11 }
 0x251   : > { %v2957_v8 = vsub.f32 %v14024_v42, %v9380_v54  ;;  %14025 = vst [vmem:[#allocation65_spill] sm:$0xff] %v9504_v46  ;;  %v2973_v13 = vsub.f32 %v14026_v12, %v9380_v54  ;;  %v14027_v25 = vld [vmem:[#allocation88_spill] sm:$0xff]  ;;  %v14028_v23 = vld [vmem:[#allocation115_spill] sm:$0xff]  ;;  %14029 = vst [vmem:[#allocation85_spill] sm:$0xff] %v9512_v60  ;;  %v3571_v0 = vmul.bf16 1069105081, %v9112_v47  ;;  %4232 = vmatprep.subr.bf16.mxu0 %v6402_v32 }
 0x252   : > { %v2989_v56 = vsub.f32 %v14027_v25, %v9380_v54  ;;  %v3005_v7 = vsub.f32 %v14028_v23, %v9380_v54  ;;  %v14030_v29 = vld [vmem:[#allocation104_spill] sm:$0xff]  ;;  %v14031_v18 = vld [vmem:[#allocation55_spill] sm:$0xff]  ;;  %v6404_v23 = vpop.eup %6403  ;;  %v3622_v60 = vmul.bf16 1069105081, %v9249_v57  ;;  %4233 = vmatpush1.bf16.msra.mxu0 %v6400_v59  ;;  %v3670_v47 = vmul.bf16 1069105081, %v9251_v41 }
 0x253   : > { %v4099_v17 = vmul.bf16 1069105081, %v14030_v29  ;;  %v3021_v42 = vsub.f32 %v14031_v18, %v9380_v54  ;;  %v14032_v46 = vld [vmem:[#allocation119_spill] sm:$0xff]  ;;  %v14034_v25 = vld [vmem:[#allocation120_spill] sm:$0xff]  ;;  %4234 = vmatprep.subr.bf16.mxu0 %v6404_v23  ;;  %v4102_v18 = vmul.bf16 1069105081, %v9158_v52  ;;  %v6406_v29 = vpop.eup %6405  ;;  %v14037_v59 = vsub.f32 %v13996_v16, %v9380_v54 }
 0x254   : > { %v3037_v21 = vsub.f32 %v14032_v46, %v9380_v54  ;;  %v14033_v36 = vld [vmem:[#allocation59_spill] sm:$0xff]  ;;  %v3069_v26 = vsub.f32 %v14034_v25, %v9380_v54  ;;  %v3619_v46 = vmul.bf16 1069105081, %v9116_v4  ;;  %v6408_v57 = vpop.eup %6407  ;;  %v14038_v52 = vsub.f32 %v13997_v20, %v9380_v54  ;;  %v9551_v6 = vpop.f32.mrb[172].mxu0 }
 0x255   : > { %v3053_v12 = vsub.f32 %v14033_v36, %v9380_v54  ;;  %6417 = vpow.bf16 %v4099_v17  ;;  %v14035_v36 = vsub.f32 %v13993_v19, %v9380_v54  ;;  %v14039_v41 = vsub.f32 %v14000_v9, %v9380_v54  ;;  %v9553_v11 = vpop.f32.mrb[172].mxu1  ;;  %v9566_v9 = vpop.f32.mrb[173].mxu0 }
 0x256   : > { %6419 = vpow.bf16 %v3571_v0  ;;  %v9542_v4 = vpack.c.bf16 %v14038_v52, %v14037_v59  ;;  %v9549_v19 = vpack.c.bf16 %v2717_v44, %v2701_v43  ;;  %4235 = vmatpush1.bf16.msra.mxu0 %v6406_v29  ;;  %14040 = vst [vmem:[#allocation12_spill] sm:$0xff] %v9553_v11  ;;  %v9560_v20 = vpack.c.bf16 %v2781_v48, %v2765_v38  ;;  %v6410_v43 = vpop.eup %6409  ;;  %v14062_v52 = vld [vmem:[#allocation96_spill] sm:$0xff] }
 0x257   : > { %v9534_v32 = vpack.c.bf16 %v14036_v15, %v14035_v36  ;;  %6421 = vpow.bf16 %v3622_v60  ;;  %v9547_v0 = vpack.c.bf16 %v2685_v27, %v14039_v41  ;;  %v14041_v60 = vsub.f32 %v14004_v14, %v9380_v54  ;;  %4236 = vmatprep.subr.bf16.mxu0 %v6408_v57  ;;  %v9568_v27 = vpop.f32.mrb[173].mxu1  ;;  %v9578_v14 = vpop.f32.mrb[174].mxu0  ;;  %v14061_v57 = vld [vmem:[#allocation24_spill] sm:$0xff]  ;;  %v14063_v41 = vld [vmem:[#allocation50_spill] sm:$0xff] }
 0x258   : > { %v9562_v17 = vpack.c.bf16 %v2813_v1, %v2797_v51  ;;  %v9564_v25 = vpack.c.bf16 %v2845_v2, %v2829_v40  ;;  %14042 = vst [vmem:[#allocation16_spill] sm:$0xff] %v9568_v27  ;;  %v9570_v44 = vpack.c.bf16 %v2877_v5, %v2861_v53  ;;  %v9572_v23 = vpack.c.bf16 %v2909_v62, %v2893_v55  ;;  %v9580_v51 = vpop.f32.mrb[174].mxu1  ;;  %v9589_v5 = vpop.f32.mrb[175].mxu0  ;;  %v14050_v55 = vld [vmem:[#allocation89_spill] sm:$0xff] }
 0x259   : > { %v9558_v16 = vpack.c.bf16 %v2749_v63, %v14041_v60  ;;  %v9574_v29 = vpack.c.bf16 %v2941_v45, %v2925_v31  ;;  %v9576_v54 = vpack.c.bf16 %v2973_v13, %v2957_v8  ;;  %14045 = vst [vmem:[#allocation87_spill] sm:$0xff] %v9580_v51  ;;  %v3667_v63 = vmul.bf16 1069105081, %v9118_v39  ;;  %v9591_v40 = vpop.f32.mrb[175].mxu1  ;;  %v6412_v31 = vpop.eup %6411  ;;  %v14064_v60 = vld [vmem:[#allocation72_spill] sm:$0xff] }
 0x25a   : > { %v9583_v38 = vpack.c.bf16 %v3005_v7, %v2989_v56  ;;  %v9585_v48 = vpack.c.bf16 %v3037_v21, %v3021_v42  ;;  %v9587_v1 = vpack.c.bf16 %v3069_v26, %v3053_v12  ;;  %14049 = vst [vmem:[#allocation32_spill] sm:$0xff] %v9591_v40  ;;  %v3715_v8 = vmul.bf16 1069105081, %v9120_v49  ;;  %4237 = vmatpush1.bf16.msra.mxu0 %v6410_v43  ;;  %v6414_v7 = vpop.eup %6413  ;;  %v14053_v56 = vld [vmem:[#allocation127_spill] sm:$0xff]  ;;  %v14055_v21 = vld [vmem:[#allocation66_spill] sm:$0xff] }
 0x25b   : > { %14043 = vst [vmem:[#allocation33_spill] sm:$0xff] %v9574_v29  ;;  %14044 = vst [vmem:[#allocation45_spill] sm:$0xff] %v9576_v54  ;;  %6423 = vpow.bf16 %v3619_v46  ;;  %v3718_v2 = vmul.bf16 1069105081, %v9253_v33  ;;  %4238 = vmatprep.subr.bf16.mxu0 %v6412_v31  ;;  %v3763_v39 = vmul.bf16 1069105081, %v9122_v3  ;;  %v6416_v53 = vpop.eup %6415  ;;  %v14065_v43 = vmax.f32 %v14063_v41, %v14064_v60 }
 0x25c   : > { %14046 = vst [vmem:[#allocation7_spill] sm:$0xff] %v9583_v38  ;;  %14047 = vst [vmem:[#allocation20_spill] sm:$0xff] %v9585_v48  ;;  %6425 = vpow.bf16 %v3670_v47  ;;  %v3811_v26 = vmul.bf16 1069105081, %v9130_v22  ;;  %v3859_v45 = vmul.bf16 1069105081, %v9132_v50 }
 0x25d   : > { %14048 = vst [vmem:[#allocation26_spill] sm:$0xff] %v9587_v1  ;;  %6427 = vpow.bf16 %v4102_v18  ;;  %v3766_v62 = vmul.bf16 1069105081, %v14050_v55  ;;  %v14052_v33 = vld [vmem:[#allocation130_spill] sm:$0xff]  ;;  %v14054_v42 = vld [vmem:[#allocation131_spill] sm:$0xff]  ;;  %v14056_v3 = vld [vmem:[#allocation92_spill] sm:$0xff] }
 0x25e   : > { %6429 = vpow.bf16 %v3667_v63  ;;  %4239 = vmatpush1.bf16.msra.mxu0 %v6414_v7  ;;  %v2308_v13 = vmax.f32 %v14053_v56, %v14052_v33  ;;  %v14057_v12 = vmax.f32 %v14055_v21, %v14056_v3  ;;  %v14058_v22 = vld [vmem:[#allocation94_spill] sm:$0xff]  ;;  %v14059_v46 = vld [vmem:[#allocation129_spill] sm:$0xff]  ;;  %v9609_v50 = vpop.f32.mrb[176].mxu0  ;;  %v9611_v36 = vpop.f32.mrb[176].mxu1  ;;  %v3907_v59 = vmul.bf16 1069105081, %v14061_v57 }
 0x25f   : > { %6431 = vpow.bf16 %v3715_v8  ;;  %v2345_v47 = vmax.f32 %v14059_v46, %v14058_v22  ;;  %4240 = vmatprep.subr.bf16.mxu0 %v6416_v53  ;;  %14060 = vst [vmem:[#allocation56_spill] sm:$0xff] %v9611_v36  ;;  %v2418_v63 = vmax.f32 %v14065_v43, %v14062_v52  ;;  %v9618_v31 = vpop.f32.mrb[177].mxu0  ;;  %v9620_v8 = vpop.f32.mrb[177].mxu1  ;;  %v14067_v7 = vld [vmem:[#allocation102_spill] sm:$0xff]  ;;  %v14068_v55 = vld [vmem:[#allocation113_spill] sm:$0xff]  ;;  %v14069_v21 = vld [vmem:[#allocation19_spill] sm:$0xff] }
 0x260   : > { %v9599_v49 = vpop.eup %6417  ;;  %6433 = vpow.bf16 %v3718_v2  ;;  %v2381_v18 = vmax.f32 %v14057_v12, %v14054_v42  ;;  %14066 = vst [vmem:[#allocation62_spill] sm:$0xff] %v9620_v8  ;;  %v2309_v56 = vmax.f32 %v2308_v13, %v14068_v55  ;;  %v9625_v46 = vpop.f32.mrb[178].mxu0  ;;  %v14071_v57 = vld [vmem:[#allocation60_spill] sm:$0xff]  ;;  %v14072_v41 = vld [vmem:[#allocation10_spill] sm:$0xff]  ;;  %v14073_v52 = vld [vmem:[#allocation111_spill] sm:$0xff] }
 0x261   : > { %14051 = vst [vmem:[#allocation46_spill] sm:$0xff] %v9599_v49  ;;  %v6420_v15 = vpop.eup %6419  ;;  %6435 = vpow.bf16 %v3763_v39  ;;  %v2346_v12 = vmax.f32 %v2345_v47, %v14069_v21  ;;  %v9627_v39 = vpop.f32.mrb[178].mxu1  ;;  %v3955_v42 = vmul.bf16 1069105081, %v14071_v57  ;;  %v3814_v43 = vmul.bf16 1069105081, %v14072_v41 }
 0x262   : > { %v6422_v2 = vpop.eup %6421  ;;  %6437 = vpow.bf16 %v3811_v26  ;;  %v2382_v53 = vmax.f32 %v2381_v18, %v14067_v7  ;;  %14070 = vst [vmem:[#allocation68_spill] sm:$0xff] %v9627_v39  ;;  %v2419_v60 = vmax.f32 %v2418_v63, %v14073_v52  ;;  %4241 = vmatpush1.bf16.msra.mxu0 %v6420_v15  ;;  %v9632_v3 = vpop.f32.mrb[179].mxu0  ;;  %v14075_v13 = vld [vmem:[#allocation25_spill] sm:$0xff]  ;;  %v14076_v47 = vld [vmem:[#allocation43_spill] sm:$0xff]  ;;  %v3436_v33 = vmul.bf16 1069105081, %v9542_v4 }
 0x263   : > { %6439 = vpow.bf16 %v3859_v45  ;;  %v9634_v26 = vpop.f32.mrb[179].mxu1  ;;  %v2310_v18 = vmax.f32 %v2309_v56, %v14075_v13  ;;  %v14077_v21 = vld [vmem:[#allocation77_spill] sm:$0xff]  ;;  %4242 = vmatprep.subr.bf16.mxu0 %v6422_v2  ;;  %v9639_v55 = vpop.f32.mrb[180].mxu0  ;;  %v3388_v45 = vmul.bf16 1069105081, %v9534_v32  ;;  %v14080_v56 = vld [vmem:[#allocation6_spill] sm:$0xff] }
 0x264   : > { %14074 = vst [vmem:[#allocation74_spill] sm:$0xff] %v9634_v26  ;;  %6441 = vpow.bf16 %v3766_v62  ;;  %v2383_v7 = vmax.f32 %v2382_v53, %v14076_v47  ;;  %v2347_v22 = vmax.f32 %v2346_v12, %v14077_v21  ;;  %v14078_v57 = vld [vmem:[#allocation93_spill] sm:$0xff]  ;;  %v9643_v15 = vpop.f32.mrb[181].mxu0  ;;  %v9645_v41 = vpop.f32.mrb[180].mxu1  ;;  %v3385_v62 = vmul.bf16 1069105081, %v9384_v61 }
 0x265   : > { %6443 = vpow.bf16 %v3907_v59  ;;  %v2420_v63 = vmax.f32 %v2419_v60, %v14078_v57  ;;  %14079 = vst [vmem:[#allocation88_spill] sm:$0xff] %v9645_v41  ;;  %v14081_v53 = vld [vmem:[#allocation95_spill] sm:$0xff]  ;;  %v14082_v12 = vld [vmem:[#allocation98_spill] sm:$0xff]  ;;  %v9651_v21 = vpop.f32.mrb[182].mxu0  ;;  %v9653_v59 = vpop.f32.mrb[181].mxu1  ;;  %v14084_v60 = vld [vmem:[#allocation21_spill] sm:$0xff] }
 0x266   : > { %v6424_v52 = vpop.eup %6423  ;;  %v2384_v13 = vmax.f32 %v2383_v7, %v14080_v56  ;;  %v2311_v47 = vmax.f32 %v2310_v18, %v14081_v53  ;;  %v2348_v2 = vmax.f32 %v2347_v22, %v14082_v12  ;;  %14083 = vst [vmem:[#allocation115_spill] sm:$0xff] %v9653_v59  ;;  %6445 = vpow.bf16 %v3955_v42  ;;  %v14085_v1 = vld [vmem:[#allocation18_spill] sm:$0xff]  ;;  %v9658_v61 = vpop.f32.mrb[183].mxu0  ;;  %v14088_v22 = vld [vmem:[#allocation103_spill] sm:$0xff]  ;;  %v14090_v38 = vld [vmem:[#allocation112_spill] sm:$0xff] }
 0x267   : > { %v6426_v32 = vpop.eup %6425  ;;  %v3862_v57 = vmul.bf16 1069105081, %v14084_v60  ;;  %v2421_v48 = vmax.f32 %v2420_v63, %v14085_v1  ;;  %4243 = vmatpush1.bf16.msra.mxu0 %v6424_v52  ;;  %v9660_v7 = vpop.f32.mrb[182].mxu1  ;;  %6447 = vpow.bf16 %v3814_v43  ;;  %v14089_v12 = vld [vmem:[#allocation107_spill] sm:$0xff]  ;;  %v14092_v49 = vld [vmem:[#allocation78_spill] sm:$0xff]  ;;  %v14093_v1 = vld [vmem:[#allocation116_spill] sm:$0xff] }
 0x268   : > { %14086 = vst [vmem:[#allocation104_spill] sm:$0xff] %v9660_v7  ;;  %v9662_v18 = vpop.eup %6427  ;;  %v2312_v56 = vmax.f32 %v2311_v47, %v14088_v22  ;;  %v2385_v53 = vmax.f32 %v2384_v13, %v14089_v12  ;;  %v2349_v42 = vmax.f32 %v2348_v2, %v14090_v38  ;;  %4244 = vmatprep.subr.bf16.mxu0 %v6426_v32  ;;  %v9667_v60 = vpop.f32.mrb[183].mxu1  ;;  %v4003_v63 = vmul.bf16 1069105081, %v14092_v49  ;;  %v14094_v43 = vld [vmem:[#allocation23_spill] sm:$0xff]  ;;  %v14095_v47 = vld [vmem:[#allocation61_spill] sm:$0xff] }
 0x269   : > { %14087 = vst [vmem:[#allocation55_spill] sm:$0xff] %v9662_v18  ;;  %14091 = vst [vmem:[#allocation119_spill] sm:$0xff] %v9667_v60  ;;  %v6430_v4 = vpop.eup %6429  ;;  %v3433_v52 = vmul.bf16 1069105081, %v9387_v24  ;;  %6449 = vpow.bf16 %v3388_v45  ;;  %v2422_v54 = vmax.f32 %v2421_v48, %v14093_v1  ;;  %v14096_v13 = vld [vmem:[#allocation75_spill] sm:$0xff]  ;;  %v14097_v32 = vld [vmem:[#allocation30_spill] sm:$0xff] }
 0x26a   : > { %v6432_v29 = vpop.eup %6431  ;;  %6451 = vpow.bf16 %v3385_v62  ;;  %v2386_v18 = vmax.f32 %v2385_v53, %v14094_v43  ;;  %v2313_v22 = vmax.f32 %v2312_v56, %v14095_v47  ;;  %v2350_v12 = vmax.f32 %v2349_v42, %v14096_v13  ;;  %v14098_v49 = vld [vmem:[#allocation31_spill] sm:$0xff]  ;;  %v14099_v45 = vld [vmem:[#allocation132_spill] sm:$0xff]  ;;  %v14101_v56 = vld [vmem:[#allocation97_spill] sm:$0xff] }
 0x26b   : > { %v6434_v2 = vpop.eup %6433  ;;  %v3910_v38 = vmul.bf16 1069105081, %v14097_v32  ;;  %v3484_v60 = vmul.bf16 1069105081, %v9547_v0  ;;  %6453 = vpow.bf16 %v3436_v33  ;;  %v2423_v7 = vmax.f32 %v2422_v54, %v14098_v49  ;;  %4245 = vmatpush1.bf16.msra.mxu0 %v6430_v4  ;;  %v14100_v53 = vld [vmem:[#allocation83_spill] sm:$0xff]  ;;  %v14102_v0 = vld [vmem:[#allocation9_spill] sm:$0xff] }
 0x26c   : > { %v6436_v48 = vpop.eup %6435  ;;  %6455 = vpow.bf16 %v3862_v57  ;;  %v2314_v62 = vmax.f32 %v2313_v22, %v14099_v45  ;;  %v2387_v1 = vmax.f32 %v2386_v18, %v14100_v53  ;;  %v2351_v43 = vmax.f32 %v2350_v12, %v14101_v56  ;;  %4246 = vmatprep.subr.bf16.mxu0 %v6434_v2  ;;  %v14103_v4 = vld [vmem:[#allocation84_spill] sm:$0xff]  ;;  %v14106_v12 = vld [vmem:[#allocation133_spill] sm:$0xff] }
 0x26d   : > { %v9685_v32 = vpop.eup %6437  ;;  %v4051_v33 = vmul.bf16 1069105081, %v14102_v0  ;;  %6457 = vpow.bf16 %v4003_v63  ;;  %v3481_v54 = vmul.bf16 1069105081, %v9389_v37  ;;  %v2424_v49 = vmax.f32 %v2423_v7, %v14103_v4  ;;  %v14107_v2 = vld [vmem:[#allocation100_spill] sm:$0xff]  ;;  %v14108_v56 = vld [vmem:[#allocation109_spill] sm:$0xff] }
 0x26e   : > { %v9694_v22 = vpop.eup %6439  ;;  %6459 = vpow.bf16 %v3433_v52  ;;  %v2388_v18 = vmax.f32 %v2387_v1, %v14106_v12  ;;  %v2315_v53 = vmax.f32 %v2314_v62, %v14107_v2  ;;  %v2352_v45 = vmax.f32 %v2351_v43, %v14108_v56  ;;  %v14111_v0 = vld [vmem:[#allocation11_spill] sm:$0xff]  ;;  %v14114_v62 = vld [vmem:[#allocation122_spill] sm:$0xff]  ;;  %v14116_v2 = vld [vmem:[#allocation37_spill] sm:$0xff] }
 0x26f   : > { %v9678_v24 = vpop.f32.mrb[184].mxu0  ;;  %v9692_v57 = vpop.f32.mrb[184].mxu1  ;;  %v3958_v7 = vmul.bf16 1069105081, %v14111_v0  ;;  %v3532_v4 = vmul.bf16 1069105081, %v9549_v19  ;;  %6461 = vpow.bf16 %v3484_v60  ;;  %4247 = vmatpush1.bf16.msra.mxu0 %v6432_v29 }
 0x270   : > { %v9683_v42 = vpop.f32.mrb[185].mxu0  ;;  %14105 = vst [vmem:[#allocation120_spill] sm:$0xff] %v9692_v57  ;;  %v9701_v63 = vpop.f32.mrb[185].mxu1  ;;  %v14112_v57 = vld [vmem:[#allocation134_spill] sm:$0xff]  ;;  %6463 = vpow.bf16 %v3910_v38  ;;  %v2316_v43 = vmax.f32 %v2315_v53, %v14114_v62  ;;  %v14118_v19 = vld [vmem:[#allocation105_spill] sm:$0xff]  ;;  %v14120_v38 = vld [vmem:[#allocation47_spill] sm:$0xff] }
 0x271   : > { %v9690_v13 = vpop.f32.mrb[186].mxu0  ;;  %14110 = vst [vmem:[#allocation127_spill] sm:$0xff] %v9701_v63  ;;  %v6442_v37 = vpop.eup %6441  ;;  %v14115_v12 = vld [vmem:[#allocation114_spill] sm:$0xff]  ;;  %v2353_v63 = vmax.f32 %v2352_v45, %v14116_v2  ;;  %6465 = vpow.bf16 %v4051_v33  ;;  %v4105_v60 = vmul.bf16 1069105081, %v14118_v19  ;;  %v14119_v29 = vld [vmem:[#allocation29_spill] sm:$0xff] }
 0x272   : > { %14104 = vst [vmem:[#allocation59_spill] sm:$0xff] %v9690_v13  ;;  %v9699_v47 = vpop.f32.mrb[187].mxu0  ;;  %v2425_v13 = vmax.f32 %v2424_v49, %v14112_v57  ;;  %v9706_v52 = vpop.f32.mrb[186].mxu1  ;;  %v2389_v56 = vmax.f32 %v2388_v18, %v14115_v12  ;;  %4248 = vmatprep.subr.bf16.mxu0 %v6442_v37  ;;  %v3529_v49 = vmul.bf16 1069105081, %v9391_v10  ;;  %6467 = vpow.bf16 %v3481_v54  ;;  %v14121_v53 = vld [vmem:[#allocation8_spill] sm:$0xff] }
 0x273   : > { %14109 = vst [vmem:[#allocation89_spill] sm:$0xff] %v9699_v47  ;;  %14113 = vst [vmem:[#allocation66_spill] sm:$0xff] %v9706_v52  ;;  %v9708_v1 = vpop.eup %6443  ;;  %v9713_v47 = vpop.f32.mrb[187].mxu1  ;;  %v2317_v62 = vmax.f32 %v2316_v43, %v14121_v53  ;;  %v14122_v18 = vld [vmem:[#allocation14_spill] sm:$0xff]  ;;  %v14123_v37 = vld [vmem:[#allocation17_spill] sm:$0xff]  ;;  %6469 = vpow.bf16 %v3532_v4  ;;  %4249 = vmatpush1.bf16.msra.mxu0 %v6436_v48 }
 0x274   : > { %14117 = vst [vmem:[#allocation129_spill] sm:$0xff] %v9713_v47  ;;  %v2426_v0 = vmax.f32 %v2425_v13, %v14119_v29  ;;  %v9718_v57 = vpop.eup %6445  ;;  %v2390_v52 = vmax.f32 %v2389_v56, %v14120_v38  ;;  %v2354_v12 = vmax.f32 %v2353_v63, %v14122_v18  ;;  %v4006_v2 = vmul.bf16 1069105081, %v14123_v37  ;;  %v14124_v19 = vld [vmem:[#allocation79_spill] sm:$0xff]  ;;  %v14126_v56 = vld [vmem:[#allocation36_spill] sm:$0xff]  ;;  %v14128_v48 = vld [vmem:[#allocation90_spill] sm:$0xff] }
 0x275   : > { %v6448_v45 = vpop.eup %6447  ;;  %v3580_v33 = vmul.bf16 1069105081, %v9558_v16  ;;  %6471 = vpow.bf16 %v3958_v7  ;;  %v14125_v54 = vld [vmem:[#allocation27_spill] sm:$0xff]  ;;  %v14127_v16 = vld [vmem:[#allocation53_spill] sm:$0xff]  ;;  %v14141_v53 = vld [vmem:[#allocation108_spill] sm:$0xff] }
 0x276   : > { %v2427_v47 = vmax.f32 %v2426_v0, %v14124_v19  ;;  %v6450_v13 = vpop.eup %6449  ;;  %v2318_v29 = vmax.f32 %v2317_v62, %v14125_v54  ;;  %v2391_v38 = vmax.f32 %v2390_v52, %v14126_v56  ;;  %v2355_v43 = vmax.f32 %v2354_v12, %v9376_v30  ;;  %4250 = vmatprep.subr.bf16.mxu0 %v6448_v45  ;;  %v14132_v56 = vld [vmem:[#allocation58_spill] sm:$0xff]  ;;  %v14136_v30 = vld [vmem:[#allocation140_spill] sm:$0xff]  ;;  %v14140_v54 = vld [vmem:[#allocation67_spill] sm:$0xff] }
 0x277   : > { %v9726_v10 = vpop.f32.mrb[188].mxu0  ;;  %v6452_v37 = vpop.eup %6451  ;;  %6473 = vpow.bf16 %v4105_v60  ;;  %v4054_v4 = vmul.bf16 1069105081, %v14127_v16  ;;  %v3577_v0 = vmul.bf16 1069105081, %v9397_v28  ;;  %4275 = vmatprep.subr.bf16.mxu1 %v6450_v13  ;;  %v14131_v13 = vld [vmem:[#allocation101_spill] sm:$0xff]  ;;  %4251 = vmatpush1.bf16.msra.mxu0 %v9685_v32 }
 0x278   : > { %v9731_v63 = vpop.f32.mrb[189].mxu0  ;;  %v2428_v19 = vmax.f32 %v2427_v47, %v14128_v48  ;;  %v9738_v7 = vpop.f32.mrb[188].mxu1  ;;  %6475 = vpow.bf16 %v3529_v49  ;;  %4276 = vmatpush1.bf16.msra.mxu1 %v6452_v37  ;;  %v2392_v12 = vmax.f32 %v2391_v38, %v9393_v34  ;;  %v2319_v52 = vmax.f32 %v2318_v29, %v9395_v35  ;;  %v14135_v34 = vld [vmem:[#allocation136_spill] sm:$0xff] }
 0x279   : > { %v9736_v18 = vpop.f32.mrb[190].mxu0  ;;  %14129 = vst [vmem:[#allocation24_spill] sm:$0xff] %v9738_v7  ;;  %v6454_v62 = vpop.eup %6453  ;;  %v2356_v60 = vmax.f32 %v2355_v43, %v9407_v58  ;;  %v4108_v47 = vmul.bf16 1069105081, %v14131_v13  ;;  %v3628_v48 = vmul.bf16 1069105081, %v9560_v20  ;;  %6477 = vpow.bf16 %v3580_v33 }
 0x27a   : > { %v9743_v45 = vpop.f32.mrb[191].mxu0  ;;  %v9745_v16 = vpop.f32.mrb[189].mxu1  ;;  %4277 = vmatprep.subr.bf16.mxu1 %v6454_v62  ;;  %v2429_v49 = vmax.f32 %v2428_v19, %v14132_v56  ;;  %6479 = vpow.bf16 %v4006_v2  ;;  %v14134_v43 = vld [vmem:[#allocation135_spill] sm:$0xff]  ;;  %v2393_v58 = vmax.f32 %v2392_v12, %v14135_v34  ;;  %v14138_v33 = vld [vmem:[#allocation28_spill] sm:$0xff]  ;;  %v14139_v62 = vld [vmem:[#allocation141_spill] sm:$0xff] }
 0x27b   : > { %14130 = vst [vmem:[#allocation50_spill] sm:$0xff] %v9745_v16  ;;  %v6456_v28 = vpop.eup %6455  ;;  %v9751_v38 = vpop.f32.mrb[190].mxu1  ;;  %v2320_v37 = vmax.f32 %v2319_v52, %v14134_v43  ;;  %v2357_v35 = vmax.f32 %v2356_v60, %v14136_v30  ;;  %6481 = vpow.bf16 %v4054_v4  ;;  %v3625_v19 = vmul.bf16 1069105081, %v14138_v33  ;;  %v14142_v43 = vld [vmem:[#allocation110_spill] sm:$0xff]  ;;  %v14144_v4 = vld [vmem:[#allocation99_spill] sm:$0xff] }
 0x27c   : > { %14133 = vst [vmem:[#allocation60_spill] sm:$0xff] %v9751_v38  ;;  %v9753_v29 = vpop.eup %6457  ;;  %4252 = vmatprep.subr.bf16.mxu0 %v6456_v28  ;;  %v9758_v13 = vpop.f32.mrb[191].mxu1  ;;  %v2430_v32 = vmax.f32 %v2429_v49, %v14139_v62  ;;  %6483 = vpow.bf16 %v3577_v0  ;;  %v2394_v2 = vmax.f32 %v2393_v58, %v14140_v54  ;;  %v14143_v60 = vld [vmem:[#allocation34_spill] sm:$0xff]  ;;  %v3676_v30 = vmul.bf16 1069105081, %v9562_v17  ;;  %v14146_v58 = vld [vmem:[#allocation117_spill] sm:$0xff] }
 0x27d   : > { %14137 = vst [vmem:[#allocation10_spill] sm:$0xff] %v9758_v13  ;;  %v6460_v20 = vpop.eup %6459  ;;  %v2321_v52 = vmax.f32 %v2320_v37, %v14141_v53  ;;  %v2358_v12 = vmax.f32 %v2357_v35, %v14142_v43  ;;  %v3673_v28 = vmul.bf16 1069105081, %v14143_v60  ;;  %6485 = vpow.bf16 %v3628_v48  ;;  %4253 = vmatpush1.bf16.msra.mxu0 %v9694_v22  ;;  %v14148_v62 = vld [vmem:[#allocation35_spill] sm:$0xff]  ;;  %v14152_v22 = vld [vmem:[#allocation41_spill] sm:$0xff] }
 0x27e   : > { %v6462_v56 = vpop.eup %6461  ;;  %4278 = vmatpush1.bf16.msra.mxu1 %v6460_v20  ;;  %v2431_v33 = vmax.f32 %v2430_v32, %v14144_v4  ;;  %6487 = vpow.bf16 %v4108_v47  ;;  %v14147_v20 = vld [vmem:[#allocation125_spill] sm:$0xff]  ;;  %v14151_v32 = vld [vmem:[#allocation70_spill] sm:$0xff] }
 0x27f   : > { %v6464_v34 = vpop.eup %6463  ;;  %4279 = vmatprep.subr.bf16.mxu1 %v6462_v56  ;;  %v9769_v49 = vpop.f32.mrb[192].mxu0  ;;  %v2322_v37 = vmax.f32 %v2321_v52, %v14146_v58  ;;  %v2395_v35 = vmax.f32 %v2394_v2, %v14147_v20  ;;  %v2359_v54 = vmax.f32 %v2358_v12, %v14148_v62  ;;  %v14150_v56 = vld [vmem:[#allocation52_spill] sm:$0xff]  ;;  %v3769_v4 = vmul.bf16 1069105081, %v14151_v32  ;;  %v14155_v2 = vld [vmem:[#allocation65_spill] sm:$0xff] }
 0x280   : > { %14145 = vst [vmem:[#allocation21_spill] sm:$0xff] %v9769_v49  ;;  %v9771_v0 = vpop.eup %6465  ;;  %4254 = vmatprep.subr.bf16.mxu0 %v6464_v34  ;;  %v9776_v60 = vpop.f32.mrb[193].mxu0  ;;  %v3721_v48 = vmul.bf16 1069105081, %v14150_v56  ;;  %6489 = vpow.bf16 %v3625_v19  ;;  %v2432_v43 = vmax.f32 %v2431_v33, %v14152_v22  ;;  %v3724_v32 = vmul.bf16 1069105081, %v9564_v25 }
 0x281   : > { %14149 = vst [vmem:[#allocation78_spill] sm:$0xff] %v9776_v60  ;;  %v6468_v17 = vpop.eup %6467  ;;  %v9781_v53 = vpop.f32.mrb[194].mxu0  ;;  %v2396_v20 = vmax.f32 %v2395_v35, %v14155_v2  ;;  %v2323_v34 = vmax.f32 %v2322_v37, %v9551_v6  ;;  %v2360_v12 = vmax.f32 %v2359_v54, %v9566_v9  ;;  %6491 = vpow.bf16 %v3676_v30  ;;  %v14158_v22 = vld [vmem:[#allocation85_spill] sm:$0xff]  ;;  %4255 = vmatpush1.bf16.msra.mxu0 %v9708_v1 }
 0x282   : > { %14153 = vst [vmem:[#allocation30_spill] sm:$0xff] %v9781_v53  ;;  %v9783_v47 = vpop.f32.mrb[192].mxu1  ;;  %v6470_v52 = vpop.eup %6469  ;;  %4280 = vmatpush1.bf16.msra.mxu1 %v6468_v17  ;;  %v2450_v56 = vmax.f32 %v9769_v49, %v9781_v53  ;;  %v2433_v17 = vmax.f32 %v2432_v43, %v14158_v22  ;;  %6493 = vpow.bf16 %v3673_v28 }
 0x283   : > { %14154 = vst [vmem:[#allocation9_spill] sm:$0xff] %v9783_v47  ;;  %v9790_v62 = vpop.f32.mrb[195].mxu0  ;;  %v9792_v19 = vpop.f32.mrb[193].mxu1  ;;  %4281 = vmatprep.subr.bf16.mxu1 %v6470_v52  ;;  %v2324_v53 = vmax.f32 %v2323_v34, %v9578_v14  ;;  %v2397_v49 = vmax.f32 %v2396_v20, %v9553_v11  ;;  %v2361_v25 = vmax.f32 %v2360_v12, %v9589_v5  ;;  %v14161_v52 = vld [vmem:[#allocation82_spill] sm:$0xff]  ;;  %6495 = vpow.bf16 %v3721_v48 }
 0x284   : > { %14156 = vst [vmem:[#allocation11_spill] sm:$0xff] %v9790_v62  ;;  %14157 = vst [vmem:[#allocation105_spill] sm:$0xff] %v9792_v19  ;;  %v6472_v33 = vpop.eup %6471  ;;  %v2487_v37 = vmax.f32 %v9776_v60, %v9790_v62  ;;  %v9799_v54 = vpop.f32.mrb[194].mxu1  ;;  %v3817_v22 = vmul.bf16 1069105081, %v14161_v52  ;;  %v2434_v62 = vmax.f32 %v2433_v17, %v9568_v27  ;;  %6497 = vpow.bf16 %v3724_v32 }
 0x285   : > { %14159 = vst [vmem:[#allocation17_spill] sm:$0xff] %v9799_v54  ;;  %v9801_v35 = vpop.eup %6473  ;;  %4256 = vmatprep.subr.bf16.mxu0 %v6472_v33  ;;  %v2524_v30 = vmax.f32 %v9783_v47, %v9799_v54  ;;  %v9808_v43 = vpop.f32.mrb[195].mxu1  ;;  %v2398_v20 = vmax.f32 %v2397_v49, %v9580_v51  ;;  %v2325_v12 = vmax.f32 %v2324_v53, %v9609_v50  ;;  %v14162_v47 = vld [vmem:[#allocation49_spill] sm:$0xff]  ;;  %v3772_v52 = vmul.bf16 1069105081, %v9570_v44 }
 0x286   : > { %14160 = vst [vmem:[#allocation53_spill] sm:$0xff] %v9808_v43  ;;  %v6476_v1 = vpop.eup %6475  ;;  %v2561_v60 = vmax.f32 %v9792_v19, %v9808_v43  ;;  %v2362_v33 = vmax.f32 %v2361_v25, %v9618_v31  ;;  %v2435_v28 = vmax.f32 %v2434_v62, %v9591_v40  ;;  %4257 = vmatpush1.bf16.msra.mxu0 %v9718_v57  ;;  %6499 = vpow.bf16 %v3769_v4 }
 0x287   : > { %v6478_v34 = vpop.eup %6477  ;;  %4282 = vmatpush1.bf16.msra.mxu1 %v6476_v1  ;;  %v9821_v17 = vpop.f32.mrb[196].mxu0  ;;  %v2326_v49 = vmax.f32 %v2325_v12, %v9625_v46  ;;  %v2399_v53 = vmax.f32 %v2398_v20, %v9611_v36  ;;  %v3820_v62 = vmul.bf16 1069105081, %v9572_v23  ;;  %6501 = vpow.bf16 %v3772_v52 }
 0x288   : > { %v6480_v54 = vpop.eup %6479  ;;  %4283 = vmatprep.subr.bf16.mxu1 %v6478_v34  ;;  %14163 = vst [vmem:[#allocation101_spill] sm:$0xff] %v9821_v17  ;;  %v2363_v25 = vmax.f32 %v2362_v33, %v9632_v3  ;;  %v2451_v1 = vmax.f32 %v2450_v56, %v9821_v17  ;;  %v9827_v11 = vpop.f32.mrb[197].mxu0  ;;  %v2436_v57 = vmax.f32 %v2435_v28, %v9620_v8  ;;  %6503 = vpow.bf16 %v3817_v22  ;;  %v14175_v22 = vld [vmem:[#allocation119_spill] sm:$0xff] }
 0x289   : > { %v6482_v48 = vpop.eup %6481  ;;  %4258 = vmatprep.subr.bf16.mxu0 %v6480_v54  ;;  %14164 = vst [vmem:[#allocation28_spill] sm:$0xff] %v9827_v11  ;;  %v2488_v32 = vmax.f32 %v2487_v37, %v9827_v11  ;;  %v9832_v34 = vpop.f32.mrb[198].mxu0  ;;  %v2400_v20 = vmax.f32 %v2399_v53, %v9627_v39  ;;  %v2327_v56 = vmax.f32 %v2326_v49, %v9639_v55  ;;  %6505 = vpow.bf16 %v3820_v62 }
 0x28a   : > { %v6484_v44 = vpop.eup %6483  ;;  %14165 = vst [vmem:[#allocation34_spill] sm:$0xff] %v9832_v34  ;;  %v9834_v54 = vpop.f32.mrb[196].mxu1  ;;  %v2364_v33 = vmax.f32 %v2363_v25, %v9643_v15  ;;  %v2452_v4 = vmax.f32 %v2451_v1, %v9832_v34  ;;  %4259 = vmatpush1.bf16.msra.mxu0 %v9753_v29  ;;  %v2437_v37 = vmax.f32 %v2436_v57, %v9634_v26  ;;  %v14171_v29 = vld [vmem:[#allocation118_spill] sm:$0xff]  ;;  %v14174_v34 = vld [vmem:[#allocation33_spill] sm:$0xff] }
 0x28b   : > { %14166 = vst [vmem:[#allocation117_spill] sm:$0xff] %v9834_v54  ;;  %v6486_v12 = vpop.eup %6485  ;;  %4284 = vmatpush1.bf16.msra.mxu1 %v6484_v44  ;;  %v9840_v43 = vpop.f32.mrb[199].mxu0  ;;  %v2525_v53 = vmax.f32 %v2524_v30, %v9834_v54  ;;  %4260 = vmatprep.subr.bf16.mxu0 %v6482_v48  ;;  %v2328_v1 = vmax.f32 %v2327_v56, %v9651_v21  ;;  %v3913_v57 = vmul.bf16 1069105081, %v14171_v29  ;;  %v14172_v48 = vld [vmem:[#allocation104_spill] sm:$0xff] }
 0x28c   : > { %14167 = vst [vmem:[#allocation52_spill] sm:$0xff] %v9840_v43  ;;  %v9842_v23 = vpop.f32.mrb[197].mxu1  ;;  %v9844_v28 = vpop.eup %6487  ;;  %4285 = vmatprep.subr.bf16.mxu1 %v6486_v12  ;;  %v2489_v49 = vmax.f32 %v2488_v32, %v9840_v43  ;;  %v2401_v19 = vmax.f32 %v2400_v20, %v9645_v41  ;;  %v2365_v11 = vmax.f32 %v2364_v33, %v9658_v61  ;;  %v3868_v17 = vmul.bf16 1069105081, %v14174_v34 }
 0x28d   : > { %14168 = vst [vmem:[#allocation70_spill] sm:$0xff] %v9842_v23  ;;  %v9850_v44 = vpop.f32.mrb[198].mxu1  ;;  %v6490_v25 = vpop.eup %6489  ;;  %v2562_v52 = vmax.f32 %v2561_v60, %v9842_v23  ;;  %v2438_v30 = vmax.f32 %v2437_v37, %v9653_v59  ;;  %v2329_v56 = vmax.f32 %v2328_v1, %v9678_v24  ;;  %v14173_v60 = vld [vmem:[#allocation137_spill] sm:$0xff]  ;;  %v14178_v1 = vld [vmem:[#allocation59_spill] sm:$0xff] }
 0x28e   : > { %14169 = vst [vmem:[#allocation82_spill] sm:$0xff] %v9850_v44  ;;  %v9856_v12 = vpop.f32.mrb[199].mxu1  ;;  %v2526_v32 = vmax.f32 %v2525_v53, %v9850_v44  ;;  %v6492_v54 = vpop.eup %6491  ;;  %v2402_v43 = vmax.f32 %v2401_v19, %v14172_v48  ;;  %v2366_v20 = vmax.f32 %v2365_v11, %v9683_v42  ;;  %4261 = vmatpush1.bf16.msra.mxu0 %v9771_v0  ;;  %v14177_v19 = vld [vmem:[#allocation55_spill] sm:$0xff]  ;;  %v14179_v11 = vld [vmem:[#allocation120_spill] sm:$0xff]  ;;  %v14182_v0 = vmul.bf16 1069105081, %v14162_v47 }
 0x28f   : > { %14170 = vst [vmem:[#allocation49_spill] sm:$0xff] %v9856_v12  ;;  %4286 = vmatpush1.bf16.msra.mxu1 %v6490_v25  ;;  %v2563_v33 = vmax.f32 %v2562_v52, %v9856_v12  ;;  %v2439_v37 = vmax.f32 %v2438_v30, %v14175_v22  ;;  %v9869_v53 = vpop.f32.mrb[200].mxu0  ;;  %v6494_v25 = vpop.eup %6493  ;;  %4262 = vmatprep.subr.bf16.mxu0 %v14177_v19  ;;  %v14180_v52 = vld [vmem:[#allocation89_spill] sm:$0xff]  ;;  %v14184_v22 = vld [vmem:[#allocation127_spill] sm:$0xff] }
 0x290   : > { %4287 = vmatprep.subr.bf16.mxu1 %v6492_v54  ;;  %14176 = vst [vmem:[#allocation118_spill] sm:$0xff] %v9869_v53  ;;  %v2330_v29 = vmax.f32 %v2329_v56, %v14178_v1  ;;  %v2403_v44 = vmax.f32 %v2402_v43, %v14179_v11  ;;  %v2367_v12 = vmax.f32 %v2366_v20, %v14180_v52  ;;  %v9876_v34 = vpop.f32.mrb[201].mxu0  ;;  %v6496_v62 = vpop.eup %6495  ;;  %6507 = vpow.bf16 %v14182_v0  ;;  %v14183_v54 = vld [vmem:[#allocation45_spill] sm:$0xff]  ;;  %v14187_v20 = vld [vmem:[#allocation66_spill] sm:$0xff] }
 0x291   : > { %v2453_v23 = vmax.f32 %v2452_v4, %v9869_v53  ;;  %14181 = vst [vmem:[#allocation137_spill] sm:$0xff] %v9876_v34  ;;  %v3916_v30 = vmul.bf16 1069105081, %v14183_v54  ;;  %v2440_v59 = vmax.f32 %v2439_v37, %v14184_v22  ;;  %v2490_v19 = vmax.f32 %v2489_v49, %v9876_v34  ;;  %v9883_v26 = vpop.f32.mrb[202].mxu0  ;;  %v9885_v56 = vpop.f32.mrb[200].mxu1  ;;  %v14190_v49 = vld [vmem:[#allocation46_spill] sm:$0xff] }
 0x292   : > { %14185 = vst [vmem:[#allocation33_spill] sm:$0xff] %v9883_v26  ;;  %14186 = vst [vmem:[#allocation55_spill] sm:$0xff] %v9885_v56  ;;  %v6498_v43 = vpop.eup %6497  ;;  %v2404_v4 = vmax.f32 %v2403_v44, %v14187_v20  ;;  %v2331_v53 = vmax.f32 %v2330_v29, %v9726_v10  ;;  %v2368_v8 = vmax.f32 %v2367_v12, %v9731_v63  ;;  %v9891_v0 = vpop.f32.mrb[203].mxu0  ;;  %6509 = vpow.bf16 %v3868_v17  ;;  %v14191_v37 = vld [vmem:[#allocation129_spill] sm:$0xff] }
 0x293   : > { %4288 = vmatpush1.bf16.msra.mxu1 %v6494_v25  ;;  %v2454_v47 = vmax.f32 %v2453_v23, %v9883_v26  ;;  %14188 = vst [vmem:[#allocation59_spill] sm:$0xff] %v9891_v0  ;;  %v9893_v54 = vpop.f32.mrb[201].mxu1  ;;  %4263 = vmatpush1.bf16.msra.mxu0 %v14190_v49  ;;  %v2441_v34 = vmax.f32 %v2440_v59, %v14191_v37  ;;  %v6500_v29 = vpop.eup %6499  ;;  %v14194_v49 = vld [vmem:[#allocation138_spill] sm:$0xff]  ;;  %6511 = vpow.bf16 %v3913_v57  ;;  %v14195_v57 = vld [vmem:[#allocation139_spill] sm:$0xff] }
 0x294   : > { %14189 = vst [vmem:[#allocation89_spill] sm:$0xff] %v9893_v54  ;;  %4289 = vmatprep.subr.bf16.mxu1 %v6498_v43  ;;  %v2527_v25 = vmax.f32 %v2526_v32, %v9885_v56  ;;  %v2491_v44 = vmax.f32 %v2490_v19, %v9891_v0  ;;  %v9899_v22 = vpop.f32.mrb[202].mxu1  ;;  %v2332_v12 = vmax.f32 %v2331_v53, %v9736_v18  ;;  %v4009_v40 = vmul.bf16 1069105081, %v14194_v49  ;;  %v6502_v19 = vpop.eup %6501  ;;  %v9913_v53 = vld [vmem:[%s12898_s2] ss:$8 sps:$4 sm:$0xff]  }
 0x295   : > { %14192 = vst [vmem:[#allocation45_spill] sm:$0xff] %v9899_v22  ;;  %v2405_v23 = vmax.f32 %v2404_v4, %v9738_v7  ;;  %v2369_v26 = vmax.f32 %v2368_v8, %v9743_v45  ;;  %v2564_v17 = vmax.f32 %v2563_v33, %v9893_v54  ;;  %v9905_v43 = vpop.f32.mrb[203].mxu1  ;;  %v2442_v59 = vmax.f32 %v2441_v34, %v9745_v16  ;;  %v14196_v34 = vld [vmem:[#allocation7_spill] sm:$0xff] }
 0x296   : > { %14193 = vst [vmem:[#allocation46_spill] sm:$0xff] %v9905_v43  ;;  %v2528_v32 = vmax.f32 %v2527_v25, %v9899_v22  ;;  %v2333_v56 = vrot.slane %v2332_v12, 4  ;;  %4265 = vmatmul.mubr.bf16.vlgmr.msra.gmra.mrb[4].mxu0 %v9913_v53  ;;  %v4057_v49 = vmul.bf16 1069105081, %v14195_v57  ;;  %v3964_v54 = vmul.bf16 1069105081, %v14196_v34 }
 0x297   : > { %4290 = vmatpush1.bf16.msra.mxu1 %v6496_v62  ;;  %v2370_v8 = vrot.slane %v2369_v26, 4  ;;  %v2406_v33 = vmax.f32 %v2405_v23, %v9751_v38  ;;  %v2565_v4 = vmax.f32 %v2564_v17, %v9905_v43  ;;  %6513 = vpow.bf16 %v3916_v30  ;;  %v9921_v25 = vpop.f32.mrb[204].mxu0  ;;  %v9926_v22 = vld [vmem:[%s12898_s2 + $0x4] ss:$8 sps:$4 sm:$0xff]   ;;  %v6504_v23 = vpop.eup %6503 }
 0x298   : > { %4291 = vmatprep.subr.bf16.mxu1 %v6502_v19  ;;  %v2443_v62 = vmax.f32 %v2442_v59, %v9758_v13  ;;  %14197 = vst [vmem:[#allocation138_spill] sm:$0xff] %v9921_v25  ;;  %4350 = vmatprep.mubr.bf16.mxu0 %v9926_v22  ;;  %v2334_v0 = vmax.f32 %v2332_v12, %v2333_v56  ;;  %v9930_v34 = vpop.f32.mrb[205].mxu0  ;;  %v14199_v30 = vmul.bf16 1069105081, %v14173_v60  ;;  %v14200_v59 = vld [vmem:[#allocation20_spill] sm:$0xff]  ;;  %v9938_v16 = vpop.f32.mrb[204].mxu1 }
 0x299   : > { %v2371_v17 = vmax.f32 %v2369_v26, %v2370_v8  ;;  %v2407_v43 = vrot.slane %v2406_v33, 4  ;;  %v2455_v57 = vmax.f32 %v2454_v47, %v9921_v25  ;;  %14198 = vst [vmem:[#allocation139_spill] sm:$0xff] %v9930_v34  ;;  %v4012_v19 = vmul.bf16 1069105081, %v14200_v59  ;;  %v9936_v13 = vpop.f32.mrb[206].mxu0  ;;  %14202 = vst [vmem:[#allocation20_spill] sm:$0xff] %v9938_v16  ;;  %v6506_v20 = vpop.eup %6505 }
 0x29a   : > { %6515 = vpow.bf16 %v14199_v30  ;;  %v2444_v37 = vrot.slane %v2443_v62, 4  ;;  %v2492_v27 = vmax.f32 %v2491_v44, %v9930_v34  ;;  %14201 = vst [vmem:[#allocation7_spill] sm:$0xff] %v9936_v13  ;;  %v2335_v26 = vrot.slane %v2334_v0, 2  ;;  %v9941_v8 = vpop.f32.mrb[207].mxu0  ;;  %v9943_v60 = vpop.f32.mrb[205].mxu1 }
 0x29b   : > { %4292 = vmatpush1.bf16.msra.mxu1 %v6500_v29  ;;  %v2372_v56 = vrot.slane %v2371_v17, 2  ;;  %v2408_v12 = vmax.f32 %v2406_v33, %v2407_v43  ;;  %v2456_v47 = vmax.f32 %v2455_v57, %v9936_v13  ;;  %14203 = vst [vmem:[#allocation142_spill] sm:$0xff] %v9941_v8  ;;  %14204 = vst [vmem:[#allocation143_spill] sm:$0xff] %v9943_v60  ;;  %6517 = vpow.bf16 %v3964_v54  ;;  %v9952_v29 = vpop.f32.mrb[206].mxu1  ;;  %v6508_v34 = vpop.eup %6507  ;;  %v14208_v43 = vld [vmem:[#allocation26_spill] sm:$0xff] }
 0x29c   : > { %4293 = vmatprep.subr.bf16.mxu1 %v6506_v20  ;;  %v9946_v30 = vmax.f32 %v2528_v32, %v9938_v16  ;;  %v2493_v44 = vmax.f32 %v2492_v27, %v9941_v8  ;;  %v9950_v59 = vmax.f32 %v2565_v4, %v9943_v60  ;;  %14207 = vst [vmem:[#allocation146_spill] sm:$0xff] %v9952_v29  ;;  %6519 = vpow.bf16 %v4009_v40  ;;  %v9955_v25 = vpop.f32.mrb[207].mxu1  ;;  %v14220_v32 = vld [vmem:[#allocation13_spill] sm:$0xff]  ;;  %v14221_v16 = vld [vmem:[#allocation48_spill] sm:$0xff]  ;;  %v14223_v8 = vld [vmem:[#allocation63_spill] sm:$0xff] }
 0x29d   : > { %v4060_v33 = vmul.bf16 1069105081, %v14208_v43  ;;  %v2336_v57 = vmax.f32 %v2334_v0, %v2335_v26  ;;  %v2445_v13 = vmax.f32 %v2443_v62, %v2444_v37  ;;  %14209 = vst [vmem:[#allocation26_spill] sm:$0xff] %v9955_v25  ;;  %v2373_v54 = vmax.f32 %v2371_v17, %v2372_v56  ;;  %v6510_v4 = vpop.eup %6509 }
 0x29e   : > { %14205 = vst [vmem:[#allocation144_spill] sm:$0xff] %v9946_v30  ;;  %14206 = vst [vmem:[#allocation145_spill] sm:$0xff] %v9950_v59  ;;  %v2409_v20 = vrot.slane %v2408_v12, 2  ;;  %6521 = vpow.bf16 %v4057_v49  ;;  %v6512_v0 = vpop.eup %6511  ;;  %v14225_v59 = vld [vmem:[#allocation91_spill] sm:$0xff]  ;;  %v14232_v30 = vld [vmem:[#allocation61_spill] sm:$0xff] }
 0x29f   : > { %4294 = vmatpush1.bf16.msra.mxu1 %v6504_v23  ;;  %v2337_v60 = vrot.slane %v2336_v57, 1  ;;  %6523 = vpow.bf16 %v4012_v19  ;;  %v9961_v40 = vpop.f32.mrb[208].mxu0  ;;  %v2374_v26 = vrot.slane %v2373_v54, 1  ;;  %v2446_v43 = vrot.slane %v2445_v13, 2  ;;  %v9977_v19 = vpop.f32.mrb[208].mxu1 }
 0x2a0   : > { %4295 = vmatprep.subr.bf16.mxu1 %v6510_v4  ;;  %14210 = vst [vmem:[#allocation147_spill] sm:$0xff] %v9961_v40  ;;  %6525 = vpow.bf16 %v4060_v33  ;;  %v9966_v62 = vmax.f32 %v2456_v47, %v9961_v40  ;;  %v9968_v17 = vpop.f32.mrb[209].mxu0  ;;  %v9970_v56 = vmax.f32 %v2408_v12, %v2409_v20  ;;  %14215 = vst [vmem:[#allocation152_spill] sm:$0xff] %v9977_v19  ;;  %v14216_v33 = vld [vmem:[#allocation121_spill] sm:$0xff]  ;;  %v9989_v27 = vpop.f32.mrb[209].mxu1 }
 0x2a1   : > { %v9963_v37 = vmax.f32 %v2336_v57, %v2337_v60  ;;  %14212 = vst [vmem:[#allocation149_spill] sm:$0xff] %v9968_v17  ;;  %v9973_v49 = vmax.f32 %v2493_v44, %v9968_v17  ;;  %v9975_v23 = vpop.f32.mrb[210].mxu0  ;;  %v14217_v57 = vld [vmem:[#allocation123_spill] sm:$0xff]  ;;  %v14222_v17 = vld [vmem:[#allocation86_spill] sm:$0xff]  ;;  %v9999_v40 = vpop.f32.mrb[210].mxu1  ;;  %v10025_v11 = vmax.f32 %v2445_v13, %v2446_v43 }
 0x2a2   : > { %14211 = vst [vmem:[#allocation148_spill] sm:$0xff] %v9966_v62  ;;  %14214 = vst [vmem:[#allocation151_spill] sm:$0xff] %v9975_v23  ;;  %v6514_v4 = vpop.eup %6513  ;;  %v9987_v44 = vpop.f32.mrb[211].mxu0  ;;  %v14235_v23 = vld [vmem:[#allocation122_spill] sm:$0xff] }
 0x2a3   : > { %14213 = vst [vmem:[#allocation150_spill] sm:$0xff] %v9973_v49  ;;  %4296 = vmatpush1.bf16.msra.mxu1 %v6508_v34  ;;  %v3086_v60 = vsub.f32 %v9726_v10, %v9963_v37  ;;  %v3102_v47 = vsub.f32 %v9736_v18, %v9963_v37  ;;  %v2606_v12 = vsub.f32 %v14216_v33, %v9963_v37  ;;  %14218 = vst [vmem:[#allocation121_spill] sm:$0xff] %v9987_v44  ;;  %v14227_v49 = vld [vmem:[#allocation113_spill] sm:$0xff]  ;;  %v10009_v44 = vpop.f32.mrb[211].mxu1 }
 0x2a4   : > { %v2622_v20 = vsub.f32 %v14217_v57, %v9963_v37  ;;  %14219 = vst [vmem:[#allocation123_spill] sm:$0xff] %v9989_v27  ;;  %4297 = vmatprep.subr.bf16.mxu1 %v6514_v4  ;;  %v2638_v34 = vsub.f32 %v14220_v32, %v9963_v37  ;;  %v2654_v10 = vsub.f32 %v14221_v16, %v9963_v37  ;;  %14224 = vst [vmem:[#allocation13_spill] sm:$0xff] %v9999_v40  ;;  %v14226_v27 = vld [vmem:[#allocation130_spill] sm:$0xff] }
 0x2a5   : > { %v2670_v18 = vsub.f32 %v14222_v17, %v9963_v37  ;;  %v2686_v33 = vsub.f32 %v14223_v8, %v9963_v37  ;;  %v6516_v57 = vpop.eup %6515  ;;  %v10001_v25 = vpack.c.bf16 %v3102_v47, %v3086_v60  ;;  %v2702_v4 = vsub.f32 %v14225_v59, %v9963_v37  ;;  %14228 = vst [vmem:[#allocation48_spill] sm:$0xff] %v10009_v44  ;;  %v14229_v17 = vld [vmem:[#allocation25_spill] sm:$0xff]  ;;  %v14230_v8 = vld [vmem:[#allocation95_spill] sm:$0xff] }
 0x2a6   : > { %v2718_v32 = vsub.f32 %v14226_v27, %v9963_v37  ;;  %v2734_v16 = vsub.f32 %v14227_v49, %v9963_v37  ;;  %v2750_v29 = vsub.f32 %v14229_v17, %v9963_v37  ;;  %v2766_v40 = vsub.f32 %v14230_v8, %v9963_v37  ;;  %v14231_v60 = vld [vmem:[#allocation103_spill] sm:$0xff]  ;;  %v6518_v19 = vpop.eup %6517  ;;  %v14233_v27 = vld [vmem:[#allocation132_spill] sm:$0xff] }
 0x2a7   : > { %v2782_v47 = vsub.f32 %v14231_v60, %v9963_v37  ;;  %v2798_v59 = vsub.f32 %v14232_v30, %v9963_v37  ;;  %4298 = vmatpush1.bf16.msra.mxu1 %v6512_v0  ;;  %v2814_v62 = vsub.f32 %v14233_v27, %v9963_v37  ;;  %v14234_v49 = vld [vmem:[#allocation100_spill] sm:$0xff]  ;;  %v2846_v17 = vsub.f32 %v14235_v23, %v9963_v37  ;;  %v6520_v8 = vpop.eup %6519  ;;  %v14237_v30 = vld [vmem:[#allocation27_spill] sm:$0xff]  ;;  %v14238_v0 = vld [vmem:[#allocation22_spill] sm:$0xff] }
 0x2a8   : > { %v2830_v44 = vsub.f32 %v14234_v49, %v9963_v37  ;;  %4299 = vmatprep.subr.bf16.mxu1 %v6518_v19  ;;  %v14236_v60 = vld [vmem:[#allocation8_spill] sm:$0xff]  ;;  %v2878_v41 = vsub.f32 %v14237_v30, %v9963_v37  ;;  %v2894_v39 = vsub.f32 %v14238_v0, %v9963_v37  ;;  %v14239_v27 = vld [vmem:[#allocation135_spill] sm:$0xff]  ;;  %v10035_v49 = vpop.f32.mrb[212].mxu0  ;;  %v2942_v43 = vsub.f32 %v14146_v58, %v9963_v37 }
 0x2a9   : > { %v2862_v48 = vsub.f32 %v14236_v60, %v9963_v37  ;;  %v2910_v36 = vsub.f32 %v14239_v27, %v9963_v37  ;;  %14240 = vst [vmem:[#allocation86_spill] sm:$0xff] %v10035_v49  ;;  %v14241_v23 = vld [vmem:[#allocation108_spill] sm:$0xff]  ;;  %v2958_v19 = vsub.f32 %v9551_v6, %v9963_v37  ;;  %v10043_v60 = vmax.f32 %v2373_v54, %v2374_v26  ;;  %v10045_v30 = vpop.f32.mrb[213].mxu0  ;;  %v6522_v51 = vpop.eup %6521 }
 0x2aa   : > { %v2926_v13 = vsub.f32 %v14241_v23, %v9963_v37  ;;  %14242 = vst [vmem:[#allocation63_spill] sm:$0xff] %v10045_v30  ;;  %v2974_v0 = vsub.f32 %v9578_v14, %v9963_v37  ;;  %v2990_v27 = vsub.f32 %v9609_v50, %v9963_v37  ;;  %v3006_v23 = vsub.f32 %v9625_v46, %v9963_v37  ;;  %v10055_v49 = vpop.f32.mrb[214].mxu0  ;;  %v10057_v6 = vpop.f32.mrb[212].mxu1 }
 0x2ab   : > { %v3022_v58 = vsub.f32 %v9639_v55, %v9963_v37  ;;  %14243 = vst [vmem:[#allocation91_spill] sm:$0xff] %v10055_v49  ;;  %14244 = vst [vmem:[#allocation130_spill] sm:$0xff] %v10057_v6  ;;  %v6524_v54 = vpop.eup %6523  ;;  %4300 = vmatpush1.bf16.msra.mxu1 %v6516_v57  ;;  %v3038_v26 = vsub.f32 %v9651_v21, %v9963_v37  ;;  %v3054_v14 = vsub.f32 %v9678_v24, %v9963_v37  ;;  %v10065_v46 = vpop.f32.mrb[215].mxu0 }
 0x2ac   : > { %v3070_v50 = vsub.f32 %v14178_v1, %v9963_v37  ;;  %v3118_v30 = vpack.c.bf16 %v2622_v20, %v2606_v12  ;;  %14245 = vst [vmem:[#allocation113_spill] sm:$0xff] %v10065_v46  ;;  %v10067_v2 = vpop.f32.mrb[213].mxu1  ;;  %v6526_v55 = vpop.eup %6525  ;;  %4301 = vmatprep.subr.bf16.mxu1 %v6524_v54  ;;  %v3134_v49 = vpack.c.bf16 %v2654_v10, %v2638_v34 }
 0x2ad   : > { %14246 = vst [vmem:[#allocation25_spill] sm:$0xff] %v10067_v2  ;;  %v10069_v6 = vpack.c.bf16 %v2686_v33, %v2670_v18  ;;  %v10071_v57 = vpack.c.bf16 %v2718_v32, %v2702_v4  ;;  %v10073_v38 = vpack.c.bf16 %v2750_v29, %v2734_v16  ;;  %v10075_v21 = vpop.f32.mrb[214].mxu1  ;;  %v10077_v24 = vpack.c.bf16 %v2782_v47, %v2766_v40 }
 0x2ae   : > { %14247 = vst [vmem:[#allocation95_spill] sm:$0xff] %v10075_v21  ;;  %v10079_v7 = vpack.c.bf16 %v2814_v62, %v2798_v59  ;;  %v10081_v1 = vpack.c.bf16 %v2846_v17, %v2830_v44  ;;  %v10083_v37 = vpack.c.bf16 %v2878_v41, %v2862_v48  ;;  %v10085_v12 = vpop.f32.mrb[215].mxu1  ;;  %v10087_v20 = vpack.c.bf16 %v2910_v36, %v2894_v39  ;;  %v14249_v59 = vld [vmem:[#allocation71_spill] sm:$0xff]  ;;  %v14269_v39 = vld [vmem:[#allocation112_spill] sm:$0xff]  ;;  %v14275_v17 = vld [vmem:[#allocation14_spill] sm:$0xff] }
 0x2af   : > { %14248 = vst [vmem:[#allocation103_spill] sm:$0xff] %v10085_v12  ;;  %v10089_v34 = vpack.c.bf16 %v2942_v43, %v2926_v13  ;;  %v10091_v10 = vpack.c.bf16 %v2974_v0, %v2958_v19  ;;  %v10093_v29 = vpack.c.bf16 %v3006_v23, %v2990_v27  ;;  %4302 = vmatpush1.bf16.msra.mxu1 %v6520_v8  ;;  %v4111_v40 = vmul.bf16 1069105081, %v10001_v25  ;;  %v10115_v8 = vpop.f32.mrb[216].mxu0  ;;  %v14254_v43 = vld [vmem:[#allocation54_spill] sm:$0xff]  ;;  %v14271_v0 = vld [vmem:[#allocation97_spill] sm:$0xff] }
 0x2b0   : > { %v10096_v18 = vpack.c.bf16 %v3038_v26, %v3022_v58  ;;  %v10098_v62 = vpack.c.bf16 %v3070_v50, %v3054_v14  ;;  %4303 = vmatprep.subr.bf16.mxu1 %v6526_v55  ;;  %v3391_v41 = vmul.bf16 1069105081, %v3118_v30  ;;  %v3087_v48 = vsub.f32 %v9731_v63, %v10043_v60  ;;  %14250 = vst [vmem:[#allocation61_spill] sm:$0xff] %v10115_v8  ;;  %v10126_v30 = vpop.f32.mrb[217].mxu0  ;;  %v14257_v23 = vld [vmem:[#allocation38_spill] sm:$0xff]  ;;  %v14261_v55 = vld [vmem:[#allocation128_spill] sm:$0xff] }
 0x2b1   : > { %v3439_v44 = vmul.bf16 1069105081, %v3134_v49  ;;  %v3487_v33 = vmul.bf16 1069105081, %v10069_v6  ;;  %v3535_v4 = vmul.bf16 1069105081, %v10071_v57  ;;  %6527 = vpow.bf16 %v4111_v40 }
 0x2b2   : > { %v3583_v25 = vmul.bf16 1069105081, %v10073_v38  ;;  %v3631_v32 = vmul.bf16 1069105081, %v10077_v24  ;;  %v3679_v16 = vmul.bf16 1069105081, %v10079_v7  ;;  %6529 = vpow.bf16 %v3391_v41 }
 0x2b3   : > { %4304 = vmatpush1.bf16.msra.mxu1 %v6522_v51  ;;  %v3103_v47 = vsub.f32 %v9743_v45, %v10043_v60  ;;  %v10117_v51 = vpop.f32.mrb[216].mxu1  ;;  %v14252_v49 = vld [vmem:[#allocation124_spill] sm:$0xff]  ;;  %v2655_v19 = vsub.f32 %v14254_v43, %v10043_v60  ;;  %14255 = vst [vmem:[#allocation100_spill] sm:$0xff] %v10126_v30  ;;  %v2671_v58 = vsub.f32 %v14257_v23, %v10043_v60  ;;  %v14258_v6 = vld [vmem:[#allocation69_spill] sm:$0xff]  ;;  %v10137_v26 = vpop.f32.mrb[218].mxu0  ;;  %v14262_v24 = vld [vmem:[#allocation94_spill] sm:$0xff]  ;;  %6531 = vpow.bf16 %v3439_v44 }
 0x2b4   : > { %4305 = vmatprep.subr.bf16.mxu1 %v9844_v28  ;;  %14251 = vst [vmem:[#allocation132_spill] sm:$0xff] %v10117_v51  ;;  %v2623_v7 = vsub.f32 %v14252_v49, %v10043_v60  ;;  %v14253_v28 = vld [vmem:[#allocation42_spill] sm:$0xff]  ;;  %v10128_v45 = vpop.f32.mrb[217].mxu1  ;;  %v2687_v54 = vsub.f32 %v14258_v6, %v10043_v60  ;;  %14259 = vst [vmem:[#allocation8_spill] sm:$0xff] %v10137_v26  ;;  %v2703_v57 = vsub.f32 %v14261_v55, %v10043_v60  ;;  %v14263_v41 = vld [vmem:[#allocation19_spill] sm:$0xff] }
 0x2b5   : > { %v2639_v13 = vsub.f32 %v14253_v28, %v10043_v60  ;;  %14256 = vst [vmem:[#allocation122_spill] sm:$0xff] %v10128_v45  ;;  %v10131_v27 = vpack.c.bf16 %v3103_v47, %v3087_v48  ;;  %v10139_v14 = vpop.f32.mrb[218].mxu1  ;;  %v2719_v40 = vsub.f32 %v14262_v24, %v10043_v60  ;;  %v2735_v48 = vsub.f32 %v14263_v41, %v10043_v60  ;;  %v10149_v47 = vpop.f32.mrb[219].mxu0  ;;  %v14267_v23 = vld [vmem:[#allocation98_spill] sm:$0xff]  ;;  %v14270_v50 = vld [vmem:[#allocation75_spill] sm:$0xff]  ;;  %v14274_v38 = vld [vmem:[#allocation37_spill] sm:$0xff] }
 0x2b6   : > { %14260 = vst [vmem:[#allocation27_spill] sm:$0xff] %v10139_v14  ;;  %14264 = vst [vmem:[#allocation22_spill] sm:$0xff] %v10149_v47  ;;  %v10151_v49 = vpop.f32.mrb[219].mxu1  ;;  %v2767_v6 = vsub.f32 %v14267_v23, %v10043_v60  ;;  %v2783_v41 = vsub.f32 %v14269_v39, %v10043_v60  ;;  %v2799_v36 = vsub.f32 %v14270_v50, %v10043_v60  ;;  %6533 = vpow.bf16 %v3487_v33  ;;  %v14366_v8 = vld [vmem:[#allocation120_spill] sm:$0xff]  ;;  %v14367_v21 = vld [vmem:[#allocation66_spill] sm:$0xff] }
 0x2b7   : > { %4306 = vmatpush1.bf16.msra.mxu1 %v9801_v35  ;;  %14265 = vst [vmem:[#allocation135_spill] sm:$0xff] %v10151_v49  ;;  %v14266_v35 = vld [vmem:[#allocation77_spill] sm:$0xff]  ;;  %v10158_v55 = vpop.f32.mrb[220].mxu0  ;;  %v2815_v28 = vsub.f32 %v14271_v0, %v10043_v60  ;;  %v2847_v24 = vsub.f32 %v14274_v38, %v10043_v60  ;;  %v2863_v39 = vsub.f32 %v14275_v17, %v10043_v60  ;;  %v10178_v50 = vpop.f32.mrb[220].mxu1  ;;  %6535 = vpow.bf16 %v3535_v4  ;;  %v14283_v17 = vld [vmem:[#allocation110_spill] sm:$0xff]  ;;  %v14284_v4 = vld [vmem:[#allocation35_spill] sm:$0xff] }
 0x2b8   : > { %v2751_v43 = vsub.f32 %v14266_v35, %v10043_v60  ;;  %14268 = vst [vmem:[#allocation108_spill] sm:$0xff] %v10158_v55  ;;  %v10167_v44 = vpop.f32.mrb[221].mxu0  ;;  %v14273_v35 = vld [vmem:[#allocation109_spill] sm:$0xff]  ;;  %14277 = vst [vmem:[#allocation42_spill] sm:$0xff] %v10178_v50  ;;  %v10188_v38 = vpop.f32.mrb[221].mxu1  ;;  %6537 = vpow.bf16 %v3583_v25  ;;  %v2927_v50 = vsub.f32 %v14283_v17, %v10043_v60  ;;  %v14370_v30 = vld [vmem:[#allocation50_spill] sm:$0xff] }
 0x2b9   : > { %14272 = vst [vmem:[#allocation71_spill] sm:$0xff] %v10167_v44  ;;  %v2831_v23 = vsub.f32 %v14273_v35, %v10043_v60  ;;  %v10176_v63 = vpop.f32.mrb[222].mxu0  ;;  %v14278_v0 = vld [vmem:[#allocation81_spill] sm:$0xff]  ;;  %v14280_v44 = vld [vmem:[#allocation140_spill] sm:$0xff]  ;;  %14282 = vst [vmem:[#allocation38_spill] sm:$0xff] %v10188_v38  ;;  %6539 = vpow.bf16 %v3631_v32  ;;  %v2991_v38 = vsub.f32 %v9618_v31, %v10043_v60  ;;  %v3039_v32 = vsub.f32 %v9658_v61, %v10043_v60 }
 0x2ba   : > { %4308 = vmatmul.mubr.bf16.vlgmr.msra.gmra.mrb[4].mxu1 %v9913_v53  ;;  %14276 = vst [vmem:[#allocation124_spill] sm:$0xff] %v10176_v63  ;;  %v2879_v49 = vsub.f32 %v14278_v0, %v10043_v60  ;;  %v14279_v53 = vld [vmem:[#allocation64_spill] sm:$0xff]  ;;  %v2911_v35 = vsub.f32 %v14280_v44, %v10043_v60  ;;  %v10186_v55 = vpop.f32.mrb[223].mxu0  ;;  %v2943_v63 = vsub.f32 %v14284_v4, %v10043_v60  ;;  %6541 = vpow.bf16 %v3679_v16 }
 0x2bb   : > { %v2895_v33 = vsub.f32 %v14279_v53, %v10043_v60  ;;  %14281 = vst [vmem:[#allocation54_spill] sm:$0xff] %v10186_v55  ;;  %4393 = vmatprep.mubr.bf16.mxu1 %v9926_v22  ;;  %v2959_v0 = vsub.f32 %v9566_v9, %v10043_v60  ;;  %v10197_v53 = vpop.f32.mrb[222].mxu1  ;;  %v2975_v44 = vsub.f32 %v9589_v5, %v10043_v60  ;;  %v14289_v31 = vmul.bf16 1069105081, %v10081_v1  ;;  %v14356_v55 = vld [vmem:[#allocation12_spill] sm:$0xff] }
 0x2bc   : > { %14285 = vst [vmem:[#allocation69_spill] sm:$0xff] %v10197_v53  ;;  %v3007_v22 = vsub.f32 %v9632_v3, %v10043_v60  ;;  %v10205_v25 = vpop.f32.mrb[223].mxu1  ;;  %v10207_v17 = vpop.eup %6527  ;;  %v3023_v9 = vsub.f32 %v9643_v15, %v10043_v60  ;;  %v3055_v5 = vsub.f32 %v9683_v42, %v10043_v60  ;;  %v3071_v3 = vsub.f32 %v14180_v52, %v10043_v60 }
 0x2bd   : > { %14286 = vst [vmem:[#allocation128_spill] sm:$0xff] %v10205_v25  ;;  %14287 = vst [vmem:[#allocation94_spill] sm:$0xff] %v10207_v17  ;;  %v10215_v4 = vpop.eup %6529  ;;  %6543 = vpow.bf16 %v14289_v31  ;;  %v14290_v16 = vsub.f32 %v14249_v59, %v10043_v60  ;;  %v10226_v15 = vpack.c.bf16 %v2655_v19, %v2639_v13  ;;  %v14293_v61 = vmul.bf16 1069105081, %v10083_v37 }
 0x2be   : > { %14288 = vst [vmem:[#allocation19_spill] sm:$0xff] %v10215_v4  ;;  %v10230_v25 = vpack.c.bf16 %v2687_v54, %v2671_v58  ;;  %v10232_v42 = vpack.c.bf16 %v2719_v40, %v2703_v57  ;;  %v10234_v53 = vpack.c.bf16 %v2751_v43, %v2735_v48  ;;  %v10238_v31 = vpack.c.bf16 %v2783_v41, %v2767_v6  ;;  %v10258_v57 = vpop.eup %6531 }
 0x2bf   : > { %v10224_v17 = vpack.c.bf16 %v2623_v7, %v14290_v16  ;;  %14292 = vst [vmem:[#allocation98_spill] sm:$0xff] %v10226_v15  ;;  %6545 = vpow.bf16 %v14293_v61  ;;  %v10236_v1 = vpop.f32.mrb[224].mxu0  ;;  %v10240_v52 = vpack.c.bf16 %v2815_v28, %v2799_v36  ;;  %v10242_v60 = vpack.c.bf16 %v2847_v24, %v2831_v23  ;;  %14308 = vst [vmem:[#allocation156_spill] sm:$0xff] %v10258_v57  ;;  %v10271_v28 = vpop.f32.mrb[224].mxu1  ;;  %v14334_v16 = vld [vmem:[#allocation6_spill] sm:$0xff] }
 0x2c0   : > { %14294 = vst [vmem:[#allocation112_spill] sm:$0xff] %v10230_v25  ;;  %14295 = vst [vmem:[#allocation75_spill] sm:$0xff] %v10232_v42  ;;  %v10244_v59 = vpack.c.bf16 %v2879_v49, %v2863_v39  ;;  %v10246_v7 = vpop.f32.mrb[225].mxu0  ;;  %v10248_v37 = vpack.c.bf16 %v2911_v35, %v2895_v33  ;;  %v10250_v13 = vpack.c.bf16 %v2943_v63, %v2927_v50  ;;  %v14309_v36 = vmul.bf16 1069105081, %v10087_v20  ;;  %v14317_v39 = vld [vmem:[#allocation24_spill] sm:$0xff] }
 0x2c1   : > { %14291 = vst [vmem:[#allocation77_spill] sm:$0xff] %v10224_v17  ;;  %14296 = vst [vmem:[#allocation97_spill] sm:$0xff] %v10234_v53  ;;  %v10252_v19 = vpack.c.bf16 %v2975_v44, %v2959_v0  ;;  %v10254_v58 = vpack.c.bf16 %v3007_v22, %v2991_v38  ;;  %v10256_v54 = vpop.f32.mrb[226].mxu0  ;;  %v10262_v40 = vpack.c.bf16 %v3039_v32, %v3023_v9  ;;  %v14312_v49 = vrot.slane %v9970_v56, 1  ;;  %v10280_v23 = vpop.eup %6533  ;;  %v14319_v35 = vld [vmem:[#allocation73_spill] sm:$0xff]  ;;  %v14325_v32 = vld [vmem:[#allocation40_spill] sm:$0xff] }
 0x2c2   : > { %14297 = vst [vmem:[#allocation109_spill] sm:$0xff] %v10236_v1  ;;  %14298 = vst [vmem:[#allocation37_spill] sm:$0xff] %v10238_v31  ;;  %6547 = vpow.bf16 %v14309_v36  ;;  %v10264_v48 = vpack.c.bf16 %v3071_v3, %v3055_v5  ;;  %v10273_v43 = vpop.f32.mrb[227].mxu0  ;;  %v4015_v6 = vmul.bf16 1069105081, %v10096_v18  ;;  %v14320_v18 = vld [vmem:[#allocation126_spill] sm:$0xff] }
 0x2c3   : > { %14299 = vst [vmem:[#allocation14_spill] sm:$0xff] %v10240_v52  ;;  %14300 = vst [vmem:[#allocation81_spill] sm:$0xff] %v10242_v60  ;;  %v10269_v63 = vmax.f32 %v9970_v56, %v14312_v49  ;;  %v4063_v24 = vmul.bf16 1069105081, %v10098_v62  ;;  %v14315_v20 = vmul.bf16 1069105081, %v10089_v34  ;;  %v10292_v34 = vpop.eup %6535 }
 0x2c4   : > { %14301 = vst [vmem:[#allocation64_spill] sm:$0xff] %v10244_v59  ;;  %14302 = vst [vmem:[#allocation140_spill] sm:$0xff] %v10246_v7  ;;  %v4114_v41 = vmul.bf16 1069105081, %v10131_v27  ;;  %v14318_v56 = vld [vmem:[#allocation60_spill] sm:$0xff]  ;;  %v10290_v62 = vpop.f32.mrb[225].mxu1  ;;  %v10304_v36 = vpop.eup %6537 }
 0x2c5   : > { %14303 = vst [vmem:[#allocation110_spill] sm:$0xff] %v10248_v37  ;;  %14304 = vst [vmem:[#allocation35_spill] sm:$0xff] %v10250_v13  ;;  %6549 = vpow.bf16 %v14315_v20  ;;  %v3088_v50 = vsub.f32 %v14317_v39, %v10269_v63  ;;  %v3104_v33 = vsub.f32 %v14318_v56, %v10269_v63  ;;  %v14323_v27 = vld [vmem:[#allocation51_spill] sm:$0xff]  ;;  %v14324_v22 = vld [vmem:[#allocation57_spill] sm:$0xff]  ;;  %v10302_v61 = vpop.f32.mrb[226].mxu1  ;;  %v10316_v5 = vpop.eup %6539 }
 0x2c6   : > { %14305 = vst [vmem:[#allocation153_spill] sm:$0xff] %v10252_v19  ;;  %14306 = vst [vmem:[#allocation154_spill] sm:$0xff] %v10254_v58  ;;  %v14326_v3 = vld [vmem:[#allocation92_spill] sm:$0xff]  ;;  %v14329_v20 = vld [vmem:[#allocation131_spill] sm:$0xff]  ;;  %v10314_v38 = vpop.f32.mrb[227].mxu1 }
 0x2c7   : > { %14307 = vst [vmem:[#allocation155_spill] sm:$0xff] %v10256_v54  ;;  %14310 = vst [vmem:[#allocation157_spill] sm:$0xff] %v10262_v40  ;;  %v10306_v49 = vpack.c.bf16 %v3104_v33, %v3088_v50  ;;  %v14330_v56 = vld [vmem:[#allocation102_spill] sm:$0xff]  ;;  %v14331_v9 = vld [vmem:[#allocation43_spill] sm:$0xff]  ;;  %v10326_v44 = vpop.f32.mrb[228].mxu0  ;;  %v10328_v54 = vpop.eup %6541  ;;  %v14343_v50 = vrot.slane %v10025_v11, 1 }
 0x2c8   : > { %14311 = vst [vmem:[#allocation158_spill] sm:$0xff] %v10264_v48  ;;  %14313 = vst [vmem:[#allocation159_spill] sm:$0xff] %v10271_v28  ;;  %v14336_v33 = vld [vmem:[#allocation23_spill] sm:$0xff]  ;;  %v14340_v0 = vld [vmem:[#allocation133_spill] sm:$0xff]  ;;  %v10343_v28 = vpop.eup %6543  ;;  %v10365_v14 = vpop.f32.mrb[228].mxu1 }
 0x2c9   : > { %14314 = vst [vmem:[#allocation160_spill] sm:$0xff] %v10273_v43  ;;  %14316 = vst [vmem:[#allocation161_spill] sm:$0xff] %v10280_v23  ;;  %v14337_v39 = vld [vmem:[#allocation83_spill] sm:$0xff]  ;;  %v10339_v43 = vmax.f32 %v10025_v11, %v14343_v50  ;;  %v14349_v7 = vld [vmem:[#allocation136_spill] sm:$0xff]  ;;  %v14353_v50 = vmul.bf16 1069105081, %v10091_v10 }
 0x2ca   : > { %14321 = vst [vmem:[#allocation24_spill] sm:$0xff] %v10290_v62  ;;  %14322 = vst [vmem:[#allocation60_spill] sm:$0xff] %v10292_v34  ;;  %v14335_v62 = vld [vmem:[#allocation107_spill] sm:$0xff]  ;;  %v10355_v11 = vpop.eup %6545  ;;  %v10377_v47 = vpop.f32.mrb[229].mxu1  ;;  %v14364_v51 = vmul.bf16 1069105081, %v10093_v29 }
 0x2cb   : > { %14327 = vst [vmem:[#allocation73_spill] sm:$0xff] %v10302_v61  ;;  %14328 = vst [vmem:[#allocation126_spill] sm:$0xff] %v10304_v36  ;;  %v14342_v61 = vld [vmem:[#allocation47_spill] sm:$0xff]  ;;  %v10341_v36 = vpop.f32.mrb[229].mxu0  ;;  %6551 = vpow.bf16 %v14353_v50  ;;  %v14361_v50 = vld [vmem:[#allocation68_spill] sm:$0xff]  ;;  %v10387_v23 = vpop.f32.mrb[230].mxu1 }
 0x2cc   : > { %14332 = vst [vmem:[#allocation51_spill] sm:$0xff] %v10314_v38  ;;  %14333 = vst [vmem:[#allocation57_spill] sm:$0xff] %v10316_v5  ;;  %v14341_v5 = vld [vmem:[#allocation114_spill] sm:$0xff]  ;;  %v14348_v38 = vld [vmem:[#allocation15_spill] sm:$0xff]  ;;  %v10353_v45 = vpop.f32.mrb[230].mxu0  ;;  %6553 = vpow.bf16 %v14364_v51  ;;  %v10408_v57 = vpop.f32.mrb[231].mxu1 }
 0x2cd   : > { %14338 = vst [vmem:[#allocation40_spill] sm:$0xff] %v10326_v44  ;;  %14339 = vst [vmem:[#allocation92_spill] sm:$0xff] %v10328_v54  ;;  %v14347_v54 = vld [vmem:[#allocation36_spill] sm:$0xff]  ;;  %v14350_v1 = vld [vmem:[#allocation67_spill] sm:$0xff]  ;;  %v10367_v26 = vpop.f32.mrb[231].mxu0  ;;  %v10389_v12 = vpop.eup %6547  ;;  %6555 = vpow.bf16 %v4015_v6 }
 0x2ce   : > { %14344 = vst [vmem:[#allocation131_spill] sm:$0xff] %v10339_v43  ;;  %14345 = vst [vmem:[#allocation102_spill] sm:$0xff] %v10341_v36  ;;  %v14355_v44 = vld [vmem:[#allocation65_spill] sm:$0xff]  ;;  %v14359_v34 = vld [vmem:[#allocation87_spill] sm:$0xff]  ;;  %6557 = vpow.bf16 %v4063_v24 }
 0x2cf   : > { %14346 = vst [vmem:[#allocation43_spill] sm:$0xff] %v10343_v28  ;;  %14351 = vst [vmem:[#allocation6_spill] sm:$0xff] %v10353_v45  ;;  %v14354_v28 = vld [vmem:[#allocation125_spill] sm:$0xff]  ;;  %v14362_v36 = vld [vmem:[#allocation88_spill] sm:$0xff]  ;;  %6559 = vpow.bf16 %v4114_v41  ;;  %v10410_v41 = vpop.f32.mrb[232].mxu0 }
 0x2d0   : > { %14352 = vst [vmem:[#allocation107_spill] sm:$0xff] %v10355_v11  ;;  %14357 = vst [vmem:[#allocation23_spill] sm:$0xff] %v10365_v14  ;;  %v14360_v11 = vld [vmem:[#allocation56_spill] sm:$0xff]  ;;  %v10393_v2 = vpop.eup %6549  ;;  %v14372_v29 = vld [vmem:[#allocation10_spill] sm:$0xff]  ;;  %v10420_v46 = vpop.f32.mrb[233].mxu0 }
 0x2d1   : > { %14358 = vst [vmem:[#allocation83_spill] sm:$0xff] %v10367_v26  ;;  %14363 = vst [vmem:[#allocation133_spill] sm:$0xff] %v10377_v47  ;;  %v14365_v14 = vld [vmem:[#allocation104_spill] sm:$0xff]  ;;  %v3089_v47 = vsub.f32 %v14370_v30, %v10339_v43  ;;  %v3105_v51 = vsub.f32 %v14372_v29, %v10339_v43  ;;  %v14386_v26 = vld [vmem:[#allocation18_spill] sm:$0xff]  ;;  %v10431_v19 = vpop.f32.mrb[232].mxu1 }
 0x2d2   : > { %14368 = vst [vmem:[#allocation114_spill] sm:$0xff] %v10387_v23  ;;  %14369 = vst [vmem:[#allocation47_spill] sm:$0xff] %v10389_v12  ;;  %v2753_v58 = vsub.f32 %v14386_v26, %v10339_v43  ;;  %v10429_v23 = vpop.f32.mrb[234].mxu0  ;;  %v10443_v42 = vpop.f32.mrb[233].mxu1  ;;  %v4117_v26 = vmul.bf16 1069105081, %v10306_v49 }
 0x2d3   : > { %14371 = vst [vmem:[#allocation36_spill] sm:$0xff] %v10393_v2  ;;  %v10402_v6 = vpack.c.bf16 %v3105_v51, %v3089_v47  ;;  %14377 = vst [vmem:[#allocation136_spill] sm:$0xff] %v10408_v57  ;;  %v14384_v57 = vld [vmem:[#allocation111_spill] sm:$0xff]  ;;  %v14389_v47 = vld [vmem:[#allocation116_spill] sm:$0xff]  ;;  %v10452_v52 = vpop.f32.mrb[234].mxu1 }
 0x2d4   : > { %14378 = vst [vmem:[#allocation67_spill] sm:$0xff] %v10410_v41  ;;  %14383 = vst [vmem:[#allocation125_spill] sm:$0xff] %v10420_v46  ;;  %v2721_v4 = vsub.f32 %v14384_v57, %v10339_v43  ;;  %v14385_v41 = vld [vmem:[#allocation93_spill] sm:$0xff]  ;;  %v2769_v48 = vsub.f32 %v14389_v47, %v10339_v43  ;;  %v14390_v46 = vld [vmem:[#allocation31_spill] sm:$0xff] }
 0x2d5   : > { %14374 = vst [vmem:[#allocation15_spill] sm:$0xff] %v10402_v6  ;;  %v2737_v40 = vsub.f32 %v14385_v41, %v10339_v43  ;;  %14387 = vst [vmem:[#allocation65_spill] sm:$0xff] %v10429_v23  ;;  %v2785_v13 = vsub.f32 %v14390_v46, %v10339_v43  ;;  %v14391_v2 = vld [vmem:[#allocation84_spill] sm:$0xff]  ;;  %v14392_v57 = vld [vmem:[#allocation134_spill] sm:$0xff]  ;;  %v10441_v41 = vpop.f32.mrb[235].mxu0 }
 0x2d6   : > { %14388 = vst [vmem:[#allocation12_spill] sm:$0xff] %v10431_v19  ;;  %v2801_v37 = vsub.f32 %v14391_v2, %v10339_v43  ;;  %v2817_v59 = vsub.f32 %v14392_v57, %v10339_v43  ;;  %14393 = vst [vmem:[#allocation87_spill] sm:$0xff] %v10441_v41  ;;  %v14395_v19 = vld [vmem:[#allocation29_spill] sm:$0xff]  ;;  %v14396_v47 = vld [vmem:[#allocation79_spill] sm:$0xff]  ;;  %v10454_v2 = vpop.eup %6551 }
 0x2d7   : > { %14394 = vst [vmem:[#allocation56_spill] sm:$0xff] %v10443_v42  ;;  %v2833_v23 = vsub.f32 %v14395_v19, %v10339_v43  ;;  %v2849_v60 = vsub.f32 %v14396_v47, %v10339_v43  ;;  %v14397_v46 = vld [vmem:[#allocation90_spill] sm:$0xff]  ;;  %14398 = vst [vmem:[#allocation68_spill] sm:$0xff] %v10452_v52  ;;  %v14401_v42 = vld [vmem:[#allocation141_spill] sm:$0xff]  ;;  %v10464_v47 = vpop.f32.mrb[235].mxu1  ;;  %v10474_v45 = vpop.eup %6553 }
 0x2d8   : > { %v2865_v25 = vsub.f32 %v14397_v46, %v10339_v43  ;;  %14399 = vst [vmem:[#allocation88_spill] sm:$0xff] %v10454_v2  ;;  %v14400_v57 = vld [vmem:[#allocation58_spill] sm:$0xff]  ;;  %v2897_v31 = vsub.f32 %v14401_v42, %v10339_v43  ;;  %v14402_v49 = vld [vmem:[#allocation99_spill] sm:$0xff]  ;;  %v14403_v19 = vld [vmem:[#allocation41_spill] sm:$0xff]  ;;  %v10484_v10 = vpop.f32.mrb[236].mxu0 }
 0x2d9   : > { %v2881_v41 = vsub.f32 %v14400_v57, %v10339_v43  ;;  %v2913_v53 = vsub.f32 %v14402_v49, %v10339_v43  ;;  %v2929_v15 = vsub.f32 %v14403_v19, %v10339_v43  ;;  %14404 = vst [vmem:[#allocation104_spill] sm:$0xff] %v10464_v47  ;;  %v14405_v46 = vld [vmem:[#allocation85_spill] sm:$0xff]  ;;  %v14406_v52 = vld [vmem:[#allocation16_spill] sm:$0xff]  ;;  %v14408_v12 = vld [vmem:[#allocation62_spill] sm:$0xff] }
 0x2da   : > { %v2945_v51 = vsub.f32 %v14405_v46, %v10339_v43  ;;  %v2961_v2 = vsub.f32 %v14406_v52, %v10339_v43  ;;  %v14407_v6 = vld [vmem:[#allocation32_spill] sm:$0xff]  ;;  %v2993_v42 = vsub.f32 %v14408_v12, %v10339_v43  ;;  %14409 = vst [vmem:[#allocation120_spill] sm:$0xff] %v10474_v45  ;;  %v14410_v49 = vld [vmem:[#allocation74_spill] sm:$0xff]  ;;  %v14411_v19 = vld [vmem:[#allocation115_spill] sm:$0xff]  ;;  %v14417_v45 = vsub.f32 %v14319_v35, %v10269_v63 }
 0x2db   : > { %v2977_v57 = vsub.f32 %v14407_v6, %v10339_v43  ;;  %v3009_v29 = vsub.f32 %v14410_v49, %v10339_v43  ;;  %v3025_v47 = vsub.f32 %v14411_v19, %v10339_v43  ;;  %v14412_v24 = vld [vmem:[#allocation119_spill] sm:$0xff]  ;;  %14414 = vst [vmem:[#allocation66_spill] sm:$0xff] %v10484_v10  ;;  %v10486_v6 = vpop.eup %6555  ;;  %v14416_v12 = vld [vmem:[#allocation129_spill] sm:$0xff]  ;;  %v14418_v49 = vsub.f32 %v14320_v18, %v10269_v63 }
 0x2dc   : > { %v3041_v46 = vsub.f32 %v14412_v24, %v10339_v43  ;;  %v14413_v30 = vld [vmem:[#allocation127_spill] sm:$0xff]  ;;  %14415 = vst [vmem:[#allocation50_spill] sm:$0xff] %v10486_v6  ;;  %v3073_v17 = vsub.f32 %v14416_v12, %v10339_v43  ;;  %v14419_v24 = vsub.f32 %v14323_v27, %v10269_v63  ;;  %v14421_v6 = vsub.f32 %v14325_v32, %v10269_v63 }
 0x2dd   : > { %v3057_v52 = vsub.f32 %v14413_v30, %v10339_v43  ;;  %v10496_v19 = vpack.c.bf16 %v14418_v49, %v14417_v45  ;;  %v14420_v30 = vsub.f32 %v14324_v22, %v10269_v63  ;;  %v14422_v12 = vsub.f32 %v14326_v3, %v10269_v63  ;;  %v10514_v43 = vpop.f32.mrb[237].mxu0  ;;  %v10516_v45 = vpop.eup %6557 }
 0x2de   : > { %14423 = vst [vmem:[#allocation10_spill] sm:$0xff] %v10516_v45  ;;  %v14424_v18 = vsub.f32 %v14329_v20, %v10269_v63  ;;  %v14425_v27 = vsub.f32 %v14330_v56, %v10269_v63  ;;  %v14426_v32 = vsub.f32 %v14331_v9, %v10269_v63  ;;  %v14427_v3 = vsub.f32 %v14334_v16, %v10269_v63  ;;  %v10552_v16 = vpop.eup %6559  ;;  %v14519_v45 = vld [vmem:[#allocation113_spill] sm:$0xff] }
 0x2df   : > { %v10504_v10 = vpack.c.bf16 %v14420_v30, %v14419_v24  ;;  %v10512_v35 = vpack.c.bf16 %v14422_v12, %v14421_v6  ;;  %v14428_v49 = vsub.f32 %v14335_v62, %v10269_v63  ;;  %v14429_v24 = vsub.f32 %v14336_v33, %v10269_v63  ;;  %v10550_v12 = vpop.f32.mrb[238].mxu0  ;;  %14432 = vst [vmem:[#allocation111_spill] sm:$0xff] %v10552_v16 }
 0x2e0   : > { %v10524_v22 = vpack.c.bf16 %v14425_v27, %v14424_v18  ;;  %v10532_v6 = vpack.c.bf16 %v14427_v3, %v14426_v32  ;;  %v14430_v56 = vsub.f32 %v14337_v39, %v10269_v63  ;;  %v14431_v30 = vsub.f32 %v14340_v0, %v10269_v63 }
 0x2e1   : > { %v10540_v20 = vpack.c.bf16 %v14429_v24, %v14428_v49  ;;  %v14433_v62 = vsub.f32 %v14341_v5, %v10269_v63  ;;  %v14434_v33 = vsub.f32 %v14342_v61, %v10269_v63  ;;  %v14435_v39 = vsub.f32 %v14347_v54, %v10269_v63  ;;  %v10586_v24 = vpop.f32.mrb[236].mxu1 }
 0x2e2   : > { %v10548_v9 = vpack.c.bf16 %v14431_v30, %v14430_v56  ;;  %v14436_v0 = vsub.f32 %v14348_v38, %v10269_v63  ;;  %v14437_v32 = vsub.f32 %v14349_v7, %v10269_v63  ;;  %v14438_v3 = vsub.f32 %v14350_v1, %v10269_v63  ;;  %14441 = vst [vmem:[#allocation93_spill] sm:$0xff] %v10586_v24  ;;  %v10588_v38 = vpop.f32.mrb[239].mxu0 }
 0x2e3   : > { %v10560_v18 = vpack.c.bf16 %v14434_v33, %v14433_v62  ;;  %v14439_v61 = vsub.f32 %v14354_v28, %v10269_v63  ;;  %v14440_v49 = vsub.f32 %v14355_v44, %v10269_v63  ;;  %14442 = vst [vmem:[#allocation18_spill] sm:$0xff] %v10588_v38  ;;  %v14443_v7 = vsub.f32 %v14356_v55, %v10269_v63 }
 0x2e4   : > { %v10568_v27 = vpack.c.bf16 %v14436_v0, %v14435_v39  ;;  %v10576_v5 = vpack.c.bf16 %v14438_v3, %v14437_v32  ;;  %v14444_v1 = vsub.f32 %v14359_v34, %v10269_v63  ;;  %v14445_v28 = vsub.f32 %v14360_v11, %v10269_v63  ;;  %v10622_v0 = vpop.f32.mrb[237].mxu1  ;;  %v14454_v3 = vld [vmem:[#allocation39_spill] sm:$0xff] }
 0x2e5   : > { %v10584_v54 = vpack.c.bf16 %v14440_v49, %v14439_v61  ;;  %v14446_v44 = vsub.f32 %v14361_v50, %v10269_v63  ;;  %v14447_v62 = vsub.f32 %v14362_v36, %v10269_v63  ;;  %v14448_v33 = vsub.f32 %v14365_v14, %v10269_v63  ;;  %14451 = vst [vmem:[#allocation116_spill] sm:$0xff] %v10622_v0  ;;  %v14452_v50 = vld [vmem:[#allocation77_spill] sm:$0xff]  ;;  %v14455_v36 = vld [vmem:[#allocation131_spill] sm:$0xff]  ;;  %v14457_v49 = vld [vmem:[#allocation106_spill] sm:$0xff] }
 0x2e6   : > { %v10596_v56 = vpack.c.bf16 %v14444_v1, %v14443_v7  ;;  %v14449_v34 = vsub.f32 %v14366_v8, %v10269_v63  ;;  %v14450_v39 = vsub.f32 %v14367_v21, %v10269_v63  ;;  %v14453_v32 = vmul.bf16 1069105081, %v14452_v50  ;;  %v14459_v1 = vld [vmem:[#allocation76_spill] sm:$0xff]  ;;  %v10650_v50 = vpop.f32.mrb[238].mxu1 }
 0x2e7   : > { %v10604_v30 = vpack.c.bf16 %v14446_v44, %v14445_v28  ;;  %v10612_v55 = vpack.c.bf16 %v14448_v33, %v14447_v62  ;;  %v14456_v61 = vsub.f32 %v14454_v3, %v14455_v36  ;;  %v14458_v14 = vsub.f32 %v14457_v49, %v14455_v36  ;;  %v14461_v28 = vld [vmem:[#allocation80_spill] sm:$0xff]  ;;  %14467 = vst [vmem:[#allocation31_spill] sm:$0xff] %v10650_v50 }
 0x2e8   : > { %v10620_v11 = vpack.c.bf16 %v14450_v39, %v14449_v34  ;;  %6561 = vpow.bf16 %v14453_v32  ;;  %v14460_v8 = vsub.f32 %v14459_v1, %v14455_v36  ;;  %v14462_v21 = vsub.f32 %v14461_v28, %v14455_v36  ;;  %v14463_v44 = vld [vmem:[#allocation44_spill] sm:$0xff]  ;;  %v14468_v32 = vld [vmem:[#allocation15_spill] sm:$0xff]  ;;  %v10662_v28 = vpop.f32.mrb[239].mxu1 }
 0x2e9   : > { %v10632_v7 = vpack.c.bf16 %v14458_v14, %v14456_v61  ;;  %v14464_v62 = vsub.f32 %v14463_v44, %v14455_v36  ;;  %v14465_v33 = vld [vmem:[#allocation72_spill] sm:$0xff]  ;;  %v4120_v3 = vmul.bf16 1069105081, %v14468_v32  ;;  %v10658_v1 = vpack.c.bf16 %v2753_v58, %v2737_v40  ;;  %14471 = vst [vmem:[#allocation84_spill] sm:$0xff] %v10662_v28  ;;  %v14474_v40 = vld [vmem:[#allocation97_spill] sm:$0xff] }
 0x2ea   : > { %v10640_v63 = vpack.c.bf16 %v14462_v21, %v14460_v8  ;;  %v14466_v34 = vsub.f32 %v14465_v33, %v14455_v36  ;;  %v14469_v61 = vld [vmem:[#allocation96_spill] sm:$0xff]  ;;  %v10660_v8 = vpack.c.bf16 %v2785_v13, %v2769_v48  ;;  %v14472_v21 = vld [vmem:[#allocation98_spill] sm:$0xff]  ;;  %v10668_v33 = vpack.c.bf16 %v2849_v60, %v2833_v23  ;;  %v10678_v13 = vpop.f32.mrb[240].mxu0 }
 0x2eb   : > { %v14470_v49 = vsub.f32 %v14469_v61, %v14455_v36  ;;  %v14473_v44 = vmul.bf16 1069105081, %v14472_v21  ;;  %v10672_v32 = vpack.c.bf16 %v2913_v53, %v2897_v31  ;;  %v10676_v58 = vpack.c.bf16 %v2977_v57, %v2961_v2  ;;  %v10687_v60 = vpop.f32.mrb[241].mxu0  ;;  %v14477_v53 = vld [vmem:[#allocation14_spill] sm:$0xff]  ;;  %v14478_v31 = vld [vmem:[#allocation112_spill] sm:$0xff] }
 0x2ec   : > { %v10648_v39 = vpack.c.bf16 %v14466_v34, %v14464_v62  ;;  %v10666_v62 = vpack.c.bf16 %v2817_v59, %v2801_v37  ;;  %v10670_v34 = vpack.c.bf16 %v2881_v41, %v2865_v25  ;;  %v3586_v48 = vmul.bf16 1069105081, %v14474_v40  ;;  %14475 = vst [vmem:[#allocation134_spill] sm:$0xff] %v10687_v60  ;;  %v14476_v25 = vld [vmem:[#allocation37_spill] sm:$0xff]  ;;  %v14487_v21 = vld [vmem:[#allocation154_spill] sm:$0xff] }
 0x2ed   : > { %v10656_v14 = vpack.c.bf16 %v2721_v4, %v14470_v49  ;;  %6563 = vpow.bf16 %v14473_v44  ;;  %v10674_v4 = vpack.c.bf16 %v2945_v51, %v2929_v15  ;;  %v10681_v36 = vpack.c.bf16 %v3009_v29, %v2993_v42  ;;  %v14480_v51 = vld [vmem:[#allocation81_spill] sm:$0xff]  ;;  %v14483_v29 = vld [vmem:[#allocation64_spill] sm:$0xff]  ;;  %v14485_v42 = vld [vmem:[#allocation35_spill] sm:$0xff] }
 0x2ee   : > { %6565 = vpow.bf16 %v4117_v26  ;;  %v10683_v61 = vpack.c.bf16 %v3041_v46, %v3025_v47  ;;  %v10685_v59 = vpack.c.bf16 %v3073_v17, %v3057_v52  ;;  %v3634_v37 = vmul.bf16 1069105081, %v14476_v25  ;;  %v14481_v26 = vld [vmem:[#allocation75_spill] sm:$0xff]  ;;  %v14484_v17 = vld [vmem:[#allocation110_spill] sm:$0xff]  ;;  %v14488_v25 = vld [vmem:[#allocation157_spill] sm:$0xff] }
 0x2ef   : > { %6567 = vpow.bf16 %v4120_v3  ;;  %v3682_v15 = vmul.bf16 1069105081, %v14477_v53  ;;  %v14479_v23 = vmul.bf16 1069105081, %v14478_v31  ;;  %v3730_v41 = vmul.bf16 1069105081, %v14480_v51 }
 0x2f0   : > { %v14482_v2 = vmul.bf16 1069105081, %v14481_v26  ;;  %v3778_v47 = vmul.bf16 1069105081, %v14483_v29  ;;  %v3826_v57 = vmul.bf16 1069105081, %v14484_v17 }
 0x2f1   : > { %6569 = vpow.bf16 %v14479_v23  ;;  %v3874_v46 = vmul.bf16 1069105081, %v14485_v42  ;;  %v14486_v3 = vld [vmem:[#allocation153_spill] sm:$0xff]  ;;  %v3970_v44 = vmul.bf16 1069105081, %v14487_v21  ;;  %v14489_v31 = vld [vmem:[#allocation19_spill] sm:$0xff] }
 0x2f2   : > { %6571 = vpow.bf16 %v14482_v2  ;;  %v3922_v49 = vmul.bf16 1069105081, %v14486_v3  ;;  %v4018_v53 = vmul.bf16 1069105081, %v14488_v25  ;;  %v14492_v51 = vld [vmem:[#allocation151_spill] sm:$0xff]  ;;  %v14494_v2 = vld [vmem:[#allocation152_spill] sm:$0xff] }
 0x2f3   : > { %6573 = vpow.bf16 %v3586_v48  ;;  %v6562_v52 = vpop.eup %6561  ;;  %v14495_v29 = vld [vmem:[#allocation144_spill] sm:$0xff]  ;;  %v10715_v21 = vpop.f32.mrb[242].mxu0 }
 0x2f4   : > { %6575 = vpow.bf16 %v3634_v37  ;;  %4318 = vmatprep.subr.bf16.mxu0 %v6562_v52  ;;  %v14491_v37 = vld [vmem:[#allocation158_spill] sm:$0xff]  ;;  %v10717_v25 = vpop.f32.mrb[240].mxu1 }
 0x2f5   : > { %6577 = vpow.bf16 %v3682_v15  ;;  %4319 = vmatpush1.bf16.msra.mxu0 %v14489_v31  ;;  %v4066_v23 = vmul.bf16 1069105081, %v14491_v37  ;;  %v3397_v15 = vmul.bf16 1069105081, %v10496_v19  ;;  %v14499_v52 = vld [vmem:[#allocation150_spill] sm:$0xff]  ;;  %14500 = vst [vmem:[#allocation79_spill] sm:$0xff] %v10717_v25 }
 0x2f6   : > { %6579 = vpow.bf16 %v3730_v41  ;;  %v14493_v41 = vld [vmem:[#allocation148_spill] sm:$0xff]  ;;  %v3445_v19 = vmul.bf16 1069105081, %v10504_v10  ;;  %v14503_v31 = vld [vmem:[#allocation145_spill] sm:$0xff]  ;;  %v14504_v37 = vld [vmem:[#allocation26_spill] sm:$0xff] }
 0x2f7   : > { %6581 = vpow.bf16 %v3778_v47  ;;  %v2458_v26 = vmax.f32 %v14493_v41, %v14492_v51  ;;  %v14496_v47 = vld [vmem:[#allocation146_spill] sm:$0xff]  ;;  %v14505_v41 = vmax.f32 %v14503_v31, %v14504_v37  ;;  %v14511_v10 = vld [vmem:[#allocation63_spill] sm:$0xff] }
 0x2f8   : > { %v6564_v40 = vpop.eup %6563  ;;  %6583 = vpow.bf16 %v3826_v57  ;;  %v14497_v17 = vmax.f32 %v14495_v29, %v14496_v47  ;;  %v14498_v57 = vld [vmem:[#allocation121_spill] sm:$0xff]  ;;  %v14508_v47 = vld [vmem:[#allocation156_spill] sm:$0xff] }
 0x2f9   : > { %v10703_v48 = vpop.eup %6565  ;;  %6585 = vpow.bf16 %v3874_v46  ;;  %4320 = vmatprep.subr.bf16.mxu0 %v6564_v40  ;;  %v2495_v3 = vmax.f32 %v14499_v52, %v14498_v57  ;;  %v14502_v40 = vld [vmem:[#allocation123_spill] sm:$0xff] }
 0x2fa   : > { %14490 = vst [vmem:[#allocation29_spill] sm:$0xff] %v10703_v48  ;;  %6587 = vpow.bf16 %v3922_v49  ;;  %v2531_v42 = vmax.f32 %v14497_v17, %v14494_v2  ;;  %v10719_v46 = vpop.eup %6567  ;;  %v3493_v49 = vmul.bf16 1069105081, %v10512_v35  ;;  %v2568_v29 = vmax.f32 %v14505_v41, %v14502_v40  ;;  %v10727_v17 = vpop.f32.mrb[243].mxu0  ;;  %4321 = vmatpush1.bf16.msra.mxu0 %v14508_v47  ;;  %v14509_v48 = vld [vmem:[#allocation13_spill] sm:$0xff] }
 0x2fb   : > { %14501 = vst [vmem:[#allocation90_spill] sm:$0xff] %v10719_v46  ;;  %6589 = vpow.bf16 %v3970_v44  ;;  %14506 = vst [vmem:[#allocation58_spill] sm:$0xff] %v10727_v17  ;;  %v10729_v2 = vpop.f32.mrb[241].mxu1  ;;  %v14510_v44 = vld [vmem:[#allocation86_spill] sm:$0xff]  ;;  %v2496_v51 = vmax.f32 %v2495_v3, %v14511_v10  ;;  %v10737_v16 = vpop.f32.mrb[244].mxu0  ;;  %v14517_v3 = vld [vmem:[#allocation91_spill] sm:$0xff] }
 0x2fc   : > { %14507 = vst [vmem:[#allocation141_spill] sm:$0xff] %v10729_v2  ;;  %v6570_v52 = vpop.eup %6569  ;;  %6591 = vpow.bf16 %v4018_v53  ;;  %v2532_v46 = vmax.f32 %v2531_v42, %v14509_v48  ;;  %v2459_v57 = vmax.f32 %v2458_v26, %v14510_v44  ;;  %v10735_v35 = vpop.f32.mrb[242].mxu1  ;;  %14513 = vst [vmem:[#allocation41_spill] sm:$0xff] %v10737_v16  ;;  %v3541_v41 = vmul.bf16 1069105081, %v10524_v22  ;;  %v14514_v53 = vld [vmem:[#allocation48_spill] sm:$0xff] }
 0x2fd   : > { %14512 = vst [vmem:[#allocation99_spill] sm:$0xff] %v10735_v35  ;;  %v6572_v31 = vpop.eup %6571  ;;  %6593 = vpow.bf16 %v4066_v23  ;;  %v3589_v40 = vmul.bf16 1069105081, %v10532_v6  ;;  %4322 = vmatprep.subr.bf16.mxu0 %v6570_v52  ;;  %v2569_v37 = vmax.f32 %v2568_v29, %v14514_v53  ;;  %v10742_v47 = vpop.f32.mrb[243].mxu1  ;;  %v14518_v10 = vld [vmem:[#allocation130_spill] sm:$0xff]  ;;  %v2497_v16 = vmax.f32 %v2496_v51, %v14519_v45  ;;  %v14522_v53 = vld [vmem:[#allocation25_spill] sm:$0xff] }
 0x2fe   : > { %14515 = vst [vmem:[#allocation85_spill] sm:$0xff] %v10742_v47  ;;  %v10744_v42 = vpop.f32.mrb[245].mxu0  ;;  %v6574_v26 = vpop.eup %6573  ;;  %6595 = vpow.bf16 %v3397_v15  ;;  %v2460_v48 = vmax.f32 %v2459_v57, %v14517_v3  ;;  %v2533_v44 = vmax.f32 %v2532_v46, %v14518_v10  ;;  %v3637_v29 = vmul.bf16 1069105081, %v10540_v20  ;;  %v14525_v51 = vld [vmem:[#allocation161_spill] sm:$0xff]  ;;  %v14526_v10 = vld [vmem:[#allocation95_spill] sm:$0xff] }
 0x2ff   : > { %14516 = vst [vmem:[#allocation16_spill] sm:$0xff] %v10744_v42  ;;  %v10749_v23 = vpop.f32.mrb[246].mxu0  ;;  %v10751_v22 = vpop.f32.mrb[244].mxu1  ;;  %v3685_v52 = vmul.bf16 1069105081, %v10548_v9  ;;  %6597 = vpow.bf16 %v3445_v19  ;;  %v2570_v47 = vmax.f32 %v2569_v37, %v14522_v53  ;;  %4323 = vmatpush1.bf16.msra.mxu0 %v14525_v51  ;;  %v14527_v3 = vld [vmem:[#allocation61_spill] sm:$0xff] }
 0x300   : > { %14520 = vst [vmem:[#allocation32_spill] sm:$0xff] %v10749_v23  ;;  %14521 = vst [vmem:[#allocation62_spill] sm:$0xff] %v10751_v22  ;;  %v10753_v6 = vpop.eup %6575  ;;  %v10758_v15 = vpop.f32.mrb[247].mxu0  ;;  %6599 = vpow.bf16 %v3493_v49  ;;  %v2534_v45 = vmax.f32 %v2533_v44, %v14526_v10  ;;  %v2461_v22 = vmax.f32 %v2460_v48, %v14527_v3  ;;  %v14528_v23 = vld [vmem:[#allocation100_spill] sm:$0xff]  ;;  %v3733_v37 = vmul.bf16 1069105081, %v10560_v18  ;;  %4324 = vmatprep.subr.bf16.mxu0 %v6572_v31 }
 0x301   : > { %14523 = vst [vmem:[#allocation74_spill] sm:$0xff] %v10758_v15  ;;  %v10760_v57 = vpop.f32.mrb[245].mxu1  ;;  %v10762_v46 = vpop.eup %6577  ;;  %v2498_v20 = vmax.f32 %v2497_v16, %v14528_v23  ;;  %v3781_v53 = vmul.bf16 1069105081, %v10568_v27  ;;  %6601 = vpow.bf16 %v3541_v41  ;;  %v14531_v49 = vld [vmem:[#allocation103_spill] sm:$0xff]  ;;  %v14534_v16 = vld [vmem:[#allocation8_spill] sm:$0xff] }
 0x302   : > { %14524 = vst [vmem:[#allocation115_spill] sm:$0xff] %v10760_v57  ;;  %v10768_v42 = vpop.f32.mrb[246].mxu1  ;;  %v10770_v9 = vpop.f32.mrb[248].mxu0  ;;  %v2571_v51 = vmax.f32 %v2570_v47, %v14531_v49  ;;  %6603 = vpow.bf16 %v3589_v40  ;;  %v2462_v10 = vmax.f32 %v2461_v22, %v14534_v16  ;;  %v14535_v23 = vld [vmem:[#allocation132_spill] sm:$0xff]  ;;  %v3829_v41 = vmul.bf16 1069105081, %v10576_v5 }
 0x303   : > { %14529 = vst [vmem:[#allocation119_spill] sm:$0xff] %v10768_v42  ;;  %14530 = vst [vmem:[#allocation127_spill] sm:$0xff] %v10770_v9  ;;  %v10772_v19 = vpop.eup %6579  ;;  %v10777_v57 = vpop.f32.mrb[247].mxu1  ;;  %v2535_v3 = vmax.f32 %v2534_v45, %v14535_v23  ;;  %v14536_v9 = vld [vmem:[#allocation22_spill] sm:$0xff]  ;;  %v3877_v47 = vmul.bf16 1069105081, %v10584_v54  ;;  %6605 = vpow.bf16 %v3637_v29 }
 0x304   : > { %14532 = vst [vmem:[#allocation129_spill] sm:$0xff] %v10777_v57  ;;  %v10779_v44 = vpop.f32.mrb[249].mxu0  ;;  %v10781_v48 = vpop.eup %6581  ;;  %v2499_v42 = vmax.f32 %v2498_v20, %v14536_v9  ;;  %v14539_v49 = vld [vmem:[#allocation122_spill] sm:$0xff]  ;;  %6607 = vpow.bf16 %v3685_v52  ;;  %v14542_v20 = vld [vmem:[#allocation60_spill] sm:$0xff]  ;;  %v14543_v23 = vld [vmem:[#allocation27_spill] sm:$0xff] }
 0x305   : > { %14533 = vst [vmem:[#allocation77_spill] sm:$0xff] %v10779_v44  ;;  %v10786_v18 = vpop.f32.mrb[250].mxu0  ;;  %v10788_v27 = vpop.f32.mrb[248].mxu1  ;;  %v2572_v57 = vmax.f32 %v2571_v51, %v14539_v49  ;;  %4325 = vmatpush1.bf16.msra.mxu0 %v14542_v20  ;;  %v2536_v9 = vmax.f32 %v2535_v3, %v14543_v23  ;;  %v14544_v16 = vld [vmem:[#allocation108_spill] sm:$0xff]  ;;  %v3925_v29 = vmul.bf16 1069105081, %v10596_v56  ;;  %6609 = vpow.bf16 %v3733_v37 }
 0x306   : > { %14537 = vst [vmem:[#allocation39_spill] sm:$0xff] %v10786_v18  ;;  %14538 = vst [vmem:[#allocation131_spill] sm:$0xff] %v10788_v27  ;;  %v10790_v31 = vpop.eup %6583  ;;  %v10795_v40 = vpop.f32.mrb[251].mxu0  ;;  %v2463_v27 = vmax.f32 %v2462_v10, %v14544_v16  ;;  %v14545_v18 = vld [vmem:[#allocation71_spill] sm:$0xff]  ;;  %v3400_v51 = vmul.bf16 1069105081, %v10632_v7  ;;  %4326 = vmatprep.subr.bf16.mxu0 %v6574_v26  ;;  %6611 = vpow.bf16 %v3781_v53 }
 0x307   : > { %14540 = vst [vmem:[#allocation106_spill] sm:$0xff] %v10795_v40  ;;  %v10797_v22 = vpop.f32.mrb[249].mxu1  ;;  %v10799_v45 = vpop.eup %6585  ;;  %v2500_v5 = vmax.f32 %v2499_v42, %v14545_v18  ;;  %v14547_v49 = vld [vmem:[#allocation135_spill] sm:$0xff]  ;;  %v14549_v10 = vld [vmem:[#allocation124_spill] sm:$0xff]  ;;  %v14550_v42 = vld [vmem:[#allocation42_spill] sm:$0xff]  ;;  %6613 = vpow.bf16 %v3829_v41 }
 0x308   : > { %14541 = vst [vmem:[#allocation76_spill] sm:$0xff] %v10797_v22  ;;  %v10805_v44 = vpop.f32.mrb[250].mxu1  ;;  %v10807_v54 = vpop.eup %6587  ;;  %v2573_v52 = vmax.f32 %v2572_v57, %v14547_v49  ;;  %v2464_v3 = vmax.f32 %v2463_v27, %v14549_v10  ;;  %v2537_v23 = vmax.f32 %v2536_v9, %v14550_v42  ;;  %v14551_v18 = vld [vmem:[#allocation54_spill] sm:$0xff]  ;;  %v3973_v7 = vmul.bf16 1069105081, %v10604_v30  ;;  %v14556_v9 = vld [vmem:[#allocation69_spill] sm:$0xff] }
 0x309   : > { %14546 = vst [vmem:[#allocation80_spill] sm:$0xff] %v10805_v44  ;;  %v10812_v22 = vpop.f32.mrb[251].mxu1  ;;  %v10814_v20 = vpop.eup %6589  ;;  %v2501_v16 = vmax.f32 %v2500_v5, %v14551_v18  ;;  %v3448_v26 = vmul.bf16 1069105081, %v10640_v63  ;;  %v14553_v57 = vld [vmem:[#allocation38_spill] sm:$0xff]  ;;  %6615 = vpow.bf16 %v3877_v47  ;;  %v14557_v42 = vld [vmem:[#allocation109_spill] sm:$0xff] }
 0x30a   : > { %14548 = vst [vmem:[#allocation44_spill] sm:$0xff] %v10812_v22  ;;  %v10819_v44 = vpop.f32.mrb[252].mxu0  ;;  %v10821_v56 = vpop.eup %6591  ;;  %v2574_v37 = vmax.f32 %v2573_v52, %v14553_v57  ;;  %v14555_v27 = vld [vmem:[#allocation126_spill] sm:$0xff]  ;;  %v2538_v5 = vmax.f32 %v2537_v23, %v14556_v9  ;;  %v2465_v18 = vmax.f32 %v2464_v3, %v14557_v42  ;;  %v14558_v10 = vld [vmem:[#allocation140_spill] sm:$0xff]  ;;  %v4021_v63 = vmul.bf16 1069105081, %v10612_v55 }
 0x30b   : > { %14552 = vst [vmem:[#allocation72_spill] sm:$0xff] %v10821_v56  ;;  %v10826_v49 = vpop.f32.mrb[253].mxu0  ;;  %v10828_v53 = vpop.eup %6593  ;;  %4327 = vmatpush1.bf16.msra.mxu0 %v14555_v27  ;;  %v2502_v56 = vmax.f32 %v2501_v16, %v14558_v10  ;;  %v4069_v41 = vmul.bf16 1069105081, %v10620_v11  ;;  %6617 = vpow.bf16 %v3400_v51  ;;  %v14559_v47 = vld [vmem:[#allocation128_spill] sm:$0xff]  ;;  %v14562_v16 = vld [vmem:[#allocation155_spill] sm:$0xff] }
 0x30c   : > { %14554 = vst [vmem:[#allocation15_spill] sm:$0xff] %v10828_v53  ;;  %v10834_v22 = vpop.f32.mrb[254].mxu0  ;;  %v10836_v30 = vpop.eup %6595  ;;  %4328 = vmatprep.subr.bf16.mxu0 %v10753_v6  ;;  %v2575_v52 = vmax.f32 %v2574_v37, %v14559_v47  ;;  %6619 = vpow.bf16 %v3925_v29  ;;  %v2466_v57 = vmax.f32 %v2465_v18, %v14562_v16  ;;  %v14563_v9 = vld [vmem:[#allocation159_spill] sm:$0xff]  ;;  %v14564_v42 = vld [vmem:[#allocation160_spill] sm:$0xff]  ;;  %v3496_v6 = vmul.bf16 1069105081, %v10648_v39 }
 0x30d   : > { %v10842_v27 = vpop.f32.mrb[252].mxu1  ;;  %v10844_v23 = vpop.f32.mrb[255].mxu0  ;;  %v2539_v10 = vmax.f32 %v2538_v5, %v14563_v9  ;;  %v2503_v55 = vmax.f32 %v2502_v56, %v14564_v42  ;;  %v3544_v51 = vmul.bf16 1069105081, %v10656_v14  ;;  %6621 = vpow.bf16 %v3448_v26  ;;  %v14566_v37 = vld [vmem:[#allocation24_spill] sm:$0xff]  ;;  %v14568_v18 = vld [vmem:[#allocation57_spill] sm:$0xff] }
 0x30e   : > { %14560 = vst [vmem:[#allocation96_spill] sm:$0xff] %v10842_v27  ;;  %14561 = vst [vmem:[#allocation98_spill] sm:$0xff] %v10844_v23  ;;  %v10846_v3 = vpop.eup %6597  ;;  %v10851_v53 = vpop.f32.mrb[253].mxu1  ;;  %v2576_v47 = vmax.f32 %v2575_v52, %v14566_v37  ;;  %6623 = vpow.bf16 %v3973_v7  ;;  %v14569_v5 = vld [vmem:[#allocation73_spill] sm:$0xff]  ;;  %v14570_v9 = vld [vmem:[#allocation40_spill] sm:$0xff] }
 0x30f   : > { %14565 = vst [vmem:[#allocation97_spill] sm:$0xff] %v10851_v53  ;;  %v10853_v11 = vpop.eup %6599  ;;  %v10858_v23 = vpop.f32.mrb[254].mxu1  ;;  %4329 = vmatpush1.bf16.msra.mxu0 %v14568_v18  ;;  %v2540_v56 = vmax.f32 %v2539_v10, %v14569_v5  ;;  %v2467_v42 = vmax.f32 %v2466_v57, %v14570_v9  ;;  %v14571_v16 = vld [vmem:[#allocation102_spill] sm:$0xff]  ;;  %v3592_v14 = vmul.bf16 1069105081, %v10658_v1  ;;  %6625 = vpow.bf16 %v4021_v63  ;;  %v14573_v7 = vld [vmem:[#allocation51_spill] sm:$0xff] }
 0x310   : > { %14567 = vst [vmem:[#allocation37_spill] sm:$0xff] %v10858_v23  ;;  %v10860_v29 = vpop.eup %6601  ;;  %v2504_v53 = vmax.f32 %v2503_v55, %v14571_v16  ;;  %v10866_v27 = vpop.f32.mrb[255].mxu1  ;;  %v3640_v26 = vmul.bf16 1069105081, %v10660_v8  ;;  %4330 = vmatprep.subr.bf16.mxu0 %v10762_v46  ;;  %v2577_v52 = vmax.f32 %v2576_v47, %v14573_v7  ;;  %6627 = vpow.bf16 %v4069_v41  ;;  %v14574_v10 = vld [vmem:[#allocation6_spill] sm:$0xff]  ;;  %v14575_v37 = vld [vmem:[#allocation23_spill] sm:$0xff] }
 0x311   : > { %14572 = vst [vmem:[#allocation14_spill] sm:$0xff] %v10866_v27  ;;  %v10868_v39 = vpop.eup %6603  ;;  %v2468_v57 = vmax.f32 %v2467_v42, %v14574_v10  ;;  %v2541_v55 = vmax.f32 %v2540_v56, %v14575_v37  ;;  %v14576_v5 = vld [vmem:[#allocation83_spill] sm:$0xff]  ;;  %v3688_v1 = vmul.bf16 1069105081, %v10666_v62  ;;  %v3736_v8 = vmul.bf16 1069105081, %v10668_v33 }
 0x312   : > { %v10874_v18 = vpop.eup %6605  ;;  %v2505_v16 = vmax.f32 %v2504_v53, %v14576_v5  ;;  %6629 = vpow.bf16 %v3496_v6  ;;  %v14577_v63 = vld [vmem:[#allocation133_spill] sm:$0xff]  ;;  %v14578_v47 = vld [vmem:[#allocation92_spill] sm:$0xff]  ;;  %v14579_v41 = vld [vmem:[#allocation114_spill] sm:$0xff]  ;;  %v3784_v62 = vmul.bf16 1069105081, %v10670_v34 }
 0x313   : > { %v10879_v9 = vpop.eup %6607  ;;  %v2578_v46 = vmax.f32 %v2577_v52, %v14577_v63  ;;  %6631 = vpow.bf16 %v3544_v51  ;;  %4331 = vmatpush1.bf16.msra.mxu0 %v14578_v47  ;;  %v2542_v42 = vmax.f32 %v2541_v55, %v14579_v41  ;;  %v14580_v7 = vld [vmem:[#allocation67_spill] sm:$0xff]  ;;  %v14581_v37 = vld [vmem:[#allocation125_spill] sm:$0xff]  ;;  %v3832_v33 = vmul.bf16 1069105081, %v10672_v32  ;;  %v14582_v6 = vld [vmem:[#allocation136_spill] sm:$0xff] }
 0x314   : > { %v10884_v27 = vpop.eup %6609  ;;  %v2469_v56 = vmax.f32 %v2468_v57, %v14580_v7  ;;  %v2506_v53 = vmax.f32 %v2505_v16, %v14581_v37  ;;  %6633 = vpow.bf16 %v3592_v14  ;;  %4332 = vmatprep.subr.bf16.mxu0 %v10772_v19  ;;  %v14583_v47 = vld [vmem:[#allocation65_spill] sm:$0xff]  ;;  %v14584_v63 = vld [vmem:[#allocation12_spill] sm:$0xff]  ;;  %v14585_v41 = vld [vmem:[#allocation87_spill] sm:$0xff]  ;;  %v3880_v34 = vmul.bf16 1069105081, %v10674_v4 }
 0x315   : > { %v10890_v5 = vpop.eup %6611  ;;  %v2579_v52 = vmax.f32 %v2578_v46, %v14582_v6  ;;  %6635 = vpow.bf16 %v3640_v26  ;;  %v2543_v57 = vmax.f32 %v2542_v42, %v14584_v63  ;;  %v3928_v32 = vmul.bf16 1069105081, %v10676_v58  ;;  %v14586_v14 = vld [vmem:[#allocation56_spill] sm:$0xff]  ;;  %v14587_v46 = vld [vmem:[#allocation43_spill] sm:$0xff]  ;;  %v10912_v63 = vpop.f32.mrb[0].mxu1 }
 0x316   : > { %v10896_v51 = vpop.eup %6613  ;;  %v2470_v55 = vmax.f32 %v2469_v56, %v14583_v47  ;;  %v2507_v16 = vmax.f32 %v2506_v53, %v14585_v41  ;;  %6637 = vpow.bf16 %v3688_v1  ;;  %v14588_v26 = vld [vmem:[#allocation68_spill] sm:$0xff]  ;;  %v14589_v56 = vld [vmem:[#allocation66_spill] sm:$0xff]  ;;  %v10910_v53 = vpop.f32.mrb[0].mxu0  ;;  %14591 = vst [vmem:[#allocation81_spill] sm:$0xff] %v10912_v63  ;;  %v3976_v58 = vmul.bf16 1069105081, %v10681_v36 }
 0x317   : > { %v10901_v37 = vpop.eup %6615  ;;  %v2580_v19 = vmax.f32 %v2579_v52, %v14586_v14  ;;  %6639 = vpow.bf16 %v3736_v8  ;;  %4333 = vmatpush1.bf16.msra.mxu0 %v14587_v46  ;;  %v2544_v6 = vmax.f32 %v2543_v57, %v14588_v26  ;;  %14590 = vst [vmem:[#allocation112_spill] sm:$0xff] %v10910_v53  ;;  %v4024_v1 = vmul.bf16 1069105081, %v10683_v61  ;;  %v14592_v8 = vld [vmem:[#allocation104_spill] sm:$0xff]  ;;  %v10920_v57 = vpop.f32.mrb[1].mxu0 }
 0x318   : > { %v6618_v7 = vpop.eup %6617  ;;  %v2471_v47 = vmax.f32 %v2470_v55, %v14589_v56  ;;  %v2508_v42 = vmax.f32 %v2507_v16, %v10514_v43  ;;  %6641 = vpow.bf16 %v3784_v62  ;;  %4334 = vmatprep.subr.bf16.mxu0 %v10781_v48  ;;  %14593 = vst [vmem:[#allocation75_spill] sm:$0xff] %v10920_v57  ;;  %v10922_v55 = vpop.f32.mrb[1].mxu1 }
 0x319   : > { %v10914_v4 = vpop.eup %6619  ;;  %4361 = vmatprep.subr.bf16.mxu1 %v6618_v7  ;;  %v2581_v52 = vmax.f32 %v2580_v19, %v14592_v8  ;;  %14594 = vst [vmem:[#allocation64_spill] sm:$0xff] %v10922_v55  ;;  %6643 = vpow.bf16 %v3832_v33  ;;  %v2545_v36 = vmax.f32 %v2544_v6, %v10586_v24  ;;  %v14596_v19 = vld [vmem:[#allocation107_spill] sm:$0xff] }
 0x31a   : > { %v6622_v16 = vpop.eup %6621  ;;  %4362 = vmatpush1.bf16.msra.mxu1 %v10836_v30  ;;  %v2472_v46 = vmax.f32 %v2471_v47, %v10550_v12  ;;  %v2509_v61 = vmax.f32 %v2508_v42, %v10588_v38  ;;  %6645 = vpow.bf16 %v3880_v34  ;;  %v14601_v42 = vld [vmem:[#allocation85_spill] sm:$0xff] }
 0x31b   : > { %v10928_v62 = vpop.eup %6623  ;;  %4363 = vmatprep.subr.bf16.mxu1 %v6622_v16  ;;  %v2582_v48 = vmax.f32 %v2581_v52, %v10622_v0  ;;  %6647 = vpow.bf16 %v3928_v32  ;;  %4335 = vmatpush1.bf16.msra.mxu0 %v14596_v19  ;;  %v2546_v33 = vmax.f32 %v2545_v36, %v10650_v50  ;;  %v14599_v19 = vld [vmem:[#allocation41_spill] sm:$0xff] }
 0x31c   : > { %v10931_v7 = vpop.eup %6625  ;;  %v2473_v30 = vmax.f32 %v2472_v46, %v10678_v13  ;;  %v2510_v47 = vmax.f32 %v2509_v61, %v10687_v60  ;;  %6649 = vpow.bf16 %v3976_v58  ;;  %4336 = vmatprep.subr.bf16.mxu0 %v10790_v31  ;;  %v4779_v31 = vmul.f32 %v10910_v53, %v10910_v53 }
 0x31d   : > { %14595 = vst [vmem:[#allocation110_spill] sm:$0xff] %v10931_v7  ;;  %v10937_v6 = vpop.eup %6627  ;;  %v2583_v34 = vmax.f32 %v2582_v48, %v10662_v28  ;;  %6651 = vpow.bf16 %v4024_v1  ;;  %v2547_v16 = vmax.f32 %v2546_v33, %v10717_v25  ;;  %v4781_v58 = vmul.f32 %v10912_v63, %v10912_v63  ;;  %v14598_v48 = vld [vmem:[#allocation47_spill] sm:$0xff] }
 0x31e   : > { %14597 = vst [vmem:[#allocation35_spill] sm:$0xff] %v10937_v6  ;;  %v6630_v52 = vpop.eup %6629  ;;  %4364 = vmatpush1.bf16.msra.mxu1 %v10846_v3  ;;  %v2474_v32 = vmax.f32 %v2473_v30, %v10715_v21  ;;  %v2511_v46 = vmax.f32 %v2510_v47, %v10727_v17  ;;  %v14600_v30 = vld [vmem:[#allocation16_spill] sm:$0xff]  ;;  %6653 = vrcp.f32 %v10910_v53  ;;  %v4811_v28 = vrot.slane %v4779_v31, 3 }
 0x31f   : > { %v6632_v36 = vpop.eup %6631  ;;  %4365 = vmatprep.subr.bf16.mxu1 %v6630_v52  ;;  %v2584_v61 = vmax.f32 %v2583_v34, %v10729_v2  ;;  %4337 = vmatpush1.bf16.msra.mxu0 %v14598_v48  ;;  %v2548_v3 = vmax.f32 %v2547_v16, %v10735_v35  ;;  %v4780_v52 = vmul.f32 %v10920_v57, %v10920_v57  ;;  %v4813_v0 = vrot.slane %v4781_v58, 3  ;;  %v14602_v16 = vld [vmem:[#allocation32_spill] sm:$0xff]  ;;  %v14603_v48 = vld [vmem:[#allocation62_spill] sm:$0xff] }
 0x320   : > { %v6634_v1 = vpop.eup %6633  ;;  %v2475_v33 = vmax.f32 %v2474_v32, %v14599_v19  ;;  %v2512_v47 = vmax.f32 %v2511_v46, %v14600_v30  ;;  %4338 = vmatprep.subr.bf16.mxu0 %v10799_v45  ;;  %v14604_v45 = vld [vmem:[#allocation115_spill] sm:$0xff]  ;;  %v4843_v53 = vsel %vm4618_vm3, %v4811_v28, 0.0  ;;  %v4782_v58 = vmul.f32 %v10922_v55, %v10922_v55  ;;  %v14609_v28 = vld [vmem:[#allocation129_spill] sm:$0xff]  ;;  %v14613_v30 = vld [vmem:[#allocation88_spill] sm:$0xff] }
 0x321   : > { %v6636_v34 = vpop.eup %6635  ;;  %v2585_v2 = vmax.f32 %v2584_v61, %v14601_v42  ;;  %v2549_v46 = vmax.f32 %v2548_v3, %v14603_v48  ;;  %v4812_v35 = vrot.slane %v4780_v52, 3  ;;  %v4857_v31 = vsel %vm4618_vm3, %v4813_v0, 0.0  ;;  %v14606_v3 = vld [vmem:[#allocation119_spill] sm:$0xff]  ;;  %v14608_v48 = vld [vmem:[#allocation77_spill] sm:$0xff] }
 0x322   : > { %v10960_v8 = vpop.eup %6637  ;;  %4366 = vmatpush1.bf16.msra.mxu1 %v10853_v11  ;;  %v2476_v32 = vmax.f32 %v2475_v33, %v14602_v16  ;;  %v2513_v14 = vmax.f32 %v2512_v47, %v10758_v15  ;;  %v14605_v33 = vld [vmem:[#allocation36_spill] sm:$0xff]  ;;  %v14607_v47 = vld [vmem:[#allocation127_spill] sm:$0xff]  ;;  %v4814_v26 = vrot.slane %v4782_v58, 3 }
 0x323   : > { %v10966_v25 = vpop.eup %6639  ;;  %4367 = vmatprep.subr.bf16.mxu1 %v6632_v36  ;;  %v2586_v61 = vmax.f32 %v2585_v2, %v14604_v45  ;;  %4339 = vmatpush1.bf16.msra.mxu0 %v14605_v33  ;;  %v2550_v42 = vmax.f32 %v2549_v46, %v14606_v3  ;;  %v4844_v36 = vrot.slane %v4843_v53, 4  ;;  %v4858_v2 = vrot.slane %v4857_v31, 4  ;;  %v14610_v46 = vld [vmem:[#allocation39_spill] sm:$0xff] }
 0x324   : > { %v10973_v11 = vpop.eup %6641  ;;  %v2477_v52 = vmax.f32 %v2476_v32, %v14607_v47  ;;  %v2514_v50 = vmax.f32 %v2513_v14, %v14608_v48  ;;  %4340 = vmatprep.subr.bf16.mxu0 %v10807_v54  ;;  %v4850_v45 = vsel %vm4618_vm3, %v4812_v35, 0.0  ;;  %v14611_v32 = vld [vmem:[#allocation131_spill] sm:$0xff]  ;;  %v14612_v54 = vld [vmem:[#allocation76_spill] sm:$0xff]  ;;  %v4864_v35 = vsel %vm4618_vm3, %v4814_v26, 0.0 }
 0x325   : > { %v10979_v24 = vpop.eup %6643  ;;  %v2587_v0 = vmax.f32 %v2586_v61, %v14609_v28  ;;  %v2551_v3 = vmax.f32 %v2550_v42, %v14611_v32  ;;  %v4845_v7 = vadd.f32 %v4844_v36, %v4843_v53  ;;  %v4859_v28 = vadd.f32 %v4858_v2, %v4857_v31 }
 0x326   : > { %v10984_v6 = vpop.eup %6645  ;;  %4368 = vmatpush1.bf16.msra.mxu1 %v10860_v29  ;;  %v2478_v33 = vmax.f32 %v2477_v52, %v14610_v46  ;;  %v2515_v14 = vmax.f32 %v2514_v50, %v10795_v40  ;;  %v4851_v15 = vrot.slane %v4850_v45, 4  ;;  %v14614_v29 = vld [vmem:[#allocation80_spill] sm:$0xff]  ;;  %v4865_v26 = vrot.slane %v4864_v35, 4  ;;  %v14618_v40 = vld [vmem:[#allocation97_spill] sm:$0xff] }
 0x327   : > { %v10990_v48 = vpop.eup %6647  ;;  %4369 = vmatprep.subr.bf16.mxu1 %v6634_v1  ;;  %v2588_v61 = vmax.f32 %v2587_v0, %v14612_v54  ;;  %4341 = vmatpush1.bf16.msra.mxu0 %v14613_v30  ;;  %v2552_v52 = vmax.f32 %v2551_v3, %v14614_v29  ;;  %v4846_v53 = vrot.slane %v4845_v7, 2  ;;  %v14615_v1 = vld [vmem:[#allocation44_spill] sm:$0xff]  ;;  %v4860_v0 = vrot.slane %v4859_v28, 2  ;;  %v14617_v29 = vld [vmem:[#allocation98_spill] sm:$0xff] }
 0x328   : > { %v10994_v58 = vpop.eup %6649  ;;  %v2479_v42 = vmax.f32 %v2478_v33, %v10819_v44  ;;  %v2516_v50 = vmax.f32 %v2515_v14, %v10826_v49  ;;  %4342 = vmatprep.subr.bf16.mxu0 %v10814_v20  ;;  %v4852_v2 = vadd.f32 %v4851_v15, %v4850_v45  ;;  %v14616_v54 = vld [vmem:[#allocation96_spill] sm:$0xff]  ;;  %v4866_v38 = vadd.f32 %v4865_v26, %v4864_v35 }
 0x329   : > { %v11000_v36 = vpop.eup %6651  ;;  %v2589_v31 = vmax.f32 %v2588_v61, %v14615_v1  ;;  %v2553_v3 = vmax.f32 %v2552_v52, %v14616_v54  ;;  %v4847_v32 = vadd.f32 %v4846_v53, %v4845_v7  ;;  %v4861_v60 = vadd.f32 %v4860_v0, %v4859_v28  ;;  %v11009_v61 = vpop.f32.mrb[2].mxu0  ;;  %v14620_v15 = vld [vmem:[#allocation120_spill] sm:$0xff] }
 0x32a   : > { %4370 = vmatpush1.bf16.msra.mxu1 %v10868_v39  ;;  %v2480_v30 = vmax.f32 %v2479_v42, %v10834_v22  ;;  %v2517_v33 = vmax.f32 %v2516_v50, %v14617_v29  ;;  %v6654_v14 = vpop.eup %6653  ;;  %v4853_v20 = vrot.slane %v4852_v2, 2  ;;  %14619 = vst [vmem:[#allocation153_spill] sm:$0xff] %v11009_v61  ;;  %v14621_v52 = vld [vmem:[#allocation72_spill] sm:$0xff]  ;;  %v14622_v50 = vld [vmem:[#allocation14_spill] sm:$0xff]  ;;  %v4867_v54 = vrot.slane %v4866_v38, 2 }
 0x32b   : > { %4371 = vmatprep.subr.bf16.mxu1 %v6636_v34  ;;  %v2590_v17 = vmax.f32 %v2589_v31, %v14618_v40  ;;  %4343 = vmatpush1.bf16.msra.mxu0 %v14620_v15  ;;  %v2554_v42 = vmax.f32 %v2553_v3, %v10858_v23  ;;  %v4848_v1 = vrot.slane %v4847_v32, 1  ;;  %v4862_v53 = vrot.slane %v4861_v60, 1 }
 0x32c   : > { %v2481_v45 = vrot.slane %v2480_v30, 4  ;;  %v2518_v39 = vrot.slane %v2517_v33, 4  ;;  %4344 = vmatprep.subr.bf16.mxu0 %v14621_v52  ;;  %v4854_v34 = vadd.f32 %v4853_v20, %v4852_v2  ;;  %v4868_v3 = vadd.f32 %v4867_v54, %v4866_v38  ;;  %v14624_v52 = vld [vmem:[#allocation50_spill] sm:$0xff] }
 0x32d   : > { %v2591_v7 = vmax.f32 %v2590_v17, %v14622_v50  ;;  %v2555_v31 = vrot.slane %v2554_v42, 4  ;;  %v4849_v0 = vadd.f32 %v4848_v1, %v4847_v32  ;;  %v4863_v15 = vadd.f32 %v4862_v53, %v4861_v60  ;;  %v14625_v50 = vld [vmem:[#allocation5_spill] sm:$0xff] }
 0x32e   : > { %4372 = vmatpush1.bf16.msra.mxu1 %v10874_v18  ;;  %v2482_v28 = vmax.f32 %v2480_v30, %v2481_v45  ;;  %v2519_v35 = vmax.f32 %v2517_v33, %v2518_v39  ;;  %v4855_v40 = vrot.slane %v4854_v34, 1  ;;  %v14623_v23 = vmul.bf16 1069105081, %v10685_v59  ;;  %v14627_v30 = vld [vmem:[#allocation15_spill] sm:$0xff]  ;;  %v14628_v45 = vld [vmem:[#allocation10_spill] sm:$0xff] }
 0x32f   : > { %4373 = vmatprep.subr.bf16.mxu1 %v10960_v8  ;;  %v2592_v26 = vrot.slane %v2591_v7, 4  ;;  %4345 = vmatpush1.bf16.msra.mxu0 %v14624_v52  ;;  %v2556_v20 = vmax.f32 %v2554_v42, %v2555_v31  ;;  %v11021_v18 = vsub.s32 6, %v14625_v50  ;;  %v4955_v1 = vadd.f32 1e-08, %v4849_v0  ;;  %v14629_v42 = vld [vmem:[#allocation111_spill] sm:$0xff]  ;;  %v14633_v31 = vld [vmem:[#allocation21_spill] sm:$0xff] }
 0x330   : > { %6655 = vpow.bf16 %v14623_v23  ;;  %v2483_v17 = vrot.slane %v2482_v28, 2  ;;  %v2520_v2 = vrot.slane %v2519_v35, 2  ;;  %4346 = vmatprep.subr.bf16.mxu0 %v14627_v30  ;;  %v4957_v60 = vadd.f32 1e-08, %v4863_v15  ;;  %v14634_v0 = vld [vmem:[#allocation30_spill] sm:$0xff]  ;;  %v14635_v15 = vld [vmem:[#allocation101_spill] sm:$0xff] }
 0x331   : > { %14626 = vst [vmem:[#allocation154_spill] sm:$0xff] %v11021_v18  ;;  %v2593_v32 = vmax.f32 %v2591_v7, %v2592_v26  ;;  %6657 = vrcp.f32 %v10912_v63  ;;  %v4856_v59 = vadd.f32 %v4855_v40, %v4854_v34  ;;  %v4869_v23 = vrot.slane %v4868_v3, 1  ;;  %v14636_v52 = vld [vmem:[#allocation34_spill] sm:$0xff] }
 0x332   : > { %4374 = vmatpush1.bf16.msra.mxu1 %v10879_v9  ;;  %v2484_v38 = vmax.f32 %v2482_v28, %v2483_v17  ;;  %v2521_v8 = vmax.f32 %v2519_v35, %v2520_v2  ;;  %v2557_v54 = vrot.slane %v2556_v20, 2  ;;  %6659 = vrcp.f32 %v10920_v57  ;;  %v14637_v2 = vld [vmem:[#allocation118_spill] sm:$0xff] }
 0x333   : > { %4375 = vmatprep.subr.bf16.mxu1 %v10966_v25  ;;  %v2594_v33 = vrot.slane %v2593_v32, 2  ;;  %4347 = vmatpush1.bf16.msra.mxu0 %v14628_v45  ;;  %6661 = vrcp.f32 %v10922_v55  ;;  %v11032_v9 = vrot.slane %v6654_v14, %v11021_v18  ;;  %v4956_v25 = vadd.f32 1e-08, %v4856_v59  ;;  %v14632_v14 = vld [vmem:[#allocation94_spill] sm:$0xff]  ;;  %v14641_v59 = vld [vmem:[#allocation147_spill] sm:$0xff]  ;;  %v14791_v18 = vld [vmem:[#allocation141_spill] sm:$0xff] }
 0x334   : > { %v2485_v39 = vrot.slane %v2484_v38, 1  ;;  %4348 = vmatprep.subr.bf16.mxu0 %v14629_v42  ;;  %6663 = vrsqrt.f32 %v4955_v1  ;;  %v4870_v50 = vadd.f32 %v4869_v23, %v4868_v3  ;;  %v2522_v7 = vrot.slane %v2521_v8, 1  ;;  %v14643_v45 = vld [vmem:[#allocation151_spill] sm:$0xff]  ;;  %v14644_v42 = vld [vmem:[#allocation86_spill] sm:$0xff] }
 0x335   : > { %14630 = vst [vmem:[#allocation157_spill] sm:$0xff] %v11032_v9  ;;  %6665 = vrsqrt.f32 %v4957_v60  ;;  %v11038_v53 = vmax.f32 %v2556_v20, %v2557_v54  ;;  %v11040_v34 = vmax.f32 %v2593_v32, %v2594_v33  ;;  %v11044_v28 = vmul.f32 %v11032_v9, %v11009_v61  ;;  %v14639_v32 = vld [vmem:[#allocation138_spill] sm:$0xff]  ;;  %v14655_v55 = vld [vmem:[#allocation67_spill] sm:$0xff] }
 0x336   : > { %4376 = vmatpush1.bf16.msra.mxu1 %v10884_v27  ;;  %v11035_v40 = vmax.f32 %v2484_v38, %v2485_v39  ;;  %v14640_v38 = vld [vmem:[#allocation7_spill] sm:$0xff]  ;;  %6667 = vrsqrt.f32 %v4956_v25  ;;  %v14650_v25 = vld [vmem:[#allocation124_spill] sm:$0xff] }
 0x337   : > { %4377 = vmatprep.subr.bf16.mxu1 %v10973_v11  ;;  %14631 = vst [vmem:[#allocation19_spill] sm:$0xff] %v11044_v28  ;;  %4349 = vmatpush1.bf16.msra.mxu0 %v14632_v14 }
 0x338   : > { %v3090_v27 = vsub.f32 %v10819_v44, %v11035_v40  ;;  %v3106_v35 = vsub.f32 %v10834_v22, %v11035_v40  ;;  %v2610_v11 = vsub.f32 %v14633_v31, %v11035_v40  ;;  %v2626_v26 = vsub.f32 %v14634_v0, %v11035_v40  ;;  %v14638_v44 = vld [vmem:[#allocation33_spill] sm:$0xff]  ;;  %v14647_v0 = vld [vmem:[#allocation8_spill] sm:$0xff] }
 0x339   : > { %v2642_v3 = vsub.f32 %v14635_v15, %v11035_v40  ;;  %v2658_v17 = vsub.f32 %v14636_v52, %v11035_v40  ;;  %v2674_v20 = vsub.f32 %v14637_v2, %v11035_v40  ;;  %v2690_v30 = vsub.f32 %v14638_v44, %v11035_v40  ;;  %v14646_v31 = vld [vmem:[#allocation61_spill] sm:$0xff]  ;;  %v14648_v52 = vld [vmem:[#allocation108_spill] sm:$0xff] }
 0x33a   : > { %4378 = vmatpush1.bf16.msra.mxu1 %v10890_v5  ;;  %v11064_v22 = vpack.c.bf16 %v3106_v35, %v3090_v27  ;;  %v2706_v1 = vsub.f32 %v14639_v32, %v11035_v40  ;;  %v2722_v60 = vsub.f32 %v14640_v38, %v11035_v40  ;;  %v2738_v23 = vsub.f32 %v14641_v59, %v11035_v40  ;;  %v11080_v5 = vld [vmem:[%s12898_s2] ss:$8 sps:$4 sm:$0xff]   ;;  %v14645_v27 = vld [vmem:[#allocation91_spill] sm:$0xff]  ;;  %v11100_v32 = vld [vmem:[%s12898_s2 + $0x4] ss:$8 sps:$4 sm:$0xff]  }
 0x33b   : > { %v11072_v54 = vpop.eup %6655  ;;  %4379 = vmatprep.subr.bf16.mxu1 %v10979_v24  ;;  %4351 = vmatmul.mubr.bf16.vlgmr.msra.gmra.mrb[8].mxu0 %v11080_v5  ;;  %v2754_v39 = vsub.f32 %v14643_v45, %v11035_v40  ;;  %v2770_v14 = vsub.f32 %v14644_v42, %v11035_v40  ;;  %v2786_v35 = vsub.f32 %v14645_v27, %v11035_v40  ;;  %v11095_v44 = vadd.f32 1e-08, %v4870_v50  ;;  %v14651_v45 = vld [vmem:[#allocation109_spill] sm:$0xff]  ;;  %v14652_v27 = vld [vmem:[#allocation155_spill] sm:$0xff]  ;;  %v14653_v50 = vld [vmem:[#allocation40_spill] sm:$0xff] }
 0x33c   : > { %v11074_v33 = vpop.eup %6657  ;;  %v2802_v24 = vsub.f32 %v14646_v31, %v11035_v40  ;;  %v2818_v15 = vsub.f32 %v14647_v0, %v11035_v40  ;;  %v2834_v2 = vsub.f32 %v14648_v52, %v11035_v40  ;;  %4436 = vmatprep.mubr.bf16.mxu0 %v11100_v32  ;;  %v2850_v59 = vsub.f32 %v14650_v25, %v11035_v40  ;;  %v14656_v25 = vld [vmem:[#allocation65_spill] sm:$0xff] }
 0x33d   : > { %14642 = vst [vmem:[#allocation158_spill] sm:$0xff] %v11074_v33  ;;  %v11103_v38 = vpop.eup %6659  ;;  %v2866_v42 = vsub.f32 %v14651_v45, %v11035_v40  ;;  %v2882_v31 = vsub.f32 %v14652_v27, %v11035_v40  ;;  %v2898_v0 = vsub.f32 %v14653_v50, %v11035_v40  ;;  %v2914_v28 = vsub.f32 %v14574_v10, %v11035_v40 }
 0x33e   : > { %14649 = vst [vmem:[#allocation148_spill] sm:$0xff] %v11103_v38  ;;  %v11113_v52 = vpop.eup %6661  ;;  %4380 = vmatpush1.bf16.msra.mxu1 %v10896_v51  ;;  %v2930_v57 = vsub.f32 %v14655_v55, %v11035_v40  ;;  %v2946_v38 = vsub.f32 %v14656_v25, %v11035_v40  ;;  %v11122_v45 = vmax.f32 %v2521_v8, %v2522_v7  ;;  %6669 = vrsqrt.f32 %v11095_v44 }
 0x33f   : > { %14654 = vst [vmem:[#allocation144_spill] sm:$0xff] %v11113_v52  ;;  %v11124_v61 = vpop.eup %6663  ;;  %4381 = vmatprep.subr.bf16.mxu1 %v10984_v6  ;;  %v2962_v27 = vsub.f32 %v14589_v56, %v11035_v40  ;;  %v2978_v51 = vsub.f32 %v10550_v12, %v11035_v40  ;;  %v2994_v10 = vsub.f32 %v10678_v13, %v11035_v40 }
 0x340   : > { %14657 = vst [vmem:[#allocation150_spill] sm:$0xff] %v11124_v61  ;;  %v3010_v55 = vsub.f32 %v10715_v21, %v11035_v40  ;;  %v11135_v50 = vpop.eup %6665  ;;  %v3026_v8 = vsub.f32 %v14599_v19, %v11035_v40  ;;  %v3042_v6 = vsub.f32 %v14602_v16, %v11035_v40  ;;  %v3058_v56 = vsub.f32 %v14607_v47, %v11035_v40 }
 0x341   : > { %14658 = vst [vmem:[#allocation145_spill] sm:$0xff] %v11135_v50  ;;  %v3074_v12 = vsub.f32 %v14610_v46, %v11035_v40  ;;  %v11145_v7 = vpack.c.bf16 %v2626_v26, %v2610_v11  ;;  %v11147_v13 = vpack.c.bf16 %v2658_v17, %v2642_v3  ;;  %v11149_v25 = vpack.c.bf16 %v2690_v30, %v2674_v20  ;;  %v11179_v30 = vpop.eup %6667 }
 0x342   : > { %v11151_v21 = vpack.c.bf16 %v2722_v60, %v2706_v1  ;;  %4382 = vmatpush1.bf16.msra.mxu1 %v10901_v37  ;;  %v11154_v19 = vpack.c.bf16 %v2754_v39, %v2738_v23  ;;  %v11156_v52 = vpack.c.bf16 %v2786_v35, %v2770_v14  ;;  %v11158_v16 = vpack.c.bf16 %v2818_v15, %v2802_v24  ;;  %v14661_v1 = vld [vmem:[#allocation11_spill] sm:$0xff]  ;;  %v14662_v23 = vld [vmem:[#allocation28_spill] sm:$0xff] }
 0x343   : > { %v11160_v47 = vpack.c.bf16 %v2850_v59, %v2834_v2  ;;  %4383 = vmatprep.subr.bf16.mxu1 %v10990_v48  ;;  %v11163_v46 = vpack.c.bf16 %v2882_v31, %v2866_v42  ;;  %v11165_v40 = vpack.c.bf16 %v2914_v28, %v2898_v0  ;;  %v11167_v11 = vpack.c.bf16 %v2946_v38, %v2930_v57  ;;  %v14660_v28 = vld [vmem:[#allocation78_spill] sm:$0xff]  ;;  %v14663_v14 = vld [vmem:[#allocation52_spill] sm:$0xff]  ;;  %v14665_v15 = vld [vmem:[#allocation59_spill] sm:$0xff] }
 0x344   : > { %v11169_v26 = vpack.c.bf16 %v2978_v51, %v2962_v27  ;;  %v11171_v3 = vpack.c.bf16 %v3010_v55, %v2994_v10  ;;  %v11173_v37 = vpack.c.bf16 %v3042_v6, %v3026_v8  ;;  %v11175_v17 = vpack.c.bf16 %v3074_v12, %v3058_v56  ;;  %14659 = vst [vmem:[#allocation156_spill] sm:$0xff] %v11179_v30  ;;  %v14666_v2 = vld [vmem:[#allocation139_spill] sm:$0xff]  ;;  %v14667_v42 = vld [vmem:[#allocation142_spill] sm:$0xff]  ;;  %v14669_v27 = vld [vmem:[#allocation121_spill] sm:$0xff]  ;;  %v11205_v10 = vpop.f32.mrb[2].mxu1 }
 0x345   : > { %v3091_v20 = vsub.f32 %v10826_v49, %v11122_v45  ;;  %v3107_v48 = vsub.f32 %v14617_v29, %v11122_v45  ;;  %v2611_v57 = vsub.f32 %v14660_v28, %v11122_v45  ;;  %v2627_v60 = vsub.f32 %v14661_v1, %v11122_v45  ;;  %v14664_v49 = vld [vmem:[#allocation137_spill] sm:$0xff]  ;;  %14670 = vst [vmem:[#allocation161_spill] sm:$0xff] %v11205_v10  ;;  %v14671_v55 = vld [vmem:[#allocation63_spill] sm:$0xff]  ;;  %v11215_v28 = vpop.f32.mrb[3].mxu0  ;;  %v11217_v1 = vpop.f32.mrb[3].mxu1 }
 0x346   : > { %v2643_v39 = vsub.f32 %v14662_v23, %v11122_v45  ;;  %4384 = vmatpush1.bf16.msra.mxu1 %v10914_v4  ;;  %v2659_v35 = vsub.f32 %v14663_v14, %v11122_v45  ;;  %v2675_v24 = vsub.f32 %v14664_v49, %v11122_v45  ;;  %v2691_v29 = vsub.f32 %v14665_v15, %v11122_v45  ;;  %v14668_v4 = vld [vmem:[#allocation149_spill] sm:$0xff]  ;;  %v14677_v14 = vld [vmem:[#allocation71_spill] sm:$0xff]  ;;  %v14678_v15 = vld [vmem:[#allocation54_spill] sm:$0xff] }
 0x347   : > { %v2707_v38 = vsub.f32 %v14666_v2, %v11122_v45  ;;  %4385 = vmatprep.subr.bf16.mxu1 %v10994_v58  ;;  %v3363_v59 = vpack.c.bf16 %v3107_v48, %v3091_v20  ;;  %v2723_v31 = vsub.f32 %v14667_v42, %v11122_v45  ;;  %v2739_v0 = vsub.f32 %v14668_v4, %v11122_v45  ;;  %v14672_v6 = vld [vmem:[#allocation113_spill] sm:$0xff]  ;;  %v14673_v58 = vld [vmem:[#allocation100_spill] sm:$0xff]  ;;  %v14674_v20 = vld [vmem:[#allocation22_spill] sm:$0xff] }
 0x348   : > { %v2755_v51 = vsub.f32 %v14669_v27, %v11122_v45  ;;  %v2771_v8 = vsub.f32 %v14671_v55, %v11122_v45  ;;  %v2787_v56 = vsub.f32 %v14672_v6, %v11122_v45  ;;  %v2803_v12 = vsub.f32 %v14673_v58, %v11122_v45  ;;  %14675 = vst [vmem:[#allocation60_spill] sm:$0xff] %v11215_v28  ;;  %v14679_v42 = vld [vmem:[#allocation140_spill] sm:$0xff]  ;;  %v14681_v6 = vld [vmem:[#allocation102_spill] sm:$0xff] }
 0x349   : > { %v2819_v48 = vsub.f32 %v14674_v20, %v11122_v45  ;;  %14676 = vst [vmem:[#allocation126_spill] sm:$0xff] %v11217_v1  ;;  %v4123_v23 = vmul.bf16 1069105081, %v11064_v22  ;;  %v2835_v49 = vsub.f32 %v14677_v14, %v11122_v45  ;;  %v2851_v2 = vsub.f32 %v14678_v15, %v11122_v45  ;;  %v14680_v27 = vld [vmem:[#allocation160_spill] sm:$0xff]  ;;  %v14682_v20 = vld [vmem:[#allocation83_spill] sm:$0xff]  ;;  %v14683_v1 = vld [vmem:[#allocation125_spill] sm:$0xff] }
 0x34a   : > { %v2867_v4 = vsub.f32 %v14679_v42, %v11122_v45  ;;  %4386 = vmatpush1.bf16.msra.mxu1 %v10928_v62  ;;  %v2883_v55 = vsub.f32 %v14680_v27, %v11122_v45  ;;  %v2899_v58 = vsub.f32 %v14681_v6, %v11122_v45  ;;  %v2915_v22 = vsub.f32 %v14682_v20, %v11122_v45  ;;  %v14684_v27 = vld [vmem:[#allocation18_spill] sm:$0xff] }
 0x34b   : > { %v2931_v14 = vsub.f32 %v14683_v1, %v11122_v45  ;;  %4387 = vmatprep.subr.bf16.mxu1 %v11000_v36  ;;  %v4126_v15 = vmul.bf16 1069105081, %v3363_v59  ;;  %v2947_v42 = vsub.f32 %v14585_v41, %v11122_v45  ;;  %v2963_v62 = vsub.f32 %v10514_v43, %v11122_v45  ;;  %v14685_v6 = vld [vmem:[#allocation134_spill] sm:$0xff]  ;;  %v14687_v1 = vld [vmem:[#allocation16_spill] sm:$0xff]  ;;  %v14689_v41 = vld [vmem:[#allocation77_spill] sm:$0xff] }
 0x34c   : > { %v2979_v30 = vsub.f32 %v14684_v27, %v11122_v45  ;;  %v2995_v50 = vsub.f32 %v14685_v6, %v11122_v45  ;;  %v14686_v20 = vld [vmem:[#allocation58_spill] sm:$0xff]  ;;  %v3027_v28 = vsub.f32 %v14687_v1, %v11122_v45  ;;  %v3059_v10 = vsub.f32 %v14689_v41, %v11122_v45 }
 0x34d   : > { %v3011_v61 = vsub.f32 %v14686_v20, %v11122_v45  ;;  %v14688_v36 = vld [vmem:[#allocation74_spill] sm:$0xff]  ;;  %6671 = vpow.bf16 %v4123_v23  ;;  %v11256_v6 = vpack.c.bf16 %v2627_v60, %v2611_v57  ;;  %v2559_v20 = vrot.slane %v11038_v53, 1 }
 0x34e   : > { %v3043_v59 = vsub.f32 %v14688_v36, %v11122_v45  ;;  %v14690_v43 = vld [vmem:[#allocation106_spill] sm:$0xff]  ;;  %6673 = vpow.bf16 %v4126_v15  ;;  %v3403_v36 = vmul.bf16 1069105081, %v11145_v7  ;;  %v3451_v41 = vmul.bf16 1069105081, %v11147_v13  ;;  %v14692_v7 = vld [vmem:[#allocation35_spill] sm:$0xff] }
 0x34f   : > { %v3075_v63 = vsub.f32 %v14690_v43, %v11122_v45  ;;  %v14691_v27 = vld [vmem:[#allocation110_spill] sm:$0xff]  ;;  %v11263_v9 = vpack.c.bf16 %v2659_v35, %v2643_v39  ;;  %v3499_v44 = vmul.bf16 1069105081, %v11149_v25  ;;  %v3547_v45 = vmul.bf16 1069105081, %v11151_v21 }
 0x350   : > { %4388 = vmatpush1.bf16.msra.mxu1 %v14691_v27  ;;  %v3595_v57 = vmul.bf16 1069105081, %v11154_v19  ;;  %v11268_v60 = vpack.c.bf16 %v2691_v29, %v2675_v24  ;;  %v3643_v23 = vmul.bf16 1069105081, %v11156_v52  ;;  %v3691_v43 = vmul.bf16 1069105081, %v11158_v16 }
 0x351   : > { %4389 = vmatprep.subr.bf16.mxu1 %v11072_v54  ;;  %v3739_v54 = vmul.bf16 1069105081, %v11160_v47  ;;  %v11273_v15 = vpack.c.bf16 %v2723_v31, %v2707_v38  ;;  %v3787_v13 = vmul.bf16 1069105081, %v11163_v46  ;;  %v11277_v39 = vpack.c.bf16 %v2755_v51, %v2739_v0  ;;  %v14696_v19 = vld [vmem:[#allocation90_spill] sm:$0xff] }
 0x352   : > { %v11279_v25 = vpack.c.bf16 %v2787_v56, %v2771_v8  ;;  %v11281_v21 = vpack.c.bf16 %v2819_v48, %v2803_v12  ;;  %v11284_v35 = vpack.c.bf16 %v2851_v2, %v2835_v49  ;;  %v11286_v52 = vpack.c.bf16 %v2883_v55, %v2867_v4  ;;  %v14705_v8 = vld [vmem:[#allocation29_spill] sm:$0xff]  ;;  %v14714_v55 = vld [vmem:[#allocation55_spill] sm:$0xff]  ;;  %v14718_v27 = vld [vmem:[#allocation146_spill] sm:$0xff] }
 0x353   : > { %14693 = vst [vmem:[#allocation57_spill] sm:$0xff] %v11277_v39  ;;  %v11288_v16 = vpack.c.bf16 %v2915_v22, %v2899_v58  ;;  %v11290_v47 = vpack.c.bf16 %v2947_v42, %v2931_v14  ;;  %v11292_v24 = vpack.c.bf16 %v2979_v30, %v2963_v62  ;;  %v11294_v29 = vpack.c.bf16 %v3011_v61, %v2995_v50  ;;  %v11309_v50 = vpop.eup %6669  ;;  %v14715_v22 = vld [vmem:[#allocation45_spill] sm:$0xff]  ;;  %v14717_v62 = vld [vmem:[#allocation20_spill] sm:$0xff] }
 0x354   : > { %4390 = vmatpush1.bf16.msra.mxu1 %v14692_v7  ;;  %14694 = vst [vmem:[#allocation6_spill] sm:$0xff] %v11279_v25  ;;  %14695 = vst [vmem:[#allocation92_spill] sm:$0xff] %v11281_v21  ;;  %v11296_v46 = vpack.c.bf16 %v3043_v59, %v3027_v28  ;;  %v11298_v38 = vpack.c.bf16 %v3075_v63, %v3059_v10  ;;  %v3835_v31 = vmul.bf16 1069105081, %v11165_v40  ;;  %v3883_v0 = vmul.bf16 1069105081, %v11167_v11 }
 0x355   : > { %4391 = vmatprep.subr.bf16.mxu1 %v14696_v19  ;;  %14697 = vst [vmem:[#allocation87_spill] sm:$0xff] %v11284_v35  ;;  %14698 = vst [vmem:[#allocation43_spill] sm:$0xff] %v11286_v52  ;;  %6675 = vpow.bf16 %v3403_v36  ;;  %v11303_v51 = vmax.f32 %v11038_v53, %v2559_v20  ;;  %v3931_v56 = vmul.bf16 1069105081, %v11169_v26  ;;  %v3979_v30 = vmul.bf16 1069105081, %v11171_v3 }
 0x356   : > { %14699 = vst [vmem:[#allocation66_spill] sm:$0xff] %v11288_v16  ;;  %14700 = vst [vmem:[#allocation107_spill] sm:$0xff] %v11290_v47  ;;  %v4027_v61 = vmul.bf16 1069105081, %v11173_v37  ;;  %6677 = vpow.bf16 %v3451_v41  ;;  %v14707_v63 = vld [vmem:[#allocation96_spill] sm:$0xff]  ;;  %v14708_v11 = vld [vmem:[#allocation37_spill] sm:$0xff] }
 0x357   : > { %14701 = vst [vmem:[#allocation47_spill] sm:$0xff] %v11292_v24  ;;  %14702 = vst [vmem:[#allocation41_spill] sm:$0xff] %v11294_v29  ;;  %6679 = vpow.bf16 %v3499_v44  ;;  %v3092_v40 = vsub.f32 %v14707_v63, %v11303_v51  ;;  %v3108_v10 = vsub.f32 %v14708_v11, %v11303_v51  ;;  %v14709_v53 = vld [vmem:[#allocation9_spill] sm:$0xff]  ;;  %v14712_v28 = vld [vmem:[#allocation82_spill] sm:$0xff]  ;;  %v2676_v58 = vsub.f32 %v14714_v55, %v11303_v51 }
 0x358   : > { %14703 = vst [vmem:[#allocation32_spill] sm:$0xff] %v11296_v46  ;;  %14704 = vst [vmem:[#allocation36_spill] sm:$0xff] %v11298_v38  ;;  %4392 = vmatpush1.bf16.msra.mxu1 %v14705_v8  ;;  %6681 = vpow.bf16 %v3547_v45  ;;  %v14710_v26 = vld [vmem:[#allocation17_spill] sm:$0xff]  ;;  %v11323_v2 = vpop.eup %6671  ;;  %v2692_v14 = vsub.f32 %v14715_v22, %v11303_v51  ;;  %v2708_v59 = vsub.f32 %v14717_v62, %v11303_v51  ;;  %v14719_v36 = vld [vmem:[#allocation152_spill] sm:$0xff]  ;;  %v4075_v41 = vmul.bf16 1069105081, %v11175_v17 }
 0x359   : > { %14706 = vst [vmem:[#allocation127_spill] sm:$0xff] %v11309_v50  ;;  %v14711_v3 = vld [vmem:[#allocation117_spill] sm:$0xff]  ;;  %14713 = vst [vmem:[#allocation39_spill] sm:$0xff] %v11323_v2  ;;  %6683 = vpow.bf16 %v3595_v57  ;;  %v3364_v4 = vpack.c.bf16 %v3108_v10, %v3092_v40  ;;  %v11330_v42 = vpop.eup %6673  ;;  %v2724_v20 = vsub.f32 %v14718_v27, %v11303_v51  ;;  %v14721_v57 = vld [vmem:[#allocation130_spill] sm:$0xff]  ;;  %v14747_v17 = vrot.slane %v11040_v34, 1 }
 0x35a   : > { %14716 = vst [vmem:[#allocation88_spill] sm:$0xff] %v11330_v42  ;;  %6685 = vpow.bf16 %v3643_v23  ;;  %v14720_v44 = vld [vmem:[#allocation13_spill] sm:$0xff]  ;;  %v14722_v19 = vld [vmem:[#allocation95_spill] sm:$0xff]  ;;  %v14723_v63 = vld [vmem:[#allocation132_spill] sm:$0xff]  ;;  %v14748_v50 = vsub.f32 %v14709_v53, %v11303_v51 }
 0x35b   : > { %4394 = vmatmul.mubr.bf16.vlgmr.msra.gmra.mrb[8].mxu1 %v11080_v5  ;;  %v2740_v5 = vsub.f32 %v14719_v36, %v11303_v51  ;;  %6687 = vpow.bf16 %v3691_v43  ;;  %v2756_v45 = vsub.f32 %v14720_v44, %v11303_v51  ;;  %v4129_v7 = vmul.bf16 1069105081, %v3364_v4  ;;  %v14724_v11 = vld [vmem:[#allocation27_spill] sm:$0xff]  ;;  %v14726_v43 = vld [vmem:[#allocation69_spill] sm:$0xff]  ;;  %v14730_v40 = vld [vmem:[#allocation114_spill] sm:$0xff] }
 0x35c   : > { %4479 = vmatprep.mubr.bf16.mxu1 %v11100_v32  ;;  %6689 = vpow.bf16 %v3739_v54  ;;  %v14725_v32 = vld [vmem:[#allocation42_spill] sm:$0xff]  ;;  %v14727_v22 = vld [vmem:[#allocation159_spill] sm:$0xff]  ;;  %v14728_v4 = vld [vmem:[#allocation73_spill] sm:$0xff]  ;;  %v11406_v12 = vmax.f32 %v11040_v34, %v14747_v17  ;;  %v11426_v34 = vpack.c.bf16 %v2692_v14, %v2676_v58  ;;  %v11428_v17 = vpack.c.bf16 %v2724_v20, %v2708_v59 }
 0x35d   : > { %6691 = vpow.bf16 %v3787_v13  ;;  %v14729_v36 = vld [vmem:[#allocation23_spill] sm:$0xff]  ;;  %v14731_v54 = vld [vmem:[#allocation12_spill] sm:$0xff]  ;;  %v14733_v23 = vld [vmem:[#allocation93_spill] sm:$0xff]  ;;  %v11430_v53 = vpack.c.bf16 %v2756_v45, %v2740_v5 }
 0x35e   : > { %6693 = vpow.bf16 %v3835_v31  ;;  %v14732_v8 = vld [vmem:[#allocation68_spill] sm:$0xff]  ;;  %v14735_v27 = vld [vmem:[#allocation31_spill] sm:$0xff]  ;;  %v14739_v55 = vld [vmem:[#allocation62_spill] sm:$0xff]  ;;  %14755 = vst [vmem:[#allocation21_spill] sm:$0xff] %v11426_v34 }
 0x35f   : > { %6695 = vpow.bf16 %v3883_v0  ;;  %v14736_v44 = vld [vmem:[#allocation79_spill] sm:$0xff]  ;;  %v14743_v37 = vld [vmem:[#allocation80_spill] sm:$0xff]  ;;  %14756 = vst [vmem:[#allocation30_spill] sm:$0xff] %v11428_v17  ;;  %14757 = vst [vmem:[#allocation101_spill] sm:$0xff] %v11430_v53 }
 0x360   : > { %v11368_v13 = vpop.eup %6675  ;;  %v14737_v31 = vld [vmem:[#allocation99_spill] sm:$0xff]  ;;  %6697 = vpow.bf16 %v3931_v56  ;;  %v14763_v58 = vld [vmem:[#allocation70_spill] sm:$0xff]  ;;  %v14764_v59 = vld [vmem:[#allocation49_spill] sm:$0xff] }
 0x361   : > { %14734 = vst [vmem:[#allocation98_spill] sm:$0xff] %v11368_v13  ;;  %v11376_v48 = vpop.eup %6677  ;;  %v14740_v62 = vld [vmem:[#allocation119_spill] sm:$0xff]  ;;  %6699 = vpow.bf16 %v3979_v30  ;;  %v2645_v14 = vsub.f32 %v14763_v58, %v11406_v12  ;;  %v2661_v20 = vsub.f32 %v14764_v59, %v11406_v12  ;;  %v14765_v5 = vld [vmem:[#allocation89_spill] sm:$0xff]  ;;  %v14772_v59 = vld [vmem:[#allocation48_spill] sm:$0xff] }
 0x362   : > { %14738 = vst [vmem:[#allocation120_spill] sm:$0xff] %v11376_v48  ;;  %v14741_v0 = vld [vmem:[#allocation131_spill] sm:$0xff]  ;;  %v11384_v2 = vpop.eup %6679  ;;  %6701 = vpow.bf16 %v4027_v61  ;;  %v14753_v61 = vsub.f32 %v14712_v28, %v11303_v51  ;;  %v2677_v45 = vsub.f32 %v14765_v5, %v11406_v12  ;;  %v2757_v5 = vsub.f32 %v14772_v59, %v11406_v12  ;;  %v14773_v53 = vld [vmem:[#allocation25_spill] sm:$0xff]  ;;  %v14779_v59 = vld [vmem:[#allocation128_spill] sm:$0xff] }
 0x363   : > { %14742 = vst [vmem:[#allocation72_spill] sm:$0xff] %v11384_v2  ;;  %v11390_v56 = vpop.eup %6681  ;;  %6703 = vpow.bf16 %v4075_v41  ;;  %v14749_v41 = vsub.f32 %v14710_v26, %v11303_v51  ;;  %v14758_v26 = vld [vmem:[#allocation97_spill] sm:$0xff]  ;;  %v14770_v58 = vld [vmem:[#allocation123_spill] sm:$0xff]  ;;  %v14784_v46 = vld [vmem:[#allocation136_spill] sm:$0xff] }
 0x364   : > { %14744 = vst [vmem:[#allocation50_spill] sm:$0xff] %v11390_v56  ;;  %v11395_v1 = vpop.eup %6683  ;;  %6705 = vpow.bf16 %v4129_v7  ;;  %v14752_v7 = vsub.f32 %v14711_v3, %v11303_v51  ;;  %v2741_v48 = vsub.f32 %v14770_v58, %v11406_v12  ;;  %v14777_v34 = vld [vmem:[#allocation135_spill] sm:$0xff]  ;;  %v14797_v16 = vld [vmem:[#allocation44_spill] sm:$0xff] }
 0x365   : > { %14745 = vst [vmem:[#allocation5_spill] sm:$0xff] %v11395_v1  ;;  %v11400_v2 = vpop.eup %6685  ;;  %v11414_v30 = vpack.c.bf16 %v14749_v41, %v14748_v50  ;;  %v3093_v50 = vsub.f32 %v14758_v26, %v11406_v12  ;;  %v14759_v41 = vld [vmem:[#allocation14_spill] sm:$0xff]  ;;  %v14768_v1 = vld [vmem:[#allocation143_spill] sm:$0xff]  ;;  %v2821_v58 = vsub.f32 %v14777_v34, %v11406_v12  ;;  %v2917_v34 = vsub.f32 %v14784_v46, %v11406_v12 }
 0x366   : > { %14746 = vst [vmem:[#allocation15_spill] sm:$0xff] %v11400_v2  ;;  %v11416_v49 = vpop.eup %6687  ;;  %v11424_v10 = vpack.c.bf16 %v14753_v61, %v14752_v7  ;;  %v3109_v42 = vsub.f32 %v14759_v41, %v11406_v12  ;;  %v14761_v2 = vld [vmem:[#allocation53_spill] sm:$0xff]  ;;  %v14766_v7 = vld [vmem:[#allocation46_spill] sm:$0xff]  ;;  %v14782_v38 = vld [vmem:[#allocation51_spill] sm:$0xff]  ;;  %v2997_v46 = vsub.f32 %v14791_v18, %v11406_v12  ;;  %v14798_v18 = vsub.f32 %v14721_v57, %v11303_v51 }
 0x367   : > { %14750 = vst [vmem:[#allocation10_spill] sm:$0xff] %v11414_v30  ;;  %14751 = vst [vmem:[#allocation111_spill] sm:$0xff] %v11416_v49  ;;  %v14760_v49 = vld [vmem:[#allocation105_spill] sm:$0xff]  ;;  %v2629_v28 = vsub.f32 %v14761_v2, %v11406_v12  ;;  %v11440_v61 = vpop.eup %6689  ;;  %v2693_v26 = vsub.f32 %v14766_v7, %v11406_v12  ;;  %v2709_v2 = vsub.f32 %v14768_v1, %v11406_v12  ;;  %v14793_v21 = vld [vmem:[#allocation115_spill] sm:$0xff] }
 0x368   : > { %14754 = vst [vmem:[#allocation94_spill] sm:$0xff] %v11424_v10  ;;  %v2613_v3 = vsub.f32 %v14760_v49, %v11406_v12  ;;  %14762 = vst [vmem:[#allocation34_spill] sm:$0xff] %v11440_v61  ;;  %v11450_v41 = vpop.eup %6691  ;;  %v3365_v49 = vpack.c.bf16 %v3109_v42, %v3093_v50  ;;  %v14769_v61 = vld [vmem:[#allocation26_spill] sm:$0xff]  ;;  %v2773_v7 = vsub.f32 %v14773_v53, %v11406_v12  ;;  %v14781_v53 = vld [vmem:[#allocation24_spill] sm:$0xff] }
 0x369   : > { %14767 = vst [vmem:[#allocation118_spill] sm:$0xff] %v11450_v41  ;;  %v2725_v56 = vsub.f32 %v14769_v61, %v11406_v12  ;;  %v11458_v13 = vpop.eup %6693  ;;  %v14774_v41 = vld [vmem:[#allocation103_spill] sm:$0xff]  ;;  %v14775_v50 = vld [vmem:[#allocation122_spill] sm:$0xff]  ;;  %v2853_v30 = vsub.f32 %v14779_v59, %v11406_v12 }
 0x36a   : > { %14771 = vst [vmem:[#allocation33_spill] sm:$0xff] %v11458_v13  ;;  %v2789_v42 = vsub.f32 %v14774_v41, %v11406_v12  ;;  %v2805_v1 = vsub.f32 %v14775_v50, %v11406_v12  ;;  %v11468_v17 = vpop.eup %6695  ;;  %v4132_v61 = vmul.bf16 1069105081, %v3365_v49  ;;  %v14778_v13 = vld [vmem:[#allocation38_spill] sm:$0xff]  ;;  %v2869_v41 = vsub.f32 %v14781_v53, %v11406_v12  ;;  %v14788_v53 = vld [vmem:[#allocation116_spill] sm:$0xff] }
 0x36b   : > { %14776 = vst [vmem:[#allocation138_spill] sm:$0xff] %v11468_v17  ;;  %v2837_v10 = vsub.f32 %v14778_v13, %v11406_v12  ;;  %v11476_v52 = vpop.eup %6697  ;;  %v2885_v50 = vsub.f32 %v14782_v38, %v11406_v12  ;;  %v14783_v17 = vld [vmem:[#allocation133_spill] sm:$0xff]  ;;  %v14786_v13 = vld [vmem:[#allocation56_spill] sm:$0xff]  ;;  %v2965_v24 = vsub.f32 %v14788_v53, %v11406_v12 }
 0x36c   : > { %14780 = vst [vmem:[#allocation7_spill] sm:$0xff] %v11476_v52  ;;  %v2901_v49 = vsub.f32 %v14783_v17, %v11406_v12  ;;  %v11486_v35 = vpop.eup %6699  ;;  %6707 = vpow.bf16 %v4132_v61  ;;  %v2933_v59 = vsub.f32 %v14786_v13, %v11406_v12  ;;  %v14787_v52 = vld [vmem:[#allocation104_spill] sm:$0xff]  ;;  %v3029_v13 = vsub.f32 %v14793_v21, %v11406_v12 }
 0x36d   : > { %14785 = vst [vmem:[#allocation147_spill] sm:$0xff] %v11486_v35  ;;  %v2949_v29 = vsub.f32 %v14787_v52, %v11406_v12  ;;  %v11494_v33 = vpop.eup %6701  ;;  %v14790_v38 = vld [vmem:[#allocation84_spill] sm:$0xff]  ;;  %v14792_v35 = vld [vmem:[#allocation85_spill] sm:$0xff] }
 0x36e   : > { %14789 = vst [vmem:[#allocation151_spill] sm:$0xff] %v11494_v33  ;;  %v2981_v17 = vsub.f32 %v14790_v38, %v11406_v12  ;;  %v3013_v61 = vsub.f32 %v14792_v35, %v11406_v12  ;;  %v11504_v47 = vpop.eup %6703  ;;  %v14795_v52 = vld [vmem:[#allocation129_spill] sm:$0xff]  ;;  %v14796_v53 = vld [vmem:[#allocation76_spill] sm:$0xff]  ;;  %v3077_v38 = vsub.f32 %v14797_v16, %v11406_v12  ;;  %v14799_v35 = vsub.f32 %v14722_v19, %v11303_v51 }
 0x36f   : > { %14794 = vst [vmem:[#allocation86_spill] sm:$0xff] %v11504_v47  ;;  %v3045_v25 = vsub.f32 %v14795_v52, %v11406_v12  ;;  %v3061_v33 = vsub.f32 %v14796_v53, %v11406_v12  ;;  %v11520_v21 = vpop.eup %6705  ;;  %v14801_v47 = vsub.f32 %v14723_v63, %v11303_v51  ;;  %v14802_v52 = vsub.f32 %v14724_v11, %v11303_v51 }
 0x370   : > { %v11518_v39 = vpack.c.bf16 %v14799_v35, %v14798_v18  ;;  %14800 = vst [vmem:[#allocation91_spill] sm:$0xff] %v11520_v21  ;;  %v14803_v16 = vsub.f32 %v14725_v32, %v11303_v51  ;;  %v14804_v12 = vsub.f32 %v14726_v43, %v11303_v51  ;;  %v14805_v19 = vsub.f32 %v14727_v22, %v11303_v51 }
 0x371   : > { %v11528_v53 = vpack.c.bf16 %v14802_v52, %v14801_v47  ;;  %v14806_v18 = vsub.f32 %v14728_v4, %v11303_v51  ;;  %v14807_v47 = vsub.f32 %v14729_v36, %v11303_v51  ;;  %v14808_v11 = vsub.f32 %v14730_v40, %v11303_v51 }
 0x372   : > { %v11536_v57 = vpack.c.bf16 %v14804_v12, %v14803_v16  ;;  %v14809_v43 = vsub.f32 %v14731_v54, %v11303_v51  ;;  %v14810_v35 = vsub.f32 %v14732_v8, %v11303_v51  ;;  %v14811_v4 = vsub.f32 %v14733_v23, %v11303_v51 }
 0x373   : > { %v11544_v63 = vpack.c.bf16 %v14806_v18, %v14805_v19  ;;  %v11552_v32 = vpack.c.bf16 %v14808_v11, %v14807_v47  ;;  %v14812_v52 = vsub.f32 %v14735_v27, %v11303_v51  ;;  %v14813_v40 = vsub.f32 %v14736_v44, %v11303_v51 }
 0x374   : > { %v11560_v22 = vpack.c.bf16 %v14810_v35, %v14809_v43  ;;  %v14814_v16 = vsub.f32 %v14737_v31, %v11303_v51  ;;  %v14815_v8 = vsub.f32 %v14739_v55, %v11303_v51  ;;  %v14816_v12 = vsub.f32 %v14740_v62, %v11303_v51  ;;  %v14841_v35 = vld [vmem:[#allocation36_spill] sm:$0xff] }
 0x375   : > { %v11568_v36 = vpack.c.bf16 %v14812_v52, %v14811_v4  ;;  %v14817_v27 = vsub.f32 %v14741_v0, %v11303_v51  ;;  %v14818_v19 = vsub.f32 %v14743_v37, %v11303_v51  ;;  %v14819_v31 = vmul.bf16 1069105081, %v11256_v6  ;;  %v14842_v52 = vld [vmem:[#allocation43_spill] sm:$0xff] }
 0x376   : > { %v11576_v54 = vpack.c.bf16 %v14814_v16, %v14813_v40  ;;  %v11584_v23 = vpack.c.bf16 %v14816_v12, %v14815_v8  ;;  %v11596_v18 = vpack.c.bf16 %v2629_v28, %v2613_v3  ;;  %v11598_v47 = vpack.c.bf16 %v2661_v20, %v2645_v14  ;;  %v14844_v16 = vld [vmem:[#allocation10_spill] sm:$0xff] }
 0x377   : > { %v11592_v44 = vpack.c.bf16 %v14818_v19, %v14817_v27  ;;  %6709 = vpow.bf16 %v14819_v31  ;;  %v14820_v55 = vmul.bf16 1069105081, %v11263_v9  ;;  %v11602_v62 = vpack.c.bf16 %v2693_v26, %v2677_v45  ;;  %v14845_v27 = vld [vmem:[#allocation94_spill] sm:$0xff] }
 0x378   : > { %v11604_v11 = vpack.c.bf16 %v2725_v56, %v2709_v2  ;;  %v11606_v0 = vpack.c.bf16 %v2757_v5, %v2741_v48  ;;  %v14821_v51 = vmul.bf16 1069105081, %v11268_v60  ;;  %v11610_v37 = vpack.c.bf16 %v2789_v42, %v2773_v7  ;;  %v14823_v48 = vld [vmem:[#allocation57_spill] sm:$0xff]  ;;  %v14826_v2 = vld [vmem:[#allocation6_spill] sm:$0xff]  ;;  %v11637_v7 = vpop.eup %6707 }
 0x379   : > { %6711 = vpow.bf16 %v14820_v55  ;;  %v11612_v6 = vpack.c.bf16 %v2821_v58, %v2805_v1  ;;  %v11614_v3 = vpack.c.bf16 %v2853_v30, %v2837_v10  ;;  %v14822_v28 = vmul.bf16 1069105081, %v11273_v15  ;;  %v14825_v10 = vld [vmem:[#allocation66_spill] sm:$0xff]  ;;  %14828 = vst [vmem:[#allocation61_spill] sm:$0xff] %v11637_v7  ;;  %v14830_v1 = vld [vmem:[#allocation92_spill] sm:$0xff]  ;;  %v14846_v55 = vld [vmem:[#allocation21_spill] sm:$0xff] }
 0x37a   : > { %6713 = vpow.bf16 %v14821_v51  ;;  %v11618_v9 = vpack.c.bf16 %v2885_v50, %v2869_v41  ;;  %v11620_v14 = vpack.c.bf16 %v2917_v34, %v2901_v49  ;;  %v11622_v56 = vpack.c.bf16 %v2949_v29, %v2933_v59  ;;  %v14829_v29 = vld [vmem:[#allocation107_spill] sm:$0xff]  ;;  %v14833_v41 = vld [vmem:[#allocation158_spill] sm:$0xff]  ;;  %v14835_v34 = vld [vmem:[#allocation41_spill] sm:$0xff] }
 0x37b   : > { %6715 = vpow.bf16 %v14822_v28  ;;  %v14824_v20 = vmul.bf16 1069105081, %v14823_v48  ;;  %v11626_v60 = vpack.c.bf16 %v2981_v17, %v2965_v24  ;;  %v11628_v45 = vpack.c.bf16 %v3013_v61, %v2997_v46  ;;  %v14832_v24 = vld [vmem:[#allocation154_spill] sm:$0xff]  ;;  %v14836_v17 = vld [vmem:[#allocation87_spill] sm:$0xff]  ;;  %v14839_v61 = vld [vmem:[#allocation157_spill] sm:$0xff] }
 0x37c   : > { %v11630_v26 = vpack.c.bf16 %v3045_v25, %v3029_v13  ;;  %v3838_v30 = vmul.bf16 1069105081, %v14825_v10  ;;  %v14827_v15 = vmul.bf16 1069105081, %v14826_v2  ;;  %v11635_v5 = vpack.c.bf16 %v3077_v38, %v3061_v33  ;;  %v14834_v25 = vld [vmem:[#allocation47_spill] sm:$0xff]  ;;  %v14838_v33 = vld [vmem:[#allocation112_spill] sm:$0xff] }
 0x37d   : > { %6717 = vpow.bf16 %v14824_v20  ;;  %v3886_v42 = vmul.bf16 1069105081, %v14829_v29  ;;  %v14831_v58 = vmul.bf16 1069105081, %v14830_v1  ;;  %v11644_v50 = vrot.slane %v14833_v41, %v14832_v24  ;;  %v14840_v38 = vld [vmem:[#allocation32_spill] sm:$0xff]  ;;  %v14847_v48 = vld [vmem:[#allocation30_spill] sm:$0xff] }
 0x37e   : > { %6719 = vpow.bf16 %v14827_v15  ;;  %v3934_v49 = vmul.bf16 1069105081, %v14834_v25  ;;  %v3982_v59 = vmul.bf16 1069105081, %v14835_v34  ;;  %v14837_v46 = vmul.bf16 1069105081, %v14836_v17 }
 0x37f   : > { %6721 = vpow.bf16 %v14831_v58  ;;  %v11652_v13 = vmul.f32 %v14839_v61, %v14838_v33  ;;  %v4030_v43 = vmul.bf16 1069105081, %v14840_v38  ;;  %v4078_v4 = vmul.bf16 1069105081, %v14841_v35  ;;  %v14848_v15 = vld [vmem:[#allocation101_spill] sm:$0xff]  ;;  %v14856_v1 = vld [vmem:[#allocation60_spill] sm:$0xff] }
 0x380   : > { %6723 = vpow.bf16 %v14837_v46  ;;  %v14843_v40 = vmul.bf16 1069105081, %v14842_v52  ;;  %v3409_v8 = vmul.bf16 1069105081, %v14844_v16  ;;  %v3412_v12 = vmul.bf16 1069105081, %v11596_v18 }
 0x381   : > { %v3457_v19 = vmul.bf16 1069105081, %v14845_v27  ;;  %v3460_v31 = vmul.bf16 1069105081, %v11598_v47  ;;  %v3505_v51 = vmul.bf16 1069105081, %v14846_v55 }
 0x382   : > { %6725 = vpow.bf16 %v14843_v40  ;;  %v3508_v28 = vmul.bf16 1069105081, %v11602_v62  ;;  %v3553_v20 = vmul.bf16 1069105081, %v14847_v48  ;;  %v6710_v10 = vpop.eup %6709  ;;  %v3556_v2 = vmul.bf16 1069105081, %v11604_v11 }
 0x383   : > { %6727 = vpow.bf16 %v3838_v30  ;;  %v3601_v29 = vmul.bf16 1069105081, %v14848_v15  ;;  %4404 = vmatprep.subr.bf16.mxu0 %v6710_v10  ;;  %v14850_v35 = vld [vmem:[#allocation81_spill] sm:$0xff]  ;;  %v11686_v40 = vpop.f32.mrb[4].mxu0  ;;  %v5244_v30 = vmul.f32 %v14856_v1, %v14856_v1  ;;  %v14862_v11 = vmul.bf16 1069105081, %v11606_v0 }
 0x384   : > { %6729 = vpow.bf16 %v3886_v42  ;;  %v6712_v18 = vpop.eup %6711  ;;  %v11684_v52 = vmul.f32 %v11644_v50, %v14850_v35  ;;  %v11694_v55 = vpop.f32.mrb[5].mxu0  ;;  %v14853_v38 = vld [vmem:[#allocation161_spill] sm:$0xff]  ;;  %v14864_v15 = vmul.bf16 1069105081, %v11518_v39  ;;  %v14865_v0 = vmul.bf16 1069105081, %v11610_v37 }
 0x385   : > { %6731 = vpow.bf16 %v3934_v49  ;;  %v6714_v62 = vpop.eup %6713  ;;  %v14849_v49 = vld [vmem:[#allocation98_spill] sm:$0xff]  ;;  %v11703_v16 = vpop.f32.mrb[6].mxu0 }
 0x386   : > { %6733 = vpow.bf16 %v3982_v59  ;;  %4405 = vmatpush1.bf16.msra.mxu0 %v14849_v49  ;;  %v6716_v34 = vpop.eup %6715  ;;  %v14851_v49 = vld [vmem:[#allocation120_spill] sm:$0xff] }
 0x387   : > { %6735 = vpow.bf16 %v4030_v43  ;;  %4406 = vmatprep.subr.bf16.mxu0 %v6712_v18  ;;  %v14852_v43 = vld [vmem:[#allocation153_spill] sm:$0xff] }
 0x388   : > { %6737 = vpow.bf16 %v4078_v4  ;;  %v11678_v61 = vpop.eup %6717 }
 0x389   : > { %6739 = vpow.bf16 %v3409_v8  ;;  %v11688_v4 = vpop.eup %6719  ;;  %v4602_v8 = vmul.f32 %v11652_v13, %v11652_v13 }
 0x38a   : > { %6741 = vpow.bf16 %v3412_v12  ;;  %v11696_v48 = vpop.eup %6721  ;;  %4407 = vmatpush1.bf16.msra.mxu0 %v14851_v49  ;;  %v5243_v12 = vmul.f32 %v14852_v43, %v14852_v43 }
 0x38b   : > { %6743 = vpow.bf16 %v3457_v19  ;;  %v11705_v27 = vpop.eup %6723  ;;  %4408 = vmatprep.subr.bf16.mxu0 %v6714_v62  ;;  %v4619_v19 = vsel %vm4618_vm3, %v4602_v8, 0.0  ;;  %v5245_v62 = vmul.f32 %v14853_v38, %v14853_v38  ;;  %v14854_v8 = vld [vmem:[#allocation72_spill] sm:$0xff] }
 0x38c   : > { %6745 = vpow.bf16 %v3460_v31  ;;  %v4620_v18 = vrot.slane %v4619_v19, 4  ;;  %v5259_v17 = vsel %vm4618_vm3, %v5243_v12, 0.0  ;;  %v4604_v31 = vmul.f32 %v11684_v52, %v11684_v52  ;;  %v14855_v12 = vld [vmem:[#allocation148_spill] sm:$0xff] }
 0x38d   : > { %v11710_v10 = vpop.eup %6725  ;;  %6747 = vpow.bf16 %v3505_v51  ;;  %v5260_v25 = vrot.slane %v5259_v17, 4  ;;  %v4513_v41 = vrot.slane %v14855_v12, %v14832_v24  ;;  %v5273_v47 = vsel %vm4618_vm3, %v5245_v62, 0.0 }
 0x38e   : > { %v11714_v59 = vpop.eup %6727  ;;  %6749 = vpow.bf16 %v3508_v28  ;;  %4409 = vmatpush1.bf16.msra.mxu0 %v14854_v8  ;;  %v4621_v49 = vadd.f32 %v4620_v18, %v4619_v19  ;;  %v4633_v42 = vsel %vm4618_vm3, %v4604_v31, 0.0  ;;  %v5274_v8 = vrot.slane %v5273_v47, 4 }
 0x38f   : > { %v11720_v46 = vpop.eup %6729  ;;  %6751 = vpow.bf16 %v3553_v20  ;;  %4410 = vmatprep.subr.bf16.mxu0 %v6716_v34  ;;  %v5261_v28 = vadd.f32 %v5260_v25, %v5259_v17  ;;  %v11732_v20 = vpop.f32.mrb[7].mxu0  ;;  %v4634_v19 = vrot.slane %v4633_v42, 4  ;;  %v14859_v34 = vld [vmem:[#allocation75_spill] sm:$0xff]  ;;  %v11746_v31 = vmul.f32 %v4513_v41, %v14856_v1 }
 0x390   : > { %v11726_v58 = vpop.eup %6731  ;;  %6753 = vpow.bf16 %v3556_v2  ;;  %v4622_v18 = vrot.slane %v4621_v49, 2  ;;  %v11743_v17 = vmul.f32 %v4513_v41, %v14859_v34  ;;  %v14863_v2 = vld [vmem:[#allocation50_spill] sm:$0xff] }
 0x391   : > { %v11734_v51 = vpop.eup %6733  ;;  %6755 = vpow.bf16 %v3601_v29  ;;  %v5262_v25 = vrot.slane %v5261_v28, 2  ;;  %14860 = vst [vmem:[#allocation124_spill] sm:$0xff] %v11746_v31  ;;  %v4635_v7 = vadd.f32 %v4634_v19, %v4633_v42  ;;  %v5266_v31 = vsel %vm4618_vm3, %v5244_v30, 0.0  ;;  %v14868_v30 = vld [vmem:[#allocation5_spill] sm:$0xff] }
 0x392   : > { %14857 = vst [vmem:[#allocation8_spill] sm:$0xff] %v11734_v51  ;;  %v11738_v12 = vpop.eup %6735  ;;  %6757 = vpow.bf16 %v14862_v11  ;;  %4411 = vmatpush1.bf16.msra.mxu0 %v14863_v2  ;;  %v4623_v21 = vadd.f32 %v4622_v18, %v4621_v49  ;;  %v4603_v41 = vmul.f32 %v11743_v17, %v11743_v17  ;;  %v14866_v18 = vmul.bf16 1069105081, %v11528_v53 }
 0x393   : > { %14858 = vst [vmem:[#allocation108_spill] sm:$0xff] %v11738_v12  ;;  %v11748_v62 = vpop.eup %6737  ;;  %v5275_v12 = vadd.f32 %v5274_v8, %v5273_v47  ;;  %6759 = vpow.bf16 %v14864_v15  ;;  %4412 = vmatprep.subr.bf16.mxu0 %v11678_v61  ;;  %v5263_v29 = vadd.f32 %v5262_v25, %v5261_v28  ;;  %v4636_v49 = vrot.slane %v4635_v7, 2 }
 0x394   : > { %14861 = vst [vmem:[#allocation109_spill] sm:$0xff] %v11748_v62  ;;  %v6740_v51 = vpop.eup %6739  ;;  %6761 = vpow.bf16 %v14865_v0  ;;  %v4624_v11 = vrot.slane %v4623_v21, 1  ;;  %v4626_v61 = vsel %vm4618_vm3, %v4603_v41, 0.0  ;;  %v5267_v28 = vrot.slane %v5266_v31, 4 }
 0x395   : > { %v6742_v62 = vpop.eup %6741  ;;  %v5276_v42 = vrot.slane %v5275_v12, 2  ;;  %6763 = vpow.bf16 %v14866_v18  ;;  %v5264_v39 = vrot.slane %v5263_v29, 1  ;;  %v14867_v8 = vmul.bf16 1069105081, %v11612_v6 }
 0x396   : > { %v6744_v47 = vpop.eup %6743  ;;  %4447 = vmatprep.subr.bf16.mxu1 %v6742_v62  ;;  %4413 = vmatpush1.bf16.msra.mxu0 %v14868_v30  ;;  %v4625_v37 = vadd.f32 %v4624_v11, %v4623_v21  ;;  %v4637_v25 = vadd.f32 %v4636_v49, %v4635_v7  ;;  %v14869_v0 = vmul.bf16 1069105081, %v11536_v57  ;;  %v4084_v53 = vmul.bf16 1069105081, %v11635_v5 }
 0x397   : > { %v6746_v19 = vpop.eup %6745  ;;  %6765 = vpow.bf16 %v14867_v8  ;;  %4448 = vmatpush1.bf16.msra.mxu1 %v6740_v51  ;;  %v5277_v2 = vadd.f32 %v5276_v42, %v5275_v12  ;;  %4414 = vmatprep.subr.bf16.mxu0 %v11688_v4  ;;  %v4627_v62 = vrot.slane %v4626_v61, 4  ;;  %v5268_v41 = vadd.f32 %v5267_v28, %v5266_v31  ;;  %v14871_v51 = vld [vmem:[#allocation150_spill] sm:$0xff]  ;;  %v14874_v31 = vld [vmem:[#allocation145_spill] sm:$0xff]  ;;  %v14875_v28 = vld [vmem:[#allocation156_spill] sm:$0xff] }
 0x398   : > { %v6748_v15 = vpop.eup %6747  ;;  %6767 = vpow.bf16 %v14869_v0  ;;  %4449 = vmatprep.subr.bf16.mxu1 %v6746_v19  ;;  %v14870_v6 = vmul.bf16 1069105081, %v11614_v3  ;;  %v11775_v21 = vmul.f32 %v14871_v51, %v14838_v33  ;;  %v5265_v7 = vadd.f32 %v5264_v39, %v5263_v29  ;;  %v14876_v29 = vld [vmem:[#allocation15_spill] sm:$0xff] }
 0x399   : > { %v6750_v18 = vpop.eup %6749  ;;  %v4638_v12 = vrot.slane %v4637_v25, 1  ;;  %v14872_v57 = vmul.bf16 1069105081, %v11544_v63  ;;  %v5278_v49 = vrot.slane %v5277_v2, 1  ;;  %v4628_v42 = vadd.f32 %v4627_v62, %v4626_v61  ;;  %v14880_v62 = vld [vmem:[#allocation126_spill] sm:$0xff] }
 0x39a   : > { %6769 = vpow.bf16 %v14870_v6  ;;  %v6752_v11 = vpop.eup %6751  ;;  %v5269_v19 = vrot.slane %v5268_v41, 2  ;;  %v14873_v4 = vmul.bf16 1069105081, %v11618_v9  ;;  %v11783_v3 = vmul.f32 %v14874_v31, %v14850_v35  ;;  %4415 = vmatpush1.bf16.msra.mxu0 %v14876_v29  ;;  %v14878_v35 = vld [vmem:[#allocation144_spill] sm:$0xff] }
 0x39b   : > { %6771 = vpow.bf16 %v14872_v57  ;;  %v11787_v33 = vmul.f32 %v14875_v28, %v14859_v34  ;;  %4450 = vmatpush1.bf16.msra.mxu1 %v6744_v47  ;;  %v11790_v39 = vadd.f32 1e-08, %v4625_v37  ;;  %v6754_v63 = vpop.eup %6753  ;;  %v14877_v61 = vmul.bf16 1069105081, %v11552_v32  ;;  %4416 = vmatprep.subr.bf16.mxu0 %v11696_v48 }
 0x39c   : > { %6773 = vpow.bf16 %v14873_v4  ;;  %4451 = vmatprep.subr.bf16.mxu1 %v6750_v18  ;;  %v4629_v9 = vrot.slane %v4628_v42, 2  ;;  %v5270_v8 = vadd.f32 %v5269_v19, %v5268_v41  ;;  %v4521_v30 = vrot.slane %v14878_v35, %v14832_v24  ;;  %v6756_v0 = vpop.eup %6755  ;;  %v14882_v41 = vld [vmem:[#allocation64_spill] sm:$0xff] }
 0x39d   : > { %6775 = vpow.bf16 %v14877_v61  ;;  %v14879_v34 = vmul.bf16 1069105081, %v11620_v14  ;;  %v11799_v47 = vadd.f32 1e-08, %v5265_v7  ;;  %v4639_v37 = vadd.f32 %v4638_v12, %v4637_v25  ;;  %v6758_v32 = vpop.eup %6757  ;;  %v14884_v7 = vld [vmem:[#allocation111_spill] sm:$0xff] }
 0x39e   : > { %v5246_v6 = vmul.f32 %v14880_v62, %v14880_v62  ;;  %v14881_v18 = vmul.bf16 1069105081, %v11560_v22  ;;  %v5279_v48 = vadd.f32 %v5278_v49, %v5277_v2  ;;  %v4630_v51 = vadd.f32 %v4629_v9, %v4628_v42  ;;  %v11808_v19 = vpop.eup %6759  ;;  %4417 = vmatpush1.bf16.msra.mxu0 %v14884_v7 }
 0x39f   : > { %6777 = vpow.bf16 %v14879_v34  ;;  %v11806_v57 = vmul.f32 %v4521_v30, %v14882_v41  ;;  %v14883_v14 = vmul.bf16 1069105081, %v11622_v56  ;;  %4452 = vmatpush1.bf16.msra.mxu1 %v6748_v15  ;;  %v11814_v25 = vmul.f32 %v4521_v30, %v14880_v62  ;;  %v6762_v2 = vpop.eup %6761  ;;  %4418 = vmatprep.subr.bf16.mxu0 %v11705_v27 }
 0x3a0   : > { %6779 = vpow.bf16 %v14881_v18  ;;  %v5280_v12 = vsel %vm4618_vm3, %v5246_v6, 0.0  ;;  %v4783_v22 = vmul.f32 %v11686_v40, %v11686_v40  ;;  %v14885_v49 = vmul.bf16 1069105081, %v11568_v36  ;;  %4453 = vmatprep.subr.bf16.mxu1 %v6754_v63  ;;  %v11824_v4 = vpop.eup %6763 }
 0x3a1   : > { %6781 = vpow.bf16 %v14883_v14  ;;  %v4631_v56 = vrot.slane %v4630_v51, 1  ;;  %v5271_v42 = vrot.slane %v5270_v8, 1  ;;  %v4605_v15 = vmul.f32 %v11806_v57, %v11806_v57 }
 0x3a2   : > { %6783 = vpow.bf16 %v14885_v49  ;;  %v14886_v31 = vmul.bf16 1069105081, %v11626_v60  ;;  %v5281_v28 = vrot.slane %v5280_v12, 4  ;;  %v4815_v29 = vrot.slane %v4783_v22, 3  ;;  %v11830_v36 = vpop.eup %6765  ;;  %v14889_v60 = vld [vmem:[#allocation34_spill] sm:$0xff] }
 0x3a3   : > { %v4784_v61 = vmul.f32 %v11694_v55, %v11694_v55  ;;  %v14887_v63 = vmul.bf16 1069105081, %v11576_v54  ;;  %v4733_v27 = vadd.f32 1e-08, %v4639_v37  ;;  %v4632_v9 = vadd.f32 %v4631_v56, %v4630_v51  ;;  %v11835_v30 = vpop.eup %6767  ;;  %4454 = vmatpush1.bf16.msra.mxu1 %v6752_v11  ;;  %4419 = vmatpush1.bf16.msra.mxu0 %v14889_v60 }
 0x3a4   : > { %6785 = vpow.bf16 %v14886_v31  ;;  %v4640_v35 = vsel %vm4618_vm3, %v4605_v15, 0.0  ;;  %v14888_v34 = vmul.bf16 1069105081, %v11628_v45  ;;  %v5282_v18 = vadd.f32 %v5281_v28, %v5280_v12  ;;  %4455 = vmatprep.subr.bf16.mxu1 %v6758_v32  ;;  %4420 = vmatprep.subr.bf16.mxu0 %v11710_v10  ;;  %v14893_v28 = vld [vmem:[#allocation118_spill] sm:$0xff] }
 0x3a5   : > { %6787 = vpow.bf16 %v14887_v63  ;;  %v4641_v6 = vrot.slane %v4640_v35, 4  ;;  %v4871_v14 = vsel %vm4618_vm3, %v4815_v29, 0.0  ;;  %v11841_v7 = vpop.eup %6769  ;;  %v14890_v54 = vmul.bf16 1069105081, %v11584_v23 }
 0x3a6   : > { %6789 = vpow.bf16 %v14888_v34  ;;  %v5272_v37 = vadd.f32 %v5271_v42, %v5270_v8  ;;  %v4872_v51 = vrot.slane %v4871_v14, 4  ;;  %v4816_v22 = vrot.slane %v4784_v61, 3  ;;  %v11846_v45 = vpop.eup %6771 }
 0x3a7   : > { %6791 = vpow.bf16 %v14890_v54  ;;  %v14891_v11 = vmul.bf16 1069105081, %v11630_v26  ;;  %v5373_v49 = vadd.f32 1e-08, %v5279_v48  ;;  %v4642_v12 = vadd.f32 %v4641_v6, %v4640_v35  ;;  %v11850_v15 = vpop.eup %6773  ;;  %4456 = vmatpush1.bf16.msra.mxu1 %v6756_v0  ;;  %4421 = vmatpush1.bf16.msra.mxu0 %v14893_v28  ;;  %v11859_v48 = vpop.f32.mrb[4].mxu1 }
 0x3a8   : > { %v5283_v56 = vrot.slane %v5282_v18, 2  ;;  %v14892_v31 = vmul.bf16 1069105081, %v11592_v44  ;;  %v4732_v23 = vadd.f32 1e-08, %v4632_v9  ;;  %v4873_v32 = vadd.f32 %v4872_v51, %v4871_v14  ;;  %v11855_v8 = vpop.eup %6775  ;;  %4457 = vmatprep.subr.bf16.mxu1 %v6762_v2  ;;  %4422 = vmatprep.subr.bf16.mxu0 %v11714_v59  ;;  %v14895_v51 = vld [vmem:[#allocation33_spill] sm:$0xff] }
 0x3a9   : > { %6793 = vpow.bf16 %v14891_v11  ;;  %v4878_v10 = vsel %vm4618_vm3, %v4816_v22, 0.0  ;;  %v4643_v42 = vrot.slane %v4642_v12, 2  ;;  %v5372_v44 = vadd.f32 1e-08, %v5272_v37 }
 0x3aa   : > { %6795 = vpow.bf16 %v14892_v31  ;;  %v5284_v26 = vadd.f32 %v5283_v56, %v5282_v18  ;;  %v4879_v29 = vrot.slane %v4878_v10, 4  ;;  %v11861_v61 = vpop.eup %6777  ;;  %v4874_v63 = vrot.slane %v4873_v32, 2 }
 0x3ab   : > { %6797 = vrsqrt.f32 %v11790_v39  ;;  %v4785_v0 = vmul.f32 %v11859_v48, %v11859_v48  ;;  %v11867_v39 = vpop.f32.mrb[5].mxu1  ;;  %v11869_v9 = vpop.eup %6779  ;;  %v4644_v35 = vadd.f32 %v4643_v42, %v4642_v12  ;;  %4458 = vmatpush1.bf16.msra.mxu1 %v11808_v19  ;;  %4423 = vmatpush1.bf16.msra.mxu0 %v14895_v51 }
 0x3ac   : > { %6799 = vrsqrt.f32 %v11799_v47  ;;  %v5285_v34 = vrot.slane %v5284_v26, 1  ;;  %v4880_v60 = vadd.f32 %v4879_v29, %v4878_v10  ;;  %v11871_v6 = vpop.f32.mrb[6].mxu1  ;;  %v11873_v2 = vpop.eup %6781  ;;  %v4875_v47 = vadd.f32 %v4874_v63, %v4873_v32  ;;  %4459 = vmatprep.subr.bf16.mxu1 %v11830_v36  ;;  %4424 = vmatprep.subr.bf16.mxu0 %v11720_v46  ;;  %v14896_v36 = vld [vmem:[#allocation127_spill] sm:$0xff]  ;;  %v14897_v63 = vld [vmem:[#allocation138_spill] sm:$0xff] }
 0x3ad   : > { %6801 = vrsqrt.f32 %v4733_v27  ;;  %v4817_v18 = vrot.slane %v4785_v0, 3  ;;  %v4786_v59 = vmul.f32 %v11867_v39, %v11867_v39  ;;  %v11877_v14 = vpop.f32.mrb[7].mxu1  ;;  %v11879_v54 = vpop.eup %6783  ;;  %v4645_v27 = vrot.slane %v4644_v35, 1 }
 0x3ae   : > { %6803 = vrsqrt.f32 %v5373_v49  ;;  %14894 = vst [vmem:[#allocation155_spill] sm:$0xff] %v11877_v14  ;;  %v5286_v37 = vadd.f32 %v5285_v34, %v5284_v26  ;;  %v4881_v22 = vrot.slane %v4880_v60, 2  ;;  %v4876_v49 = vrot.slane %v4875_v47, 1 }
 0x3af   : > { %6805 = vrsqrt.f32 %v4732_v23  ;;  %v11883_v11 = vpop.eup %6785  ;;  %v4885_v12 = vsel %vm4618_vm3, %v4817_v18, 0.0  ;;  %v4818_v56 = vrot.slane %v4786_v59, 3  ;;  %v4646_v19 = vadd.f32 %v4645_v27, %v4644_v35  ;;  %4460 = vmatpush1.bf16.msra.mxu1 %v11824_v4  ;;  %4425 = vmatpush1.bf16.msra.mxu0 %v14897_v63  ;;  %v14898_v27 = vld [vmem:[#allocation7_spill] sm:$0xff] }
 0x3b0   : > { %6807 = vrsqrt.f32 %v5372_v44  ;;  %v11888_v31 = vpop.eup %6787  ;;  %v5374_v23 = vadd.f32 1e-08, %v5286_v37  ;;  %v4886_v32 = vrot.slane %v4885_v12, 4  ;;  %v5247_v10 = vmul.f32 %v11703_v16, %v11703_v16  ;;  %4461 = vmatprep.subr.bf16.mxu1 %v11841_v7  ;;  %4426 = vmatprep.subr.bf16.mxu0 %v11726_v58  ;;  %v14901_v63 = vld [vmem:[#allocation147_spill] sm:$0xff] }
 0x3b1   : > { %v11892_v42 = vpop.eup %6789  ;;  %6809 = vpow.bf16 %v4084_v53  ;;  %v11898_v46 = vmul.f32 %v14896_v36, %v14882_v41  ;;  %v4892_v26 = vsel %vm4618_vm3, %v4818_v56, 0.0  ;;  %v5019_v29 = vrot.slane %v11775_v21, 3 }
 0x3b2   : > { %v11901_v28 = vpop.eup %6791  ;;  %v4734_v44 = vadd.f32 1e-08, %v4646_v19  ;;  %6811 = vrcp.f32 %v11686_v40  ;;  %v4877_v0 = vadd.f32 %v4876_v49, %v4875_v47  ;;  %v5021_v53 = vrot.slane %v11783_v3, 3  ;;  %v14904_v49 = vld [vmem:[#allocation109_spill] sm:$0xff] }
 0x3b3   : > { %v5020_v41 = vrot.slane %v11787_v33, 3  ;;  %6813 = vrsqrt.f32 %v5374_v23  ;;  %v4882_v21 = vadd.f32 %v4881_v22, %v4880_v60  ;;  %v4887_v34 = vadd.f32 %v4886_v32, %v4885_v12  ;;  %4462 = vmatpush1.bf16.msra.mxu1 %v11835_v30  ;;  %4427 = vmatpush1.bf16.msra.mxu0 %v14898_v27  ;;  %v14900_v30 = vld [vmem:[#allocation8_spill] sm:$0xff] }
 0x3b4   : > { %v11907_v5 = vpop.eup %6793  ;;  %6815 = vrsqrt.f32 %v4734_v44  ;;  %v4893_v18 = vrot.slane %v4892_v26, 4  ;;  %v11918_v47 = vsel %vm4618_vm3, %v5247_v10, 0.0  ;;  %v11925_v58 = vmul.f32 %v11644_v50, %v14853_v38  ;;  %4463 = vmatprep.subr.bf16.mxu1 %v11850_v15  ;;  %4428 = vmatprep.subr.bf16.mxu0 %v14900_v30 }
 0x3b5   : > { %v11913_v35 = vpop.eup %6795  ;;  %6817 = vrcp.f32 %v11859_v48  ;;  %v4959_v37 = vadd.f32 1e-08, %v4877_v0  ;;  %v4888_v23 = vrot.slane %v4887_v34, 2 }
 0x3b6   : > { %v11915_v4 = vpop.eup %6797  ;;  %6819 = vrcp.f32 %v11694_v55  ;;  %v11953_v32 = vadd.f32 %v4893_v18, %v4892_v26 }
 0x3b7   : > { %v6800_v59 = vpop.eup %6799  ;;  %v4763_v33 = vmul.f32 %v11915_v4, %v11652_v13  ;;  %v11938_v13 = vmul.f32 %v11732_v20, %v11732_v20  ;;  %4464 = vmatpush1.bf16.msra.mxu1 %v11846_v45  ;;  %6821 = vrsqrt.f32 %v4959_v37  ;;  %4429 = vmatpush1.bf16.msra.mxu0 %v14901_v63 }
 0x3b8   : > { %v11928_v7 = vpop.eup %6801  ;;  %v11932_v60 = vmul.f32 %v6800_v59, %v14852_v43  ;;  %v4883_v43 = vrot.slane %v4882_v21, 1  ;;  %4465 = vmatprep.subr.bf16.mxu1 %v11861_v61  ;;  %v14902_v59 = vld [vmem:[#allocation108_spill] sm:$0xff] }
 0x3b9   : > { %14899 = vst [vmem:[#allocation40_spill] sm:$0xff] %v11938_v13  ;;  %v6804_v50 = vpop.eup %6803  ;;  %v11940_v51 = vadd.f32 %v5019_v29, %v4763_v33  ;;  %v4765_v22 = vmul.f32 %v11928_v7, %v11684_v52  ;;  %v11963_v29 = vmul.f32 %v11871_v6, %v11871_v6  ;;  %4430 = vmatprep.subr.bf16.mxu0 %v14902_v59 }
 0x3ba   : > { %v11947_v12 = vpop.eup %6805  ;;  %v5419_v56 = vmul.f32 %v11932_v60, %v4763_v33  ;;  %v11951_v19 = vmul.f32 %v6804_v50, %v14853_v38  ;;  %v11985_v50 = vadd.f32 %v4883_v43, %v4882_v21  ;;  %v14903_v21 = vld [vmem:[#allocation151_spill] sm:$0xff] }
 0x3bb   : > { %v6808_v10 = vpop.eup %6807  ;;  %v5067_v52 = vmul.f32 %v11940_v51, %v11940_v51  ;;  %v11957_v15 = vadd.f32 %v5021_v53, %v4765_v22  ;;  %v4764_v36 = vmul.f32 %v11947_v12, %v11743_v17  ;;  %4466 = vmatpush1.bf16.msra.mxu1 %v11855_v8  ;;  %4431 = vmatpush1.bf16.msra.mxu0 %v14903_v21 }
 0x3bc   : > { %v5435_v44 = vsel %vm4618_vm3, %v5419_v56, 0.0  ;;  %v5421_v38 = vmul.f32 %v11951_v19, %v4765_v22  ;;  %v11968_v26 = vmul.f32 %v6808_v10, %v14856_v1  ;;  %v11979_v33 = vpop.eup %6809  ;;  %4467 = vmatprep.subr.bf16.mxu1 %v11873_v2  ;;  %4432 = vmatprep.subr.bf16.mxu0 %v14904_v49  ;;  %v14905_v2 = vrot.slane %v11898_v46, 3 }
 0x3bd   : > { %v5083_v0 = vsel %vm4618_vm3, %v5067_v52, 0.0  ;;  %v5436_v53 = vrot.slane %v5435_v44, 4  ;;  %v5069_v17 = vmul.f32 %v11957_v15, %v11957_v15  ;;  %v11975_v18 = vadd.f32 %v5020_v41, %v4764_v36  ;;  %v11981_v1 = vpop.eup %6811 }
 0x3be   : > { %v5084_v45 = vrot.slane %v5083_v0, 4  ;;  %v5449_v27 = vsel %vm4618_vm3, %v5421_v38, 0.0  ;;  %v5420_v37 = vmul.f32 %v11968_v26, %v4764_v36  ;;  %v6814_v22 = vpop.eup %6813  ;;  %v11994_v38 = vadd.f32 %v4888_v23, %v4887_v34 }
 0x3bf   : > { %v5437_v30 = vadd.f32 %v5436_v53, %v5435_v44  ;;  %v5097_v41 = vsel %vm4618_vm3, %v5069_v17, 0.0  ;;  %v5450_v56 = vrot.slane %v5449_v27, 4  ;;  %v5068_v61 = vmul.f32 %v11975_v18, %v11975_v18  ;;  %v11990_v10 = vpop.eup %6815  ;;  %4468 = vmatpush1.bf16.msra.mxu1 %v11869_v9 }
 0x3c0   : > { %v5085_v52 = vadd.f32 %v5084_v45, %v5083_v0  ;;  %v5098_v63 = vrot.slane %v5097_v41, 4  ;;  %v5442_v59 = vsel %vm4618_vm3, %v5420_v37, 0.0  ;;  %v11997_v43 = vpop.eup %6817  ;;  %v4766_v34 = vmul.f32 %v11990_v10, %v11806_v57  ;;  %4469 = vmatprep.subr.bf16.mxu1 %v11883_v11 }
 0x3c1   : > { %v5438_v36 = vrot.slane %v5437_v30, 2  ;;  %v5451_v44 = vadd.f32 %v5450_v56, %v5449_v27  ;;  %v5090_v53 = vsel %vm4618_vm3, %v5068_v61, 0.0  ;;  %v5443_v17 = vrot.slane %v5442_v59, 4  ;;  %v12002_v0 = vpop.eup %6819 }
 0x3c2   : > { %v5086_v45 = vrot.slane %v5085_v52, 2  ;;  %v5099_v37 = vadd.f32 %v5098_v63, %v5097_v41  ;;  %v5091_v8 = vrot.slane %v5090_v53, 4  ;;  %v12007_v27 = vmul.f32 %v6814_v22, %v14880_v62  ;;  %v14906_v41 = vld [vmem:[#allocation86_spill] sm:$0xff]  ;;  %v14907_v62 = vld [vmem:[#allocation88_spill] sm:$0xff]  ;;  %v12018_v22 = vpop.eup %6821 }
 0x3c3   : > { %v5439_v23 = vadd.f32 %v5438_v36, %v5437_v30  ;;  %v5452_v21 = vrot.slane %v5451_v44, 2  ;;  %v5444_v3 = vadd.f32 %v5443_v17, %v5442_v59  ;;  %v12011_v49 = vadd.f32 %v14905_v2, %v4766_v34  ;;  %4433 = vmatpush1.bf16.msra.mxu0 %v14906_v41  ;;  %4470 = vmatpush1.bf16.msra.mxu1 %v11879_v54 }
 0x3c4   : > { %v5087_v56 = vadd.f32 %v5086_v45, %v5085_v52  ;;  %v5100_v61 = vrot.slane %v5099_v37, 2  ;;  %v5092_v14 = vadd.f32 %v5091_v8, %v5090_v53  ;;  %v5422_v30 = vmul.f32 %v12007_v27, %v4766_v34  ;;  %4434 = vmatprep.subr.bf16.mxu0 %v14907_v62  ;;  %4471 = vmatprep.subr.bf16.mxu1 %v11892_v42  ;;  %v12044_v62 = vld [vmem:[%s12898_s2] ss:$8 sps:$4 sm:$0xff]  }
 0x3c5   : > { %v5440_v63 = vrot.slane %v5439_v23, 1  ;;  %v5453_v13 = vadd.f32 %v5452_v21, %v5451_v44  ;;  %v5445_v57 = vrot.slane %v5444_v3, 2  ;;  %v5070_v36 = vmul.f32 %v12011_v49, %v12011_v49  ;;  %v14908_v21 = vld [vmem:[#allocation39_spill] sm:$0xff] }
 0x3c6   : > { %v5088_v52 = vrot.slane %v5087_v56, 1  ;;  %v5101_v59 = vadd.f32 %v5100_v61, %v5099_v37  ;;  %v5093_v46 = vrot.slane %v5092_v14, 2  ;;  %v5456_v44 = vsel %vm4618_vm3, %v5422_v30, 0.0 }
 0x3c7   : > { %v12022_v9 = vadd.f32 %v5440_v63, %v5439_v23  ;;  %v5454_v53 = vrot.slane %v5453_v13, 1  ;;  %v5446_v17 = vadd.f32 %v5445_v57, %v5444_v3  ;;  %v5104_v11 = vsel %vm4618_vm3, %v5070_v36, 0.0  ;;  %4435 = vmatpush1.bf16.msra.mxu0 %v14908_v21  ;;  %v14909_v57 = vld [vmem:[#allocation19_spill] sm:$0xff]  ;;  %4472 = vmatpush1.bf16.msra.mxu1 %v11888_v31 }
 0x3c8   : > { %v5089_v45 = vadd.f32 %v5088_v52, %v5087_v56  ;;  %v5102_v8 = vrot.slane %v5101_v59, 1  ;;  %v5094_v34 = vadd.f32 %v5093_v46, %v5092_v14  ;;  %v5105_v23 = vrot.slane %v5104_v11, 4  ;;  %4473 = vmatprep.subr.bf16.mxu1 %v11907_v5 }
 0x3c9   : > { %v5547_v37 = vmax.f32 %v12022_v9, 0.0  ;;  %v12029_v61 = vadd.f32 %v5454_v53, %v5453_v13  ;;  %v5447_v2 = vrot.slane %v5446_v17, 1  ;;  %v5457_v56 = vrot.slane %v5456_v44, 4 }
 0x3ca   : > { %v5195_v3 = vadd.f32 1e-08, %v5089_v45  ;;  %v5103_v41 = vadd.f32 %v5102_v8, %v5101_v59  ;;  %v5095_v63 = vrot.slane %v5094_v34, 1  ;;  %v4890_v13 = vrot.slane %v11994_v38, 1  ;;  %4437 = vmatmul.mubr.bf16.vlgmr.msra.gmra.mrb[12].mxu0 %v12044_v62 }
 0x3cb   : > { %v12035_v14 = vmul.f32 %v5547_v37, %v14909_v57  ;;  %v5549_v54 = vmax.f32 %v12029_v61, 0.0  ;;  %v12038_v30 = vadd.f32 %v5447_v2, %v5446_v17  ;;  %v5106_v59 = vadd.f32 %v5105_v23, %v5104_v11  ;;  %4474 = vmatpush1.bf16.msra.mxu1 %v11901_v28 }
 0x3cc   : > { %6823 = vrsqrt.f32 %v5195_v3  ;;  %v5197_v42 = vadd.f32 1e-08, %v5103_v41  ;;  %v5096_v52 = vadd.f32 %v5095_v63, %v5094_v34  ;;  %v5458_v53 = vadd.f32 %v5457_v56, %v5456_v44  ;;  %4475 = vmatprep.subr.bf16.mxu1 %v11979_v33 }
 0x3cd   : > { %v12051_v46 = vmul.f32 %v5549_v54, %v11925_v58  ;;  %v5548_v36 = vmax.f32 %v12038_v30, 0.0  ;;  %v4895_v17 = vrot.slane %v11953_v32, 2  ;;  %v12058_v45 = vmul.f32 %v11915_v4, %v11915_v4  ;;  %v14910_v58 = vld [vmem:[#allocation124_spill] sm:$0xff] }
 0x3ce   : > { %6825 = vrsqrt.f32 %v5197_v42  ;;  %v5196_v8 = vadd.f32 1e-08, %v5096_v52  ;;  %v5107_v34 = vrot.slane %v5106_v59, 2  ;;  %v12062_v31 = vmul.f32 %v11928_v7, %v11928_v7 }
 0x3cf   : > { %v12067_v11 = vmul.f32 %v5548_v36, %v14910_v58  ;;  %v5459_v44 = vrot.slane %v5458_v53, 2  ;;  %6827 = vrcp.f32 %v11867_v39  ;;  %v4891_v4 = vadd.f32 %v4890_v13, %v11994_v38  ;;  %4476 = vmatpush1.bf16.msra.mxu1 %v11913_v35 }
 0x3d0   : > { %6829 = vrsqrt.f32 %v5196_v8  ;;  %v5108_v5 = vadd.f32 %v5107_v34, %v5106_v59  ;;  %v12072_v21 = vadd.f32 1e-08, %v11985_v50  ;;  %v4896_v7 = vadd.f32 %v4895_v17, %v11953_v32 }
 0x3d1   : > { %v5460_v2 = vadd.f32 %v5459_v44, %v5458_v53  ;;  %v4525_v23 = vrot.slane %v11981_v1, %v14832_v24  ;;  %v14911_v3 = vrot.slane %v11918_v47, 4  ;;  %v12084_v38 = vmul.f32 %v11947_v12, %v11947_v12 }
 0x3d2   : > { %v5109_v50 = vrot.slane %v5108_v5, 1  ;;  %v4533_v28 = vrot.slane %v11997_v43, %v14832_v24  ;;  %v5301_v32 = vsel %vm4618_vm3, %v11963_v29, 0.0  ;;  %v4961_v57 = vadd.f32 1e-08, %v4891_v4  ;;  %v14912_v29 = vld [vmem:[#allocation61_spill] sm:$0xff] }
 0x3d3   : > { %v5289_v41 = vadd.f32 %v14911_v3, %v11918_v47  ;;  %v5461_v63 = vrot.slane %v5460_v2, 1  ;;  %v12091_v33 = vmul.f32 %v4525_v23, %v11686_v40  ;;  %v12094_v1 = vmul.f32 %v4525_v23, %v11703_v16  ;;  %4477 = vmatprep.subr.bf16.mxu1 %v14912_v29  ;;  %v14913_v23 = vld [vmem:[#allocation91_spill] sm:$0xff] }
 0x3d4   : > { %v5110_v47 = vadd.f32 %v5109_v50, %v5108_v5  ;;  %v12098_v12 = vmul.f32 %v4533_v28, %v11859_v48  ;;  %v12101_v43 = vmul.f32 %v4533_v28, %v11871_v6  ;;  %v5302_v59 = vrot.slane %v5301_v32, 4  ;;  %4478 = vmatpush1.bf16.msra.mxu1 %v14913_v23 }
 0x3d5   : > { %v5290_v56 = vrot.slane %v5289_v41, 2  ;;  %v12103_v13 = vadd.f32 %v5461_v63, %v5460_v2  ;;  %v4606_v42 = vmul.f32 %v12091_v33, %v12091_v33  ;;  %v12110_v35 = vmul.f32 %v12018_v22, %v11686_v40 }
 0x3d6   : > { %v6824_v53 = vpop.eup %6823  ;;  %v5198_v17 = vadd.f32 1e-08, %v5110_v47  ;;  %v4897_v8 = vrot.slane %v4896_v7, 1  ;;  %v4608_v34 = vmul.f32 %v12098_v12, %v12098_v12  ;;  %v5303_v40 = vadd.f32 %v5302_v59, %v5301_v32 }
 0x3d7   : > { %v5291_v52 = vadd.f32 %v5290_v56, %v5289_v41  ;;  %v5227_v58 = vmul.f32 %v6824_v53, %v11940_v51  ;;  %v5550_v44 = vmax.f32 %v12103_v13, 0.0  ;;  %v4647_v5 = vsel %vm4618_vm3, %v4606_v42, 0.0  ;;  %4480 = vmatmul.mubr.bf16.vlgmr.msra.gmra.mrb[12].mxu1 %v12044_v62 }
 0x3d8   : > { %v6826_v2 = vpop.eup %6825  ;;  %6831 = vrsqrt.f32 %v5198_v17  ;;  %v4648_v3 = vrot.slane %v4647_v5, 4  ;;  %v4661_v41 = vsel %vm4618_vm3, %v4608_v34, 0.0  ;;  %v12130_v63 = vmul.f32 %v11990_v10, %v11990_v10 }
 0x3d9   : > { %v5292_v4 = vrot.slane %v5291_v52, 1  ;;  %v12119_v22 = vpop.eup %6827  ;;  %v5563_v50 = vmul.f32 %v11932_v60, %v5227_v58  ;;  %v5229_v28 = vmul.f32 %v6826_v2, %v11957_v15  ;;  %v12126_v51 = vmul.f32 %v5550_v44, %v11814_v25 }
 0x3da   : > { %v6830_v56 = vpop.eup %6829  ;;  %6833 = vrsqrt.f32 %v4961_v57  ;;  %v4649_v47 = vadd.f32 %v4648_v3, %v4647_v5  ;;  %v4662_v32 = vrot.slane %v4661_v41, 4  ;;  %v5304_v59 = vrot.slane %v5303_v40, 2 }
 0x3db   : > { %v5293_v29 = vadd.f32 %v5292_v4, %v5291_v52  ;;  %v5579_v42 = vsel %vm4618_vm3, %v5563_v50, 0.0  ;;  %v5565_v60 = vmul.f32 %v11951_v19, %v5229_v28  ;;  %v5228_v15 = vmul.f32 %v6830_v56, %v11975_v18 }
 0x3dc   : > { %v5580_v25 = vrot.slane %v5579_v42, 4  ;;  %v5023_v53 = vrot.slane %v12110_v35, 3  ;;  %v4898_v17 = vadd.f32 %v4897_v8, %v4896_v7  ;;  %v4650_v10 = vrot.slane %v4649_v47, 2 }
 0x3dd   : > { %v5593_v34 = vsel %vm4618_vm3, %v5565_v60, 0.0  ;;  %v5564_v57 = vmul.f32 %v11968_v26, %v5228_v15  ;;  %v5375_v52 = vadd.f32 1e-08, %v5293_v29  ;;  %v4663_v58 = vadd.f32 %v4662_v32, %v4661_v41 }
 0x3de   : > { %v5581_v5 = vadd.f32 %v5580_v25, %v5579_v42  ;;  %v5594_v4 = vrot.slane %v5593_v34, 4  ;;  %6835 = vrsqrt.f32 %v12072_v21  ;;  %v4651_v19 = vadd.f32 %v4650_v10, %v4649_v47 }
 0x3df   : > { %v5586_v18 = vsel %vm4618_vm3, %v5564_v57, 0.0  ;;  %v4664_v62 = vrot.slane %v4663_v58, 2  ;;  %v5305_v2 = vadd.f32 %v5304_v59, %v5303_v40  ;;  %v4529_v23 = vrot.slane %v12002_v0, %v14832_v24 }
 0x3e0   : > { %v5582_v7 = vrot.slane %v5581_v5, 2  ;;  %v5595_v8 = vadd.f32 %v5594_v4, %v5593_v34  ;;  %v5587_v3 = vrot.slane %v5586_v18, 4  ;;  %v4652_v50 = vrot.slane %v4651_v19, 1 }
 0x3e1   : > { %v12143_v28 = vadd.f32 1e-08, %v4898_v17  ;;  %6837 = vrsqrt.f32 %v5375_v52  ;;  %v4665_v26 = vadd.f32 %v4664_v62, %v4663_v58  ;;  %v5306_v41 = vrot.slane %v5305_v2, 1 }
 0x3e2   : > { %v6832_v56 = vpop.eup %6831  ;;  %v5583_v29 = vadd.f32 %v5582_v7, %v5581_v5  ;;  %v5596_v21 = vrot.slane %v5595_v8, 2  ;;  %v5588_v47 = vadd.f32 %v5587_v3, %v5586_v18  ;;  %v4653_v32 = vadd.f32 %v4652_v50, %v4651_v19 }
 0x3e3   : > { %v5230_v42 = vmul.f32 %v6832_v56, %v12011_v49  ;;  %v4666_v40 = vrot.slane %v4665_v26, 1  ;;  %v5307_v60 = vadd.f32 %v5306_v41, %v5305_v2  ;;  %v12147_v0 = vmul.f32 %v4529_v23, %v11694_v55 }
 0x3e4   : > { %v6834_v15 = vpop.eup %6833  ;;  %v5584_v59 = vrot.slane %v5583_v29, 1  ;;  %v5597_v25 = vadd.f32 %v5596_v21, %v5595_v8  ;;  %v5589_v17 = vrot.slane %v5588_v47, 2  ;;  %v4735_v10 = vadd.f32 1e-08, %v4653_v32 }
 0x3e5   : > { %v5566_v34 = vmul.f32 %v12007_v27, %v5230_v42  ;;  %v4667_v57 = vadd.f32 %v4666_v40, %v4665_v26  ;;  %v5377_v52 = vadd.f32 1e-08, %v5307_v60  ;;  %v12151_v58 = vmul.f32 %v4529_v23, %v11732_v20  ;;  %v14916_v26 = vld [vmem:[#allocation40_spill] sm:$0xff] }
 0x3e6   : > { %v5585_v5 = vadd.f32 %v5584_v59, %v5583_v29  ;;  %v5598_v4 = vrot.slane %v5597_v25, 1  ;;  %v5590_v49 = vadd.f32 %v5589_v17, %v5588_v47  ;;  %6839 = vrsqrt.f32 %v4735_v10 }
 0x3e7   : > { %v5600_v19 = vsel %vm4618_vm3, %v5566_v34, 0.0  ;;  %v4737_v18 = vadd.f32 1e-08, %v4667_v57  ;;  %6841 = vrsqrt.f32 %v5377_v52  ;;  %v4607_v62 = vmul.f32 %v12147_v0, %v12147_v0  ;;  %v14921_v57 = vld [vmem:[#allocation155_spill] sm:$0xff] }
 0x3e8   : > { %v12156_v2 = vpop.eup %6835  ;;  %v5691_v7 = vmax.f32 %v5585_v5, 0.0  ;;  %v5599_v27 = vadd.f32 %v5598_v4, %v5597_v25  ;;  %v5591_v8 = vrot.slane %v5590_v49, 1  ;;  %v5601_v3 = vrot.slane %v5600_v19, 4 }
 0x3e9   : > { %vm12160_vm4 = vcmp.gt.f32.partialorder %v5547_v37, 0.0  ;;  %6843 = vrsqrt.f32 %v4737_v18  ;;  %v4654_v50 = vsel %vm4618_vm3, %v4607_v62, 0.0  ;;  %v5294_v41 = vsel %vm4618_vm3, %v14916_v26, 0.0 }
 0x3ea   : > { %v4537_v56 = vrot.slane %v12119_v22, %v14832_v24  ;;  %v5707_v29 = vmul.f32 %v5691_v7, %v5691_v7  ;;  %v5693_v21 = vmax.f32 %v5599_v27, 0.0  ;;  %v5592_v47 = vadd.f32 %v5591_v8, %v5590_v49 }
 0x3eb   : > { %v5602_v32 = vadd.f32 %v5601_v3, %v5600_v19  ;;  %v6838_v42 = vpop.eup %6837  ;;  %vm12171_vm5 = vcmp.gt.f32.partialorder %v5549_v54, 0.0  ;;  %v4993_v37 = vmul.f32 %v6834_v15, %v11859_v48  ;;  %v4655_v40 = vrot.slane %v4654_v50, 4 }
 0x3ec   : > { %v5295_v60 = vrot.slane %v5294_v41, 4  ;;  %v12177_v59 = vmul.f32 %v4537_v56, %v11867_v39  ;;  %v5723_v25 = vmul.f32 %v5707_v29, %v5707_v29  ;;  %v5709_v22 = vmul.f32 %v5693_v21, %v5693_v21 }
 0x3ed   : > { %v5692_v17 = vmax.f32 %v5592_v47, 0.0  ;;  %v5603_v10 = vrot.slane %v5602_v32, 2  ;;  %vm12181_vm6 = vcmp.gt.f32.partialorder %v5548_v36, 0.0  ;;  %v4656_v61 = vadd.f32 %v4655_v40, %v4654_v50 }
 0x3ee   : > { %v5296_v54 = vadd.f32 %v5295_v60, %v5294_v41  ;;  %v12186_v52 = vmul.f32 %v4537_v56, %v14921_v57  ;;  %v4609_v48 = vmul.f32 %v12177_v59, %v12177_v59  ;;  %v5739_v15 = vmul.f32 %v5723_v25, %v5723_v25 }
 0x3ef   : > { %v5725_v5 = vmul.f32 %v5709_v22, %v5709_v22  ;;  %v5708_v4 = vmul.f32 %v5692_v17, %v5692_v17  ;;  %v5604_v49 = vadd.f32 %v5603_v10, %v5602_v32  ;;  %v5025_v19 = vrot.slane %v4993_v37, 3 }
 0x3f0   : > { %v12191_v18 = vmul.f32 %v6838_v42, %v11703_v16  ;;  %v4657_v30 = vrot.slane %v4656_v61, 2  ;;  %v5297_v36 = vrot.slane %v5296_v54, 2  ;;  %v12193_v62 = vpop.eup %6839  ;;  %v5755_v7 = vmul.f32 %v5739_v15, %v5739_v15 }
 0x3f1   : > { %v5741_v27 = vmul.f32 %v5725_v5, %v5725_v5  ;;  %v5724_v8 = vmul.f32 %v5708_v4, %v5708_v4  ;;  %v5605_v3 = vrot.slane %v5604_v49, 1  ;;  %v6842_v50 = vpop.eup %6841  ;;  %v4767_v26 = vmul.f32 %v12193_v62, %v12091_v33 }
 0x3f2   : > { %v4658_v41 = vadd.f32 %v4657_v30, %v4656_v61  ;;  %v12198_v56 = vsel %vm4618_vm3, %v4609_v48, 0.0  ;;  %v12202_v16 = vmul.f32 %v14921_v57, %v14921_v57  ;;  %v5771_v29 = vmul.f32 %v5755_v7, %v5755_v7 }
 0x3f3   : > { %v5757_v21 = vmul.f32 %v5741_v27, %v5741_v27  ;;  %v5740_v47 = vmul.f32 %v5724_v8, %v5724_v8  ;;  %v5606_v32 = vadd.f32 %v5605_v3, %v5604_v49  ;;  %v12204_v42 = vpop.eup %6843  ;;  %v12208_v37 = vadd.f32 %v5023_v53, %v4767_v26 }
 0x3f4   : > { %v5423_v33 = vmul.f32 %v12191_v18, %v4767_v26  ;;  %v12212_v40 = vmul.f32 %v6842_v50, %v11871_v6  ;;  %v4659_v60 = vrot.slane %v4658_v41, 1  ;;  %v5803_v25 = vsel %vm12160_vm4, %v5771_v29, 0.0 }
 0x3f5   : > { %v5773_v22 = vmul.f32 %v5757_v21, %v5757_v21  ;;  %v5756_v17 = vmul.f32 %v5740_v47, %v5740_v47  ;;  %v5694_v10 = vmax.f32 %v5606_v32, 0.0  ;;  %v5835_v61 = vadd.f32 %v12035_v14, %v5803_v25 }
 0x3f6   : > { %vm12219_vm8 = vcmp.gt.f32.partialorder %v5550_v44, 0.0  ;;  %v5071_v53 = vmul.f32 %v12208_v37, %v12208_v37  ;;  %v5463_v6 = vsel %vm4618_vm3, %v5423_v33, 0.0  ;;  %v4769_v23 = vmul.f32 %v12204_v42, %v12098_v12 }
 0x3f7   : > { %v5805_v48 = vsel %vm12171_vm5, %v5773_v22, 0.0  ;;  %v5772_v15 = vmul.f32 %v5756_v17, %v5756_v17  ;;  %v5710_v14 = vmul.f32 %v5694_v10, %v5694_v10  ;;  %v5464_v5 = vrot.slane %v5463_v6, 4 }
 0x3f8   : > { %v5867_v13 = vmul.f32 %v12058_v45, %v5835_v61  ;;  %v5837_v44 = vadd.f32 %v12051_v46, %v5805_v48  ;;  %v5111_v4 = vsel %vm4618_vm3, %v5071_v53, 0.0  ;;  %v12233_v49 = vadd.f32 %v5025_v19, %v4769_v23 }
 0x3f9   : > { %v5804_v30 = vsel %vm12181_vm6, %v5772_v15, 0.0  ;;  %v5726_v7 = vmul.f32 %v5710_v14, %v5710_v14  ;;  %v5112_v12 = vrot.slane %v5111_v4, 4  ;;  %v5465_v27 = vadd.f32 %v5464_v5, %v5463_v6 }
 0x3fa   : > { %v5869_v9 = vmul.f32 %v12062_v31, %v5837_v44  ;;  %v5836_v8 = vadd.f32 %v12067_v11, %v5804_v30  ;;  %v5073_v45 = vmul.f32 %v12233_v49, %v12233_v49  ;;  %v5425_v46 = vmul.f32 %v12212_v40, %v4769_v23 }
 0x3fb   : > { %v5742_v3 = vmul.f32 %v5726_v7, %v5726_v7  ;;  %v5113_v19 = vadd.f32 %v5112_v12, %v5111_v4  ;;  %v5466_v50 = vrot.slane %v5465_v27, 2  ;;  %v5298_v26 = vadd.f32 %v5297_v36, %v5296_v54 }
 0x3fc   : > { %v5868_v34 = vmul.f32 %v12084_v38, %v5836_v8  ;;  %v5125_v29 = vsel %vm4618_vm3, %v5073_v45, 0.0  ;;  %v5477_v21 = vsel %vm4618_vm3, %v5425_v46, 0.0  ;;  %v4660_v47 = vadd.f32 %v4659_v60, %v4658_v41 }
 0x3fd   : > { %v5758_v31 = vmul.f32 %v5742_v3, %v5742_v3  ;;  %v5114_v11 = vrot.slane %v5113_v19, 2  ;;  %v5467_v32 = vadd.f32 %v5466_v50, %v5465_v27  ;;  %v5126_v33 = vrot.slane %v5125_v29, 4 }
 0x3fe   : > { %v5899_v25 = vcombine.low %v5867_v13, %v5868_v34  ;;  %v5900_v22 = vcombine.high %v5867_v13, %v5868_v34  ;;  %v5478_v17 = vrot.slane %v5477_v21, 4  ;;  %v4736_v10 = vadd.f32 1e-08, %v4660_v47 }
 0x3ff   : > { %v5774_v38 = vmul.f32 %v5758_v31, %v5758_v31  ;;  %v5115_v36 = vadd.f32 %v5114_v11, %v5113_v19  ;;  %v5468_v61 = vrot.slane %v5467_v32, 1  ;;  %v5127_v41 = vadd.f32 %v5126_v33, %v5125_v29 }
 0x400   : > { %v6192_v60 = vrot.slane %v5899_v25, 11  ;;  %v5919_v53 = vrot.slane %v5900_v22, 7  ;;  %v5479_v6 = vadd.f32 %v5478_v17, %v5477_v21  ;;  %6845 = vrsqrt.f32 %v4736_v10 }
 0x401   : > { %v5806_v23 = vsel %vm12219_vm8, %v5774_v38, 0.0  ;;  %v5116_v48 = vrot.slane %v5115_v36, 1  ;;  %v12256_v15 = vadd.f32 %v5468_v61, %v5467_v32  ;;  %v5128_v14 = vrot.slane %v5127_v41, 2 }
 0x402   : > { %v5920_v5 = vsel %vm12250_vm9, %v6192_v60, %v5919_v53  ;;  %v5838_v13 = vadd.f32 %v12126_v51, %v5806_v23  ;;  %v5480_v44 = vrot.slane %v5479_v6, 2  ;;  %v5299_v4 = vrot.slane %v5298_v26, 1 }
 0x403   : > { %5957 = vst [vmem:[%s12261_s24] sm:$0x77] %v5920_v5  ;;  %v5117_v30 = vadd.f32 %v5116_v48, %v5115_v36  ;;  %v5551_v7 = vmax.f32 %v12256_v15, 0.0  ;;  %v5129_v35 = vadd.f32 %v5128_v14, %v5127_v41  ;;  %v4669_v12 = vrot.slane %v12198_v56, 4 }
 0x404   : > { %v5870_v27 = vmul.f32 %v12130_v63, %v5838_v13  ;;  %v5481_v8 = vadd.f32 %v5480_v44, %v5479_v6  ;;  %v5300_v45 = vadd.f32 %v5299_v4, %v5298_v26  ;;  %v5308_v46 = vsel %vm4618_vm3, %v12202_v16, 0.0 }
 0x405   : > { %v4992_v51 = vmul.f32 %v12156_v2, %v11694_v55  ;;  %v5199_v3 = vadd.f32 1e-08, %v5117_v30  ;;  %v12274_v19 = vmul.f32 %v5551_v7, %v12094_v1  ;;  %v5130_v50 = vrot.slane %v5129_v35, 1 }
 0x406   : > { %v5901_v34 = vcombine.low %v5869_v9, %v5870_v27  ;;  %v5902_v29 = vcombine.high %v5869_v9, %v5870_v27  ;;  %v5482_v21 = vrot.slane %v5481_v8, 1  ;;  %v5376_v47 = vadd.f32 1e-08, %v5300_v45 }
 0x407   : > { %6847 = vrsqrt.f32 %v5199_v3  ;;  %v5131_v63 = vadd.f32 %v5130_v50, %v5129_v35  ;;  %v4670_v26 = vadd.f32 %v4669_v12, %v12198_v56  ;;  %v5309_v16 = vrot.slane %v5308_v46, 4 }
 0x408   : > { %v6193_v31 = vrot.slane %v5901_v34, 11  ;;  %v5923_v11 = vrot.slane %v5902_v29, 7  ;;  %v12277_v55 = vadd.f32 %v5482_v21, %v5481_v8  ;;  %6849 = vrsqrt.f32 %v5376_v47 }
 0x409   : > { %v5024_v2 = vrot.slane %v4992_v51, 3  ;;  %v5201_v32 = vadd.f32 1e-08, %v5131_v63  ;;  %v4671_v1 = vrot.slane %v4670_v26, 2  ;;  %v5310_v33 = vadd.f32 %v5309_v16, %v5308_v46 }
 0x40a   : > { %v12279_v25 = vpop.eup %6845  ;;  %v5924_v9 = vsel %vm12250_vm9, %v6193_v31, %v5923_v11  ;;  %6851 = vrsqrt.f32 %v12143_v28  ;;  %v5553_v22 = vmax.f32 %v12277_v55, 0.0  ;;  %vm12352_vm10 = vcmp.gt.f32.partialorder %v5551_v7, 0.0 }
 0x40b   : > { %5958 = vst [vmem:[%s12261_s24 + $0x8] sm:$0x77] %v5924_v9  ;;  %6853 = vrsqrt.f32 %v5201_v32  ;;  %v4768_v56 = vmul.f32 %v12279_v25, %v12147_v0  ;;  %v4672_v17 = vadd.f32 %v4671_v1, %v4670_v26  ;;  %v5311_v38 = vrot.slane %v5310_v33, 2 }
 0x40c   : > { %v12291_v10 = vmul.f32 %v5553_v22, %v12101_v43  ;;  %vm12377_vm11 = vcmp.gt.f32.partialorder %v5553_v22, 0.0 }
 0x40d   : > { %v12293_v36 = vadd.f32 %v5024_v2, %v4768_v56  ;;  %v4673_v61 = vrot.slane %v4672_v17, 1  ;;  %v5312_v41 = vadd.f32 %v5311_v38, %v5310_v33 }
 0x40e   : > { %v12310_v11 = vpop.f32.mrb[8].mxu0 }
 0x40f   : > { %v5072_v28 = vmul.f32 %v12293_v36, %v12293_v36  ;;  %v4674_v60 = vadd.f32 %v4673_v61, %v4672_v17  ;;  %v5313_v53 = vrot.slane %v5312_v41, 1  ;;  %v12317_v1 = vpop.f32.mrb[9].mxu0  ;;  %v12325_v61 = vmul.f32 %v12193_v62, %v12193_v62 }
 0x410   : > { %v12321_v17 = vpop.f32.mrb[10].mxu0 }
 0x411   : > { %v6848_v6 = vpop.eup %6847  ;;  %v5118_v23 = vsel %vm4618_vm3, %v5072_v28, 0.0  ;;  %v4738_v0 = vadd.f32 1e-08, %v4674_v60  ;;  %v5314_v43 = vadd.f32 %v5313_v53, %v5312_v41  ;;  %v12327_v60 = vpop.f32.mrb[11].mxu0 }
 0x412   : > { %v6850_v48 = vpop.eup %6849  ;;  %v5231_v14 = vmul.f32 %v6848_v6, %v12208_v37  ;;  %v5119_v5 = vrot.slane %v5118_v23, 4 }
 0x413   : > { %v12300_v13 = vmul.f32 %v6850_v48, %v11732_v20  ;;  %6855 = vrsqrt.f32 %v4738_v0  ;;  %v5378_v35 = vadd.f32 1e-08, %v5314_v43  ;;  %v4788_v0 = vmul.f32 %v12317_v1, %v12317_v1 }
 0x414   : > { %v6852_v44 = vpop.eup %6851  ;;  %v5567_v4 = vmul.f32 %v12191_v18, %v5231_v14  ;;  %v5120_v30 = vadd.f32 %v5119_v5, %v5118_v23 }
 0x415   : > { %v6854_v12 = vpop.eup %6853  ;;  %v5424_v27 = vmul.f32 %v12300_v13, %v4768_v56  ;;  %6857 = vrsqrt.f32 %v5378_v35  ;;  %v4994_v20 = vmul.f32 %v6852_v44, %v11867_v39 }
 0x416   : > { %v5607_v8 = vsel %vm4618_vm3, %v5567_v4, 0.0  ;;  %v5233_v45 = vmul.f32 %v6854_v12, %v12233_v49  ;;  %v5121_v46 = vrot.slane %v5120_v30, 2  ;;  %6859 = vrcp.f32 %v12310_v11 }
 0x417   : > { %v5608_v37 = vrot.slane %v5607_v8, 4  ;;  %v5470_v51 = vsel %vm4618_vm3, %v5424_v27, 0.0  ;;  %v5026_v16 = vrot.slane %v4994_v20, 3  ;;  %v4820_v4 = vrot.slane %v4788_v0, 3 }
 0x418   : > { %v5569_v3 = vmul.f32 %v12212_v40, %v5233_v45  ;;  %v5122_v50 = vadd.f32 %v5121_v46, %v5120_v30  ;;  %v5471_v18 = vrot.slane %v5470_v51, 4  ;;  %v4787_v40 = vmul.f32 %v12310_v11, %v12310_v11 }
 0x419   : > { %v5609_v34 = vadd.f32 %v5608_v37, %v5607_v8  ;;  %v12343_v12 = vmul.f32 %v12204_v42, %v12204_v42  ;;  %v4906_v46 = vsel %vm4618_vm3, %v4820_v4, 0.0 }
 0x41a   : > { %v5621_v29 = vsel %vm4618_vm3, %v5569_v3, 0.0  ;;  %v5123_v21 = vrot.slane %v5122_v50, 1  ;;  %v5472_v47 = vadd.f32 %v5471_v18, %v5470_v51  ;;  %v4819_v28 = vrot.slane %v4787_v40, 3 }
 0x41b   : > { %v5610_v63 = vrot.slane %v5609_v34, 2  ;;  %v5622_v26 = vrot.slane %v5621_v29, 4  ;;  %v4907_v15 = vrot.slane %v4906_v46, 4 }
 0x41c   : > { %v5124_v49 = vadd.f32 %v5123_v21, %v5122_v50  ;;  %v5473_v31 = vrot.slane %v5472_v47, 2  ;;  %v4899_v62 = vsel %vm4618_vm3, %v4819_v28, 0.0 }
 0x41d   : > { %v12312_v2 = vpop.eup %6855  ;;  %v5611_v32 = vadd.f32 %v5610_v63, %v5609_v34  ;;  %v5623_v39 = vadd.f32 %v5622_v26, %v5621_v29  ;;  %v4900_v44 = vrot.slane %v4899_v62, 4 }
 0x41e   : > { %v5200_v33 = vadd.f32 1e-08, %v5124_v49  ;;  %v5474_v9 = vadd.f32 %v5473_v31, %v5472_v47  ;;  %v4770_v56 = vmul.f32 %v12312_v2, %v12177_v59 }
 0x41f   : > { %v5612_v38 = vrot.slane %v5611_v32, 1  ;;  %v5624_v41 = vrot.slane %v5623_v39, 2  ;;  %v6858_v53 = vpop.eup %6857  ;;  %v4901_v45 = vadd.f32 %v4900_v44, %v4899_v62 }
 0x420   : > { %6861 = vrsqrt.f32 %v5200_v33  ;;  %v5475_v6 = vrot.slane %v5474_v9, 1  ;;  %v12329_v23 = vadd.f32 %v5026_v16, %v4770_v56  ;;  %v12334_v14 = vmul.f32 %v6858_v53, %v14921_v57  ;;  %v6860_v29 = vpop.eup %6859 }
 0x421   : > { %v5613_v59 = vadd.f32 %v5612_v38, %v5611_v32  ;;  %v5625_v48 = vadd.f32 %v5624_v41, %v5623_v39  ;;  %v4902_v34 = vrot.slane %v4901_v45, 2  ;;  %6863 = vrcp.f32 %v12317_v1 }
 0x422   : > { %v12337_v5 = vadd.f32 %v5475_v6, %v5474_v9  ;;  %v5074_v43 = vmul.f32 %v12329_v23, %v12329_v23  ;;  %v5426_v27 = vmul.f32 %v12334_v14, %v4770_v56  ;;  %v4541_v7 = vrot.slane %v6860_v29, %v14832_v24 }
 0x423   : > { %v5695_v30 = vmax.f32 %v5613_v59, 0.0  ;;  %v5626_v35 = vrot.slane %v5625_v48, 1  ;;  %v4903_v16 = vadd.f32 %v4902_v34, %v4901_v45  ;;  %v4908_v59 = vadd.f32 %v4907_v15, %v4906_v46 }
 0x424   : > { %v5552_v57 = vmax.f32 %v12337_v5, 0.0  ;;  %v5132_v8 = vsel %vm4618_vm3, %v5074_v43, 0.0  ;;  %v5484_v3 = vsel %vm4618_vm3, %v5426_v27, 0.0  ;;  %v12366_v9 = vmul.f32 %v4541_v7, %v12310_v11 }
 0x425   : > { %v5711_v37 = vmul.f32 %v5695_v30, %v5695_v30  ;;  %v5627_v51 = vadd.f32 %v5626_v35, %v5625_v48  ;;  %v5133_v20 = vrot.slane %v5132_v8, 4  ;;  %v5485_v18 = vrot.slane %v5484_v3, 4 }
 0x426   : > { %v12359_v42 = vmul.f32 %v5552_v57, %v12151_v58  ;;  %v5251_v58 = vmul.f32 %v12321_v17, %v12321_v17  ;;  %v4904_v33 = vrot.slane %v4903_v16, 1  ;;  %v12369_v56 = vmul.f32 %v4541_v7, %v12321_v17 }
 0x427   : > { %v5727_v21 = vmul.f32 %v5711_v37, %v5711_v37  ;;  %v5697_v47 = vmax.f32 %v5627_v51, 0.0  ;;  %v5134_v63 = vadd.f32 %v5133_v20, %v5132_v8  ;;  %v5486_v26 = vadd.f32 %v5485_v18, %v5484_v3 }
 0x428   : > { %v4905_v0 = vadd.f32 %v4904_v33, %v4903_v16  ;;  %v4610_v48 = vmul.f32 %v12366_v9, %v12366_v9  ;;  %v5315_v27 = vsel %vm4618_vm3, %v5251_v58, 0.0  ;;  %v4909_v22 = vrot.slane %v4908_v59, 2 }
 0x429   : > { %v5743_v49 = vmul.f32 %v5727_v21, %v5727_v21  ;;  %v5713_v31 = vmul.f32 %v5697_v47, %v5697_v47  ;;  %v5135_v32 = vrot.slane %v5134_v63, 2  ;;  %v5487_v40 = vrot.slane %v5486_v26, 2 }
 0x42a   : > { %v6862_v39 = vpop.eup %6861  ;;  %v4963_v34 = vadd.f32 1e-08, %v4905_v0  ;;  %vm12445_vm12 = vcmp.gt.f32.partialorder %v5552_v57, 0.0 }
 0x42b   : > { %v5759_v38 = vmul.f32 %v5743_v49, %v5743_v49  ;;  %v5729_v41 = vmul.f32 %v5713_v31, %v5713_v31  ;;  %v5232_v28 = vmul.f32 %v6862_v39, %v12293_v36  ;;  %v5136_v53 = vadd.f32 %v5135_v32, %v5134_v63  ;;  %v6864_v20 = vpop.eup %6863 }
 0x42c   : > { %v5488_v6 = vadd.f32 %v5487_v40, %v5486_v26  ;;  %v4675_v36 = vsel %vm4618_vm3, %v4610_v48, 0.0  ;;  %v5316_v63 = vrot.slane %v5315_v27, 4  ;;  %v4910_v49 = vadd.f32 %v4909_v22, %v4908_v59 }
 0x42d   : > { %v5775_v62 = vmul.f32 %v5759_v38, %v5759_v38  ;;  %v5745_v43 = vmul.f32 %v5729_v41, %v5729_v41  ;;  %v5568_v44 = vmul.f32 %v12300_v13, %v5232_v28  ;;  %v5137_v4 = vrot.slane %v5136_v53, 1 }
 0x42e   : > { %v5489_v35 = vrot.slane %v5488_v6, 1  ;;  %v4676_v29 = vrot.slane %v4675_v36, 4  ;;  %v5317_v31 = vadd.f32 %v5316_v63, %v5315_v27  ;;  %v4545_v32 = vrot.slane %v6864_v20, %v14832_v24  ;;  %v12417_v59 = vpop.f32.mrb[8].mxu1 }
 0x42f   : > { %v5807_v8 = vsel %vm12352_vm10, %v5775_v62, 0.0  ;;  %v5761_v45 = vmul.f32 %v5745_v43, %v5745_v43  ;;  %v5614_v46 = vsel %vm4618_vm3, %v5568_v44, 0.0  ;;  %v5138_v37 = vadd.f32 %v5137_v4, %v5136_v53  ;;  %v12423_v43 = vpop.f32.mrb[9].mxu1 }
 0x430   : > { %v5839_v13 = vadd.f32 %v12274_v19, %v5807_v8  ;;  %v5615_v51 = vrot.slane %v5614_v46, 4  ;;  %v12387_v55 = vadd.f32 %v5489_v35, %v5488_v6  ;;  %v4677_v19 = vadd.f32 %v4676_v29, %v4675_v36  ;;  %v12429_v27 = vpop.f32.mrb[10].mxu1 }
 0x431   : > { %v5777_v3 = vmul.f32 %v5761_v45, %v5761_v45  ;;  %v5202_v18 = vadd.f32 1e-08, %v5138_v37  ;;  %v5252_v40 = vmul.f32 %v12327_v60, %v12327_v60  ;;  %v5318_v33 = vrot.slane %v5317_v31, 2 }
 0x432   : > { %v12390_v21 = vmul.f32 %v12325_v61, %v5839_v13  ;;  %v5616_v50 = vadd.f32 %v5615_v51, %v5614_v46  ;;  %v5554_v47 = vmax.f32 %v12387_v55, 0.0  ;;  %v4678_v61 = vrot.slane %v4677_v19, 2  ;;  %v12433_v51 = vpop.f32.mrb[11].mxu1 }
 0x433   : > { %v5809_v26 = vsel %vm12377_vm11, %v5777_v3, 0.0  ;;  %6865 = vrsqrt.f32 %v5202_v18  ;;  %v12408_v38 = vmul.f32 %v4545_v32, %v12317_v1  ;;  %v4911_v41 = vrot.slane %v4910_v49, 1 }
 0x434   : > { %v5841_v16 = vadd.f32 %v12291_v10, %v5809_v26  ;;  %v5617_v15 = vrot.slane %v5616_v50, 2  ;;  %v12399_v7 = vmul.f32 %v5554_v47, %v12186_v52  ;;  %6867 = vrsqrt.f32 %v4963_v34 }
 0x435   : > { %v4679_v10 = vadd.f32 %v4678_v61, %v4677_v19  ;;  %v12411_v28 = vmul.f32 %v4545_v32, %v12327_v60  ;;  %v5319_v6 = vadd.f32 %v5318_v33, %v5317_v31  ;;  %v5322_v48 = vsel %vm4618_vm3, %v5252_v40, 0.0 }
 0x436   : > { %v12403_v58 = vmul.f32 %v12343_v12, %v5841_v16  ;;  %v5618_v39 = vadd.f32 %v5617_v15, %v5616_v50  ;;  %v12415_v12 = vmul.f32 %v12279_v25, %v12279_v25  ;;  %6869 = vrcp.f32 %v12417_v59 }
 0x437   : > { %v4680_v53 = vrot.slane %v4679_v10, 1  ;;  %v4789_v62 = vmul.f32 %v12417_v59, %v12417_v59  ;;  %v4611_v4 = vmul.f32 %v12408_v38, %v12408_v38  ;;  %v4912_v35 = vadd.f32 %v4911_v41, %v4910_v49 }
 0x438   : > { %v5619_v52 = vrot.slane %v5618_v39, 1  ;;  %v4790_v25 = vmul.f32 %v12423_v43, %v12423_v43  ;;  %v5320_v36 = vrot.slane %v5319_v6, 1  ;;  %v5253_v37 = vmul.f32 %v12429_v27, %v12429_v27 }
 0x439   : > { %v4681_v44 = vadd.f32 %v4680_v53, %v4679_v10  ;;  %v4821_v45 = vrot.slane %v4789_v62, 3  ;;  %v5323_v13 = vrot.slane %v5322_v48, 4  ;;  %v4682_v63 = vsel %vm4618_vm3, %v4611_v4, 0.0 }
 0x43a   : > { %v5620_v0 = vadd.f32 %v5619_v52, %v5618_v39  ;;  %v4822_v3 = vrot.slane %v4790_v25, 3  ;;  %v5321_v18 = vadd.f32 %v5320_v36, %v5319_v6  ;;  %v5329_v50 = vsel %vm4618_vm3, %v5253_v37, 0.0 }
 0x43b   : > { %v4739_v46 = vadd.f32 1e-08, %v4681_v44  ;;  %v4913_v29 = vsel %vm4618_vm3, %v4821_v45, 0.0  ;;  %v5330_v31 = vrot.slane %v5329_v50, 4  ;;  %v4964_v6 = vadd.f32 1e-08, %v4912_v35 }
 0x43c   : > { %v5696_v30 = vmax.f32 %v5620_v0, 0.0  ;;  %v4914_v16 = vrot.slane %v4913_v29, 4  ;;  %v4920_v15 = vsel %vm4618_vm3, %v4822_v3, 0.0  ;;  %v5379_v61 = vadd.f32 1e-08, %v5321_v18 }
 0x43d   : > { %v6866_v8 = vpop.eup %6865  ;;  %6871 = vrsqrt.f32 %v4739_v46  ;;  %v4921_v49 = vrot.slane %v4920_v15, 4  ;;  %v5331_v41 = vadd.f32 %v5330_v31, %v5329_v50  ;;  %v5324_v57 = vadd.f32 %v5323_v13, %v5322_v48 }
 0x43e   : > { %v5712_v22 = vmul.f32 %v5696_v30, %v5696_v30  ;;  %v5234_v20 = vmul.f32 %v6866_v8, %v12329_v23  ;;  %v6868_v34 = vpop.eup %6867  ;;  %v4683_v23 = vrot.slane %v4682_v63, 4  ;;  %v4915_v10 = vadd.f32 %v4914_v16, %v4913_v29 }
 0x43f   : > { %v4995_v40 = vmul.f32 %v6868_v34, %v12310_v11  ;;  %v4922_v52 = vadd.f32 %v4921_v49, %v4920_v15  ;;  %6873 = vrsqrt.f32 %v5379_v61  ;;  %v5332_v4 = vrot.slane %v5331_v41, 2 }
 0x440   : > { %v5728_v26 = vmul.f32 %v5712_v22, %v5712_v22  ;;  %v5570_v19 = vmul.f32 %v12334_v14, %v5234_v20  ;;  %v4916_v0 = vrot.slane %v4915_v10, 2  ;;  %v6870_v62 = vpop.eup %6869  ;;  %6875 = vrcp.f32 %v12423_v43 }
 0x441   : > { %v4684_v11 = vadd.f32 %v4683_v23, %v4682_v63  ;;  %v5027_v25 = vrot.slane %v4995_v40, 3  ;;  %v4549_v8 = vrot.slane %v6870_v62, %v14832_v24  ;;  %v4923_v46 = vrot.slane %v4922_v52, 2 }
 0x442   : > { %v5744_v32 = vmul.f32 %v5728_v26, %v5728_v26  ;;  %v5628_v39 = vsel %vm4618_vm3, %v5570_v19, 0.0  ;;  %v4917_v36 = vadd.f32 %v4916_v0, %v4915_v10  ;;  %v5333_v5 = vadd.f32 %v5332_v4, %v5331_v41 }
 0x443   : > { %v5629_v33 = vrot.slane %v5628_v39, 4  ;;  %v12454_v22 = vmul.f32 %v4549_v8, %v12417_v59  ;;  %v12457_v20 = vmul.f32 %v4549_v8, %v12429_v27  ;;  %v12464_v29 = vmul.f32 %v12312_v2, %v12312_v2 }
 0x444   : > { %v5760_v53 = vmul.f32 %v5744_v32, %v5744_v32  ;;  %v4918_v35 = vrot.slane %v4917_v36, 1  ;;  %v4685_v48 = vrot.slane %v4684_v11, 2  ;;  %v5334_v26 = vrot.slane %v5333_v5, 1 }
 0x445   : > { %v5630_v44 = vadd.f32 %v5629_v33, %v5628_v39  ;;  %v4612_v63 = vmul.f32 %v12454_v22, %v12454_v22  ;;  %6877 = vrsqrt.f32 %v4964_v6  ;;  %v12471_v15 = vadd.f32 %v4923_v46, %v4922_v52 }
 0x446   : > { %v5776_v30 = vmul.f32 %v5760_v53, %v5760_v53  ;;  %v4919_v13 = vadd.f32 %v4918_v35, %v4917_v36  ;;  %v5325_v61 = vrot.slane %v5324_v57, 2  ;;  %v4686_v39 = vadd.f32 %v4685_v48, %v4684_v11 }
 0x447   : > { %v5631_v45 = vrot.slane %v5630_v44, 2  ;;  %v12459_v3 = vpop.eup %6871  ;;  %v4689_v2 = vsel %vm4618_vm3, %v4612_v63, 0.0  ;;  %v5335_v33 = vadd.f32 %v5334_v26, %v5333_v5  ;;  %v4925_v6 = vrot.slane %v12471_v15, 1 }
 0x448   : > { %v5808_v37 = vsel %vm12445_vm12, %v5776_v30, 0.0  ;;  %v4771_v50 = vmul.f32 %v12459_v3, %v12366_v9  ;;  %v4690_v10 = vrot.slane %v4689_v2, 4  ;;  %vm12486_vm13 = vcmp.gt.f32.partialorder %v5554_v47, 0.0 }
 0x449   : > { %v5840_v18 = vadd.f32 %v12359_v42, %v5808_v37  ;;  %v5632_v34 = vadd.f32 %v5631_v45, %v5630_v44  ;;  %v4965_v42 = vadd.f32 1e-08, %v4919_v13  ;;  %v6874_v31 = vpop.eup %6873  ;;  %v4687_v30 = vrot.slane %v4686_v39, 1 }
 0x44a   : > { %v12473_v49 = vadd.f32 %v5027_v25, %v4771_v50  ;;  %v12481_v40 = vmul.f32 %v6874_v31, %v12321_v17  ;;  %v6876_v52 = vpop.eup %6875  ;;  %v4691_v62 = vadd.f32 %v4690_v10, %v4689_v2  ;;  %v5381_v47 = vadd.f32 1e-08, %v5335_v33 }
 0x44b   : > { %v5872_v19 = vmul.f32 %v12415_v12, %v5840_v18  ;;  %v5633_v16 = vrot.slane %v5632_v34, 1  ;;  %6879 = vrsqrt.f32 %v4965_v42  ;;  %v5326_v36 = vadd.f32 %v5325_v61, %v5324_v57 }
 0x44c   : > { %v5075_v12 = vmul.f32 %v12473_v49, %v12473_v49  ;;  %v5427_v17 = vmul.f32 %v12481_v40, %v4771_v50  ;;  %v4692_v55 = vrot.slane %v4691_v62, 2  ;;  %v4688_v5 = vadd.f32 %v4687_v30, %v4686_v39 }
 0x44d   : > { %v5903_v23 = vcombine.low %v12390_v21, %v5872_v19  ;;  %v5904_v9 = vcombine.high %v12390_v21, %v5872_v19  ;;  %v5634_v32 = vadd.f32 %v5633_v16, %v5632_v34  ;;  %v5327_v35 = vrot.slane %v5326_v36, 1 }
 0x44e   : > { %v5139_v0 = vsel %vm4618_vm3, %v5075_v12, 0.0  ;;  %v5491_v25 = vsel %vm4618_vm3, %v5427_v17, 0.0  ;;  %v4693_v37 = vadd.f32 %v4692_v55, %v4691_v62  ;;  %v4553_v18 = vrot.slane %v6876_v52, %v14832_v24 }
 0x44f   : > { %v6194_v41 = vrot.slane %v5903_v23, 11  ;;  %v5927_v53 = vrot.slane %v5904_v9, 7  ;;  %v5698_v14 = vmax.f32 %v5634_v32, 0.0  ;;  %v5140_v11 = vrot.slane %v5139_v0, 4  ;;  %v6878_v48 = vpop.eup %6877 }
 0x450   : > { %v5492_v46 = vrot.slane %v5491_v25, 4  ;;  %v5254_v34 = vmul.f32 %v12433_v51, %v12433_v51  ;;  %v4740_v26 = vadd.f32 1e-08, %v4688_v5  ;;  %v4694_v19 = vrot.slane %v4693_v37, 1 }
 0x451   : > { %v5928_v44 = vsel %vm12250_vm9, %v6194_v41, %v5927_v53  ;;  %v5714_v4 = vmul.f32 %v5698_v14, %v5698_v14  ;;  %v5141_v45 = vadd.f32 %v5140_v11, %v5139_v0  ;;  %v5328_v16 = vadd.f32 %v5327_v35, %v5326_v36 }
 0x452   : > { %5959 = vst [vmem:[%s12261_s24 + $0x10] sm:$0x77] %v5928_v44  ;;  %v5493_v63 = vadd.f32 %v5492_v46, %v5491_v25  ;;  %v12500_v57 = vmul.f32 %v4553_v18, %v12423_v43  ;;  %v12503_v42 = vmul.f32 %v4553_v18, %v12433_v51  ;;  %6881 = vrsqrt.f32 %v4740_v26 }
 0x453   : > { %v5730_v8 = vmul.f32 %v5714_v4, %v5714_v4  ;;  %v5142_v50 = vrot.slane %v5141_v45, 2  ;;  %v4695_v23 = vadd.f32 %v4694_v19, %v4693_v37  ;;  %6883 = vrsqrt.f32 %v5381_v47 }
 0x454   : > { %v5494_v31 = vrot.slane %v5493_v63, 2  ;;  %v5380_v9 = vadd.f32 1e-08, %v5328_v16  ;;  %v4613_v32 = vmul.f32 %v12500_v57, %v12500_v57  ;;  %v4996_v12 = vmul.f32 %v6878_v48, %v12317_v1 }
 0x455   : > { %v5746_v13 = vmul.f32 %v5730_v8, %v5730_v8  ;;  %v5143_v61 = vadd.f32 %v5142_v50, %v5141_v45  ;;  %v6880_v52 = vpop.eup %6879  ;;  %v4741_v41 = vadd.f32 1e-08, %v4695_v23  ;;  %v5336_v14 = vsel %vm4618_vm3, %v5254_v34, 0.0 }
 0x456   : > { %v5495_v33 = vadd.f32 %v5494_v31, %v5493_v63  ;;  %6885 = vrsqrt.f32 %v5380_v9  ;;  %v4696_v53 = vsel %vm4618_vm3, %v4613_v32, 0.0  ;;  %v4926_v17 = vadd.f32 %v4925_v6, %v12471_v15 }
 0x457   : > { %v5762_v2 = vmul.f32 %v5746_v13, %v5746_v13  ;;  %v5144_v10 = vrot.slane %v5143_v61, 1  ;;  %6887 = vrsqrt.f32 %v4741_v41  ;;  %v4697_v1 = vrot.slane %v4696_v53, 4 }
 0x458   : > { %v5496_v44 = vrot.slane %v5495_v33, 1  ;;  %v5337_v25 = vrot.slane %v5336_v14, 4  ;;  %v5028_v47 = vrot.slane %v4996_v12, 3  ;;  %v4966_v8 = vadd.f32 1e-08, %v4926_v17 }
 0x459   : > { %v5778_v39 = vmul.f32 %v5762_v2, %v5762_v2  ;;  %v5145_v62 = vadd.f32 %v5144_v10, %v5143_v61  ;;  %v4698_v36 = vadd.f32 %v4697_v1, %v4696_v53 }
 0x45a   : > { %v12514_v30 = vadd.f32 %v5496_v44, %v5495_v33  ;;  %v5338_v45 = vadd.f32 %v5337_v25, %v5336_v14 }
 0x45b   : > { %v5810_v0 = vsel %vm12486_vm13, %v5778_v39, 0.0  ;;  %v5203_v11 = vadd.f32 1e-08, %v5145_v62  ;;  %v4699_v46 = vrot.slane %v4698_v36, 2 }
 0x45c   : > { %v5842_v4 = vadd.f32 %v12399_v7, %v5810_v0  ;;  %v5555_v21 = vmax.f32 %v12514_v30, 0.0  ;;  %v4997_v7 = vmul.f32 %v6880_v52, %v12417_v59  ;;  %v12521_v5 = vpop.eup %6881  ;;  %v5339_v37 = vrot.slane %v5338_v45, 2 }
 0x45d   : > { %6889 = vrsqrt.f32 %v5203_v11  ;;  %v6884_v35 = vpop.eup %6883  ;;  %v4772_v48 = vmul.f32 %v12521_v5, %v12408_v38  ;;  %v4700_v13 = vadd.f32 %v4699_v46, %v4698_v36 }
 0x45e   : > { %v5874_v55 = vmul.f32 %v12464_v29, %v5842_v4  ;;  %v12526_v29 = vmul.f32 %v5555_v21, %v12369_v56  ;;  %v5029_v63 = vrot.slane %v4997_v7, 3  ;;  %6891 = vrsqrt.f32 %v4966_v8 }
 0x45f   : > { %v12532_v26 = vadd.f32 %v5028_v47, %v4772_v48  ;;  %v12536_v56 = vmul.f32 %v6884_v35, %v12429_v27  ;;  %v4701_v16 = vrot.slane %v4700_v13, 1  ;;  %vm5795_vm14 = vcmp.gt.f32.partialorder %v5555_v21, 0.0 }
 0x460   : > { %v5905_v15 = vcombine.low %v12403_v58, %v5874_v55  ;;  %v5906_v6 = vcombine.high %v12403_v58, %v5874_v55  ;;  %v5340_v58 = vadd.f32 %v5339_v37, %v5338_v45  ;;  %v6886_v50 = vpop.eup %6885 }
 0x461   : > { %v12539_v19 = vmul.f32 %v6886_v50, %v12327_v60  ;;  %v12541_v38 = vpop.eup %6887  ;;  %v5076_v61 = vmul.f32 %v12532_v26, %v12532_v26  ;;  %v4702_v9 = vadd.f32 %v4701_v16, %v4700_v13 }
 0x462   : > { %v6195_v18 = vrot.slane %v5905_v15, 11  ;;  %v5931_v34 = vrot.slane %v5906_v6, 7  ;;  %v5341_v2 = vrot.slane %v5340_v58, 1  ;;  %v4773_v31 = vmul.f32 %v12541_v38, %v12454_v22 }
 0x463   : > { %v5428_v23 = vmul.f32 %v12539_v19, %v4772_v48  ;;  %v5146_v32 = vsel %vm4618_vm3, %v5076_v61, 0.0  ;;  %v4742_v53 = vadd.f32 1e-08, %v4702_v9 }
 0x464   : > { %v5932_v59 = vsel %vm12250_vm9, %v6195_v18, %v5931_v34  ;;  %v5342_v27 = vadd.f32 %v5341_v2, %v5340_v58  ;;  %v12549_v12 = vadd.f32 %v5029_v63, %v4773_v31  ;;  %v5429_v60 = vmul.f32 %v12536_v56, %v4773_v31 }
 0x465   : > { %5960 = vst [vmem:[%s12261_s24 + $0x18] sm:$0x77] %v5932_v59  ;;  %v5147_v10 = vrot.slane %v5146_v32, 4  ;;  %v5498_v33 = vsel %vm4618_vm3, %v5428_v23, 0.0  ;;  %6893 = vrsqrt.f32 %v4742_v53 }
 0x466   : > { %v5499_v41 = vrot.slane %v5498_v33, 4  ;;  %v5382_v14 = vadd.f32 1e-08, %v5342_v27  ;;  %v5077_v22 = vmul.f32 %v12549_v12, %v12549_v12  ;;  %v5505_v0 = vsel %vm4618_vm3, %v5429_v60, 0.0 }
 0x467   : > { %v6890_v39 = vpop.eup %6889  ;;  %v5148_v17 = vadd.f32 %v5147_v10, %v5146_v32  ;;  %v5506_v44 = vrot.slane %v5505_v0, 4 }
 0x468   : > { %v5235_v52 = vmul.f32 %v6890_v39, %v12473_v49  ;;  %v5500_v4 = vadd.f32 %v5499_v41, %v5498_v33  ;;  %v5153_v1 = vsel %vm4618_vm3, %v5077_v22, 0.0  ;;  %6895 = vrsqrt.f32 %v5382_v14  ;;  %v6892_v25 = vpop.eup %6891 }
 0x469   : > { %v5149_v11 = vrot.slane %v5148_v17, 2  ;;  %v5154_v55 = vrot.slane %v5153_v1, 4  ;;  %v5507_v47 = vadd.f32 %v5506_v44, %v5505_v0 }
 0x46a   : > { %v5571_v62 = vmul.f32 %v12481_v40, %v5235_v52  ;;  %v5501_v36 = vrot.slane %v5500_v4, 2  ;;  %v4998_v40 = vmul.f32 %v6892_v25, %v12423_v43 }
 0x46b   : > { %v5150_v45 = vadd.f32 %v5149_v11, %v5148_v17  ;;  %v5155_v15 = vadd.f32 %v5154_v55, %v5153_v1  ;;  %v5508_v6 = vrot.slane %v5507_v47, 2 }
 0x46c   : > { %v5635_v49 = vsel %vm4618_vm3, %v5571_v62, 0.0  ;;  %v5502_v7 = vadd.f32 %v5501_v36, %v5500_v4  ;;  %v5030_v63 = vrot.slane %v4998_v40, 3 }
 0x46d   : > { %v5636_v8 = vrot.slane %v5635_v49, 4  ;;  %v5151_v37 = vrot.slane %v5150_v45, 1  ;;  %v5156_v35 = vrot.slane %v5155_v15, 2  ;;  %v5509_v18 = vadd.f32 %v5508_v6, %v5507_v47 }
 0x46e   : > { %v5503_v34 = vrot.slane %v5502_v7, 1 }
 0x46f   : > { %v5637_v46 = vadd.f32 %v5636_v8, %v5635_v49  ;;  %v5152_v13 = vadd.f32 %v5151_v37, %v5150_v45  ;;  %v5157_v58 = vadd.f32 %v5156_v35, %v5155_v15  ;;  %v5510_v50 = vrot.slane %v5509_v18, 1  ;;  %v12563_v61 = vpop.eup %6893 }
 0x470   : > { %v12561_v59 = vadd.f32 %v5503_v34, %v5502_v7  ;;  %v4774_v27 = vmul.f32 %v12563_v61, %v12500_v57 }
 0x471   : > { %v5638_v48 = vrot.slane %v5637_v46, 2  ;;  %v5204_v2 = vadd.f32 1e-08, %v5152_v13  ;;  %v5158_v31 = vrot.slane %v5157_v58, 1  ;;  %v12565_v23 = vadd.f32 %v5510_v50, %v5509_v18 }
 0x472   : > { %v5556_v43 = vmax.f32 %v12561_v59, 0.0  ;;  %v6896_v9 = vpop.eup %6895  ;;  %v5062_v52 = vadd.f32 %v5030_v63, %v4774_v27 }
 0x473   : > { %v5639_v16 = vadd.f32 %v5638_v48, %v5637_v46  ;;  %6897 = vrsqrt.f32 %v5204_v2  ;;  %v5159_v39 = vadd.f32 %v5158_v31, %v5157_v58  ;;  %v5557_v60 = vmax.f32 %v12565_v23, 0.0 }
 0x474   : > { %v12574_v10 = vmul.f32 %v5556_v43, %v12411_v28  ;;  %v5414_v41 = vmul.f32 %v6896_v9, %v12433_v51  ;;  %v5078_v57 = vmul.f32 %v5062_v52, %v5062_v52  ;;  %vm5796_vm15 = vcmp.gt.f32.partialorder %v5556_v43, 0.0 }
 0x475   : > { %v5640_v32 = vrot.slane %v5639_v16, 1  ;;  %v5205_v53 = vadd.f32 1e-08, %v5159_v39  ;;  %v12580_v14 = vmul.f32 %v5557_v60, %v12457_v20  ;;  %vm5797_vm0 = vcmp.gt.f32.partialorder %v5557_v60, 0.0 }
 0x476   : > { %v5430_v0 = vmul.f32 %v5414_v41, %v4774_v27  ;;  %v5160_v62 = vsel %vm4618_vm3, %v5078_v57, 0.0 }
 0x477   : > { %v5641_v33 = vadd.f32 %v5640_v32, %v5639_v16  ;;  %6899 = vrsqrt.f32 %v5205_v53  ;;  %v5161_v44 = vrot.slane %v5160_v62, 4 }
 0x478   : > { %v5512_v28 = vsel %vm4618_vm3, %v5430_v0, 0.0 }
 0x479   : > { %v5699_v22 = vmax.f32 %v5641_v33, 0.0  ;;  %v5513_v4 = vrot.slane %v5512_v28, 4  ;;  %v5162_v11 = vadd.f32 %v5161_v44, %v5160_v62 }
 0x47b   : > { %v5715_v17 = vmul.f32 %v5699_v22, %v5699_v22  ;;  %v5514_v51 = vadd.f32 %v5513_v4, %v5512_v28  ;;  %v5163_v20 = vrot.slane %v5162_v11, 2 }
 0x47d   : > { %v5731_v1 = vmul.f32 %v5715_v17, %v5715_v17  ;;  %v6898_v25 = vpop.eup %6897  ;;  %v5515_v47 = vrot.slane %v5514_v51, 2  ;;  %v5164_v45 = vadd.f32 %v5163_v20, %v5162_v11 }
 0x47e   : > { %v5236_v55 = vmul.f32 %v6898_v25, %v12532_v26 }
 0x47f   : > { %v5747_v49 = vmul.f32 %v5731_v1, %v5731_v1  ;;  %v5516_v15 = vadd.f32 %v5515_v47, %v5514_v51  ;;  %v5165_v46 = vrot.slane %v5164_v45, 1  ;;  %v5860_v47 = vmul.f32 %v12521_v5, %v12521_v5 }
 0x480   : > { %v5572_v8 = vmul.f32 %v12539_v19, %v5236_v55  ;;  %v5859_v19 = vmul.f32 %v12459_v3, %v12459_v3 }
 0x481   : > { %v5763_v36 = vmul.f32 %v5747_v49, %v5747_v49  ;;  %v6900_v7 = vpop.eup %6899  ;;  %v5517_v37 = vrot.slane %v5516_v15, 1  ;;  %v5166_v48 = vadd.f32 %v5165_v46, %v5164_v45 }
 0x482   : > { %v5642_v40 = vsel %vm4618_vm3, %v5572_v8, 0.0  ;;  %v5237_v18 = vmul.f32 %v6900_v7, %v12549_v12 }
 0x483   : > { %v5779_v6 = vmul.f32 %v5763_v36, %v5763_v36  ;;  %v5643_v26 = vrot.slane %v5642_v40, 4  ;;  %v12593_v13 = vadd.f32 %v5517_v37, %v5516_v15  ;;  %v5206_v50 = vadd.f32 1e-08, %v5166_v48 }
 0x484   : > { %v5573_v58 = vmul.f32 %v12536_v56, %v5237_v18  ;;  %v5861_v15 = vmul.f32 %v12541_v38, %v12541_v38 }
 0x485   : > { %v5811_v35 = vsel %vm5795_vm14, %v5779_v6, 0.0  ;;  %v5644_v30 = vadd.f32 %v5643_v26, %v5642_v40  ;;  %v5558_v63 = vmax.f32 %v12593_v13, 0.0  ;;  %6901 = vrsqrt.f32 %v5206_v50 }
 0x486   : > { %v5843_v34 = vadd.f32 %v12526_v29, %v5811_v35  ;;  %v5649_v16 = vsel %vm4618_vm3, %v5573_v58, 0.0 }
 0x487   : > { %v5645_v12 = vrot.slane %v5644_v30, 2  ;;  %v5650_v2 = vrot.slane %v5649_v16, 4  ;;  %v12603_v3 = vmul.f32 %v5558_v63, %v12503_v42  ;;  %vm5798_vm1 = vcmp.gt.f32.partialorder %v5558_v63, 0.0 }
 0x488   : > { %v12596_v21 = vmul.f32 %v5859_v19, %v5843_v34 }
 0x489   : > { %v5646_v29 = vadd.f32 %v5645_v12, %v5644_v30  ;;  %v5651_v31 = vadd.f32 %v5650_v2, %v5649_v16 }
 0x48b   : > { %v5647_v9 = vrot.slane %v5646_v29, 1  ;;  %v5652_v56 = vrot.slane %v5651_v31, 2 }
 0x48d   : > { %v5648_v32 = vadd.f32 %v5647_v9, %v5646_v29  ;;  %v5653_v27 = vadd.f32 %v5652_v56, %v5651_v31 }
 0x48f   : > { %v5700_v39 = vmax.f32 %v5648_v32, 0.0  ;;  %v5654_v33 = vrot.slane %v5653_v27, 1  ;;  %v6902_v22 = vpop.eup %6901 }
 0x490   : > { %v5238_v17 = vmul.f32 %v6902_v22, %v5062_v52 }
 0x491   : > { %v5716_v53 = vmul.f32 %v5700_v39, %v5700_v39  ;;  %v5655_v57 = vadd.f32 %v5654_v33, %v5653_v27 }
 0x492   : > { %v5574_v44 = vmul.f32 %v5414_v41, %v5238_v17 }
 0x493   : > { %v5732_v0 = vmul.f32 %v5716_v53, %v5716_v53  ;;  %v5701_v62 = vmax.f32 %v5655_v57, 0.0 }
 0x494   : > { %v5656_v42 = vsel %vm4618_vm3, %v5574_v44, 0.0 }
 0x495   : > { %v5748_v28 = vmul.f32 %v5732_v0, %v5732_v0  ;;  %v5717_v4 = vmul.f32 %v5701_v62, %v5701_v62  ;;  %v5657_v51 = vrot.slane %v5656_v42, 4 }
 0x497   : > { %v5764_v1 = vmul.f32 %v5748_v28, %v5748_v28  ;;  %v5733_v11 = vmul.f32 %v5717_v4, %v5717_v4  ;;  %v5658_v55 = vadd.f32 %v5657_v51, %v5656_v42 }
 0x499   : > { %v5780_v25 = vmul.f32 %v5764_v1, %v5764_v1  ;;  %v5749_v49 = vmul.f32 %v5733_v11, %v5733_v11  ;;  %v5659_v8 = vrot.slane %v5658_v55, 2 }
 0x49b   : > { %v5812_v20 = vsel %vm5796_vm15, %v5780_v25, 0.0  ;;  %v5765_v36 = vmul.f32 %v5749_v49, %v5749_v49  ;;  %v5660_v7 = vadd.f32 %v5659_v8, %v5658_v55 }
 0x49c   : > { %v5844_v41 = vadd.f32 %v12574_v10, %v5812_v20 }
 0x49d   : > { %v12610_v52 = vpop.f32.mrb[12].mxu0  ;;  %v5781_v6 = vmul.f32 %v5765_v36, %v5765_v36  ;;  %v5661_v19 = vrot.slane %v5660_v7, 1 }
 0x49e   : > { %6903 = vrcp.f32 %v12610_v52  ;;  %v12614_v45 = vpop.f32.mrb[13].mxu0  ;;  %v4791_v59 = vmul.f32 %v12610_v52, %v12610_v52  ;;  %v5876_v10 = vmul.f32 %v5860_v47, %v5844_v41 }
 0x49f   : > { %6905 = vrcp.f32 %v12614_v45  ;;  %v4792_v5 = vmul.f32 %v12614_v45, %v12614_v45  ;;  %v12623_v43 = vpop.f32.mrb[14].mxu0  ;;  %v5813_v18 = vsel %vm5797_vm0, %v5781_v6, 0.0  ;;  %v5662_v16 = vadd.f32 %v5661_v19, %v5660_v7 }
 0x4a0   : > { %v5255_v40 = vmul.f32 %v12623_v43, %v12623_v43  ;;  %v12627_v46 = vpop.f32.mrb[15].mxu0  ;;  %v4823_v38 = vrot.slane %v4791_v59, 3  ;;  %v5907_v26 = vcombine.low %v12596_v21, %v5876_v10  ;;  %v5908_v34 = vcombine.high %v12596_v21, %v5876_v10 }
 0x4a1   : > { %v4824_v37 = vrot.slane %v4792_v5, 3  ;;  %v5256_v35 = vmul.f32 %v12627_v46, %v12627_v46  ;;  %v5845_v48 = vadd.f32 %v12580_v14, %v5813_v18  ;;  %v5702_v9 = vmax.f32 %v5662_v16, 0.0 }
 0x4a2   : > { %v4927_v58 = vsel %vm4618_vm3, %v4823_v38, 0.0  ;;  %v5343_v23 = vsel %vm4618_vm3, %v5255_v40, 0.0  ;;  %v6196_v60 = vrot.slane %v5907_v26, 11  ;;  %v5935_v50 = vrot.slane %v5908_v34, 7 }
 0x4a3   : > { %v4934_v30 = vsel %vm4618_vm3, %v4824_v37, 0.0  ;;  %v4928_v12 = vrot.slane %v4927_v58, 4  ;;  %v12639_v2 = vmul.f32 %v5861_v15, %v5845_v48  ;;  %v5344_v31 = vrot.slane %v5343_v23, 4 }
 0x4a4   : > { %v4935_v29 = vrot.slane %v4934_v30, 4  ;;  %v5350_v21 = vsel %vm4618_vm3, %v5256_v35, 0.0  ;;  %v5936_v14 = vsel %vm12250_vm9, %v6196_v60, %v5935_v50  ;;  %v5718_v53 = vmul.f32 %v5702_v9, %v5702_v9 }
 0x4a5   : > { %v4929_v56 = vadd.f32 %v4928_v12, %v4927_v58  ;;  %v5351_v32 = vrot.slane %v5350_v21, 4  ;;  %5961 = vst [vmem:[%s12261_s24 + $0x20] sm:$0x77] %v5936_v14  ;;  %v5345_v39 = vadd.f32 %v5344_v31, %v5343_v23  ;;  %v5862_v23 = vmul.f32 %v12563_v61, %v12563_v61 }
 0x4a6   : > { %v4936_v27 = vadd.f32 %v4935_v29, %v4934_v30  ;;  %v5734_v44 = vmul.f32 %v5718_v53, %v5718_v53 }
 0x4a7   : > { %v4930_v22 = vrot.slane %v4929_v56, 2  ;;  %v5352_v57 = vadd.f32 %v5351_v32, %v5350_v21  ;;  %v5346_v28 = vrot.slane %v5345_v39, 2 }
 0x4a8   : > { %v6904_v33 = vpop.eup %6903  ;;  %v4937_v17 = vrot.slane %v4936_v27, 2  ;;  %v5750_v55 = vmul.f32 %v5734_v44, %v5734_v44 }
 0x4a9   : > { %v6906_v0 = vpop.eup %6905  ;;  %v4557_v62 = vrot.slane %v6904_v33, %v14832_v24  ;;  %v4931_v4 = vadd.f32 %v4930_v22, %v4929_v56  ;;  %v5353_v42 = vrot.slane %v5352_v57, 2  ;;  %v5347_v49 = vadd.f32 %v5346_v28, %v5345_v39 }
 0x4aa   : > { %v4561_v1 = vrot.slane %v6906_v0, %v14832_v24  ;;  %v4938_v11 = vadd.f32 %v4937_v17, %v4936_v27  ;;  %v12661_v59 = vpop.f32.mrb[12].mxu1  ;;  %v5766_v6 = vmul.f32 %v5750_v55, %v5750_v55 }
 0x4ab   : > { %v12648_v51 = vmul.f32 %v4557_v62, %v12610_v52  ;;  %v12651_v25 = vmul.f32 %v4557_v62, %v12623_v43  ;;  %v4932_v20 = vrot.slane %v4931_v4, 1  ;;  %v5348_v15 = vrot.slane %v5347_v49, 1  ;;  %v12666_v40 = vpop.f32.mrb[13].mxu1 }
 0x4ac   : > { %v12654_v47 = vmul.f32 %v4561_v1, %v12614_v45  ;;  %v12657_v36 = vmul.f32 %v4561_v1, %v12627_v46  ;;  %v4939_v41 = vrot.slane %v4938_v11, 1  ;;  %v5354_v5 = vadd.f32 %v5353_v42, %v5352_v57  ;;  %v12671_v26 = vpop.f32.mrb[14].mxu1 }
 0x4ad   : > { %v4614_v8 = vmul.f32 %v12648_v51, %v12648_v51  ;;  %v4933_v10 = vadd.f32 %v4932_v20, %v4931_v4  ;;  %6907 = vrcp.f32 %v12661_v59  ;;  %v4793_v7 = vmul.f32 %v12661_v59, %v12661_v59  ;;  %v12673_v30 = vpop.f32.mrb[15].mxu1 }
 0x4ae   : > { %v4940_v38 = vadd.f32 %v4939_v41, %v4938_v11  ;;  %v5349_v35 = vadd.f32 %v5348_v15, %v5347_v49  ;;  %v4615_v18 = vmul.f32 %v12654_v47, %v12654_v47  ;;  %v5782_v34 = vmul.f32 %v5766_v6, %v5766_v6 }
 0x4af   : > { %v4703_v37 = vsel %vm4618_vm3, %v4614_v8, 0.0  ;;  %v4967_v19 = vadd.f32 1e-08, %v4933_v10  ;;  %v4825_v58 = vrot.slane %v4793_v7, 3  ;;  %v5355_v29 = vrot.slane %v5354_v5, 1 }
 0x4b0   : > { %v4704_v48 = vrot.slane %v4703_v37, 4  ;;  %v4710_v60 = vsel %vm4618_vm3, %v4615_v18, 0.0  ;;  %v5814_v50 = vsel %vm5798_vm1, %v5782_v34, 0.0  ;;  %v4968_v21 = vadd.f32 1e-08, %v4940_v38 }
 0x4b1   : > { %v4941_v12 = vsel %vm4618_vm3, %v4825_v58, 0.0  ;;  %v5846_v31 = vadd.f32 %v12603_v3, %v5814_v50  ;;  %v4711_v9 = vrot.slane %v4710_v60, 4  ;;  %6909 = vrsqrt.f32 %v4967_v19 }
 0x4b2   : > { %v4705_v16 = vadd.f32 %v4704_v48, %v4703_v37  ;;  %v4942_v14 = vrot.slane %v4941_v12, 4  ;;  %v5383_v32 = vadd.f32 1e-08, %v5349_v35  ;;  %v4794_v13 = vmul.f32 %v12666_v40, %v12666_v40 }
 0x4b3   : > { %v5878_v63 = vmul.f32 %v5862_v23, %v5846_v31  ;;  %v4712_v27 = vadd.f32 %v4711_v9, %v4710_v60  ;;  %6911 = vrcp.f32 %v12666_v40  ;;  %v5356_v33 = vadd.f32 %v5355_v29, %v5354_v5 }
 0x4b4   : > { %v4706_v56 = vrot.slane %v4705_v16, 2  ;;  %v4943_v61 = vadd.f32 %v4942_v14, %v4941_v12  ;;  %v4826_v53 = vrot.slane %v4794_v13, 3  ;;  %v5257_v3 = vmul.f32 %v12671_v26, %v12671_v26 }
 0x4b5   : > { %v5909_v22 = vcombine.low %v12639_v2, %v5878_v63  ;;  %v5910_v57 = vcombine.high %v12639_v2, %v5878_v63  ;;  %v4713_v17 = vrot.slane %v4712_v27, 2  ;;  %6913 = vrsqrt.f32 %v4968_v21 }
 0x4b6   : > { %v4707_v39 = vadd.f32 %v4706_v56, %v4705_v16  ;;  %v4944_v0 = vrot.slane %v4943_v61, 2  ;;  %v4948_v44 = vsel %vm4618_vm3, %v4826_v53, 0.0  ;;  %v5357_v4 = vsel %vm4618_vm3, %v5257_v3, 0.0 }
 0x4b7   : > { %v6908_v62 = vpop.eup %6907  ;;  %v6197_v1 = vrot.slane %v5909_v22, 11  ;;  %v5939_v42 = vrot.slane %v5910_v57, 7  ;;  %v4714_v49 = vadd.f32 %v4713_v17, %v4712_v27  ;;  %v4949_v20 = vrot.slane %v4948_v44, 4 }
 0x4b8   : > { %v4708_v28 = vrot.slane %v4707_v39, 1  ;;  %v4945_v11 = vadd.f32 %v4944_v0, %v4943_v61  ;;  %v4565_v41 = vrot.slane %v6908_v62, %v14832_v24  ;;  %v5358_v8 = vrot.slane %v5357_v4, 4 }
 0x4b9   : > { %v5940_v2 = vsel %vm12250_vm9, %v6197_v1, %v5939_v42  ;;  %6915 = vrsqrt.f32 %v5383_v32  ;;  %v4715_v15 = vrot.slane %v4714_v49, 1  ;;  %v5384_v5 = vadd.f32 1e-08, %v5356_v33 }
 0x4ba   : > { %v4709_v55 = vadd.f32 %v4708_v28, %v4707_v39  ;;  %5962 = vst [vmem:[%s12261_s24 + $0x28] sm:$0x77] %v5940_v2  ;;  %v4950_v10 = vadd.f32 %v4949_v20, %v4948_v44  ;;  %v12696_v7 = vmul.f32 %v4565_v41, %v12661_v59  ;;  %v12699_v38 = vmul.f32 %v4565_v41, %v12671_v26 }
 0x4bb   : > { %v4946_v37 = vrot.slane %v4945_v11, 1  ;;  %v4716_v35 = vadd.f32 %v4715_v15, %v4714_v49  ;;  %v5359_v18 = vadd.f32 %v5358_v8, %v5357_v4  ;;  %v5258_v34 = vmul.f32 %v12673_v30, %v12673_v30  ;;  %v6910_v19 = vpop.eup %6909 }
 0x4bc   : > { %v4743_v6 = vadd.f32 1e-08, %v4709_v55  ;;  %v4951_v48 = vrot.slane %v4950_v10, 2  ;;  %v4616_v58 = vmul.f32 %v12696_v7, %v12696_v7  ;;  %v4999_v39 = vmul.f32 %v6910_v19, %v12610_v52 }
 0x4bd   : > { %v6912_v23 = vpop.eup %6911  ;;  %v4744_v60 = vadd.f32 1e-08, %v4716_v35  ;;  %v5360_v12 = vrot.slane %v5359_v18, 2  ;;  %v4947_v29 = vadd.f32 %v4946_v37, %v4945_v11  ;;  %v5364_v14 = vsel %vm4618_vm3, %v5258_v34, 0.0 }
 0x4be   : > { %6917 = vrsqrt.f32 %v4743_v6  ;;  %v4952_v50 = vadd.f32 %v4951_v48, %v4950_v10  ;;  %v4717_v16 = vsel %vm4618_vm3, %v4616_v58, 0.0  ;;  %v4569_v21 = vrot.slane %v6912_v23, %v14832_v24 }
 0x4bf   : > { %6919 = vrsqrt.f32 %v5384_v5  ;;  %v4718_v31 = vrot.slane %v4717_v16, 4  ;;  %v6914_v9 = vpop.eup %6913  ;;  %v5361_v32 = vadd.f32 %v5360_v12, %v5359_v18  ;;  %v5365_v13 = vrot.slane %v5364_v14, 4 }
 0x4c0   : > { %6921 = vrsqrt.f32 %v4744_v60  ;;  %v4953_v56 = vrot.slane %v4952_v50, 1  ;;  %v12709_v61 = vmul.f32 %v4569_v21, %v12666_v40  ;;  %v12712_v27 = vmul.f32 %v4569_v21, %v12673_v30 }
 0x4c1   : > { %v4719_v63 = vadd.f32 %v4718_v31, %v4717_v16  ;;  %v5362_v33 = vrot.slane %v5361_v32, 1  ;;  %v5366_v53 = vadd.f32 %v5365_v13, %v5364_v14  ;;  %v4969_v0 = vadd.f32 1e-08, %v4947_v29 }
 0x4c2   : > { %v4954_v24 = vadd.f32 %v4953_v56, %v4952_v50  ;;  %v4617_v57 = vmul.f32 %v12709_v61, %v12709_v61  ;;  %v5031_v1 = vrot.slane %v4999_v39, 3  ;;  %v5000_v42 = vmul.f32 %v6914_v9, %v12614_v45 }
 0x4c3   : > { %v6916_v3 = vpop.eup %6915  ;;  %v4720_v22 = vrot.slane %v4719_v63, 2  ;;  %v5363_v17 = vadd.f32 %v5362_v33, %v5361_v32  ;;  %v5367_v62 = vrot.slane %v5366_v53, 2  ;;  %6923 = vrsqrt.f32 %v4969_v0 }
 0x4c4   : > { %v4724_v44 = vsel %vm4618_vm3, %v4617_v57, 0.0  ;;  %v12724_v20 = vmul.f32 %v6916_v3, %v12623_v43  ;;  %v4970_v41 = vadd.f32 1e-08, %v4954_v24  ;;  %v5032_v35 = vrot.slane %v5000_v42, 3 }
 0x4c5   : > { %v4721_v28 = vadd.f32 %v4720_v22, %v4719_v63  ;;  %v4725_v52 = vrot.slane %v4724_v44, 4  ;;  %v5368_v11 = vadd.f32 %v5367_v62, %v5366_v53  ;;  %v5385_v2 = vadd.f32 1e-08, %v5363_v17 }
 0x4c6   : > { %6925 = vrsqrt.f32 %v4970_v41 }
 0x4c7   : > { %v4722_v8 = vrot.slane %v4721_v28, 1  ;;  %v4726_v15 = vadd.f32 %v4725_v52, %v4724_v44  ;;  %v5369_v5 = vrot.slane %v5368_v11, 1  ;;  %6927 = vrsqrt.f32 %v5385_v2 }
 0x4c8   : > { %v12718_v4 = vpop.eup %6917 }
 0x4c9   : > { %v6920_v49 = vpop.eup %6919  ;;  %v4775_v55 = vmul.f32 %v12718_v4, %v12648_v51  ;;  %v4723_v45 = vadd.f32 %v4722_v8, %v4721_v28  ;;  %v4727_v51 = vrot.slane %v4726_v15, 2  ;;  %v5370_v43 = vadd.f32 %v5369_v5, %v5368_v11 }
 0x4ca   : > { %v12729_v37 = vpop.eup %6921  ;;  %v12732_v18 = vmul.f32 %v6920_v49, %v12627_v46 }
 0x4cb   : > { %v12726_v6 = vadd.f32 %v5031_v1, %v4775_v55  ;;  %v5431_v10 = vmul.f32 %v12724_v20, %v4775_v55  ;;  %v4776_v48 = vmul.f32 %v12729_v37, %v12654_v47  ;;  %v4745_v23 = vadd.f32 1e-08, %v4723_v45 }
 0x4cc   : > { %v4728_v60 = vadd.f32 %v4727_v51, %v4726_v15  ;;  %v5386_v12 = vadd.f32 1e-08, %v5370_v43 }
 0x4cd   : > { %v5079_v34 = vmul.f32 %v12726_v6, %v12726_v6  ;;  %v5519_v19 = vsel %vm4618_vm3, %v5431_v10, 0.0  ;;  %v12740_v16 = vadd.f32 %v5032_v35, %v4776_v48  ;;  %v5432_v46 = vmul.f32 %v12732_v18, %v4776_v48  ;;  %v6924_v39 = vpop.eup %6923 }
 0x4ce   : > { %v5520_v58 = vrot.slane %v5519_v19, 4  ;;  %6929 = vrsqrt.f32 %v4745_v23  ;;  %v4729_v21 = vrot.slane %v4728_v60, 1  ;;  %v5001_v44 = vmul.f32 %v6924_v39, %v12661_v59 }
 0x4cf   : > { %v5167_v50 = vsel %vm4618_vm3, %v5079_v34, 0.0  ;;  %v5080_v14 = vmul.f32 %v12740_v16, %v12740_v16  ;;  %v5526_v47 = vsel %vm4618_vm3, %v5432_v46, 0.0  ;;  %6931 = vrsqrt.f32 %v5386_v12 }
 0x4d0   : > { %v5168_v29 = vrot.slane %v5167_v50, 4  ;;  %v5521_v31 = vadd.f32 %v5520_v58, %v5519_v19  ;;  %v5527_v32 = vrot.slane %v5526_v47, 4  ;;  %v4730_v13 = vadd.f32 %v4729_v21, %v4728_v60  ;;  %v6926_v28 = vpop.eup %6925 }
 0x4d1   : > { %v5174_v63 = vsel %vm4618_vm3, %v5080_v14, 0.0  ;;  %v6928_v1 = vpop.eup %6927  ;;  %v5033_v5 = vrot.slane %v5001_v44, 3  ;;  %v5002_v19 = vmul.f32 %v6926_v28, %v12666_v40 }
 0x4d2   : > { %v5169_v9 = vadd.f32 %v5168_v29, %v5167_v50  ;;  %v5522_v56 = vrot.slane %v5521_v31, 2  ;;  %v5175_v3 = vrot.slane %v5174_v63, 4  ;;  %v5528_v24 = vadd.f32 %v5527_v32, %v5526_v47 }
 0x4d3   : > { %v4746_v22 = vadd.f32 1e-08, %v4730_v13  ;;  %v12756_v59 = vmul.f32 %v6928_v1, %v12671_v26  ;;  %v5034_v12 = vrot.slane %v5002_v19, 3 }
 0x4d4   : > { %v5170_v33 = vrot.slane %v5169_v9, 2  ;;  %v5523_v53 = vadd.f32 %v5522_v56, %v5521_v31  ;;  %v5176_v17 = vadd.f32 %v5175_v3, %v5174_v63  ;;  %v5529_v62 = vrot.slane %v5528_v24, 2 }
 0x4d5   : > { %6933 = vrsqrt.f32 %v4746_v22 }
 0x4d6   : > { %v5171_v57 = vadd.f32 %v5170_v33, %v5169_v9  ;;  %v5524_v0 = vrot.slane %v5523_v53, 1  ;;  %v5177_v11 = vrot.slane %v5176_v17, 2  ;;  %v5530_v49 = vadd.f32 %v5529_v62, %v5528_v24 }
 0x4d8   : > { %v5172_v42 = vrot.slane %v5171_v57, 1  ;;  %v12748_v52 = vadd.f32 %v5524_v0, %v5523_v53  ;;  %v12750_v55 = vpop.eup %6929  ;;  %v5178_v2 = vadd.f32 %v5177_v11, %v5176_v17  ;;  %v5531_v15 = vrot.slane %v5530_v49, 1 }
 0x4d9   : > { %v4777_v10 = vmul.f32 %v12750_v55, %v12696_v7  ;;  %v6932_v43 = vpop.eup %6931 }
 0x4da   : > { %v5173_v41 = vadd.f32 %v5172_v42, %v5171_v57  ;;  %v5559_v8 = vmax.f32 %v12748_v52, 0.0  ;;  %v5179_v51 = vrot.slane %v5178_v2, 1  ;;  %v12763_v34 = vadd.f32 %v5531_v15, %v5530_v49 }
 0x4db   : > { %v12766_v48 = vadd.f32 %v5033_v5, %v4777_v10  ;;  %v5433_v58 = vmul.f32 %v12756_v59, %v4777_v10  ;;  %v12782_v31 = vmul.f32 %v6932_v43, %v12673_v30 }
 0x4dc   : > { %v5207_v45 = vadd.f32 1e-08, %v5173_v41  ;;  %v12761_v35 = vmul.f32 %v5559_v8, %v12651_v25  ;;  %v5180_v7 = vadd.f32 %v5179_v51, %v5178_v2  ;;  %v5560_v26 = vmax.f32 %v12763_v34, 0.0 }
 0x4dd   : > { %v5081_v23 = vmul.f32 %v12766_v48, %v12766_v48  ;;  %v5533_v25 = vsel %vm4618_vm3, %v5433_v58, 0.0  ;;  %vm5799_vm2 = vcmp.gt.f32.partialorder %v5559_v8, 0.0 }
 0x4de   : > { %6935 = vrsqrt.f32 %v5207_v45  ;;  %v5208_v60 = vadd.f32 1e-08, %v5180_v7  ;;  %v5534_v50 = vrot.slane %v5533_v25, 4  ;;  %v12778_v40 = vmul.f32 %v5560_v26, %v12657_v36 }
 0x4df   : > { %v12773_v46 = vpop.eup %6933  ;;  %v5181_v29 = vsel %vm4618_vm3, %v5081_v23, 0.0  ;;  %vm5800_vm4 = vcmp.gt.f32.partialorder %v5560_v26, 0.0 }
 0x4e0   : > { %6937 = vrsqrt.f32 %v5208_v60  ;;  %v5182_v21 = vrot.slane %v5181_v29, 4  ;;  %v5535_v14 = vadd.f32 %v5534_v50, %v5533_v25  ;;  %v4778_v47 = vmul.f32 %v12773_v46, %v12709_v61 }
 0x4e2   : > { %v5183_v9 = vadd.f32 %v5182_v21, %v5181_v29  ;;  %v5536_v56 = vrot.slane %v5535_v14, 2  ;;  %v12786_v32 = vadd.f32 %v5034_v12, %v4778_v47  ;;  %v5434_v13 = vmul.f32 %v12782_v31, %v4778_v47 }
 0x4e4   : > { %v5184_v36 = vrot.slane %v5183_v9, 2  ;;  %v5537_v63 = vadd.f32 %v5536_v56, %v5535_v14  ;;  %v5082_v39 = vmul.f32 %v12786_v32, %v12786_v32  ;;  %v5540_v30 = vsel %vm4618_vm3, %v5434_v13, 0.0 }
 0x4e5   : > { %v5541_v33 = vrot.slane %v5540_v30, 4 }
 0x4e6   : > { %v5185_v3 = vadd.f32 %v5184_v36, %v5183_v9  ;;  %v5538_v24 = vrot.slane %v5537_v63, 1  ;;  %v5188_v22 = vsel %vm4618_vm3, %v5082_v39, 0.0 }
 0x4e7   : > { %v5189_v57 = vrot.slane %v5188_v22, 4  ;;  %v5542_v0 = vadd.f32 %v5541_v33, %v5540_v30 }
 0x4e8   : > { %v6936_v53 = vpop.eup %6935  ;;  %v5186_v17 = vrot.slane %v5185_v3, 1  ;;  %v12794_v62 = vadd.f32 %v5538_v24, %v5537_v63 }
 0x4e9   : > { %v5239_v61 = vmul.f32 %v6936_v53, %v12726_v6  ;;  %v5190_v44 = vadd.f32 %v5189_v57, %v5188_v22  ;;  %v5543_v1 = vrot.slane %v5542_v0, 2 }
 0x4ea   : > { %v6938_v42 = vpop.eup %6937  ;;  %v5187_v11 = vadd.f32 %v5186_v17, %v5185_v3  ;;  %v5561_v49 = vmax.f32 %v12794_v62, 0.0 }
 0x4eb   : > { %v5575_v28 = vmul.f32 %v12724_v20, %v5239_v61  ;;  %v5240_v2 = vmul.f32 %v6938_v42, %v12740_v16  ;;  %v5191_v15 = vrot.slane %v5190_v44, 2  ;;  %v5544_v5 = vadd.f32 %v5543_v1, %v5542_v0 }
 0x4ec   : > { %v5209_v10 = vadd.f32 1e-08, %v5187_v11  ;;  %v12803_v45 = vmul.f32 %v5561_v49, %v12699_v38 }
 0x4ed   : > { %v5663_v41 = vsel %vm4618_vm3, %v5575_v28, 0.0  ;;  %v5576_v20 = vmul.f32 %v12732_v18, %v5240_v2  ;;  %v5192_v51 = vadd.f32 %v5191_v15, %v5190_v44  ;;  %v5545_v43 = vrot.slane %v5544_v5, 1 }
 0x4ee   : > { %v5664_v6 = vrot.slane %v5663_v41, 4  ;;  %6939 = vrsqrt.f32 %v5209_v10 }
 0x4ef   : > { %v5670_v58 = vsel %vm4618_vm3, %v5576_v20, 0.0  ;;  %v5193_v7 = vrot.slane %v5192_v51, 1  ;;  %v12807_v23 = vadd.f32 %v5545_v43, %v5544_v5 }
 0x4f0   : > { %v5665_v19 = vadd.f32 %v5664_v6, %v5663_v41  ;;  %v5671_v25 = vrot.slane %v5670_v58, 4  ;;  %v5863_v6 = vmul.f32 %v12718_v4, %v12718_v4 }
 0x4f1   : > { %v5194_v60 = vadd.f32 %v5193_v7, %v5192_v51  ;;  %v5562_v50 = vmax.f32 %v12807_v23, 0.0 }
 0x4f2   : > { %v5666_v16 = vrot.slane %v5665_v19, 2  ;;  %v5672_v29 = vadd.f32 %v5671_v25, %v5670_v58 }
 0x4f3   : > { %v5210_v38 = vadd.f32 1e-08, %v5194_v60  ;;  %v12813_v18 = vmul.f32 %v5562_v50, %v12712_v27  ;;  %vm5802_vm5 = vcmp.gt.f32.partialorder %v5562_v50, 0.0 }
 0x4f4   : > { %v5667_v12 = vadd.f32 %v5666_v16, %v5665_v19  ;;  %v5673_v14 = vrot.slane %v5672_v29, 2  ;;  %v5864_v19 = vmul.f32 %v12729_v37, %v12729_v37 }
 0x4f5   : > { %6941 = vrsqrt.f32 %v5210_v38 }
 0x4f6   : > { %v5668_v21 = vrot.slane %v5667_v12, 1  ;;  %v5674_v9 = vadd.f32 %v5673_v14, %v5672_v29 }
 0x4f8   : > { %v5669_v47 = vadd.f32 %v5668_v21, %v5667_v12  ;;  %v6940_v56 = vpop.eup %6939  ;;  %v5675_v36 = vrot.slane %v5674_v9, 1 }
 0x4f9   : > { %v5241_v63 = vmul.f32 %v6940_v56, %v12766_v48 }
 0x4fa   : > { %v5703_v13 = vmax.f32 %v5669_v47, 0.0  ;;  %v5676_v30 = vadd.f32 %v5675_v36, %v5674_v9 }
 0x4fb   : > { %v5577_v33 = vmul.f32 %v12756_v59, %v5241_v63  ;;  %v5865_v63 = vmul.f32 %v12750_v55, %v12750_v55 }
 0x4fc   : > { %v5719_v39 = vmul.f32 %v5703_v13, %v5703_v13  ;;  %v5704_v3 = vmax.f32 %v5676_v30, 0.0 }
 0x4fd   : > { %v5677_v24 = vsel %vm4618_vm3, %v5577_v33, 0.0 }
 0x4fe   : > { %v5735_v53 = vmul.f32 %v5719_v39, %v5719_v39  ;;  %v5720_v22 = vmul.f32 %v5704_v3, %v5704_v3  ;;  %v5678_v61 = vrot.slane %v5677_v24, 4  ;;  %v5866_v3 = vmul.f32 %v12773_v46, %v12773_v46 }
 0x4ff   : > { %v6942_v57 = vpop.eup %6941 }
 0x500   : > { %v5751_v27 = vmul.f32 %v5735_v53, %v5735_v53  ;;  %v5736_v17 = vmul.f32 %v5720_v22, %v5720_v22  ;;  %v5679_v28 = vadd.f32 %v5678_v61, %v5677_v24  ;;  %v5242_v44 = vmul.f32 %v6942_v57, %v12786_v32 }
 0x502   : > { %v5767_v0 = vmul.f32 %v5751_v27, %v5751_v27  ;;  %v5752_v42 = vmul.f32 %v5736_v17, %v5736_v17  ;;  %v5680_v48 = vrot.slane %v5679_v28, 2  ;;  %v5578_v11 = vmul.f32 %v12782_v31, %v5242_v44 }
 0x504   : > { %v5783_v1 = vmul.f32 %v5767_v0, %v5767_v0  ;;  %v5768_v41 = vmul.f32 %v5752_v42, %v5752_v42  ;;  %v5681_v2 = vadd.f32 %v5680_v48, %v5679_v28  ;;  %v5684_v15 = vsel %vm4618_vm3, %v5578_v11, 0.0 }
 0x505   : > { %v5685_v10 = vrot.slane %v5684_v15, 4  ;;  %vm5801_vm3 = vcmp.gt.f32.partialorder %v5561_v49, 0.0 }
 0x506   : > { %v5815_v59 = vsel %vm5799_vm2, %v5783_v1, 0.0  ;;  %v5784_v32 = vmul.f32 %v5768_v41, %v5768_v41  ;;  %v5682_v20 = vrot.slane %v5681_v2, 1 }
 0x507   : > { %v5847_v5 = vadd.f32 %v12761_v35, %v5815_v59  ;;  %v5686_v31 = vadd.f32 %v5685_v10, %v5684_v15 }
 0x508   : > { %v5816_v52 = vsel %vm5800_vm4, %v5784_v32, 0.0  ;;  %v5683_v8 = vadd.f32 %v5682_v20, %v5681_v2 }
 0x509   : > { %v5879_v51 = vmul.f32 %v5863_v6, %v5847_v5  ;;  %v5848_v43 = vadd.f32 %v12778_v40, %v5816_v52  ;;  %v5687_v35 = vrot.slane %v5686_v31, 2 }
 0x50a   : > { %v5705_v58 = vmax.f32 %v5683_v8, 0.0 }
 0x50b   : > { %v5880_v7 = vmul.f32 %v5864_v19, %v5848_v43  ;;  %v5688_v4 = vadd.f32 %v5687_v35, %v5686_v31 }
 0x50c   : > { %v5721_v16 = vmul.f32 %v5705_v58, %v5705_v58 }
 0x50d   : > { %v5911_v25 = vcombine.low %v5879_v51, %v5880_v7  ;;  %v5912_v60 = vcombine.high %v5879_v51, %v5880_v7  ;;  %v5689_v12 = vrot.slane %v5688_v4, 1 }
 0x50e   : > { %v5737_v29 = vmul.f32 %v5721_v16, %v5721_v16 }
 0x50f   : > { %v6198_v34 = vrot.slane %v5911_v25, 11  ;;  %v5943_v26 = vrot.slane %v5912_v60, 7  ;;  %v5690_v38 = vadd.f32 %v5689_v12, %v5688_v4 }
 0x510   : > { %v5753_v21 = vmul.f32 %v5737_v29, %v5737_v29 }
 0x511   : > { %v5944_v40 = vsel %vm12250_vm9, %v6198_v34, %v5943_v26  ;;  %v5706_v14 = vmax.f32 %v5690_v38, 0.0 }
 0x512   : > { %5963 = vst [vmem:[%s12261_s24 + $0x30] sm:$0x77] %v5944_v40  ;;  %v5769_v37 = vmul.f32 %v5753_v21, %v5753_v21 }
 0x513   : > { %v5722_v47 = vmul.f32 %v5706_v14, %v5706_v14 }
 0x514   : > { %v5785_v9 = vmul.f32 %v5769_v37, %v5769_v37 }
 0x515   : > { %v5738_v56 = vmul.f32 %v5722_v47, %v5722_v47 }
 0x516   : > { %v5817_v13 = vsel %vm5801_vm3, %v5785_v9, 0.0 }
 0x517   : > { %v5849_v36 = vadd.f32 %v12803_v45, %v5817_v13  ;;  %v5754_v39 = vmul.f32 %v5738_v56, %v5738_v56 }
 0x519   : > { %v5881_v30 = vmul.f32 %v5865_v63, %v5849_v36  ;;  %v5770_v33 = vmul.f32 %v5754_v39, %v5754_v39 }
 0x51b   : > { %v5786_v53 = vmul.f32 %v5770_v33, %v5770_v33 }
 0x51d   : > { %v5818_v62 = vsel %vm5802_vm5, %v5786_v53, 0.0 }
 0x51e   : > { %v5850_v49 = vadd.f32 %v12813_v18, %v5818_v62 }
 0x520   : > { %v5882_v45 = vmul.f32 %v5866_v3, %v5850_v49 }
 0x522   : > { %v5913_v24 = vcombine.low %v5881_v30, %v5882_v45  ;;  %v5914_v27 = vcombine.high %v5881_v30, %v5882_v45 }
 0x524   : > { %v6199_v55 = vrot.slane %v5913_v24, 11  ;;  %v5947_v22 = vrot.slane %v5914_v27, 7 }
 0x526   : > { %v5948_v46 = vsel %vm12250_vm9, %v6199_v55, %v5947_v22 }
 0x527   : > { %5964 = vst [vmem:[%s12261_s24 + $0x38] sm:$0x77] %v5948_v46 }
 0x528   : > { %6979 = shalt.err (!%p6976_p3)
}
 0x529   : > { %s6980_s7 = scalar_lea.hbm %s12849_s29, 1024  ;;  %s6984_s10 = scalar_lea.hbm %s12899_s3, 2048 }
 0x52a   : > { %p6981_p4 = scmp.ne.s32.totalorder %s12849_s29, %s6980_s7  ;;  %p6985_p9 = scmp.lt.u32.totalorder %s12849_s29, %s12899_s3 }
 0x52b   : > { %p6986_p10 = scmp.lt.u32.totalorder %s6984_s10, %s6980_s7  ;;  %p6988_p12 = scmp.lt.u32.totalorder %s6980_s7, %s12849_s29 }
 0x52c   : > { %p6982_p7 = pnand %p6981_p4, %p7092_p5 }
 0x52d   : > { %p6987_p11 = por %p6986_p10, %p6985_p9 }
 0x52e   : > { %p6983_p8 = pneg %p6982_p7 }
 0x52f   : > { %p6989_p13 = por %p6988_p12, %p6987_p11 }
 0x531   : > { %p6990_p0 = pnand %p6989_p13, %p6983_p8 }
 0x533   : > { %6993 = shalt.err (!%p6990_p0)
}
 0x534   : > { %6206 = dma.vmem_to_hbm [thread:$0]  (%p7092_p5), %s12851_s28, 1024, %s12849_s29, %s5966_s30  }
 0x535 PF: > { %p6212_p1 = scmp.ge.s32.totalorder %s7028_s15, 2  ;;  %s5992_s19 = sand.u32 1, %s7016_s12  }
 0x536   : > { %s5993_s20 = scalar_lea.sflag [#allocation3], %s5992_s19 }
 0x537   : > { %p6209_p2 = pnand %p6212_p1, %p7096_p6 }
 0x539   : > { %7011 = dma.done.wait (!%p6209_p2), %s5993_s20, 1024  }
 0x53a   : > { %7013 = vsyncadd (!%p6209_p2), %s5993_s20, 4294966272  ;;  %p13_p3 = scmp.ge.s32.totalorder %s7079_s18, 4   ;;  %s14934_s12 = smov %s7020_s13 }
 0x53b   : > { %s14935_s13 = smov %s7024_s14  ;;  %s14936_s14 = smov %s7090_s21 }
 0x53c   : > { %s14937_s15 = smov %s7079_s18  ;;  %15 = sbr.rel (!%p13_p3) target bundleno = 3 (0x3), region = 67 }
 0x543   :  { %5998 = vsyncpa [#allocation3], 1 }
 0x544   :  { %6000 = vsyncpa [#allocation3 + $0x1], 1 }

</bundles_post_ra>
